<compile_context>
chip_gen: v6e
topology: v6e:2x2x1
jax: 0.10.0
libtpu: 0.0.40
codegen_flags: <defaults>
</compile_context>

<pallas_src>
import jax
import jax.numpy as jnp
import numpy as np
from jax import lax
from jax.experimental import pallas as pl
from jax.experimental.pallas import tpu as pltpu

EPS = 1e-5


def _hswish(v):
    return v * jnp.clip(v + 3.0, 0.0, 6.0) * (1.0 / 6.0)


def _largest_divisor_leq(n, cap):
    cap = max(1, min(n, cap))
    for d in range(cap, 0, -1):
        if n % d == 0:
            return d
    return 1


# ----------------------- fused sparse-tap convolution ------------------------

def _make_tap_conv_kernel(flat_offs, H, W, WP, Cin, Cout, add_center, cflat,
                          cdt, with_stats):
    """out[h, w] = sum_t x_flat[off_t + h*WP + w] @ wt[t]  (+ bias [+ center x]).

    The input is a spatially padded image flattened to rows (HPP*WP, Cin), so
    every tap is a *contiguous* row slice; columns w in [W, WP) are junk and
    dropped before the store / stats."""
    def kernel(xpf_ref, wt_ref, b_ref, o_ref, *maybe_stats):
        acc = jnp.zeros((H * WP, Cout), jnp.float32)
        for t, off in enumerate(flat_offs):
            xs = xpf_ref[0, off:off + H * WP, :].astype(cdt)
            acc = acc + jnp.dot(xs, wt_ref[t],
                                preferred_element_type=jnp.float32)
        acc = acc + b_ref[...]
        if add_center:
            # residual (out + x): add the un-shifted centre window in f32
            acc = acc + xpf_ref[0, cflat:cflat + H * WP, :]
        valid = acc.reshape(H, WP, Cout)[:, :W, :]
        o_ref[0] = valid
        if with_stats:
            st_ref = maybe_stats[0]
            v2 = valid.reshape(H * W, Cout)
            st_ref[0] = jnp.concatenate(
                [jnp.sum(v2, axis=0, keepdims=True),
                 jnp.sum(v2 * v2, axis=0, keepdims=True)], axis=0)
    return kernel


def tap_conv(xp, offsets_yx, wt, b, *, H, W, add_center=False,
             center_yx=(0, 0), with_stats=False):
    """xp: (N, HPP, WP, Cin) padded input (WP a multiple of 8, >=1 extra bottom
    row).  wt: (T, Cin, Cout).  Returns (N, H, W, Cout) float32 and, if
    with_stats, per-image (sum, sum_sq) of shape (N, 2, Cout)."""
    N, HPP, WP, Cin = xp.shape
    T, _, Cout = wt.shape
    xpf = xp.reshape(N, HPP * WP, Cin)                      # free reshape
    flat_offs = tuple(dy * WP + dx for dy, dx in offsets_yx)
    cflat = center_yx[0] * WP + center_yx[1]
    kernel = _make_tap_conv_kernel(flat_offs, H, W, WP, Cin, Cout,
                                   add_center, cflat, wt.dtype, with_stats)
    out_shape = jax.ShapeDtypeStruct((N, H, W, Cout), jnp.float32)
    out_specs = pl.BlockSpec((1, H, W, Cout), lambda n: (n, 0, 0, 0))
    if with_stats:
        out_shape = (out_shape,
                     jax.ShapeDtypeStruct((N, 2, Cout), jnp.float32))
        out_specs = (out_specs,
                     pl.BlockSpec((1, 2, Cout), lambda n: (n, 0, 0)))
    return pl.pallas_call(
        kernel,
        out_shape=out_shape,
        grid=(N,),
        in_specs=[
            pl.BlockSpec((1, HPP * WP, Cin), lambda n: (n, 0, 0)),
            pl.BlockSpec((T, Cin, Cout), lambda n: (0, 0, 0)),
            pl.BlockSpec((1, Cout), lambda n: (0, 0)),
        ],
        out_specs=out_specs,
        compiler_params=pltpu.CompilerParams(
            dimension_semantics=("parallel",)),
    )(xpf, wt, b.reshape(1, Cout))


def _pad_spatial(x, pad):
    """Pad H/W by `pad`, plus extra bottom row + right columns so the padded
    width is a multiple of 8 and the flat tap slices never go out of bounds."""
    N, H, W, C = x.shape
    wp_target = -(-(W + 2 * pad) // 8) * 8
    extra_w = wp_target - (W + 2 * pad)
    return jnp.pad(x, ((0, 0), (pad, pad + 1), (pad, pad + extra_w), (0, 0)))


def fold_aspp_weights(p, C):
    """Pre-compose each branch tap with its slice of the 1x1 output conv:
       out = sum_taps x_shift @ (w_tap @ w5_i) + (sum_i b_i @ w5_i + b5) + x."""
    P = 4                                        # max dilation padding
    w5 = p['w5'].reshape(4 * C, C)
    w5s = [w5[i * C:(i + 1) * C] for i in range(4)]
    taps = {}

    def add(dy, dx, w):
        taps[(dy, dx)] = taps[(dy, dx)] + w if (dy, dx) in taps else w

    add(P, P, p['w1'][0, 0] @ w5s[0])                           # 1x1 branch
    for slot, (wk, d) in zip((1, 2, 3), (('w2', 2), ('w3', 3), ('w4', 4))):
        for ky in range(3):
            for kx in range(3):
                add(P + (ky - 1) * d, P + (kx - 1) * d,
                    p[wk][ky, kx] @ w5s[slot])
    offsets = sorted(taps)                                       # 25 distinct
    wf = jnp.stack([taps[o] for o in offsets], axis=0)           # (25, C, C)
    b_comb = (p['b1'] @ w5s[0] + p['b2'] @ w5s[1]
              + p['b3'] @ w5s[2] + p['b4'] @ w5s[3] + p['b5'])
    return offsets, wf, b_comb, P


# ------------- BN1 -> hardswish -> 2x2 max pool (+ BN2 partial stats) --------

def _make_bn_pool_kernel(C2):
    def kernel(y_ref, sc_ref, sh_ref, o_ref, st_ref):
        v = y_ref[0]                               # (2*tph, Wp, 2*C2)
        h = _hswish(v * sc_ref[...] + sh_ref[...])
        cmax = jnp.maximum(h[:, :, :C2], h[:, :, C2:])   # column pair max
        r2, wp, _ = cmax.shape
        pooled = jnp.max(cmax.reshape(r2 // 2, 2, wp, C2), axis=1)
        o_ref[0] = pooled
        p2 = pooled.reshape((r2 // 2) * wp, C2)
        st_ref[0, 0] = jnp.concatenate(
            [jnp.sum(p2, axis=0, keepdims=True),
             jnp.sum(p2 * p2, axis=0, keepdims=True)], axis=0)
    return kernel


def bn_hswish_pool(y, scale, shift):
    """Applies BN1 affine + hardswish + 2x2/stride-2 max pool; also returns
    (sum, sum_sq) of the pooled output per channel (for BN2)."""
    N, H, W, C2 = y.shape
    Hp, Wp = H // 2, W // 2
    y4 = y.reshape(N, H, Wp, 2 * C2)               # free: column pairs -> lanes
    sc = jnp.tile(scale.reshape(1, C2), (1, 2))
    sh = jnp.tile(shift.reshape(1, C2), (1, 2))
    cap = max(1, (1 << 20) // max(1, 2 * Wp * 2 * C2 * 4))
    tph = _largest_divisor_leq(Hp, cap)
    nt = Hp // tph
    pooled, stats = pl.pallas_call(
        _make_bn_pool_kernel(C2),
        out_shape=(jax.ShapeDtypeStruct((N, Hp, Wp, C2), jnp.float32),
                   jax.ShapeDtypeStruct((N, nt, 2, C2), jnp.float32)),
        grid=(N, nt),
        in_specs=[
            pl.BlockSpec((1, 2 * tph, Wp, 2 * C2), lambda n, t: (n, t, 0, 0)),
            pl.BlockSpec((1, 2 * C2), lambda n, t: (0, 0)),
            pl.BlockSpec((1, 2 * C2), lambda n, t: (0, 0)),
        ],
        out_specs=(pl.BlockSpec((1, tph, Wp, C2), lambda n, t: (n, t, 0, 0)),
                   pl.BlockSpec((1, 1, 2, C2), lambda n, t: (n, t, 0, 0))),
        compiler_params=pltpu.CompilerParams(
            dimension_semantics=("parallel", "parallel")),
    )(y4, sc, sh)
    return pooled, stats.sum(axis=(0, 1))


# ------------------------- BN2 -> hardswish (elementwise) --------------------

def _affine_hswish_kernel(x_ref, sc_ref, sh_ref, o_ref):
    o_ref[...] = _hswish(x_ref[...] * sc_ref[...] + sh_ref[...])


def affine_hswish(x2d, scale, shift):
    R, L = x2d.shape
    G = 1
    if L < 128 and 128 % L == 0 and R % (128 // L) == 0:
        G = 128 // L                               # fold rows into lanes
    xg = x2d.reshape(R // G, G * L)
    scg = jnp.tile(scale.reshape(1, L), (1, G))
    shg = jnp.tile(shift.reshape(1, L), (1, G))
    Rg, Lg = xg.shape
    tr = _largest_divisor_leq(Rg, 2048)
    if tr != Rg and tr % 8 != 0:
        tr = Rg
    out = pl.pallas_call(
        _affine_hswish_kernel,
        out_shape=jax.ShapeDtypeStruct((Rg, Lg), jnp.float32),
        grid=(Rg // tr,),
        in_specs=[pl.BlockSpec((tr, Lg), lambda i: (i, 0)),
                  pl.BlockSpec((1, Lg), lambda i: (0, 0)),
                  pl.BlockSpec((1, Lg), lambda i: (0, 0))],
        out_specs=pl.BlockSpec((tr, Lg), lambda i: (i, 0)),
        compiler_params=pltpu.CompilerParams(
            dimension_semantics=("parallel",)),
    )(xg, scg, shg)
    return out.reshape(R, L)


# ------------------------------ forward pass ---------------------------------

def aspp_forward(x_nchw, p):
    x = jnp.transpose(x_nchw, (0, 2, 3, 1)).astype(jnp.float32)   # NCHW -> NHWC
    N, H, W, C = x.shape
    C2 = 2 * C

    # Fused ASPP: 4 branches + 1x1 output conv + residual, weights folded.
    offsets, wf, b_comb, P = fold_aspp_weights(p, C)
    xp = _pad_spatial(x, P)
    out = tap_conv(xp, offsets, wf.astype(jnp.bfloat16), b_comb,
                   H=H, W=W, add_center=True, center_yx=(P, P))   # (N,H,W,C)

    # ConvPooling conv: k=2, dilation=2, padding=1 (4 taps, f32) + BN1 stats.
    op = _pad_spatial(out, 1)
    wcp = p['wcp'].reshape(4, C, C2)
    y, st1 = tap_conv(op, [(0, 0), (0, 2), (2, 0), (2, 2)], wcp, p['bcp'],
                      H=H, W=W, with_stats=True)                  # (N,H,W,2C)

    # BN1 (batch stats) -> hardswish -> 2x2/stride-2 max pool (+ BN2 stats).
    M = N * H * W
    s1 = st1.sum(axis=0)                                          # (2, 2C)
    mean1 = s1[0] / M
    # NOTE: E[x^2]-E[x]^2 form; fine at this tolerance / magnitude range.
    inv1 = lax.rsqrt(s1[1] / M - mean1 * mean1 + EPS)
    scale1 = p['g1'] * inv1
    shift1 = p['be1'] - mean1 * scale1
    pooled, s2 = bn_hswish_pool(y, scale1, shift1)                # (N,H/2,W/2,2C)

    # BN2 (batch stats) -> hardswish.
    Hp, Wp = H // 2, W // 2
    M2 = N * Hp * Wp
    mean2 = s2[0] / M2
    inv2 = lax.rsqrt(s2[1] / M2 - mean2 * mean2 + EPS)
    scale2 = p['g2'] * inv2
    shift2 = p['be2'] - mean2 * scale2
    pf = pooled.reshape(M2, C2)
    z = affine_hswish(pf, scale2, shift2).reshape(N, Hp, Wp, C2)

    return jnp.transpose(z, (0, 3, 1, 2))                         # NHWC -> NCHW


def init_params(key, C):
    keys = jax.random.split(key, 12)

    def w(k, shape, fan_in):
        return jax.random.uniform(k, shape, jnp.float32, -1.0, 1.0) / np.sqrt(fan_in)

    p = {}
    p['w1'] = w(keys[0], (1, 1, C, C), C);          p['b1'] = w(keys[1], (C,), C)
    p['w2'] = w(keys[2], (3, 3, C, C), 9 * C);      p['b2'] = w(keys[3], (C,), 9 * C)
    p['w3'] = w(keys[4], (3, 3, C, C), 9 * C);      p['b3'] = w(keys[5], (C,), 9 * C)
    p['w4'] = w(keys[6], (3, 3, C, C), 9 * C);      p['b4'] = w(keys[7], (C,), 9 * C)
    p['w5'] = w(keys[8], (1, 1, 4 * C, C), 4 * C);  p['b5'] = w(keys[9], (C,), 4 * C)
    p['wcp'] = w(keys[10], (2, 2, C, 2 * C), 4 * C)
    p['bcp'] = w(keys[11], (2 * C,), 4 * C)
    p['g1'] = jnp.ones((2 * C,), jnp.float32);  p['be1'] = jnp.zeros((2 * C,), jnp.float32)
    p['g2'] = jnp.ones((2 * C,), jnp.float32);  p['be2'] = jnp.zeros((2 * C,), jnp.float32)
    return p


# ------------------------- pure-JAX reference --------------------------------

def ref_forward(x_nchw, p):
    x = jnp.transpose(x_nchw, (0, 2, 3, 1)).astype(jnp.float32)

    def conv(xx, w, b, dil, pad):
        return lax.conv_general_dilated(
            xx, w, window_strides=(1, 1), padding=[(pad, pad), (pad, pad)],
            rhs_dilation=(dil, dil),
            dimension_numbers=('NHWC', 'HWIO', 'NHWC'),
            precision=lax.Precision.HIGHEST) + b

    a1 = conv(x, p['w1'], p['b1'], 1, 0)
    a2 = conv(x, p['w2'], p['b2'], 2, 2)
    a3 = conv(x, p['w3'], p['b3'], 3, 3)
    a4 = conv(x, p['w4'], p['b4'], 4, 4)
    cat = jnp.concatenate([a1, a2, a3, a4], axis=-1)
    out = conv(cat, p['w5'], p['b5'], 1, 0) + x
    y = conv(out, p['wcp'], p['bcp'], 2, 1)

    mean = y.mean(axis=(0, 1, 2)); var = y.var(axis=(0, 1, 2))
    y = _hswish((y - mean) * lax.rsqrt(var + EPS) * p['g1'] + p['be1'])
    N, H, W, C2 = y.shape
    y = y.reshape(N, H // 2, 2, W // 2, 2, C2).max(axis=(2, 4))
    mean2 = y.mean(axis=(0, 1, 2)); var2 = y.var(axis=(0, 1, 2))
    y = _hswish((y - mean2) * lax.rsqrt(var2 + EPS) * p['g2'] + p['be2'])
    return jnp.transpose(y, (0, 3, 1, 2))


# --------------------------------- main ---------------------------------------

if __name__ == "__main__":
    key = jax.random.PRNGKey(0)
    kx, kp = jax.random.split(key)
    C = 4
    x = jax.random.normal(kx, (2, C, 16, 16), jnp.float32)   # NCHW, like PyTorch
    params = init_params(kp, C)

    out = jax.jit(aspp_forward)(x, params)
    out = jax.block_until_ready(out)
    assert out.shape == (2, 2 * C, 8, 8), out.shape

    ref = ref_forward(x, params)
    np.testing.assert_allclose(np.asarray(out), np.asarray(ref),
                               rtol=1e-2, atol=1e-2)
    print("KERNEL_OK")
</pallas_src>

<mosaic_0001>
module attributes {stable_mosaic.version = 11 : i64} {
  func.func @kernel(%arg0: i32, %arg1: memref<1x600x4xf32, #tpu.memory_space<vmem>>, %arg2: memref<25x4x4xbf16, #tpu.memory_space<vmem>>, %arg3: memref<1x4xf32, #tpu.memory_space<vmem>>, %arg4: memref<1x16x16x4xf32, #tpu.memory_space<vmem>>) attributes {dimension_semantics = [#tpu.dimension_semantics<parallel>], iteration_bounds = array<i64: 2>, scalar_prefetch = 0 : i64, scratch_operands = 0 : i64, tpu.core_type = #tpu.core_type<tc>, window_params = [{transform_indices = @transform_0, window_bounds = array<i64: 1, 600, 4>}, {pipeline_mode = #tpu.pipeline_mode<synchronous>, transform_indices = @transform_1, window_bounds = array<i64: 25, 4, 4>}, {pipeline_mode = #tpu.pipeline_mode<synchronous>, transform_indices = @transform_2, window_bounds = array<i64: 1, 4>}, {transform_indices = @transform_3, window_bounds = array<i64: 1, 16, 16, 4>}]} {
    %cst = arith.constant 0.000000e+00 : f32
    %0 = vector.broadcast %cst : f32 to vector<384x4xf32>
    %c0 = arith.constant 0 : index
    %c0_0 = arith.constant 0 : index
    %c0_1 = arith.constant 0 : index
    %1 = vector.load %arg1[%c0, %c0_0, %c0_1] : memref<1x600x4xf32, #tpu.memory_space<vmem>>, vector<1x384x4xf32>
    %2 = vector.shape_cast %1 : vector<1x384x4xf32> to vector<384x4xf32>
    %3 = arith.truncf %2 : vector<384x4xf32> to vector<384x4xbf16>
    %c0_2 = arith.constant 0 : index
    %c0_3 = arith.constant 0 : index
    %c0_4 = arith.constant 0 : index
    %4 = vector.load %arg2[%c0_2, %c0_3, %c0_4] : memref<25x4x4xbf16, #tpu.memory_space<vmem>>, vector<1x4x4xbf16>
    %5 = vector.shape_cast %4 : vector<1x4x4xbf16> to vector<4x4xbf16>
    %cst_5 = arith.constant dense<0.000000e+00> : vector<384x4xf32>
    %6 = tpu.matmul %3, %5, %cst_5 {dimension_numbers = #tpu.dot_dimension_numbers<[1], [0], [0], [1], [0, 0, 1, 1], [], []>} : vector<384x4xbf16>, vector<4x4xbf16>, vector<384x4xf32> -> vector<384x4xf32>
    %7 = arith.addf %0, %6 : vector<384x4xf32>
    %c0_6 = arith.constant 0 : index
    %c4 = arith.constant 4 : index
    %c0_7 = arith.constant 0 : index
    %8 = vector.load %arg1[%c0_6, %c4, %c0_7] : memref<1x600x4xf32, #tpu.memory_space<vmem>>, vector<1x384x4xf32>
    %9 = vector.shape_cast %8 : vector<1x384x4xf32> to vector<384x4xf32>
    %10 = arith.truncf %9 : vector<384x4xf32> to vector<384x4xbf16>
    %c1 = arith.constant 1 : index
    %c0_8 = arith.constant 0 : index
    %c0_9 = arith.constant 0 : index
    %11 = vector.load %arg2[%c1, %c0_8, %c0_9] : memref<25x4x4xbf16, #tpu.memory_space<vmem>>, vector<1x4x4xbf16>
    %12 = vector.shape_cast %11 : vector<1x4x4xbf16> to vector<4x4xbf16>
    %cst_10 = arith.constant dense<0.000000e+00> : vector<384x4xf32>
    %13 = tpu.matmul %10, %12, %cst_10 {dimension_numbers = #tpu.dot_dimension_numbers<[1], [0], [0], [1], [0, 0, 1, 1], [], []>} : vector<384x4xbf16>, vector<4x4xbf16>, vector<384x4xf32> -> vector<384x4xf32>
    %14 = arith.addf %7, %13 : vector<384x4xf32>
    %c0_11 = arith.constant 0 : index
    %c8 = arith.constant 8 : index
    %c0_12 = arith.constant 0 : index
    %15 = vector.load %arg1[%c0_11, %c8, %c0_12] : memref<1x600x4xf32, #tpu.memory_space<vmem>>, vector<1x384x4xf32>
    %16 = vector.shape_cast %15 : vector<1x384x4xf32> to vector<384x4xf32>
    %17 = arith.truncf %16 : vector<384x4xf32> to vector<384x4xbf16>
    %c2 = arith.constant 2 : index
    %c0_13 = arith.constant 0 : index
    %c0_14 = arith.constant 0 : index
    %18 = vector.load %arg2[%c2, %c0_13, %c0_14] : memref<25x4x4xbf16, #tpu.memory_space<vmem>>, vector<1x4x4xbf16>
    %19 = vector.shape_cast %18 : vector<1x4x4xbf16> to vector<4x4xbf16>
    %cst_15 = arith.constant dense<0.000000e+00> : vector<384x4xf32>
    %20 = tpu.matmul %17, %19, %cst_15 {dimension_numbers = #tpu.dot_dimension_numbers<[1], [0], [0], [1], [0, 0, 1, 1], [], []>} : vector<384x4xbf16>, vector<4x4xbf16>, vector<384x4xf32> -> vector<384x4xf32>
    %21 = arith.addf %14, %20 : vector<384x4xf32>
    %c0_16 = arith.constant 0 : index
    %c25 = arith.constant 25 : index
    %c0_17 = arith.constant 0 : index
    %22 = vector.load %arg1[%c0_16, %c25, %c0_17] : memref<1x600x4xf32, #tpu.memory_space<vmem>>, vector<1x384x4xf32>
    %23 = vector.shape_cast %22 : vector<1x384x4xf32> to vector<384x4xf32>
    %24 = arith.truncf %23 : vector<384x4xf32> to vector<384x4xbf16>
    %c3 = arith.constant 3 : index
    %c0_18 = arith.constant 0 : index
    %c0_19 = arith.constant 0 : index
    %25 = vector.load %arg2[%c3, %c0_18, %c0_19] : memref<25x4x4xbf16, #tpu.memory_space<vmem>>, vector<1x4x4xbf16>
    %26 = vector.shape_cast %25 : vector<1x4x4xbf16> to vector<4x4xbf16>
    %cst_20 = arith.constant dense<0.000000e+00> : vector<384x4xf32>
    %27 = tpu.matmul %24, %26, %cst_20 {dimension_numbers = #tpu.dot_dimension_numbers<[1], [0], [0], [1], [0, 0, 1, 1], [], []>} : vector<384x4xbf16>, vector<4x4xbf16>, vector<384x4xf32> -> vector<384x4xf32>
    %28 = arith.addf %21, %27 : vector<384x4xf32>
    %c0_21 = arith.constant 0 : index
    %c28 = arith.constant 28 : index
    %c0_22 = arith.constant 0 : index
    %29 = vector.load %arg1[%c0_21, %c28, %c0_22] : memref<1x600x4xf32, #tpu.memory_space<vmem>>, vector<1x384x4xf32>
    %30 = vector.shape_cast %29 : vector<1x384x4xf32> to vector<384x4xf32>
    %31 = arith.truncf %30 : vector<384x4xf32> to vector<384x4xbf16>
    %c4_23 = arith.constant 4 : index
    %c0_24 = arith.constant 0 : index
    %c0_25 = arith.constant 0 : index
    %32 = vector.load %arg2[%c4_23, %c0_24, %c0_25] : memref<25x4x4xbf16, #tpu.memory_space<vmem>>, vector<1x4x4xbf16>
    %33 = vector.shape_cast %32 : vector<1x4x4xbf16> to vector<4x4xbf16>
    %cst_26 = arith.constant dense<0.000000e+00> : vector<384x4xf32>
    %34 = tpu.matmul %31, %33, %cst_26 {dimension_numbers = #tpu.dot_dimension_numbers<[1], [0], [0], [1], [0, 0, 1, 1], [], []>} : vector<384x4xbf16>, vector<4x4xbf16>, vector<384x4xf32> -> vector<384x4xf32>
    %35 = arith.addf %28, %34 : vector<384x4xf32>
    %c0_27 = arith.constant 0 : index
    %c31 = arith.constant 31 : index
    %c0_28 = arith.constant 0 : index
    %36 = vector.load %arg1[%c0_27, %c31, %c0_28] : memref<1x600x4xf32, #tpu.memory_space<vmem>>, vector<1x384x4xf32>
    %37 = vector.shape_cast %36 : vector<1x384x4xf32> to vector<384x4xf32>
    %38 = arith.truncf %37 : vector<384x4xf32> to vector<384x4xbf16>
    %c5 = arith.constant 5 : index
    %c0_29 = arith.constant 0 : index
    %c0_30 = arith.constant 0 : index
    %39 = vector.load %arg2[%c5, %c0_29, %c0_30] : memref<25x4x4xbf16, #tpu.memory_space<vmem>>, vector<1x4x4xbf16>
    %40 = vector.shape_cast %39 : vector<1x4x4xbf16> to vector<4x4xbf16>
    %cst_31 = arith.constant dense<0.000000e+00> : vector<384x4xf32>
    %41 = tpu.matmul %38, %40, %cst_31 {dimension_numbers = #tpu.dot_dimension_numbers<[1], [0], [0], [1], [0, 0, 1, 1], [], []>} : vector<384x4xbf16>, vector<4x4xbf16>, vector<384x4xf32> -> vector<384x4xf32>
    %42 = arith.addf %35, %41 : vector<384x4xf32>
    %c0_32 = arith.constant 0 : index
    %c50 = arith.constant 50 : index
    %c0_33 = arith.constant 0 : index
    %43 = vector.load %arg1[%c0_32, %c50, %c0_33] : memref<1x600x4xf32, #tpu.memory_space<vmem>>, vector<1x384x4xf32>
    %44 = vector.shape_cast %43 : vector<1x384x4xf32> to vector<384x4xf32>
    %45 = arith.truncf %44 : vector<384x4xf32> to vector<384x4xbf16>
    %c6 = arith.constant 6 : index
    %c0_34 = arith.constant 0 : index
    %c0_35 = arith.constant 0 : index
    %46 = vector.load %arg2[%c6, %c0_34, %c0_35] : memref<25x4x4xbf16, #tpu.memory_space<vmem>>, vector<1x4x4xbf16>
    %47 = vector.shape_cast %46 : vector<1x4x4xbf16> to vector<4x4xbf16>
    %cst_36 = arith.constant dense<0.000000e+00> : vector<384x4xf32>
    %48 = tpu.matmul %45, %47, %cst_36 {dimension_numbers = #tpu.dot_dimension_numbers<[1], [0], [0], [1], [0, 0, 1, 1], [], []>} : vector<384x4xbf16>, vector<4x4xbf16>, vector<384x4xf32> -> vector<384x4xf32>
    %49 = arith.addf %42, %48 : vector<384x4xf32>
    %c0_37 = arith.constant 0 : index
    %c52 = arith.constant 52 : index
    %c0_38 = arith.constant 0 : index
    %50 = vector.load %arg1[%c0_37, %c52, %c0_38] : memref<1x600x4xf32, #tpu.memory_space<vmem>>, vector<1x384x4xf32>
    %51 = vector.shape_cast %50 : vector<1x384x4xf32> to vector<384x4xf32>
    %52 = arith.truncf %51 : vector<384x4xf32> to vector<384x4xbf16>
    %c7 = arith.constant 7 : index
    %c0_39 = arith.constant 0 : index
    %c0_40 = arith.constant 0 : index
    %53 = vector.load %arg2[%c7, %c0_39, %c0_40] : memref<25x4x4xbf16, #tpu.memory_space<vmem>>, vector<1x4x4xbf16>
    %54 = vector.shape_cast %53 : vector<1x4x4xbf16> to vector<4x4xbf16>
    %cst_41 = arith.constant dense<0.000000e+00> : vector<384x4xf32>
    %55 = tpu.matmul %52, %54, %cst_41 {dimension_numbers = #tpu.dot_dimension_numbers<[1], [0], [0], [1], [0, 0, 1, 1], [], []>} : vector<384x4xbf16>, vector<4x4xbf16>, vector<384x4xf32> -> vector<384x4xf32>
    %56 = arith.addf %49, %55 : vector<384x4xf32>
    %c0_42 = arith.constant 0 : index
    %c54 = arith.constant 54 : index
    %c0_43 = arith.constant 0 : index
    %57 = vector.load %arg1[%c0_42, %c54, %c0_43] : memref<1x600x4xf32, #tpu.memory_space<vmem>>, vector<1x384x4xf32>
    %58 = vector.shape_cast %57 : vector<1x384x4xf32> to vector<384x4xf32>
    %59 = arith.truncf %58 : vector<384x4xf32> to vector<384x4xbf16>
    %c8_44 = arith.constant 8 : index
    %c0_45 = arith.constant 0 : index
    %c0_46 = arith.constant 0 : index
    %60 = vector.load %arg2[%c8_44, %c0_45, %c0_46] : memref<25x4x4xbf16, #tpu.memory_space<vmem>>, vector<1x4x4xbf16>
    %61 = vector.shape_cast %60 : vector<1x4x4xbf16> to vector<4x4xbf16>
    %cst_47 = arith.constant dense<0.000000e+00> : vector<384x4xf32>
    %62 = tpu.matmul %59, %61, %cst_47 {dimension_numbers = #tpu.dot_dimension_numbers<[1], [0], [0], [1], [0, 0, 1, 1], [], []>} : vector<384x4xbf16>, vector<4x4xbf16>, vector<384x4xf32> -> vector<384x4xf32>
    %63 = arith.addf %56, %62 : vector<384x4xf32>
    %c0_48 = arith.constant 0 : index
    %c96 = arith.constant 96 : index
    %c0_49 = arith.constant 0 : index
    %64 = vector.load %arg1[%c0_48, %c96, %c0_49] : memref<1x600x4xf32, #tpu.memory_space<vmem>>, vector<1x384x4xf32>
    %65 = vector.shape_cast %64 : vector<1x384x4xf32> to vector<384x4xf32>
    %66 = arith.truncf %65 : vector<384x4xf32> to vector<384x4xbf16>
    %c9 = arith.constant 9 : index
    %c0_50 = arith.constant 0 : index
    %c0_51 = arith.constant 0 : index
    %67 = vector.load %arg2[%c9, %c0_50, %c0_51] : memref<25x4x4xbf16, #tpu.memory_space<vmem>>, vector<1x4x4xbf16>
    %68 = vector.shape_cast %67 : vector<1x4x4xbf16> to vector<4x4xbf16>
    %cst_52 = arith.constant dense<0.000000e+00> : vector<384x4xf32>
    %69 = tpu.matmul %66, %68, %cst_52 {dimension_numbers = #tpu.dot_dimension_numbers<[1], [0], [0], [1], [0, 0, 1, 1], [], []>} : vector<384x4xbf16>, vector<4x4xbf16>, vector<384x4xf32> -> vector<384x4xf32>
    %70 = arith.addf %63, %69 : vector<384x4xf32>
    %c0_53 = arith.constant 0 : index
    %c97 = arith.constant 97 : index
    %c0_54 = arith.constant 0 : index
    %71 = vector.load %arg1[%c0_53, %c97, %c0_54] : memref<1x600x4xf32, #tpu.memory_space<vmem>>, vector<1x384x4xf32>
    %72 = vector.shape_cast %71 : vector<1x384x4xf32> to vector<384x4xf32>
    %73 = arith.truncf %72 : vector<384x4xf32> to vector<384x4xbf16>
    %c10 = arith.constant 10 : index
    %c0_55 = arith.constant 0 : index
    %c0_56 = arith.constant 0 : index
    %74 = vector.load %arg2[%c10, %c0_55, %c0_56] : memref<25x4x4xbf16, #tpu.memory_space<vmem>>, vector<1x4x4xbf16>
    %75 = vector.shape_cast %74 : vector<1x4x4xbf16> to vector<4x4xbf16>
    %cst_57 = arith.constant dense<0.000000e+00> : vector<384x4xf32>
    %76 = tpu.matmul %73, %75, %cst_57 {dimension_numbers = #tpu.dot_dimension_numbers<[1], [0], [0], [1], [0, 0, 1, 1], [], []>} : vector<384x4xbf16>, vector<4x4xbf16>, vector<384x4xf32> -> vector<384x4xf32>
    %77 = arith.addf %70, %76 : vector<384x4xf32>
    %c0_58 = arith.constant 0 : index
    %c98 = arith.constant 98 : index
    %c0_59 = arith.constant 0 : index
    %78 = vector.load %arg1[%c0_58, %c98, %c0_59] : memref<1x600x4xf32, #tpu.memory_space<vmem>>, vector<1x384x4xf32>
    %79 = vector.shape_cast %78 : vector<1x384x4xf32> to vector<384x4xf32>
    %80 = arith.truncf %79 : vector<384x4xf32> to vector<384x4xbf16>
    %c11 = arith.constant 11 : index
    %c0_60 = arith.constant 0 : index
    %c0_61 = arith.constant 0 : index
    %81 = vector.load %arg2[%c11, %c0_60, %c0_61] : memref<25x4x4xbf16, #tpu.memory_space<vmem>>, vector<1x4x4xbf16>
    %82 = vector.shape_cast %81 : vector<1x4x4xbf16> to vector<4x4xbf16>
    %cst_62 = arith.constant dense<0.000000e+00> : vector<384x4xf32>
    %83 = tpu.matmul %80, %82, %cst_62 {dimension_numbers = #tpu.dot_dimension_numbers<[1], [0], [0], [1], [0, 0, 1, 1], [], []>} : vector<384x4xbf16>, vector<4x4xbf16>, vector<384x4xf32> -> vector<384x4xf32>
    %84 = arith.addf %77, %83 : vector<384x4xf32>
    %c0_63 = arith.constant 0 : index
    %c100 = arith.constant 100 : index
    %c0_64 = arith.constant 0 : index
    %85 = vector.load %arg1[%c0_63, %c100, %c0_64] : memref<1x600x4xf32, #tpu.memory_space<vmem>>, vector<1x384x4xf32>
    %86 = vector.shape_cast %85 : vector<1x384x4xf32> to vector<384x4xf32>
    %87 = arith.truncf %86 : vector<384x4xf32> to vector<384x4xbf16>
    %c12 = arith.constant 12 : index
    %c0_65 = arith.constant 0 : index
    %c0_66 = arith.constant 0 : index
    %88 = vector.load %arg2[%c12, %c0_65, %c0_66] : memref<25x4x4xbf16, #tpu.memory_space<vmem>>, vector<1x4x4xbf16>
    %89 = vector.shape_cast %88 : vector<1x4x4xbf16> to vector<4x4xbf16>
    %cst_67 = arith.constant dense<0.000000e+00> : vector<384x4xf32>
    %90 = tpu.matmul %87, %89, %cst_67 {dimension_numbers = #tpu.dot_dimension_numbers<[1], [0], [0], [1], [0, 0, 1, 1], [], []>} : vector<384x4xbf16>, vector<4x4xbf16>, vector<384x4xf32> -> vector<384x4xf32>
    %91 = arith.addf %84, %90 : vector<384x4xf32>
    %c0_68 = arith.constant 0 : index
    %c102 = arith.constant 102 : index
    %c0_69 = arith.constant 0 : index
    %92 = vector.load %arg1[%c0_68, %c102, %c0_69] : memref<1x600x4xf32, #tpu.memory_space<vmem>>, vector<1x384x4xf32>
    %93 = vector.shape_cast %92 : vector<1x384x4xf32> to vector<384x4xf32>
    %94 = arith.truncf %93 : vector<384x4xf32> to vector<384x4xbf16>
    %c13 = arith.constant 13 : index
    %c0_70 = arith.constant 0 : index
    %c0_71 = arith.constant 0 : index
    %95 = vector.load %arg2[%c13, %c0_70, %c0_71] : memref<25x4x4xbf16, #tpu.memory_space<vmem>>, vector<1x4x4xbf16>
    %96 = vector.shape_cast %95 : vector<1x4x4xbf16> to vector<4x4xbf16>
    %cst_72 = arith.constant dense<0.000000e+00> : vector<384x4xf32>
    %97 = tpu.matmul %94, %96, %cst_72 {dimension_numbers = #tpu.dot_dimension_numbers<[1], [0], [0], [1], [0, 0, 1, 1], [], []>} : vector<384x4xbf16>, vector<4x4xbf16>, vector<384x4xf32> -> vector<384x4xf32>
    %98 = arith.addf %91, %97 : vector<384x4xf32>
    %c0_73 = arith.constant 0 : index
    %c103 = arith.constant 103 : index
    %c0_74 = arith.constant 0 : index
    %99 = vector.load %arg1[%c0_73, %c103, %c0_74] : memref<1x600x4xf32, #tpu.memory_space<vmem>>, vector<1x384x4xf32>
    %100 = vector.shape_cast %99 : vector<1x384x4xf32> to vector<384x4xf32>
    %101 = arith.truncf %100 : vector<384x4xf32> to vector<384x4xbf16>
    %c14 = arith.constant 14 : index
    %c0_75 = arith.constant 0 : index
    %c0_76 = arith.constant 0 : index
    %102 = vector.load %arg2[%c14, %c0_75, %c0_76] : memref<25x4x4xbf16, #tpu.memory_space<vmem>>, vector<1x4x4xbf16>
    %103 = vector.shape_cast %102 : vector<1x4x4xbf16> to vector<4x4xbf16>
    %cst_77 = arith.constant dense<0.000000e+00> : vector<384x4xf32>
    %104 = tpu.matmul %101, %103, %cst_77 {dimension_numbers = #tpu.dot_dimension_numbers<[1], [0], [0], [1], [0, 0, 1, 1], [], []>} : vector<384x4xbf16>, vector<4x4xbf16>, vector<384x4xf32> -> vector<384x4xf32>
    %105 = arith.addf %98, %104 : vector<384x4xf32>
    %c0_78 = arith.constant 0 : index
    %c104 = arith.constant 104 : index
    %c0_79 = arith.constant 0 : index
    %106 = vector.load %arg1[%c0_78, %c104, %c0_79] : memref<1x600x4xf32, #tpu.memory_space<vmem>>, vector<1x384x4xf32>
    %107 = vector.shape_cast %106 : vector<1x384x4xf32> to vector<384x4xf32>
    %108 = arith.truncf %107 : vector<384x4xf32> to vector<384x4xbf16>
    %c15 = arith.constant 15 : index
    %c0_80 = arith.constant 0 : index
    %c0_81 = arith.constant 0 : index
    %109 = vector.load %arg2[%c15, %c0_80, %c0_81] : memref<25x4x4xbf16, #tpu.memory_space<vmem>>, vector<1x4x4xbf16>
    %110 = vector.shape_cast %109 : vector<1x4x4xbf16> to vector<4x4xbf16>
    %cst_82 = arith.constant dense<0.000000e+00> : vector<384x4xf32>
    %111 = tpu.matmul %108, %110, %cst_82 {dimension_numbers = #tpu.dot_dimension_numbers<[1], [0], [0], [1], [0, 0, 1, 1], [], []>} : vector<384x4xbf16>, vector<4x4xbf16>, vector<384x4xf32> -> vector<384x4xf32>
    %112 = arith.addf %105, %111 : vector<384x4xf32>
    %c0_83 = arith.constant 0 : index
    %c146 = arith.constant 146 : index
    %c0_84 = arith.constant 0 : index
    %113 = vector.load %arg1[%c0_83, %c146, %c0_84] : memref<1x600x4xf32, #tpu.memory_space<vmem>>, vector<1x384x4xf32>
    %114 = vector.shape_cast %113 : vector<1x384x4xf32> to vector<384x4xf32>
    %115 = arith.truncf %114 : vector<384x4xf32> to vector<384x4xbf16>
    %c16 = arith.constant 16 : index
    %c0_85 = arith.constant 0 : index
    %c0_86 = arith.constant 0 : index
    %116 = vector.load %arg2[%c16, %c0_85, %c0_86] : memref<25x4x4xbf16, #tpu.memory_space<vmem>>, vector<1x4x4xbf16>
    %117 = vector.shape_cast %116 : vector<1x4x4xbf16> to vector<4x4xbf16>
    %cst_87 = arith.constant dense<0.000000e+00> : vector<384x4xf32>
    %118 = tpu.matmul %115, %117, %cst_87 {dimension_numbers = #tpu.dot_dimension_numbers<[1], [0], [0], [1], [0, 0, 1, 1], [], []>} : vector<384x4xbf16>, vector<4x4xbf16>, vector<384x4xf32> -> vector<384x4xf32>
    %119 = arith.addf %112, %118 : vector<384x4xf32>
    %c0_88 = arith.constant 0 : index
    %c148 = arith.constant 148 : index
    %c0_89 = arith.constant 0 : index
    %120 = vector.load %arg1[%c0_88, %c148, %c0_89] : memref<1x600x4xf32, #tpu.memory_space<vmem>>, vector<1x384x4xf32>
    %121 = vector.shape_cast %120 : vector<1x384x4xf32> to vector<384x4xf32>
    %122 = arith.truncf %121 : vector<384x4xf32> to vector<384x4xbf16>
    %c17 = arith.constant 17 : index
    %c0_90 = arith.constant 0 : index
    %c0_91 = arith.constant 0 : index
    %123 = vector.load %arg2[%c17, %c0_90, %c0_91] : memref<25x4x4xbf16, #tpu.memory_space<vmem>>, vector<1x4x4xbf16>
    %124 = vector.shape_cast %123 : vector<1x4x4xbf16> to vector<4x4xbf16>
    %cst_92 = arith.constant dense<0.000000e+00> : vector<384x4xf32>
    %125 = tpu.matmul %122, %124, %cst_92 {dimension_numbers = #tpu.dot_dimension_numbers<[1], [0], [0], [1], [0, 0, 1, 1], [], []>} : vector<384x4xbf16>, vector<4x4xbf16>, vector<384x4xf32> -> vector<384x4xf32>
    %126 = arith.addf %119, %125 : vector<384x4xf32>
    %c0_93 = arith.constant 0 : index
    %c150 = arith.constant 150 : index
    %c0_94 = arith.constant 0 : index
    %127 = vector.load %arg1[%c0_93, %c150, %c0_94] : memref<1x600x4xf32, #tpu.memory_space<vmem>>, vector<1x384x4xf32>
    %128 = vector.shape_cast %127 : vector<1x384x4xf32> to vector<384x4xf32>
    %129 = arith.truncf %128 : vector<384x4xf32> to vector<384x4xbf16>
    %c18 = arith.constant 18 : index
    %c0_95 = arith.constant 0 : index
    %c0_96 = arith.constant 0 : index
    %130 = vector.load %arg2[%c18, %c0_95, %c0_96] : memref<25x4x4xbf16, #tpu.memory_space<vmem>>, vector<1x4x4xbf16>
    %131 = vector.shape_cast %130 : vector<1x4x4xbf16> to vector<4x4xbf16>
    %cst_97 = arith.constant dense<0.000000e+00> : vector<384x4xf32>
    %132 = tpu.matmul %129, %131, %cst_97 {dimension_numbers = #tpu.dot_dimension_numbers<[1], [0], [0], [1], [0, 0, 1, 1], [], []>} : vector<384x4xbf16>, vector<4x4xbf16>, vector<384x4xf32> -> vector<384x4xf32>
    %133 = arith.addf %126, %132 : vector<384x4xf32>
    %c0_98 = arith.constant 0 : index
    %c169 = arith.constant 169 : index
    %c0_99 = arith.constant 0 : index
    %134 = vector.load %arg1[%c0_98, %c169, %c0_99] : memref<1x600x4xf32, #tpu.memory_space<vmem>>, vector<1x384x4xf32>
    %135 = vector.shape_cast %134 : vector<1x384x4xf32> to vector<384x4xf32>
    %136 = arith.truncf %135 : vector<384x4xf32> to vector<384x4xbf16>
    %c19 = arith.constant 19 : index
    %c0_100 = arith.constant 0 : index
    %c0_101 = arith.constant 0 : index
    %137 = vector.load %arg2[%c19, %c0_100, %c0_101] : memref<25x4x4xbf16, #tpu.memory_space<vmem>>, vector<1x4x4xbf16>
    %138 = vector.shape_cast %137 : vector<1x4x4xbf16> to vector<4x4xbf16>
    %cst_102 = arith.constant dense<0.000000e+00> : vector<384x4xf32>
    %139 = tpu.matmul %136, %138, %cst_102 {dimension_numbers = #tpu.dot_dimension_numbers<[1], [0], [0], [1], [0, 0, 1, 1], [], []>} : vector<384x4xbf16>, vector<4x4xbf16>, vector<384x4xf32> -> vector<384x4xf32>
    %140 = arith.addf %133, %139 : vector<384x4xf32>
    %c0_103 = arith.constant 0 : index
    %c172 = arith.constant 172 : index
    %c0_104 = arith.constant 0 : index
    %141 = vector.load %arg1[%c0_103, %c172, %c0_104] : memref<1x600x4xf32, #tpu.memory_space<vmem>>, vector<1x384x4xf32>
    %142 = vector.shape_cast %141 : vector<1x384x4xf32> to vector<384x4xf32>
    %143 = arith.truncf %142 : vector<384x4xf32> to vector<384x4xbf16>
    %c20 = arith.constant 20 : index
    %c0_105 = arith.constant 0 : index
    %c0_106 = arith.constant 0 : index
    %144 = vector.load %arg2[%c20, %c0_105, %c0_106] : memref<25x4x4xbf16, #tpu.memory_space<vmem>>, vector<1x4x4xbf16>
    %145 = vector.shape_cast %144 : vector<1x4x4xbf16> to vector<4x4xbf16>
    %cst_107 = arith.constant dense<0.000000e+00> : vector<384x4xf32>
    %146 = tpu.matmul %143, %145, %cst_107 {dimension_numbers = #tpu.dot_dimension_numbers<[1], [0], [0], [1], [0, 0, 1, 1], [], []>} : vector<384x4xbf16>, vector<4x4xbf16>, vector<384x4xf32> -> vector<384x4xf32>
    %147 = arith.addf %140, %146 : vector<384x4xf32>
    %c0_108 = arith.constant 0 : index
    %c175 = arith.constant 175 : index
    %c0_109 = arith.constant 0 : index
    %148 = vector.load %arg1[%c0_108, %c175, %c0_109] : memref<1x600x4xf32, #tpu.memory_space<vmem>>, vector<1x384x4xf32>
    %149 = vector.shape_cast %148 : vector<1x384x4xf32> to vector<384x4xf32>
    %150 = arith.truncf %149 : vector<384x4xf32> to vector<384x4xbf16>
    %c21 = arith.constant 21 : index
    %c0_110 = arith.constant 0 : index
    %c0_111 = arith.constant 0 : index
    %151 = vector.load %arg2[%c21, %c0_110, %c0_111] : memref<25x4x4xbf16, #tpu.memory_space<vmem>>, vector<1x4x4xbf16>
    %152 = vector.shape_cast %151 : vector<1x4x4xbf16> to vector<4x4xbf16>
    %cst_112 = arith.constant dense<0.000000e+00> : vector<384x4xf32>
    %153 = tpu.matmul %150, %152, %cst_112 {dimension_numbers = #tpu.dot_dimension_numbers<[1], [0], [0], [1], [0, 0, 1, 1], [], []>} : vector<384x4xbf16>, vector<4x4xbf16>, vector<384x4xf32> -> vector<384x4xf32>
    %154 = arith.addf %147, %153 : vector<384x4xf32>
    %c0_113 = arith.constant 0 : index
    %c192 = arith.constant 192 : index
    %c0_114 = arith.constant 0 : index
    %155 = vector.load %arg1[%c0_113, %c192, %c0_114] : memref<1x600x4xf32, #tpu.memory_space<vmem>>, vector<1x384x4xf32>
    %156 = vector.shape_cast %155 : vector<1x384x4xf32> to vector<384x4xf32>
    %157 = arith.truncf %156 : vector<384x4xf32> to vector<384x4xbf16>
    %c22 = arith.constant 22 : index
    %c0_115 = arith.constant 0 : index
    %c0_116 = arith.constant 0 : index
    %158 = vector.load %arg2[%c22, %c0_115, %c0_116] : memref<25x4x4xbf16, #tpu.memory_space<vmem>>, vector<1x4x4xbf16>
    %159 = vector.shape_cast %158 : vector<1x4x4xbf16> to vector<4x4xbf16>
    %cst_117 = arith.constant dense<0.000000e+00> : vector<384x4xf32>
    %160 = tpu.matmul %157, %159, %cst_117 {dimension_numbers = #tpu.dot_dimension_numbers<[1], [0], [0], [1], [0, 0, 1, 1], [], []>} : vector<384x4xbf16>, vector<4x4xbf16>, vector<384x4xf32> -> vector<384x4xf32>
    %161 = arith.addf %154, %160 : vector<384x4xf32>
    %c0_118 = arith.constant 0 : index
    %c196 = arith.constant 196 : index
    %c0_119 = arith.constant 0 : index
    %162 = vector.load %arg1[%c0_118, %c196, %c0_119] : memref<1x600x4xf32, #tpu.memory_space<vmem>>, vector<1x384x4xf32>
    %163 = vector.shape_cast %162 : vector<1x384x4xf32> to vector<384x4xf32>
    %164 = arith.truncf %163 : vector<384x4xf32> to vector<384x4xbf16>
    %c23 = arith.constant 23 : index
    %c0_120 = arith.constant 0 : index
    %c0_121 = arith.constant 0 : index
    %165 = vector.load %arg2[%c23, %c0_120, %c0_121] : memref<25x4x4xbf16, #tpu.memory_space<vmem>>, vector<1x4x4xbf16>
    %166 = vector.shape_cast %165 : vector<1x4x4xbf16> to vector<4x4xbf16>
    %cst_122 = arith.constant dense<0.000000e+00> : vector<384x4xf32>
    %167 = tpu.matmul %164, %166, %cst_122 {dimension_numbers = #tpu.dot_dimension_numbers<[1], [0], [0], [1], [0, 0, 1, 1], [], []>} : vector<384x4xbf16>, vector<4x4xbf16>, vector<384x4xf32> -> vector<384x4xf32>
    %168 = arith.addf %161, %167 : vector<384x4xf32>
    %c0_123 = arith.constant 0 : index
    %c200 = arith.constant 200 : index
    %c0_124 = arith.constant 0 : index
    %169 = vector.load %arg1[%c0_123, %c200, %c0_124] : memref<1x600x4xf32, #tpu.memory_space<vmem>>, vector<1x384x4xf32>
    %170 = vector.shape_cast %169 : vector<1x384x4xf32> to vector<384x4xf32>
    %171 = arith.truncf %170 : vector<384x4xf32> to vector<384x4xbf16>
    %c24 = arith.constant 24 : index
    %c0_125 = arith.constant 0 : index
    %c0_126 = arith.constant 0 : index
    %172 = vector.load %arg2[%c24, %c0_125, %c0_126] : memref<25x4x4xbf16, #tpu.memory_space<vmem>>, vector<1x4x4xbf16>
    %173 = vector.shape_cast %172 : vector<1x4x4xbf16> to vector<4x4xbf16>
    %cst_127 = arith.constant dense<0.000000e+00> : vector<384x4xf32>
    %174 = tpu.matmul %171, %173, %cst_127 {dimension_numbers = #tpu.dot_dimension_numbers<[1], [0], [0], [1], [0, 0, 1, 1], [], []>} : vector<384x4xbf16>, vector<4x4xbf16>, vector<384x4xf32> -> vector<384x4xf32>
    %175 = arith.addf %168, %174 : vector<384x4xf32>
    %c0_128 = arith.constant 0 : index
    %c0_129 = arith.constant 0 : index
    %176 = vector.load %arg3[%c0_128, %c0_129] : memref<1x4xf32, #tpu.memory_space<vmem>>, vector<1x4xf32>
    %177 = vector.broadcast %176 : vector<1x4xf32> to vector<384x4xf32>
    %178 = arith.addf %175, %177 : vector<384x4xf32>
    %c0_130 = arith.constant 0 : index
    %c100_131 = arith.constant 100 : index
    %c0_132 = arith.constant 0 : index
    %179 = vector.load %arg1[%c0_130, %c100_131, %c0_132] : memref<1x600x4xf32, #tpu.memory_space<vmem>>, vector<1x384x4xf32>
    %180 = vector.shape_cast %179 : vector<1x384x4xf32> to vector<384x4xf32>
    %181 = arith.addf %178, %180 : vector<384x4xf32>
    %182 = vector.shape_cast %181 : vector<384x4xf32> to vector<16x24x4xf32>
    %183 = vector.extract_strided_slice %182 {offsets = [0, 0, 0], sizes = [16, 16, 4], strides = [1, 1, 1]} : vector<16x24x4xf32> to vector<16x16x4xf32>
    %c0_133 = arith.constant 0 : index
    %c0_134 = arith.constant 0 : index
    %c0_135 = arith.constant 0 : index
    %c0_136 = arith.constant 0 : index
    %184 = vector.load %arg4[%c0_133, %c0_134, %c0_135, %c0_136] : memref<1x16x16x4xf32, #tpu.memory_space<vmem>>, vector<1x16x16x4xf32>
    %185 = vector.shape_cast %184 : vector<1x16x16x4xf32> to vector<16x16x4xf32>
    %186 = vector.shape_cast %183 : vector<16x16x4xf32> to vector<1x16x16x4xf32>
    tpu.vector_store %arg4[%c0_133, %c0_134, %c0_135, %c0_136], %186 {strides = array<i32>} : memref<1x16x16x4xf32, #tpu.memory_space<vmem>>, vector<1x16x16x4xf32>,
    return
  }
  func.func @transform_0(%arg0: i32) -> (i32, i32, i32) {
    %c0_i32 = arith.constant 0 : i32
    %c0_i32_0 = arith.constant 0 : i32
    %c0_i32_1 = arith.constant 0 : i32
    return %arg0, %c0_i32, %c0_i32_0 : i32, i32, i32
  }
  func.func @transform_1(%arg0: i32) -> (i32, i32, i32) {
    %c0_i32 = arith.constant 0 : i32
    %c0_i32_0 = arith.constant 0 : i32
    %c0_i32_1 = arith.constant 0 : i32
    %c0_i32_2 = arith.constant 0 : i32
    return %c0_i32, %c0_i32_0, %c0_i32_1 : i32, i32, i32
  }
  func.func @transform_2(%arg0: i32) -> (i32, i32) {
    %c0_i32 = arith.constant 0 : i32
    %c0_i32_0 = arith.constant 0 : i32
    %c0_i32_1 = arith.constant 0 : i32
    return %c0_i32, %c0_i32_0 : i32, i32
  }
  func.func @transform_3(%arg0: i32) -> (i32, i32, i32, i32) {
    %c0_i32 = arith.constant 0 : i32
    %c0_i32_0 = arith.constant 0 : i32
    %c0_i32_1 = arith.constant 0 : i32
    %c0_i32_2 = arith.constant 0 : i32
    return %arg0, %c0_i32, %c0_i32_0, %c0_i32_1 : i32, i32, i32, i32
  }
}

module attributes {stable_mosaic.version = 11 : i64} {
  func.func @kernel(%arg0: i32, %arg1: memref<1x456x4xf32, #tpu.memory_space<vmem>>, %arg2: memref<4x4x8xf32, #tpu.memory_space<vmem>>, %arg3: memref<1x8xf32, #tpu.memory_space<vmem>>, %arg4: memref<1x16x16x8xf32, #tpu.memory_space<vmem>>, %arg5: memref<1x2x8xf32, #tpu.memory_space<vmem>>) attributes {dimension_semantics = [#tpu.dimension_semantics<parallel>], iteration_bounds = array<i64: 2>, scalar_prefetch = 0 : i64, scratch_operands = 0 : i64, tpu.core_type = #tpu.core_type<tc>, window_params = [{transform_indices = @transform_0, window_bounds = array<i64: 1, 456, 4>}, {pipeline_mode = #tpu.pipeline_mode<synchronous>, transform_indices = @transform_1, window_bounds = array<i64: 4, 4, 8>}, {pipeline_mode = #tpu.pipeline_mode<synchronous>, transform_indices = @transform_2, window_bounds = array<i64: 1, 8>}, {transform_indices = @transform_3, window_bounds = array<i64: 1, 16, 16, 8>}, {transform_indices = @transform_4, window_bounds = array<i64: 1, 2, 8>}]} {
    %cst = arith.constant 0.000000e+00 : f32
    %0 = vector.broadcast %cst : f32 to vector<384x8xf32>
    %c0 = arith.constant 0 : index
    %c0_0 = arith.constant 0 : index
    %c0_1 = arith.constant 0 : index
    %1 = vector.load %arg1[%c0, %c0_0, %c0_1] : memref<1x456x4xf32, #tpu.memory_space<vmem>>, vector<1x384x4xf32>
    %2 = vector.shape_cast %1 : vector<1x384x4xf32> to vector<384x4xf32>
    %c0_2 = arith.constant 0 : index
    %c0_3 = arith.constant 0 : index
    %c0_4 = arith.constant 0 : index
    %3 = vector.load %arg2[%c0_2, %c0_3, %c0_4] : memref<4x4x8xf32, #tpu.memory_space<vmem>>, vector<1x4x8xf32>
    %4 = vector.shape_cast %3 : vector<1x4x8xf32> to vector<4x8xf32>
    %cst_5 = arith.constant dense<0.000000e+00> : vector<384x8xf32>
    %5 = tpu.matmul %2, %4, %cst_5 {dimension_numbers = #tpu.dot_dimension_numbers<[1], [0], [0], [1], [0, 0, 1, 1], [], []>} : vector<384x4xf32>, vector<4x8xf32>, vector<384x8xf32> -> vector<384x8xf32>
    %6 = arith.addf %0, %5 : vector<384x8xf32>
    %c0_6 = arith.constant 0 : index
    %c2 = arith.constant 2 : index
    %c0_7 = arith.constant 0 : index
    %7 = vector.load %arg1[%c0_6, %c2, %c0_7] : memref<1x456x4xf32, #tpu.memory_space<vmem>>, vector<1x384x4xf32>
    %8 = vector.shape_cast %7 : vector<1x384x4xf32> to vector<384x4xf32>
    %c1 = arith.constant 1 : index
    %c0_8 = arith.constant 0 : index
    %c0_9 = arith.constant 0 : index
    %9 = vector.load %arg2[%c1, %c0_8, %c0_9] : memref<4x4x8xf32, #tpu.memory_space<vmem>>, vector<1x4x8xf32>
    %10 = vector.shape_cast %9 : vector<1x4x8xf32> to vector<4x8xf32>
    %cst_10 = arith.constant dense<0.000000e+00> : vector<384x8xf32>
    %11 = tpu.matmul %8, %10, %cst_10 {dimension_numbers = #tpu.dot_dimension_numbers<[1], [0], [0], [1], [0, 0, 1, 1], [], []>} : vector<384x4xf32>, vector<4x8xf32>, vector<384x8xf32> -> vector<384x8xf32>
    %12 = arith.addf %6, %11 : vector<384x8xf32>
    %c0_11 = arith.constant 0 : index
    %c48 = arith.constant 48 : index
    %c0_12 = arith.constant 0 : index
    %13 = vector.load %arg1[%c0_11, %c48, %c0_12] : memref<1x456x4xf32, #tpu.memory_space<vmem>>, vector<1x384x4xf32>
    %14 = vector.shape_cast %13 : vector<1x384x4xf32> to vector<384x4xf32>
    %c2_13 = arith.constant 2 : index
    %c0_14 = arith.constant 0 : index
    %c0_15 = arith.constant 0 : index
    %15 = vector.load %arg2[%c2_13, %c0_14, %c0_15] : memref<4x4x8xf32, #tpu.memory_space<vmem>>, vector<1x4x8xf32>
    %16 = vector.shape_cast %15 : vector<1x4x8xf32> to vector<4x8xf32>
    %cst_16 = arith.constant dense<0.000000e+00> : vector<384x8xf32>
    %17 = tpu.matmul %14, %16, %cst_16 {dimension_numbers = #tpu.dot_dimension_numbers<[1], [0], [0], [1], [0, 0, 1, 1], [], []>} : vector<384x4xf32>, vector<4x8xf32>, vector<384x8xf32> -> vector<384x8xf32>
    %18 = arith.addf %12, %17 : vector<384x8xf32>
    %c0_17 = arith.constant 0 : index
    %c50 = arith.constant 50 : index
    %c0_18 = arith.constant 0 : index
    %19 = vector.load %arg1[%c0_17, %c50, %c0_18] : memref<1x456x4xf32, #tpu.memory_space<vmem>>, vector<1x384x4xf32>
    %20 = vector.shape_cast %19 : vector<1x384x4xf32> to vector<384x4xf32>
    %c3 = arith.constant 3 : index
    %c0_19 = arith.constant 0 : index
    %c0_20 = arith.constant 0 : index
    %21 = vector.load %arg2[%c3, %c0_19, %c0_20] : memref<4x4x8xf32, #tpu.memory_space<vmem>>, vector<1x4x8xf32>
    %22 = vector.shape_cast %21 : vector<1x4x8xf32> to vector<4x8xf32>
    %cst_21 = arith.constant dense<0.000000e+00> : vector<384x8xf32>
    %23 = tpu.matmul %20, %22, %cst_21 {dimension_numbers = #tpu.dot_dimension_numbers<[1], [0], [0], [1], [0, 0, 1, 1], [], []>} : vector<384x4xf32>, vector<4x8xf32>, vector<384x8xf32> -> vector<384x8xf32>
    %24 = arith.addf %18, %23 : vector<384x8xf32>
    %c0_22 = arith.constant 0 : index
    %c0_23 = arith.constant 0 : index
    %25 = vector.load %arg3[%c0_22, %c0_23] : memref<1x8xf32, #tpu.memory_space<vmem>>, vector<1x8xf32>
    %26 = vector.broadcast %25 : vector<1x8xf32> to vector<384x8xf32>
    %27 = arith.addf %24, %26 : vector<384x8xf32>
    %28 = vector.shape_cast %27 : vector<384x8xf32> to vector<16x24x8xf32>
    %29 = vector.extract_strided_slice %28 {offsets = [0, 0, 0], sizes = [16, 16, 8], strides = [1, 1, 1]} : vector<16x24x8xf32> to vector<16x16x8xf32>
    %c0_24 = arith.constant 0 : index
    %c0_25 = arith.constant 0 : index
    %c0_26 = arith.constant 0 : index
    %c0_27 = arith.constant 0 : index
    %30 = vector.load %arg4[%c0_24, %c0_25, %c0_26, %c0_27] : memref<1x16x16x8xf32, #tpu.memory_space<vmem>>, vector<1x16x16x8xf32>
    %31 = vector.shape_cast %30 : vector<1x16x16x8xf32> to vector<16x16x8xf32>
    %32 = vector.shape_cast %29 : vector<16x16x8xf32> to vector<1x16x16x8xf32>
    tpu.vector_store %arg4[%c0_24, %c0_25, %c0_26, %c0_27], %32 {strides = array<i32>} : memref<1x16x16x8xf32, #tpu.memory_space<vmem>>, vector<1x16x16x8xf32>,
    %33 = vector.shape_cast %29 : vector<16x16x8xf32> to vector<256x8xf32>
    %cst_28 = arith.constant dense<0.000000e+00> : vector<8xf32>
    %34 = vector.multi_reduction <add>, %33, %cst_28 [0] : vector<256x8xf32> to vector<8xf32>
    %35 = vector.shape_cast %34 : vector<8xf32> to vector<1x8xf32>
    %36 = arith.mulf %33, %33 : vector<256x8xf32>
    %cst_29 = arith.constant dense<0.000000e+00> : vector<8xf32>
    %37 = vector.multi_reduction <add>, %36, %cst_29 [0] : vector<256x8xf32> to vector<8xf32>
    %38 = vector.shape_cast %37 : vector<8xf32> to vector<1x8xf32>
    %39 = tpu.concatenate %35, %38 in 0 : vector<1x8xf32>, vector<1x8xf32> -> vector<2x8xf32>
    %c0_30 = arith.constant 0 : index
    %c0_31 = arith.constant 0 : index
    %c0_32 = arith.constant 0 : index
    %40 = vector.load %arg5[%c0_30, %c0_31, %c0_32] : memref<1x2x8xf32, #tpu.memory_space<vmem>>, vector<1x2x8xf32>
    %41 = vector.shape_cast %40 : vector<1x2x8xf32> to vector<2x8xf32>
    %42 = vector.shape_cast %39 : vector<2x8xf32> to vector<1x2x8xf32>
    tpu.vector_store %arg5[%c0_30, %c0_31, %c0_32], %42 {strides = array<i32>} : memref<1x2x8xf32, #tpu.memory_space<vmem>>, vector<1x2x8xf32>,
    return
  }
  func.func @transform_0(%arg0: i32) -> (i32, i32, i32) {
    %c0_i32 = arith.constant 0 : i32
    %c0_i32_0 = arith.constant 0 : i32
    %c0_i32_1 = arith.constant 0 : i32
    return %arg0, %c0_i32, %c0_i32_0 : i32, i32, i32
  }
  func.func @transform_1(%arg0: i32) -> (i32, i32, i32) {
    %c0_i32 = arith.constant 0 : i32
    %c0_i32_0 = arith.constant 0 : i32
    %c0_i32_1 = arith.constant 0 : i32
    %c0_i32_2 = arith.constant 0 : i32
    return %c0_i32, %c0_i32_0, %c0_i32_1 : i32, i32, i32
  }
  func.func @transform_2(%arg0: i32) -> (i32, i32) {
    %c0_i32 = arith.constant 0 : i32
    %c0_i32_0 = arith.constant 0 : i32
    %c0_i32_1 = arith.constant 0 : i32
    return %c0_i32, %c0_i32_0 : i32, i32
  }
  func.func @transform_3(%arg0: i32) -> (i32, i32, i32, i32) {
    %c0_i32 = arith.constant 0 : i32
    %c0_i32_0 = arith.constant 0 : i32
    %c0_i32_1 = arith.constant 0 : i32
    %c0_i32_2 = arith.constant 0 : i32
    return %arg0, %c0_i32, %c0_i32_0, %c0_i32_1 : i32, i32, i32, i32
  }
  func.func @transform_4(%arg0: i32) -> (i32, i32, i32) {
    %c0_i32 = arith.constant 0 : i32
    %c0_i32_0 = arith.constant 0 : i32
    %c0_i32_1 = arith.constant 0 : i32
    return %arg0, %c0_i32, %c0_i32_0 : i32, i32, i32
  }
}

module attributes {stable_mosaic.version = 11 : i64} {
  func.func @kernel(%arg0: i32, %arg1: i32, %arg2: memref<1x16x8x16xf32, #tpu.memory_space<vmem>>, %arg3: memref<1x16xf32, #tpu.memory_space<vmem>>, %arg4: memref<1x16xf32, #tpu.memory_space<vmem>>, %arg5: memref<1x8x8x8xf32, #tpu.memory_space<vmem>>, %arg6: memref<1x1x2x8xf32, #tpu.memory_space<vmem>>) attributes {dimension_semantics = [#tpu.dimension_semantics<parallel>, #tpu.dimension_semantics<parallel>], iteration_bounds = array<i64: 2, 1>, scalar_prefetch = 0 : i64, scratch_operands = 0 : i64, tpu.core_type = #tpu.core_type<tc>, window_params = [{transform_indices = @transform_0, window_bounds = array<i64: 1, 16, 8, 16>}, {pipeline_mode = #tpu.pipeline_mode<synchronous>, transform_indices = @transform_1, window_bounds = array<i64: 1, 16>}, {pipeline_mode = #tpu.pipeline_mode<synchronous>, transform_indices = @transform_2, window_bounds = array<i64: 1, 16>}, {transform_indices = @transform_3, window_bounds = array<i64: 1, 8, 8, 8>}, {transform_indices = @transform_4, window_bounds = array<i64: 1, 1, 2, 8>}]} {
    %c0 = arith.constant 0 : index
    %c0_0 = arith.constant 0 : index
    %c0_1 = arith.constant 0 : index
    %c0_2 = arith.constant 0 : index
    %0 = vector.load %arg2[%c0, %c0_0, %c0_1, %c0_2] : memref<1x16x8x16xf32, #tpu.memory_space<vmem>>, vector<1x16x8x16xf32>
    %1 = vector.shape_cast %0 : vector<1x16x8x16xf32> to vector<16x8x16xf32>
    %c0_3 = arith.constant 0 : index
    %c0_4 = arith.constant 0 : index
    %2 = vector.load %arg3[%c0_3, %c0_4] : memref<1x16xf32, #tpu.memory_space<vmem>>, vector<1x16xf32>
    %3 = vector.shape_cast %2 : vector<1x16xf32> to vector<1x1x16xf32>
    %4 = vector.broadcast %3 : vector<1x1x16xf32> to vector<16x8x16xf32>
    %5 = arith.mulf %1, %4 : vector<16x8x16xf32>
    %c0_5 = arith.constant 0 : index
    %c0_6 = arith.constant 0 : index
    %6 = vector.load %arg4[%c0_5, %c0_6] : memref<1x16xf32, #tpu.memory_space<vmem>>, vector<1x16xf32>
    %7 = vector.shape_cast %6 : vector<1x16xf32> to vector<1x1x16xf32>
    %8 = vector.broadcast %7 : vector<1x1x16xf32> to vector<16x8x16xf32>
    %9 = arith.addf %5, %8 : vector<16x8x16xf32>
    %cst = arith.constant 3.000000e+00 : f32
    %10 = vector.broadcast %cst : f32 to vector<16x8x16xf32>
    %11 = arith.addf %9, %10 : vector<16x8x16xf32>
    %cst_7 = arith.constant 0.000000e+00 : f32
    %cst_8 = arith.constant 6.000000e+00 : f32
    %12 = vector.broadcast %cst_7 : f32 to vector<16x8x16xf32>
    %13 = arith.maximumf %12, %11 : vector<16x8x16xf32>
    %14 = vector.broadcast %cst_8 : f32 to vector<16x8x16xf32>
    %15 = arith.minimumf %14, %13 : vector<16x8x16xf32>
    %16 = arith.mulf %9, %15 : vector<16x8x16xf32>
    %cst_9 = arith.constant 0.166666672 : f32
    %17 = vector.broadcast %cst_9 : f32 to vector<16x8x16xf32>
    %18 = arith.mulf %16, %17 : vector<16x8x16xf32>
    %19 = vector.extract_strided_slice %18 {offsets = [0, 0, 0], sizes = [16, 8, 8], strides = [1, 1, 1]} : vector<16x8x16xf32> to vector<16x8x8xf32>
    %20 = vector.extract_strided_slice %18 {offsets = [0, 0, 8], sizes = [16, 8, 8], strides = [1, 1, 1]} : vector<16x8x16xf32> to vector<16x8x8xf32>
    %21 = arith.maximumf %19, %20 : vector<16x8x8xf32>
    %22 = vector.shape_cast %21 : vector<16x8x8xf32> to vector<8x2x8x8xf32>
    %cst_10 = arith.constant dense<0xFF800000> : vector<8x8x8xf32>
    %23 = vector.multi_reduction <maximumf>, %22, %cst_10 [1] : vector<8x2x8x8xf32> to vector<8x8x8xf32>
    %c0_11 = arith.constant 0 : index
    %c0_12 = arith.constant 0 : index
    %c0_13 = arith.constant 0 : index
    %c0_14 = arith.constant 0 : index
    %24 = vector.load %arg5[%c0_11, %c0_12, %c0_13, %c0_14] : memref<1x8x8x8xf32, #tpu.memory_space<vmem>>, vector<1x8x8x8xf32>
    %25 = vector.shape_cast %24 : vector<1x8x8x8xf32> to vector<8x8x8xf32>
    %26 = vector.shape_cast %23 : vector<8x8x8xf32> to vector<1x8x8x8xf32>
    tpu.vector_store %arg5[%c0_11, %c0_12, %c0_13, %c0_14], %26 {strides = array<i32>} : memref<1x8x8x8xf32, #tpu.memory_space<vmem>>, vector<1x8x8x8xf32>,
    %27 = vector.shape_cast %23 : vector<8x8x8xf32> to vector<64x8xf32>
    %cst_15 = arith.constant dense<0.000000e+00> : vector<8xf32>
    %28 = vector.multi_reduction <add>, %27, %cst_15 [0] : vector<64x8xf32> to vector<8xf32>
    %29 = vector.shape_cast %28 : vector<8xf32> to vector<1x8xf32>
    %30 = arith.mulf %27, %27 : vector<64x8xf32>
    %cst_16 = arith.constant dense<0.000000e+00> : vector<8xf32>
    %31 = vector.multi_reduction <add>, %30, %cst_16 [0] : vector<64x8xf32> to vector<8xf32>
    %32 = vector.shape_cast %31 : vector<8xf32> to vector<1x8xf32>
    %33 = tpu.concatenate %29, %32 in 0 : vector<1x8xf32>, vector<1x8xf32> -> vector<2x8xf32>
    %c0_17 = arith.constant 0 : index
    %c0_18 = arith.constant 0 : index
    %c0_19 = arith.constant 0 : index
    %c0_20 = arith.constant 0 : index
    %34 = vector.load %arg6[%c0_17, %c0_18, %c0_19, %c0_20] : memref<1x1x2x8xf32, #tpu.memory_space<vmem>>, vector<1x1x2x8xf32>
    %35 = vector.shape_cast %34 : vector<1x1x2x8xf32> to vector<2x8xf32>
    %36 = vector.shape_cast %33 : vector<2x8xf32> to vector<1x1x2x8xf32>
    tpu.vector_store %arg6[%c0_17, %c0_18, %c0_19, %c0_20], %36 {strides = array<i32>} : memref<1x1x2x8xf32, #tpu.memory_space<vmem>>, vector<1x1x2x8xf32>,
    return
  }
  func.func @transform_0(%arg0: i32, %arg1: i32) -> (i32, i32, i32, i32) {
    %c0_i32 = arith.constant 0 : i32
    %c0_i32_0 = arith.constant 0 : i32
    %c0_i32_1 = arith.constant 0 : i32
    return %arg0, %arg1, %c0_i32, %c0_i32_0 : i32, i32, i32, i32
  }
  func.func @transform_1(%arg0: i32, %arg1: i32) -> (i32, i32) {
    %c0_i32 = arith.constant 0 : i32
    %c0_i32_0 = arith.constant 0 : i32
    %c0_i32_1 = arith.constant 0 : i32
    return %c0_i32, %c0_i32_0 : i32, i32
  }
  func.func @transform_2(%arg0: i32, %arg1: i32) -> (i32, i32) {
    %c0_i32 = arith.constant 0 : i32
    %c0_i32_0 = arith.constant 0 : i32
    %c0_i32_1 = arith.constant 0 : i32
    return %c0_i32, %c0_i32_0 : i32, i32
  }
  func.func @transform_3(%arg0: i32, %arg1: i32) -> (i32, i32, i32, i32) {
    %c0_i32 = arith.constant 0 : i32
    %c0_i32_0 = arith.constant 0 : i32
    %c0_i32_1 = arith.constant 0 : i32
    return %arg0, %arg1, %c0_i32, %c0_i32_0 : i32, i32, i32, i32
  }
  func.func @transform_4(%arg0: i32, %arg1: i32) -> (i32, i32, i32, i32) {
    %c0_i32 = arith.constant 0 : i32
    %c0_i32_0 = arith.constant 0 : i32
    %c0_i32_1 = arith.constant 0 : i32
    return %arg0, %arg1, %c0_i32, %c0_i32_0 : i32, i32, i32, i32
  }
}

module attributes {stable_mosaic.version = 11 : i64} {
  func.func @_affine_hswish_kernel(%arg0: i32, %arg1: memref<8x128xf32, #tpu.memory_space<vmem>>, %arg2: memref<1x128xf32, #tpu.memory_space<vmem>>, %arg3: memref<1x128xf32, #tpu.memory_space<vmem>>, %arg4: memref<8x128xf32, #tpu.memory_space<vmem>>) attributes {dimension_semantics = [#tpu.dimension_semantics<parallel>], iteration_bounds = array<i64: 1>, scalar_prefetch = 0 : i64, scratch_operands = 0 : i64, tpu.core_type = #tpu.core_type<tc>, window_params = [{transform_indices = @transform_0, window_bounds = array<i64: 8, 128>}, {pipeline_mode = #tpu.pipeline_mode<synchronous>, transform_indices = @transform_1, window_bounds = array<i64: 1, 128>}, {pipeline_mode = #tpu.pipeline_mode<synchronous>, transform_indices = @transform_2, window_bounds = array<i64: 1, 128>}, {transform_indices = @transform_3, window_bounds = array<i64: 8, 128>}]} {
    %c0 = arith.constant 0 : index
    %c0_0 = arith.constant 0 : index
    %0 = vector.load %arg1[%c0, %c0_0] : memref<8x128xf32, #tpu.memory_space<vmem>>, vector<8x128xf32>
    %c0_1 = arith.constant 0 : index
    %c0_2 = arith.constant 0 : index
    %1 = vector.load %arg2[%c0_1, %c0_2] : memref<1x128xf32, #tpu.memory_space<vmem>>, vector<1x128xf32>
    %2 = vector.broadcast %1 : vector<1x128xf32> to vector<8x128xf32>
    %3 = arith.mulf %0, %2 : vector<8x128xf32>
    %c0_3 = arith.constant 0 : index
    %c0_4 = arith.constant 0 : index
    %4 = vector.load %arg3[%c0_3, %c0_4] : memref<1x128xf32, #tpu.memory_space<vmem>>, vector<1x128xf32>
    %5 = vector.broadcast %4 : vector<1x128xf32> to vector<8x128xf32>
    %6 = arith.addf %3, %5 : vector<8x128xf32>
    %cst = arith.constant 3.000000e+00 : f32
    %7 = vector.broadcast %cst : f32 to vector<8x128xf32>
    %8 = arith.addf %6, %7 : vector<8x128xf32>
    %cst_5 = arith.constant 0.000000e+00 : f32
    %cst_6 = arith.constant 6.000000e+00 : f32
    %9 = vector.broadcast %cst_5 : f32 to vector<8x128xf32>
    %10 = arith.maximumf %9, %8 : vector<8x128xf32>
    %11 = vector.broadcast %cst_6 : f32 to vector<8x128xf32>
    %12 = arith.minimumf %11, %10 : vector<8x128xf32>
    %13 = arith.mulf %6, %12 : vector<8x128xf32>
    %cst_7 = arith.constant 0.166666672 : f32
    %14 = vector.broadcast %cst_7 : f32 to vector<8x128xf32>
    %15 = arith.mulf %13, %14 : vector<8x128xf32>
    %c0_8 = arith.constant 0 : index
    %c0_9 = arith.constant 0 : index
    %16 = vector.load %arg4[%c0_8, %c0_9] : memref<8x128xf32, #tpu.memory_space<vmem>>, vector<8x128xf32>
    tpu.vector_store %arg4[%c0_8, %c0_9], %15 {strides = array<i32>} : memref<8x128xf32, #tpu.memory_space<vmem>>, vector<8x128xf32>,
    return
  }
  func.func @transform_0(%arg0: i32) -> (i32, i32) {
    %c0_i32 = arith.constant 0 : i32
    %c0_i32_0 = arith.constant 0 : i32
    return %arg0, %c0_i32 : i32, i32
  }
  func.func @transform_1(%arg0: i32) -> (i32, i32) {
    %c0_i32 = arith.constant 0 : i32
    %c0_i32_0 = arith.constant 0 : i32
    %c0_i32_1 = arith.constant 0 : i32
    return %c0_i32, %c0_i32_0 : i32, i32
  }
  func.func @transform_2(%arg0: i32) -> (i32, i32) {
    %c0_i32 = arith.constant 0 : i32
    %c0_i32_0 = arith.constant 0 : i32
    %c0_i32_1 = arith.constant 0 : i32
    return %c0_i32, %c0_i32_0 : i32, i32
  }
  func.func @transform_3(%arg0: i32) -> (i32, i32) {
    %c0_i32 = arith.constant 0 : i32
    %c0_i32_0 = arith.constant 0 : i32
    return %arg0, %c0_i32 : i32, i32
  }
}

</mosaic_0001>

<bundles_post_ra>
// kernel: aspp_forward.6
= control target key start
LH: loop header
LB: loop body
LE: loop exit
PB: predicated region body
PF: predicated region fallthrough
CT: control target
= control target key end

     0   :  { %s784_s15 = smov 0   ;;  %s786_s16 = smov 0   ;;  %s1015_s0 = inlined_call_operand.vmem [shape: f32[2,16,8,16], index: 0, kind: input, shape index: {}]   ;;  %s1016_s1 = inlined_call_operand.vmem [shape: f32[1,16], index: 1, kind: input, shape index: {}]   ;;  %s1017_s2 = inlined_call_operand.vmem [shape: f32[1,16], index: 2, kind: input, shape index: {}]   ;;  %s1018_s3 = inlined_call_operand.vmem [shape: f32[2,8,8,8], index: 3, kind: output, shape index: {0}]   ;;  %s1019_s4 = inlined_call_operand.vmem [shape: f32[2,1,2,8], index: 4, kind: output, shape index: {1}]  }
   0x1   :  { %s788_s17 = smov 0  }
   0x2 LB: > { %s27_s18 = sadd.s32 1, %s752_s16  ;;  %p697_p0 = scmp.ge.s32.totalorder %s756_s17, 1  ;;  %s756_s17 = sphi %s788_s17, %s15_s17   ;;  %s752_s16 = sphi %s786_s16, %s1021_s16   ;;  %s748_s15 = sphi %s784_s15, %s1020_s15  }
   0x3   : > { %p29_p1 = scmp.ge.s32.totalorder %s27_s18, 2  ;;  %p188_p2 = scmp.lt.s32.totalorder %s756_s17, 3 }
   0x5   : > { %s1023_s18 = smov (%p29_p1, %s27_s18), 0  ;;  %p189_p3 = pnand %p697_p0, %p188_p2 }
   0x6   : > { %p230_p4 = scmp.lt.s32.totalorder (!%p189_p3), %s748_s15, 1  ;;  %s758_s27 = smov (!%p189_p3), 120  }
   0x7   : > { %192 = sbr.rel (%p189_p3) target bundleno = 197 (0xc5), region = 32 }
   0xc   : > { %s1025_s15 = smov (!%p230_p4, %s748_s15), 1  ;;  %v808_v0 = vld [vmem:[%s1016_s1] ss:$0 sm:$0xff]  ;;  %vm478_vm0 = vcmask 64512   ;;  %vm561_vm1 = vcmask 1040384   ;;  %vm563_vm2 = vcmask 58368  }
   0xd   : > { %s707_s19 = sshll.u32 %s1025_s15, 7  ;;  %v818_v1 = vld [vmem:[%s1017_s2] ss:$0 sm:$0xff]  ;;  %s708_s28 = sshll.u32 %s1025_s15, 6 }
   0xe   : > { %s813_s24 = scalar_lea.vmem %s1015_s0, %s707_s19  ;;  %s942_s5 = scalar_lea.vmem %s1018_s3, %s708_s28 }
   0xf   : > { %v258_v2 = vld [vmem:[%s813_s24 + $0x10] sm:$0xff]  ;;  %v256_v3 = vld [vmem:[%s813_s24] sm:$0xff]  ;;  %v259_v4 = vld [vmem:[%s813_s24 + $0x18] sm:$0xff]  ;;  %s702_s6 = sshll.u32 %s1025_s15, 1 }
  0x10   : > { %v281_v5 = vmul.f32 %v808_v0, %v258_v2  ;;  %v279_v6 = vmul.f32 %v808_v0, %v256_v3  ;;  %v282_v7 = vmul.f32 %v808_v0, %v259_v4  ;;  %v257_v8 = vld [vmem:[%s813_s24 + $0x8] sm:$0xff]  ;;  %v260_v10 = vld [vmem:[%s813_s24 + $0x20] sm:$0xff]  ;;  %v263_v14 = vld [vmem:[%s813_s24 + $0x38] sm:$0xff]  ;;  %s255_s9 = scalar_lea.vmem %s1019_s4, %s702_s6 }
  0x11   : > { %v261_v9 = vld [vmem:[%s813_s24 + $0x28] sm:$0xff]  ;;  %v280_v11 = vmul.f32 %v808_v0, %v257_v8  ;;  %v283_v13 = vmul.f32 %v808_v0, %v260_v10  ;;  %v262_v15 = vld [vmem:[%s813_s24 + $0x30] sm:$0xff]  ;;  %v286_v19 = vmul.f32 %v808_v0, %v263_v14  ;;  %v264_v53 = vld [vmem:[%s813_s24 + $0x40] sm:$0xff] }
  0x12   : > { %v284_v12 = vmul.f32 %v808_v0, %v261_v9  ;;  %v304_v16 = vadd.f32 %v818_v1, %v281_v5  ;;  %v302_v17 = vadd.f32 %v818_v1, %v279_v6  ;;  %v305_v18 = vadd.f32 %v818_v1, %v282_v7  ;;  %v265_v52 = vld [vmem:[%s813_s24 + $0x48] sm:$0xff]  ;;  %v267_v58 = vld [vmem:[%s813_s24 + $0x58] sm:$0xff]  ;;  %v266_v59 = vld [vmem:[%s813_s24 + $0x50] sm:$0xff] }
  0x13   : > { %v303_v20 = vadd.f32 %v818_v1, %v280_v11  ;;  %v306_v22 = vadd.f32 %v818_v1, %v283_v13  ;;  %v285_v23 = vmul.f32 %v808_v0, %v262_v15  ;;  %v309_v27 = vadd.f32 %v818_v1, %v286_v19  ;;  %v269_v60 = vld [vmem:[%s813_s24 + $0x68] sm:$0xff]  ;;  %v268_v2 = vld [vmem:[%s813_s24 + $0x60] sm:$0xff]  ;;  %v271_v3 = vld [vmem:[%s813_s24 + $0x78] sm:$0xff] }
  0x14   : > { %v307_v21 = vadd.f32 %v818_v1, %v284_v12  ;;  %v320_v24 = vadd.f32 3.0, %v304_v16  ;;  %v318_v25 = vadd.f32 3.0, %v302_v17  ;;  %v321_v26 = vadd.f32 3.0, %v305_v18  ;;  %v270_v12 = vld [vmem:[%s813_s24 + $0x70] sm:$0xff] }
  0x15   : > { %v319_v28 = vadd.f32 3.0, %v303_v20  ;;  %v322_v30 = vadd.f32 3.0, %v306_v22  ;;  %v308_v31 = vadd.f32 %v818_v1, %v285_v23  ;;  %v325_v35 = vadd.f32 3.0, %v309_v27 }
  0x16   : > { %v323_v29 = vadd.f32 3.0, %v307_v21  ;;  %v336_v32 = vmax.f32 %v320_v24, 0.0  ;;  %v334_v33 = vmax.f32 %v318_v25, 0.0  ;;  %v337_v34 = vmax.f32 %v321_v26, 0.0 }
  0x17   : > { %v335_v36 = vmax.f32 %v319_v28, 0.0  ;;  %v338_v38 = vmax.f32 %v322_v30, 0.0  ;;  %v324_v39 = vadd.f32 3.0, %v308_v31  ;;  %v341_v43 = vmax.f32 %v325_v35, 0.0 }
  0x18   : > { %v339_v37 = vmax.f32 %v323_v29, 0.0  ;;  %v352_v40 = vmin.f32 %v336_v32, 6.0  ;;  %v350_v41 = vmin.f32 %v334_v33, 6.0  ;;  %v353_v42 = vmin.f32 %v337_v34, 6.0 }
  0x19   : > { %v351_v44 = vmin.f32 %v335_v36, 6.0  ;;  %v354_v46 = vmin.f32 %v338_v38, 6.0  ;;  %v340_v47 = vmax.f32 %v324_v39, 0.0  ;;  %v357_v51 = vmin.f32 %v341_v43, 6.0 }
  0x1a   : > { %v355_v45 = vmin.f32 %v339_v37, 6.0  ;;  %v368_v48 = vmul.f32 %v352_v40, %v304_v16  ;;  %v366_v49 = vmul.f32 %v350_v41, %v302_v17  ;;  %v369_v50 = vmul.f32 %v353_v42, %v305_v18 }
  0x1b   : > { %v367_v54 = vmul.f32 %v351_v44, %v303_v20  ;;  %v370_v56 = vmul.f32 %v354_v46, %v306_v22  ;;  %v356_v57 = vmin.f32 %v340_v47, 6.0  ;;  %v373_v63 = vmul.f32 %v357_v51, %v309_v27 }
  0x1c   : > { %v371_v55 = vmul.f32 %v355_v45, %v307_v21  ;;  %v849_v61 = vmul.f32 0.16666667, %v368_v48  ;;  %v851_v62 = vmul.f32 0.16666667, %v366_v49  ;;  %v855_v4 = vmul.f32 0.16666667, %v369_v50 }
  0x1d   : > { %v857_v5 = vmul.f32 0.16666667, %v367_v54  ;;  %v372_v7 = vmul.f32 %v356_v57, %v308_v31  ;;  %v865_v8 = vmul.f32 0.16666667, %v370_v56  ;;  %v288_v9 = vmul.f32 %v808_v0, %v265_v52 }
  0x1e   : > { %v859_v6 = vmul.f32 0.16666667, %v371_v55  ;;  %418 = vrot.lane.b32.xlu1 %v849_v61, %s758_s27  ;;  %414 = vrot.lane.b32.xlu0 %v851_v62, %s758_s27  ;;  %v287_v10 = vmul.f32 %v808_v0, %v264_v53  ;;  %v290_v11 = vmul.f32 %v808_v0, %v267_v58  ;;  %v871_v13 = vmul.f32 0.16666667, %v373_v63 }
  0x1f   : > { %v289_v14 = vmul.f32 %v808_v0, %v266_v59  ;;  %v292_v15 = vmul.f32 %v808_v0, %v269_v60  ;;  %v291_v16 = vmul.f32 %v808_v0, %v268_v2  ;;  %v311_v17 = vadd.f32 %v818_v1, %v288_v9 }
  0x20   : > { %v310_v18 = vadd.f32 %v818_v1, %v287_v10  ;;  %v313_v19 = vadd.f32 %v818_v1, %v290_v11  ;;  %v294_v20 = vmul.f32 %v808_v0, %v271_v3  ;;  %v293_v24 = vmul.f32 %v808_v0, %v270_v12 }
  0x21   : > { %v312_v21 = vadd.f32 %v818_v1, %v289_v14  ;;  %v315_v22 = vadd.f32 %v818_v1, %v292_v15  ;;  %v314_v23 = vadd.f32 %v818_v1, %v291_v16  ;;  %v327_v25 = vadd.f32 3.0, %v311_v17 }
  0x22   : > { %420 = vrot.lane.b32.xlu1 %v855_v4, %s758_s27  ;;  %416 = vrot.lane.b32.xlu0 %v857_v5, %s758_s27  ;;  %v326_v26 = vadd.f32 3.0, %v310_v18  ;;  %v329_v27 = vadd.f32 3.0, %v313_v19  ;;  %v317_v28 = vadd.f32 %v818_v1, %v294_v20  ;;  %v316_v32 = vadd.f32 %v818_v1, %v293_v24 }
  0x23   : > { %v328_v29 = vadd.f32 3.0, %v312_v21  ;;  %v331_v30 = vadd.f32 3.0, %v315_v22  ;;  %v330_v31 = vadd.f32 3.0, %v314_v23  ;;  %v343_v33 = vmax.f32 %v327_v25, 0.0 }
  0x24   : > { %v342_v34 = vmax.f32 %v326_v26, 0.0  ;;  %v345_v35 = vmax.f32 %v329_v27, 0.0  ;;  %v333_v0 = vadd.f32 3.0, %v317_v28  ;;  %v332_v39 = vadd.f32 3.0, %v316_v32 }
  0x25   : > { %v344_v36 = vmax.f32 %v328_v29, 0.0  ;;  %v347_v37 = vmax.f32 %v331_v30, 0.0  ;;  %v346_v38 = vmax.f32 %v330_v31, 0.0  ;;  %v894_v40 = vmul.f32 0.16666667, %v372_v7 }
  0x26   : > { %424 = vrot.lane.b32.xlu1 %v859_v6, %s758_s27  ;;  %422 = vrot.lane.b32.xlu0 %v865_v8, %s758_s27  ;;  %v359_v41 = vmin.f32 %v343_v33, 6.0  ;;  %v358_v42 = vmin.f32 %v342_v34, 6.0  ;;  %v361_v43 = vmin.f32 %v345_v35, 6.0  ;;  %v349_v48 = vmax.f32 %v333_v0, 0.0 }
  0x27   : > { %v360_v1 = vmin.f32 %v344_v36, 6.0  ;;  %v363_v46 = vmin.f32 %v347_v37, 6.0  ;;  %v362_v47 = vmin.f32 %v346_v38, 6.0  ;;  %v348_v49 = vmax.f32 %v332_v39, 0.0 }
  0x28   : > { %v375_v44 = vmul.f32 %v359_v41, %v311_v17  ;;  %v374_v45 = vmul.f32 %v358_v42, %v310_v18  ;;  %v377_v52 = vmul.f32 %v361_v43, %v313_v19  ;;  %v365_v55 = vmin.f32 %v349_v48, 6.0 }
  0x29   : > { %v376_v53 = vmul.f32 %v360_v1, %v312_v21  ;;  %v379_v54 = vmul.f32 %v363_v46, %v315_v22  ;;  %v378_v58 = vmul.f32 %v362_v47, %v314_v23  ;;  %v364_v59 = vmin.f32 %v348_v49, 6.0 }
  0x2a   : > { %428 = vrot.lane.b32.xlu1 %v871_v13, %s758_s27  ;;  %426 = vrot.lane.b32.xlu0 %v894_v40, %s758_s27  ;;  %v900_v50 = vmul.f32 0.16666667, %v375_v44  ;;  %v902_v51 = vmul.f32 0.16666667, %v374_v45  ;;  %v908_v56 = vmul.f32 0.16666667, %v377_v52  ;;  %v381_v2 = vmul.f32 %v365_v55, %v317_v28 }
  0x2b   : > { %v910_v57 = vmul.f32 0.16666667, %v376_v53  ;;  %v916_v60 = vmul.f32 0.16666667, %v379_v54  ;;  %v918_v63 = vmul.f32 0.16666667, %v378_v58  ;;  %v380_v3 = vmul.f32 %v364_v59, %v316_v32 }
  0x2c   : > { %v924_v7 = vmul.f32 0.16666667, %v381_v2 }
  0x2d   : > { %v926_v9 = vmul.f32 0.16666667, %v380_v3 }
  0x2e   : > { %432 = vrot.lane.b32.xlu1 %v900_v50, %s758_s27  ;;  %430 = vrot.lane.b32.xlu0 %v902_v51, %s758_s27 }
  0x32   : > { %436 = vrot.lane.b32.xlu1 %v908_v56, %s758_s27  ;;  %434 = vrot.lane.b32.xlu0 %v910_v57, %s758_s27 }
  0x36   : > { %440 = vrot.lane.b32.xlu1 %v916_v60, %s758_s27  ;;  %438 = vrot.lane.b32.xlu0 %v918_v63, %s758_s27 }
  0x3a   : > { %444 = vrot.lane.b32.xlu1 %v924_v7, %s758_s27  ;;  %442 = vrot.lane.b32.xlu0 %v926_v9, %s758_s27 }
  0x90   : > { %v419_v10 = vpop.permute.xlu1 %418  ;;  %v415_v11 = vpop.permute.xlu0 %414 }
  0x91   : > { %v464_v12 = vmax.f32 %v849_v61, %v419_v10  ;;  %v462_v14 = vmax.f32 %v851_v62, %v415_v11 }
  0x93   : > { %v482_v19 = vsel %vm478_vm0, %v464_v12, -inf  ;;  %v479_v20 = vsel %vm478_vm0, %v462_v14, -inf }
  0x94   : > { %v421_v15 = vpop.permute.xlu1 %420  ;;  %v417_v16 = vpop.permute.xlu0 %416 }
  0x95   : > { %v465_v17 = vmax.f32 %v855_v4, %v421_v15  ;;  %v463_v18 = vmax.f32 %v857_v5, %v417_v16 }
  0x97   : > { %v483_v61 = vsel %vm478_vm0, %v465_v17, -inf  ;;  %v480_v62 = vsel %vm478_vm0, %v463_v18, -inf }
  0x98   : > { %v484_v21 = vmax.f32 %v482_v19, %v483_v61  ;;  %v481_v4 = vmax.f32 %v479_v20, %v480_v62  ;;  %v425_v22 = vpop.permute.xlu1 %424  ;;  %v423_v5 = vpop.permute.xlu0 %422 }
  0x99   : > { %v467_v23 = vmax.f32 %v859_v6, %v425_v22  ;;  %v466_v24 = vmax.f32 %v865_v8, %v423_v5 }
  0x9a   : > { %504 = vst.msk [vmem:[%s942_s5 + $0x8] sm:$0xff] %vm478_vm0, %v484_v21  ;;  %503 = vst.msk [vmem:[%s942_s5] sm:$0xff] %vm478_vm0, %v481_v4  ;;  %v533_v36 = vmul.f32 %v484_v21, %v484_v21  ;;  %v532_v37 = vmul.f32 %v481_v4, %v481_v4  ;;  %v512_v39 = vsel %vm478_vm0, %v484_v21, 0.0 }
  0x9b   : > { %v486_v25 = vsel %vm478_vm0, %v467_v23, -inf  ;;  %v485_v26 = vsel %vm478_vm0, %v466_v24, -inf }
  0x9c   : > { %v487_v27 = vmax.f32 %v485_v26, %v486_v25  ;;  %v429_v28 = vpop.permute.xlu1 %428  ;;  %v427_v29 = vpop.permute.xlu0 %426  ;;  %v541_v46 = vsel %vm478_vm0, %v533_v36, 0.0  ;;  %v540_v47 = vsel %vm478_vm0, %v532_v37, 0.0 }
  0x9d   : > { %v469_v30 = vmax.f32 %v871_v13, %v429_v28  ;;  %v468_v31 = vmax.f32 %v894_v40, %v427_v29  ;;  %v511_v40 = vsel %vm478_vm0, %v481_v4, 0.0  ;;  %v542_v59 = vadd.f32 %v541_v46, %v540_v47 }
  0x9e   : > { %505 = vst.msk [vmem:[%s942_s5 + $0x10] sm:$0xff] %vm478_vm0, %v487_v27  ;;  %v534_v41 = vmul.f32 %v487_v27, %v487_v27  ;;  %v514_v48 = vsel %vm478_vm0, %v487_v27, 0.0 }
  0x9f   : > { %v489_v6 = vsel %vm478_vm0, %v469_v30, -inf  ;;  %v488_v8 = vsel %vm478_vm0, %v468_v31, -inf }
  0xa0   : > { %v490_v32 = vmax.f32 %v488_v8, %v489_v6  ;;  %v433_v33 = vpop.permute.xlu1 %432  ;;  %v431_v34 = vpop.permute.xlu0 %430  ;;  %v543_v53 = vsel %vm478_vm0, %v534_v41, 0.0 }
  0xa1   : > { %v471_v35 = vmax.f32 %v900_v50, %v433_v33  ;;  %v470_v0 = vmax.f32 %v902_v51, %v431_v34  ;;  %v513_v50 = vadd.f32 %v512_v39, %v511_v40  ;;  %v544_v15 = vadd.f32 %v543_v53, %v542_v59 }
  0xa2   : > { %506 = vst.msk [vmem:[%s942_s5 + $0x18] sm:$0xff] %vm478_vm0, %v490_v32  ;;  %v535_v49 = vmul.f32 %v490_v32, %v490_v32  ;;  %v516_v54 = vsel %vm478_vm0, %v490_v32, 0.0 }
  0xa3   : > { %v492_v13 = vsel %vm478_vm0, %v471_v35, -inf  ;;  %v491_v38 = vsel %vm478_vm0, %v470_v0, -inf  ;;  %v515_v2 = vadd.f32 %v514_v48, %v513_v50 }
  0xa4   : > { %v493_v42 = vmax.f32 %v491_v38, %v492_v13  ;;  %v437_v43 = vpop.permute.xlu1 %436  ;;  %v435_v1 = vpop.permute.xlu0 %434  ;;  %v545_v11 = vsel %vm478_vm0, %v535_v49, 0.0 }
  0xa5   : > { %v473_v44 = vmax.f32 %v908_v56, %v437_v43  ;;  %v472_v45 = vmax.f32 %v910_v57, %v435_v1  ;;  %v517_v16 = vadd.f32 %v516_v54, %v515_v2  ;;  %v546_v62 = vadd.f32 %v545_v11, %v544_v15 }
  0xa6   : > { %507 = vst.msk [vmem:[%s942_s5 + $0x20] sm:$0xff] %vm478_vm0, %v493_v42  ;;  %v536_v55 = vmul.f32 %v493_v42, %v493_v42  ;;  %v518_v12 = vsel %vm478_vm0, %v493_v42, 0.0 }
  0xa7   : > { %v495_v51 = vsel %vm478_vm0, %v473_v44, -inf  ;;  %v494_v52 = vsel %vm478_vm0, %v472_v45, -inf  ;;  %v519_v21 = vadd.f32 %v518_v12, %v517_v16 }
  0xa8   : > { %v496_v56 = vmax.f32 %v494_v52, %v495_v51  ;;  %v441_v57 = vpop.permute.xlu1 %440  ;;  %v439_v58 = vpop.permute.xlu0 %438  ;;  %v547_v19 = vsel %vm478_vm0, %v536_v55, 0.0 }
  0xa9   : > { %v475_v3 = vmax.f32 %v916_v60, %v441_v57  ;;  %v474_v10 = vmax.f32 %v918_v63, %v439_v58  ;;  %v548_v25 = vadd.f32 %v547_v19, %v546_v62 }
  0xaa   : > { %508 = vst.msk [vmem:[%s942_s5 + $0x28] sm:$0xff] %vm478_vm0, %v496_v56  ;;  %v537_v14 = vmul.f32 %v496_v56, %v496_v56  ;;  %v520_v60 = vsel %vm478_vm0, %v496_v56, 0.0 }
  0xab   : > { %v498_v17 = vsel %vm478_vm0, %v475_v3, -inf  ;;  %v497_v18 = vsel %vm478_vm0, %v474_v10, -inf  ;;  %v521_v26 = vadd.f32 %v520_v60, %v519_v21 }
  0xac   : > { %v499_v20 = vmax.f32 %v497_v18, %v498_v17  ;;  %v445_v63 = vpop.permute.xlu1 %444  ;;  %v443_v61 = vpop.permute.xlu0 %442  ;;  %v549_v5 = vsel %vm478_vm0, %v537_v14, 0.0 }
  0xad   : > { %v477_v4 = vmax.f32 %v924_v7, %v445_v63  ;;  %v476_v22 = vmax.f32 %v926_v9, %v443_v61  ;;  %v550_v31 = vadd.f32 %v549_v5, %v548_v25 }
  0xae   : > { %509 = vst.msk [vmem:[%s942_s5 + $0x30] sm:$0xff] %vm478_vm0, %v499_v20  ;;  %v522_v23 = vsel %vm478_vm0, %v499_v20, 0.0  ;;  %v538_v24 = vmul.f32 %v499_v20, %v499_v20 }
  0xaf   : > { %v501_v27 = vsel %vm478_vm0, %v477_v4, -inf  ;;  %v500_v28 = vsel %vm478_vm0, %v476_v22, -inf  ;;  %v523_v7 = vadd.f32 %v522_v23, %v521_v26 }
  0xb0   : > { %v551_v29 = vsel %vm478_vm0, %v538_v24, 0.0  ;;  %v502_v30 = vmax.f32 %v500_v28, %v501_v27 }
  0xb1   : > { %v552_v8 = vadd.f32 %v551_v29, %v550_v31 }
  0xb2   : > { %510 = vst.msk [vmem:[%s942_s5 + $0x38] sm:$0xff] %vm478_vm0, %v502_v30  ;;  %v524_v9 = vsel %vm478_vm0, %v502_v30, 0.0  ;;  %v539_v6 = vmul.f32 %v502_v30, %v502_v30 }
  0xb3   : > { %v525_v32 = vadd.f32 %v524_v9, %v523_v7 }
  0xb4   : > { %v553_v33 = vsel %vm478_vm0, %v539_v6, 0.0 }
  0xb5   : > { %v526_v34 = vrot.slane %v525_v32, 4  ;;  %v554_v35 = vadd.f32 %v553_v33, %v552_v8 }
  0xb7   : > { %v527_v0 = vadd.f32 %v526_v34, %v525_v32  ;;  %v555_v36 = vrot.slane %v554_v35, 4 }
  0xb9   : > { %v528_v37 = vrot.slane %v527_v0, 2  ;;  %v556_v13 = vadd.f32 %v555_v36, %v554_v35 }
  0xbb   : > { %v529_v38 = vadd.f32 %v528_v37, %v527_v0  ;;  %v557_v39 = vrot.slane %v556_v13, 2 }
  0xbd   : > { %v530_v40 = vrot.slane %v529_v38, 1  ;;  %v558_v41 = vadd.f32 %v557_v39, %v556_v13 }
  0xbf   : > { %v559_v42 = vrot.slane %v558_v41, 1  ;;  %v531_v43 = vadd.f32 %v530_v40, %v529_v38 }
  0xc1   : > { %v560_v1 = vadd.f32 %v559_v42, %v558_v41 }
  0xc3   : > { %v562_v44 = vsel %vm561_vm1, %v531_v43, %v560_v1 }
  0xc4   : > { %564 = vst.msk [vmem:[%s255_s9] sm:$0x3] %vm563_vm2, %v562_v44 }
  0xc5 PF: > { %s15_s17 = sadd.s32 1, %s756_s17   ;;  %s1020_s15 = smov %s752_s16 }
  0xc6   : > { %p12_p5 = scmp.ge.s32.totalorder %s15_s17, 4   ;;  %s1021_s16 = smov %s1023_s18 }
  0xc8   :  { %14 = sbr.rel (!%p12_p5) target bundleno = 2 (0x2), region = 74 }

// kernel: aspp_forward.5
= control target key start
LH: loop header
LB: loop body
LE: loop exit
PB: predicated region body
PF: predicated region fallthrough
CT: control target
= control target key end

     0   :  { %s3296_s15 = smov 0   ;;  %s4242_s0 = inlined_call_operand.vmem [shape: f32[2,456,4], index: 0, kind: input, shape index: {}]   ;;  %s4243_s1 = inlined_call_operand.vmem [shape: f32[4,4,8], index: 1, kind: input, shape index: {}]   ;;  %s4244_s2 = inlined_call_operand.vmem [shape: f32[1,8], index: 2, kind: input, shape index: {}]   ;;  %s4245_s3 = inlined_call_operand.vmem [shape: f32[2,16,16,8], index: 3, kind: output, shape index: {0}]   ;;  %s4246_s4 = inlined_call_operand.vmem [shape: f32[2,2,8], index: 4, kind: output, shape index: {1}]  }
   0x1 LB: > { %s2550_s16 = sadd.s32 4294967295, %s3269_s15   ;;  %p2554_p0 = scmp.ge.s32.totalorder %s3269_s15, 1  ;;  %s3269_s15 = sphi %s3296_s15, %s15_s15  }
   0x2   : > { %p165_p1 = scmp.lt.s32.totalorder %s3269_s15, 3 }
   0x4   : > { %p166_p2 = pnand %p2554_p0, %p165_p1 }
   0x6   : > { %169 = sbr.rel (%p166_p2) target bundleno = 427 (0x1ab), region = 32 }
   0xb   : > { %v2559_v0 = vld [vmem:[%s4243_s1 + $0x4] sm:$0xf]  ;;  %vm453_vm0 = vcmask 1043456   ;;  %v257_v1 = vld [vmem:[%s4243_s1] sm:$0xf]  ;;  %p195_p3 = scmp.lt.s32.totalorder %s2550_s16, 1 }
   0xc   : > { %2958 = vmatprep.subr.msk.mxu0 %vm453_vm0, %v2559_v0  ;;  %3032 = vmatprep.subr.msk.mxu1 %vm453_vm0, %v257_v1  ;;  %v2658_v2 = vld [vmem:[%s4243_s1 + $0x8] sm:$0xf]  ;;  %v2708_v3 = vld [vmem:[%s4243_s1 + $0xc] sm:$0xf]  ;;  %vm308_vm1 = vcmask 31744   ;;  %vm2257_vm2 = vcmask 64512  }
   0xd   : > { %2959 = vmatpush3.msk.msra.mxu0 %vm453_vm0, %v2559_v0  ;;  %s4308_s16 = smov (!%p195_p3, %s2550_s16), 1  ;;  %3033 = vmatpush3.msk.msra.mxu1 %vm453_vm0, %v257_v1  ;;  %vm2460_vm3 = vcmask 1040384   ;;  %vm2462_vm4 = vcmask 58368  }
   0xe   : > { %3106 = vmatprep.subr.msk.mxu0 %vm453_vm0, %v2658_v2  ;;  %3180 = vmatprep.subr.msk.mxu1 %vm453_vm0, %v2708_v3  ;;  %s3254_s25 = smul.u32 456, %s4308_s16  ;;  %s2761_s29 = sshll.u32 %s4308_s16, 8 }
   0xf   : > { %s4043_s8 = scalar_lea.vmem %s4245_s3, %s2761_s29  ;;  %s2558_s9 = sshll.u32 %s4308_s16, 1 }
  0x10   : > { %s3328_s28 = scalar_lea.vmem %s4242_s0, %s3254_s25  ;;  %s208_s12 = scalar_lea.vmem %s4246_s4, %s2558_s9 }
  0x11   : > { %v258_v4 = vld [vmem:[%s3328_s28 + $0x2] sm:$0xff]  ;;  %v259_v6 = vld [vmem:[%s3328_s28 + $0xa] sm:$0xff]  ;;  %v260_v8 = vld [vmem:[%s3328_s28 + $0x12] sm:$0xff] }
  0x12   : > { %v209_v5 = vld [vmem:[%s3328_s28] sm:$0xff]  ;;  %2960 = vmatprep.mubr.msk.f32.mxu0 %vm308_vm1, %v258_v4  ;;  %v210_v7 = vld [vmem:[%s3328_s28 + $0x8] sm:$0xff]  ;;  %v211_v9 = vld [vmem:[%s3328_s28 + $0x10] sm:$0xff] }
  0x13   : > { %3034 = vmatprep.mubr.msk.f32.mxu1 %vm308_vm1, %v209_v5  ;;  %2961 = vmatmul.mubr.msk.f32.vlgmr.msra.gmra.mxu0 %vm308_vm1, %v259_v6  ;;  %v261_v10 = vld [vmem:[%s3328_s28 + $0x1a] sm:$0xff]  ;;  %v262_v12 = vld [vmem:[%s3328_s28 + $0x22] sm:$0xff]  ;;  %v263_v14 = vld [vmem:[%s3328_s28 + $0x2a] sm:$0xff] }
  0x14   : > { %3035 = vmatmul.mubr.msk.f32.vlgmr.msra.gmra.mxu1 %vm308_vm1, %v210_v7  ;;  %3107 = vmatpush3.msk.msra.mxu0 %vm453_vm0, %v2658_v2  ;;  %v212_v11 = vld [vmem:[%s3328_s28 + $0x18] sm:$0xff]  ;;  %v213_v13 = vld [vmem:[%s3328_s28 + $0x20] sm:$0xff]  ;;  %v214_v15 = vld [vmem:[%s3328_s28 + $0x28] sm:$0xff] }
  0x15   : > { %3181 = vmatpush3.msk.msra.mxu1 %vm453_vm0, %v2708_v3  ;;  %2963 = vmatprep.mubr.msk.f32.mxu0 %vm308_vm1, %v260_v8  ;;  %v3355_v16 = vld [vmem:[%s3328_s28 + $0x32] sm:$0xff]  ;;  %v3367_v18 = vld [vmem:[%s3328_s28 + $0x3a] sm:$0xff]  ;;  %v3373_v20 = vld [vmem:[%s3328_s28 + $0x42] sm:$0xff] }
  0x16   : > { %3037 = vmatprep.mubr.msk.f32.mxu1 %vm308_vm1, %v211_v9  ;;  %v3358_v17 = vld [vmem:[%s3328_s28 + $0x30] sm:$0xff]  ;;  %v3370_v19 = vld [vmem:[%s3328_s28 + $0x38] sm:$0xff]  ;;  %v3376_v21 = vld [vmem:[%s3328_s28 + $0x40] sm:$0xff] }
  0x17   : > { %2964 = vmatmul.mubr.msk.f32.gmra.mxu0 %vm308_vm1, %v261_v10  ;;  %v3387_v22 = vld [vmem:[%s3328_s28 + $0x4a] sm:$0xff]  ;;  %v3393_v24 = vld [vmem:[%s3328_s28 + $0x52] sm:$0xff]  ;;  %v3407_v26 = vld [vmem:[%s3328_s28 + $0x5a] sm:$0xff] }
  0x18   : > { %3038 = vmatmul.mubr.msk.f32.gmra.mxu1 %vm308_vm1, %v212_v11  ;;  %2966 = vmatprep.mubr.msk.f32.mxu0 %vm308_vm1, %v262_v12  ;;  %v3390_v23 = vld [vmem:[%s3328_s28 + $0x48] sm:$0xff]  ;;  %v3396_v25 = vld [vmem:[%s3328_s28 + $0x50] sm:$0xff]  ;;  %v3410_v27 = vld [vmem:[%s3328_s28 + $0x58] sm:$0xff] }
  0x19   : > { %3040 = vmatprep.mubr.msk.f32.mxu1 %vm308_vm1, %v213_v13  ;;  %v3413_v28 = vld [vmem:[%s3328_s28 + $0x62] sm:$0xff]  ;;  %v3427_v30 = vld [vmem:[%s3328_s28 + $0x6a] sm:$0xff]  ;;  %v3433_v32 = vld [vmem:[%s3328_s28 + $0x72] sm:$0xff] }
  0x1a   : > { %v3416_v29 = vld [vmem:[%s3328_s28 + $0x60] sm:$0xff]  ;;  %v3430_v31 = vld [vmem:[%s3328_s28 + $0x68] sm:$0xff]  ;;  %v3436_v33 = vld [vmem:[%s3328_s28 + $0x70] sm:$0xff] }
  0x1b   : > { %2967 = vmatmul.mubr.msk.f32.gmra.mxu0 %vm308_vm1, %v263_v14  ;;  %v3447_v34 = vld [vmem:[%s3328_s28 + $0x7a] sm:$0xff]  ;;  %v3453_v36 = vld [vmem:[%s3328_s28 + $0x82] sm:$0xff]  ;;  %v3467_v38 = vld [vmem:[%s3328_s28 + $0x8a] sm:$0xff] }
  0x1c   : > { %3041 = vmatmul.mubr.msk.f32.gmra.mxu1 %vm308_vm1, %v214_v15  ;;  %2969 = vmatprep.mubr.msk.f32.mxu0 %vm308_vm1, %v3355_v16  ;;  %v3450_v35 = vld [vmem:[%s3328_s28 + $0x78] sm:$0xff]  ;;  %v3456_v37 = vld [vmem:[%s3328_s28 + $0x80] sm:$0xff]  ;;  %v3470_v39 = vld [vmem:[%s3328_s28 + $0x88] sm:$0xff] }
  0x1d   : > { %3043 = vmatprep.mubr.msk.f32.mxu1 %vm308_vm1, %v3358_v17  ;;  %v3473_v40 = vld [vmem:[%s3328_s28 + $0x92] sm:$0xff]  ;;  %v3487_v42 = vld [vmem:[%s3328_s28 + $0x9a] sm:$0xff]  ;;  %v3493_v44 = vld [vmem:[%s3328_s28 + $0xa2] sm:$0xff] }
  0x1e   : > { %v3476_v41 = vld [vmem:[%s3328_s28 + $0x90] sm:$0xff]  ;;  %v3490_v43 = vld [vmem:[%s3328_s28 + $0x98] sm:$0xff]  ;;  %v3496_v45 = vld [vmem:[%s3328_s28 + $0xa0] sm:$0xff] }
  0x1f   : > { %2970 = vmatmul.mubr.msk.f32.gmra.mxu0 %vm308_vm1, %v3367_v18  ;;  %v3507_v46 = vld [vmem:[%s3328_s28 + $0xaa] sm:$0xff]  ;;  %v3513_v48 = vld [vmem:[%s3328_s28 + $0xb2] sm:$0xff]  ;;  %v3527_v50 = vld [vmem:[%s3328_s28 + $0xba] sm:$0xff] }
  0x20   : > { %3044 = vmatmul.mubr.msk.f32.gmra.mxu1 %vm308_vm1, %v3370_v19  ;;  %2972 = vmatprep.mubr.msk.f32.mxu0 %vm308_vm1, %v3373_v20  ;;  %v3510_v47 = vld [vmem:[%s3328_s28 + $0xa8] sm:$0xff]  ;;  %v3516_v49 = vld [vmem:[%s3328_s28 + $0xb0] sm:$0xff]  ;;  %v3530_v51 = vld [vmem:[%s3328_s28 + $0xb8] sm:$0xff] }
  0x21   : > { %3046 = vmatprep.mubr.msk.f32.mxu1 %vm308_vm1, %v3376_v21  ;;  %v3533_v52 = vld [vmem:[%s3328_s28 + $0xc2] sm:$0xff]  ;;  %v3547_v54 = vld [vmem:[%s3328_s28 + $0xca] sm:$0xff]  ;;  %v3553_v56 = vld [vmem:[%s3328_s28 + $0xd2] sm:$0xff] }
  0x22   : > { %v3536_v53 = vld [vmem:[%s3328_s28 + $0xc0] sm:$0xff]  ;;  %v3550_v55 = vld [vmem:[%s3328_s28 + $0xc8] sm:$0xff]  ;;  %v3556_v57 = vld [vmem:[%s3328_s28 + $0xd0] sm:$0xff] }
  0x23   : > { %2973 = vmatmul.mubr.msk.f32.gmra.mxu0 %vm308_vm1, %v3387_v22  ;;  %v3567_v58 = vld [vmem:[%s3328_s28 + $0xda] sm:$0xff]  ;;  %v3573_v60 = vld [vmem:[%s3328_s28 + $0xe2] sm:$0xff]  ;;  %v3587_v62 = vld [vmem:[%s3328_s28 + $0xea] sm:$0xff] }
  0x24   : > { %3047 = vmatmul.mubr.msk.f32.gmra.mxu1 %vm308_vm1, %v3390_v23  ;;  %2975 = vmatprep.mubr.msk.f32.mxu0 %vm308_vm1, %v3393_v24  ;;  %v3570_v59 = vld [vmem:[%s3328_s28 + $0xd8] sm:$0xff]  ;;  %v3576_v61 = vld [vmem:[%s3328_s28 + $0xe0] sm:$0xff]  ;;  %v3590_v63 = vld [vmem:[%s3328_s28 + $0xe8] sm:$0xff] }
  0x25   : > { %3049 = vmatprep.mubr.msk.f32.mxu1 %vm308_vm1, %v3396_v25  ;;  %v3593_v0 = vld [vmem:[%s3328_s28 + $0xf2] sm:$0xff]  ;;  %v3607_v2 = vld [vmem:[%s3328_s28 + $0xfa] sm:$0xff]  ;;  %v3613_v4 = vld [vmem:[%s3328_s28 + $0x102] sm:$0xff] }
  0x26   : > { %v3596_v1 = vld [vmem:[%s3328_s28 + $0xf0] sm:$0xff]  ;;  %v3610_v3 = vld [vmem:[%s3328_s28 + $0xf8] sm:$0xff]  ;;  %v3616_v5 = vld [vmem:[%s3328_s28 + $0x100] sm:$0xff] }
  0x27   : > { %2976 = vmatmul.mubr.msk.f32.gmra.mxu0 %vm308_vm1, %v3407_v26  ;;  %v3627_v6 = vld [vmem:[%s3328_s28 + $0x10a] sm:$0xff]  ;;  %v3633_v8 = vld [vmem:[%s3328_s28 + $0x112] sm:$0xff]  ;;  %v3647_v10 = vld [vmem:[%s3328_s28 + $0x11a] sm:$0xff] }
  0x28   : > { %3050 = vmatmul.mubr.msk.f32.gmra.mxu1 %vm308_vm1, %v3410_v27  ;;  %2978 = vmatprep.mubr.msk.f32.mxu0 %vm308_vm1, %v3413_v28  ;;  %v3630_v7 = vld [vmem:[%s3328_s28 + $0x108] sm:$0xff]  ;;  %4267 = vst [vmem:[#allocation2_spill] sm:$0xff] %v3633_v8  ;;  %v3636_v9 = vld [vmem:[%s3328_s28 + $0x110] sm:$0xff]  ;;  %4269 = vst [vmem:[#allocation4_spill] sm:$0xff] %v3647_v10 }
  0x29   : > { %3052 = vmatprep.mubr.msk.f32.mxu1 %vm308_vm1, %v3416_v29  ;;  %4268 = vst [vmem:[#allocation3_spill] sm:$0xff] %v3636_v9  ;;  %v3650_v11 = vld [vmem:[%s3328_s28 + $0x118] sm:$0xff]  ;;  %v3653_v12 = vld [vmem:[%s3328_s28 + $0x122] sm:$0xff]  ;;  %v3667_v14 = vld [vmem:[%s3328_s28 + $0x12a] sm:$0xff] }
  0x2a   : > { %4270 = vst [vmem:[#allocation5_spill] sm:$0xff] %v3650_v11  ;;  %4271 = vst [vmem:[#allocation6_spill] sm:$0xff] %v3653_v12  ;;  %v3656_v13 = vld [vmem:[%s3328_s28 + $0x120] sm:$0xff]  ;;  %v3670_v15 = vld [vmem:[%s3328_s28 + $0x128] sm:$0xff] }
  0x2b   : > { %2979 = vmatmul.mubr.msk.f32.gmra.mxu0 %vm308_vm1, %v3427_v30  ;;  %4272 = vst [vmem:[#allocation7_spill] sm:$0xff] %v3656_v13  ;;  %4273 = vst [vmem:[#allocation8_spill] sm:$0xff] %v3667_v14 }
  0x2c   : > { %3053 = vmatmul.mubr.msk.f32.gmra.mxu1 %vm308_vm1, %v3430_v31  ;;  %2981 = vmatprep.mubr.msk.f32.mxu0 %vm308_vm1, %v3433_v32  ;;  %4274 = vst [vmem:[#allocation9_spill] sm:$0xff] %v3670_v15 }
  0x2d   : > { %3055 = vmatprep.mubr.msk.f32.mxu1 %vm308_vm1, %v3436_v33 }
  0x2f   : > { %2982 = vmatmul.mubr.msk.f32.gmra.mxu0 %vm308_vm1, %v3447_v34 }
  0x30   : > { %3056 = vmatmul.mubr.msk.f32.gmra.mxu1 %vm308_vm1, %v3450_v35  ;;  %2984 = vmatprep.mubr.msk.f32.mxu0 %vm308_vm1, %v3453_v36 }
  0x31   : > { %3058 = vmatprep.mubr.msk.f32.mxu1 %vm308_vm1, %v3456_v37 }
  0x33   : > { %2985 = vmatmul.mubr.msk.f32.gmra.mxu0 %vm308_vm1, %v3467_v38 }
  0x34   : > { %3059 = vmatmul.mubr.msk.f32.gmra.mxu1 %vm308_vm1, %v3470_v39  ;;  %2987 = vmatprep.mubr.msk.f32.mxu0 %vm308_vm1, %v3473_v40 }
  0x35   : > { %3061 = vmatprep.mubr.msk.f32.mxu1 %vm308_vm1, %v3476_v41 }
  0x37   : > { %2988 = vmatmul.mubr.msk.f32.gmra.mxu0 %vm308_vm1, %v3487_v42 }
  0x38   : > { %3062 = vmatmul.mubr.msk.f32.gmra.mxu1 %vm308_vm1, %v3490_v43  ;;  %2990 = vmatprep.mubr.msk.f32.mxu0 %vm308_vm1, %v3493_v44 }
  0x39   : > { %3064 = vmatprep.mubr.msk.f32.mxu1 %vm308_vm1, %v3496_v45 }
  0x3b   : > { %2991 = vmatmul.mubr.msk.f32.gmra.mxu0 %vm308_vm1, %v3507_v46 }
  0x3c   : > { %3065 = vmatmul.mubr.msk.f32.gmra.mxu1 %vm308_vm1, %v3510_v47  ;;  %2993 = vmatprep.mubr.msk.f32.mxu0 %vm308_vm1, %v3513_v48 }
  0x3d   : > { %3067 = vmatprep.mubr.msk.f32.mxu1 %vm308_vm1, %v3516_v49 }
  0x3f   : > { %2994 = vmatmul.mubr.msk.f32.gmra.mxu0 %vm308_vm1, %v3527_v50 }
  0x40   : > { %3068 = vmatmul.mubr.msk.f32.gmra.mxu1 %vm308_vm1, %v3530_v51  ;;  %2996 = vmatprep.mubr.msk.f32.mxu0 %vm308_vm1, %v3533_v52 }
  0x41   : > { %3070 = vmatprep.mubr.msk.f32.mxu1 %vm308_vm1, %v3536_v53 }
  0x43   : > { %2997 = vmatmul.mubr.msk.f32.gmra.mxu0 %vm308_vm1, %v3547_v54 }
  0x44   : > { %3071 = vmatmul.mubr.msk.f32.gmra.mxu1 %vm308_vm1, %v3550_v55  ;;  %2999 = vmatprep.mubr.msk.f32.mxu0 %vm308_vm1, %v3553_v56 }
  0x45   : > { %3073 = vmatprep.mubr.msk.f32.mxu1 %vm308_vm1, %v3556_v57 }
  0x47   : > { %3000 = vmatmul.mubr.msk.f32.gmra.mxu0 %vm308_vm1, %v3567_v58 }
  0x48   : > { %3074 = vmatmul.mubr.msk.f32.gmra.mxu1 %vm308_vm1, %v3570_v59  ;;  %3002 = vmatprep.mubr.msk.f32.mxu0 %vm308_vm1, %v3573_v60 }
  0x49   : > { %3076 = vmatprep.mubr.msk.f32.mxu1 %vm308_vm1, %v3576_v61 }
  0x4b   : > { %3003 = vmatmul.mubr.msk.f32.gmra.mxu0 %vm308_vm1, %v3587_v62 }
  0x4c   : > { %3077 = vmatmul.mubr.msk.f32.gmra.mxu1 %vm308_vm1, %v3590_v63  ;;  %3005 = vmatprep.mubr.msk.f32.mxu0 %vm308_vm1, %v3593_v0 }
  0x4d   : > { %3079 = vmatprep.mubr.msk.f32.mxu1 %vm308_vm1, %v3596_v1 }
  0x4f   : > { %3006 = vmatmul.mubr.msk.f32.gmra.mxu0 %vm308_vm1, %v3607_v2 }
  0x50   : > { %3080 = vmatmul.mubr.msk.f32.gmra.mxu1 %vm308_vm1, %v3610_v3  ;;  %3008 = vmatprep.mubr.msk.f32.mxu0 %vm308_vm1, %v3613_v4 }
  0x51   : > { %3082 = vmatprep.mubr.msk.f32.mxu1 %vm308_vm1, %v3616_v5 }
  0x53   : > { %3009 = vmatmul.mubr.msk.f32.gmra.mxu0 %vm308_vm1, %v3627_v6 }
  0x54   : > { %3083 = vmatmul.mubr.msk.f32.gmra.mxu1 %vm308_vm1, %v3630_v7  ;;  %3011 = vmatprep.mubr.msk.f32.mxu0 %vm308_vm1, %v3633_v8  ;;  %v3673_v8 = vld [vmem:[%s3328_s28 + $0x132] sm:$0xff] }
  0x55   : > { %3085 = vmatprep.mubr.msk.f32.mxu1 %vm308_vm1, %v3636_v9  ;;  %4275 = vst [vmem:[#allocation10_spill] sm:$0xff] %v3673_v8  ;;  %v3676_v9 = vld [vmem:[%s3328_s28 + $0x130] sm:$0xff] }
  0x56   : > { %4276 = vst [vmem:[#allocation11_spill] sm:$0xff] %v3676_v9 }
  0x57   : > { %3012 = vmatmul.mubr.msk.f32.gmra.mxu0 %vm308_vm1, %v3647_v10  ;;  %v3693_v10 = vld [vmem:[%s3328_s28 + $0x142] sm:$0xff] }
  0x58   : > { %3086 = vmatmul.mubr.msk.f32.gmra.mxu1 %vm308_vm1, %v3650_v11  ;;  %3014 = vmatprep.mubr.msk.f32.mxu0 %vm308_vm1, %v3653_v12  ;;  %v3687_v12 = vld [vmem:[%s3328_s28 + $0x13a] sm:$0xff]  ;;  %4279 = vst [vmem:[#allocation14_spill] sm:$0xff] %v3693_v10 }
  0x59   : > { %3088 = vmatprep.mubr.msk.f32.mxu1 %vm308_vm1, %v3656_v13  ;;  %4277 = vst [vmem:[#allocation12_spill] sm:$0xff] %v3687_v12  ;;  %v3690_v13 = vld [vmem:[%s3328_s28 + $0x138] sm:$0xff]  ;;  %v3696_v11 = vld [vmem:[%s3328_s28 + $0x140] sm:$0xff] }
  0x5a   : > { %4278 = vst [vmem:[#allocation13_spill] sm:$0xff] %v3690_v13  ;;  %4280 = vst [vmem:[#allocation15_spill] sm:$0xff] %v3696_v11 }
  0x5b   : > { %3015 = vmatmul.mubr.msk.f32.gmra.mxu0 %vm308_vm1, %v3667_v14  ;;  %v3713_v14 = vld [vmem:[%s3328_s28 + $0x152] sm:$0xff] }
  0x5c   : > { %3089 = vmatmul.mubr.msk.f32.gmra.mxu1 %vm308_vm1, %v3670_v15  ;;  %3017 = vmatprep.mubr.msk.f32.mxu0 %vm308_vm1, %v3673_v8  ;;  %v3707_v8 = vld [vmem:[%s3328_s28 + $0x14a] sm:$0xff]  ;;  %4283 = vst [vmem:[#allocation18_spill] sm:$0xff] %v3713_v14 }
  0x5d   : > { %3091 = vmatprep.mubr.msk.f32.mxu1 %vm308_vm1, %v3676_v9  ;;  %4281 = vst [vmem:[#allocation16_spill] sm:$0xff] %v3707_v8  ;;  %v3710_v9 = vld [vmem:[%s3328_s28 + $0x148] sm:$0xff]  ;;  %v3716_v15 = vld [vmem:[%s3328_s28 + $0x150] sm:$0xff] }
  0x5e   : > { %4282 = vst [vmem:[#allocation17_spill] sm:$0xff] %v3710_v9  ;;  %4284 = vst [vmem:[#allocation19_spill] sm:$0xff] %v3716_v15 }
  0x5f   : > { %3018 = vmatmul.mubr.msk.f32.gmra.mxu0 %vm308_vm1, %v3687_v12  ;;  %v3733_v12 = vld [vmem:[%s3328_s28 + $0x162] sm:$0xff] }
  0x60   : > { %3092 = vmatmul.mubr.msk.f32.gmra.mxu1 %vm308_vm1, %v3690_v13  ;;  %3020 = vmatprep.mubr.msk.f32.mxu0 %vm308_vm1, %v3693_v10  ;;  %v3727_v10 = vld [vmem:[%s3328_s28 + $0x15a] sm:$0xff]  ;;  %4285 = vst [vmem:[#allocation20_spill] sm:$0xff] %v3733_v12 }
  0x61   : > { %3094 = vmatprep.mubr.msk.f32.mxu1 %vm308_vm1, %v3696_v11  ;;  %v3730_v11 = vld [vmem:[%s3328_s28 + $0x158] sm:$0xff]  ;;  %v3736_v13 = vld [vmem:[%s3328_s28 + $0x160] sm:$0xff] }
  0x62   : > { %4286 = vst [vmem:[#allocation21_spill] sm:$0xff] %v3736_v13 }
  0x63   : > { %3021 = vmatmul.mubr.msk.f32.gmra.mxu0 %vm308_vm1, %v3707_v8  ;;  %v3753_v8 = vld [vmem:[%s3328_s28 + $0x172] sm:$0xff] }
  0x64   : > { %3095 = vmatmul.mubr.msk.f32.gmra.mxu1 %vm308_vm1, %v3710_v9  ;;  %3023 = vmatprep.mubr.msk.f32.mxu0 %vm308_vm1, %v3713_v14  ;;  %v3747_v14 = vld [vmem:[%s3328_s28 + $0x16a] sm:$0xff] }
  0x65   : > { %3097 = vmatprep.mubr.msk.f32.mxu1 %vm308_vm1, %v3716_v15  ;;  %v3750_v15 = vld [vmem:[%s3328_s28 + $0x168] sm:$0xff]  ;;  %v3756_v9 = vld [vmem:[%s3328_s28 + $0x170] sm:$0xff] }
  0x67   : > { %3024 = vmatmul.mubr.msk.f32.gmra.mxu0 %vm308_vm1, %v3727_v10 }
  0x68   : > { %3098 = vmatmul.mubr.msk.f32.gmra.mxu1 %vm308_vm1, %v3730_v11  ;;  %3026 = vmatprep.mubr.msk.f32.mxu0 %vm308_vm1, %v3733_v12  ;;  %v3767_v12 = vld [vmem:[%s3328_s28 + $0x17a] sm:$0xff] }
  0x69   : > { %3100 = vmatprep.mubr.msk.f32.mxu1 %vm308_vm1, %v3736_v13  ;;  %v3770_v13 = vld [vmem:[%s3328_s28 + $0x178] sm:$0xff] }
  0x6b   : > { %3027 = vmatmul.mubr.msk.f32.gmra.mxu0 %vm308_vm1, %v3747_v14 }
  0x6c   : > { %3101 = vmatmul.mubr.msk.f32.gmra.mxu1 %vm308_vm1, %v3750_v15  ;;  %3029 = vmatprep.mubr.msk.f32.mxu0 %vm308_vm1, %v3753_v8 }
  0x6d   : > { %3103 = vmatprep.mubr.msk.f32.mxu1 %vm308_vm1, %v3756_v9 }
  0x6f   : > { %3030 = vmatmul.mubr.msk.f32.gmra.mxu0 %vm308_vm1, %v3767_v12 }
  0x70   : > { %3104 = vmatmul.mubr.msk.f32.gmra.mxu1 %vm308_vm1, %v3770_v13  ;;  %3108 = vmatprep.mubr.msk.f32.mxu0 %vm308_vm1, %v3358_v17  ;;  %v4288_v17 = vld [vmem:[#allocation2_spill] sm:$0xff] }
  0x71   : > { %3182 = vmatprep.mubr.msk.f32.mxu1 %vm308_vm1, %v3355_v16  ;;  %v4287_v16 = vld [vmem:[#allocation3_spill] sm:$0xff] }
  0x73   : > { %3109 = vmatmul.mubr.msk.f32.vlgmr.msra.gmra.mxu0 %vm308_vm1, %v3370_v19  ;;  %v4290_v19 = vld [vmem:[#allocation4_spill] sm:$0xff] }
  0x74   : > { %3183 = vmatmul.mubr.msk.f32.vlgmr.msra.gmra.mxu1 %vm308_vm1, %v3367_v18  ;;  %3111 = vmatprep.mubr.msk.f32.mxu0 %vm308_vm1, %v3376_v21  ;;  %v4289_v18 = vld [vmem:[#allocation5_spill] sm:$0xff]  ;;  %v4292_v21 = vld [vmem:[#allocation6_spill] sm:$0xff] }
  0x75   : > { %3185 = vmatprep.mubr.msk.f32.mxu1 %vm308_vm1, %v3373_v20  ;;  %v4291_v20 = vld [vmem:[#allocation7_spill] sm:$0xff] }
  0x77   : > { %3112 = vmatmul.mubr.msk.f32.gmra.mxu0 %vm308_vm1, %v3390_v23  ;;  %v4294_v23 = vld [vmem:[#allocation8_spill] sm:$0xff] }
  0x78   : > { %3186 = vmatmul.mubr.msk.f32.gmra.mxu1 %vm308_vm1, %v3387_v22  ;;  %3114 = vmatprep.mubr.msk.f32.mxu0 %vm308_vm1, %v3396_v25  ;;  %v4293_v22 = vld [vmem:[#allocation9_spill] sm:$0xff]  ;;  %v4296_v25 = vld [vmem:[#allocation10_spill] sm:$0xff] }
  0x79   : > { %3188 = vmatprep.mubr.msk.f32.mxu1 %vm308_vm1, %v3393_v24  ;;  %v4295_v24 = vld [vmem:[#allocation11_spill] sm:$0xff] }
  0x7b   : > { %3115 = vmatmul.mubr.msk.f32.gmra.mxu0 %vm308_vm1, %v3410_v27  ;;  %v4298_v27 = vld [vmem:[#allocation12_spill] sm:$0xff] }
  0x7c   : > { %3189 = vmatmul.mubr.msk.f32.gmra.mxu1 %vm308_vm1, %v3407_v26  ;;  %3117 = vmatprep.mubr.msk.f32.mxu0 %vm308_vm1, %v3416_v29  ;;  %v4297_v26 = vld [vmem:[#allocation13_spill] sm:$0xff]  ;;  %v4300_v29 = vld [vmem:[#allocation14_spill] sm:$0xff] }
  0x7d   : > { %3191 = vmatprep.mubr.msk.f32.mxu1 %vm308_vm1, %v3413_v28  ;;  %v4299_v28 = vld [vmem:[#allocation15_spill] sm:$0xff] }
  0x7f   : > { %3118 = vmatmul.mubr.msk.f32.gmra.mxu0 %vm308_vm1, %v3430_v31  ;;  %v4302_v31 = vld [vmem:[#allocation16_spill] sm:$0xff] }
  0x80   : > { %3192 = vmatmul.mubr.msk.f32.gmra.mxu1 %vm308_vm1, %v3427_v30  ;;  %3120 = vmatprep.mubr.msk.f32.mxu0 %vm308_vm1, %v3436_v33  ;;  %v4301_v30 = vld [vmem:[#allocation17_spill] sm:$0xff]  ;;  %v4304_v33 = vld [vmem:[#allocation18_spill] sm:$0xff] }
  0x81   : > { %3194 = vmatprep.mubr.msk.f32.mxu1 %vm308_vm1, %v3433_v32  ;;  %v4303_v32 = vld [vmem:[#allocation19_spill] sm:$0xff] }
  0x83   : > { %3121 = vmatmul.mubr.msk.f32.gmra.mxu0 %vm308_vm1, %v3450_v35  ;;  %v4306_v35 = vld [vmem:[#allocation20_spill] sm:$0xff] }
  0x84   : > { %3195 = vmatmul.mubr.msk.f32.gmra.mxu1 %vm308_vm1, %v3447_v34  ;;  %3123 = vmatprep.mubr.msk.f32.mxu0 %vm308_vm1, %v3456_v37  ;;  %v4305_v34 = vld [vmem:[#allocation21_spill] sm:$0xff]  ;;  %v1742_v37 = vld [vmem:[%s3328_s28 + $0x182] sm:$0xff] }
  0x85   : > { %3197 = vmatprep.mubr.msk.f32.mxu1 %vm308_vm1, %v3453_v36  ;;  %v1224_v36 = vld [vmem:[%s3328_s28 + $0x180] sm:$0xff] }
  0x87   : > { %3124 = vmatmul.mubr.msk.f32.gmra.mxu0 %vm308_vm1, %v3470_v39  ;;  %v1743_v39 = vld [vmem:[%s3328_s28 + $0x18a] sm:$0xff] }
  0x88   : > { %3198 = vmatmul.mubr.msk.f32.gmra.mxu1 %vm308_vm1, %v3467_v38  ;;  %3126 = vmatprep.mubr.msk.f32.mxu0 %vm308_vm1, %v3476_v41  ;;  %v1225_v38 = vld [vmem:[%s3328_s28 + $0x188] sm:$0xff]  ;;  %v1744_v41 = vld [vmem:[%s3328_s28 + $0x192] sm:$0xff] }
  0x89   : > { %3200 = vmatprep.mubr.msk.f32.mxu1 %vm308_vm1, %v3473_v40  ;;  %v1226_v40 = vld [vmem:[%s3328_s28 + $0x190] sm:$0xff] }
  0x8b   : > { %3127 = vmatmul.mubr.msk.f32.gmra.mxu0 %vm308_vm1, %v3490_v43  ;;  %v1745_v43 = vld [vmem:[%s3328_s28 + $0x19a] sm:$0xff] }
  0x8c   : > { %3201 = vmatmul.mubr.msk.f32.gmra.mxu1 %vm308_vm1, %v3487_v42  ;;  %3129 = vmatprep.mubr.msk.f32.mxu0 %vm308_vm1, %v3496_v45  ;;  %v1227_v42 = vld [vmem:[%s3328_s28 + $0x198] sm:$0xff]  ;;  %v1746_v45 = vld [vmem:[%s3328_s28 + $0x1a2] sm:$0xff] }
  0x8d   : > { %3203 = vmatprep.mubr.msk.f32.mxu1 %vm308_vm1, %v3493_v44  ;;  %v1228_v44 = vld [vmem:[%s3328_s28 + $0x1a0] sm:$0xff] }
  0x8f   : > { %3130 = vmatmul.mubr.msk.f32.gmra.mxu0 %vm308_vm1, %v3510_v47  ;;  %v1747_v47 = vld [vmem:[%s3328_s28 + $0x1aa] sm:$0xff] }
  0x90   : > { %3204 = vmatmul.mubr.msk.f32.gmra.mxu1 %vm308_vm1, %v3507_v46  ;;  %3132 = vmatprep.mubr.msk.f32.mxu0 %vm308_vm1, %v3516_v49  ;;  %v1229_v46 = vld [vmem:[%s3328_s28 + $0x1a8] sm:$0xff] }
  0x91   : > { %3206 = vmatprep.mubr.msk.f32.mxu1 %vm308_vm1, %v3513_v48 }
  0x93   : > { %3133 = vmatmul.mubr.msk.f32.gmra.mxu0 %vm308_vm1, %v3530_v51 }
  0x94   : > { %3207 = vmatmul.mubr.msk.f32.gmra.mxu1 %vm308_vm1, %v3527_v50  ;;  %3135 = vmatprep.mubr.msk.f32.mxu0 %vm308_vm1, %v3536_v53 }
  0x95   : > { %3209 = vmatprep.mubr.msk.f32.mxu1 %vm308_vm1, %v3533_v52 }
  0x97   : > { %3136 = vmatmul.mubr.msk.f32.gmra.mxu0 %vm308_vm1, %v3550_v55 }
  0x98   : > { %3210 = vmatmul.mubr.msk.f32.gmra.mxu1 %vm308_vm1, %v3547_v54  ;;  %3138 = vmatprep.mubr.msk.f32.mxu0 %vm308_vm1, %v3556_v57 }
  0x99   : > { %3212 = vmatprep.mubr.msk.f32.mxu1 %vm308_vm1, %v3553_v56 }
  0x9b   : > { %3139 = vmatmul.mubr.msk.f32.gmra.mxu0 %vm308_vm1, %v3570_v59 }
  0x9c   : > { %3213 = vmatmul.mubr.msk.f32.gmra.mxu1 %vm308_vm1, %v3567_v58  ;;  %3141 = vmatprep.mubr.msk.f32.mxu0 %vm308_vm1, %v3576_v61 }
  0x9d   : > { %3215 = vmatprep.mubr.msk.f32.mxu1 %vm308_vm1, %v3573_v60 }
  0x9f   : > { %3142 = vmatmul.mubr.msk.f32.gmra.mxu0 %vm308_vm1, %v3590_v63 }
  0xa0   : > { %3216 = vmatmul.mubr.msk.f32.gmra.mxu1 %vm308_vm1, %v3587_v62  ;;  %3144 = vmatprep.mubr.msk.f32.mxu0 %vm308_vm1, %v3596_v1 }
  0xa1   : > { %3218 = vmatprep.mubr.msk.f32.mxu1 %vm308_vm1, %v3593_v0 }
  0xa3   : > { %3145 = vmatmul.mubr.msk.f32.gmra.mxu0 %vm308_vm1, %v3610_v3 }
  0xa4   : > { %3219 = vmatmul.mubr.msk.f32.gmra.mxu1 %vm308_vm1, %v3607_v2  ;;  %3147 = vmatprep.mubr.msk.f32.mxu0 %vm308_vm1, %v3616_v5 }
  0xa5   : > { %3221 = vmatprep.mubr.msk.f32.mxu1 %vm308_vm1, %v3613_v4 }
  0xa7   : > { %3148 = vmatmul.mubr.msk.f32.gmra.mxu0 %vm308_vm1, %v3630_v7 }
  0xa8   : > { %3222 = vmatmul.mubr.msk.f32.gmra.mxu1 %vm308_vm1, %v3627_v6  ;;  %3150 = vmatprep.mubr.msk.f32.mxu0 %vm308_vm1, %v4287_v16 }
  0xa9   : > { %3224 = vmatprep.mubr.msk.f32.mxu1 %vm308_vm1, %v4288_v17 }
  0xab   : > { %3151 = vmatmul.mubr.msk.f32.gmra.mxu0 %vm308_vm1, %v4289_v18 }
  0xac   : > { %3225 = vmatmul.mubr.msk.f32.gmra.mxu1 %vm308_vm1, %v4290_v19  ;;  %3153 = vmatprep.mubr.msk.f32.mxu0 %vm308_vm1, %v4291_v20 }
  0xad   : > { %3227 = vmatprep.mubr.msk.f32.mxu1 %vm308_vm1, %v4292_v21 }
  0xaf   : > { %3154 = vmatmul.mubr.msk.f32.gmra.mxu0 %vm308_vm1, %v4293_v22 }
  0xb0   : > { %3228 = vmatmul.mubr.msk.f32.gmra.mxu1 %vm308_vm1, %v4294_v23  ;;  %3156 = vmatprep.mubr.msk.f32.mxu0 %vm308_vm1, %v4295_v24 }
  0xb1   : > { %3230 = vmatprep.mubr.msk.f32.mxu1 %vm308_vm1, %v4296_v25 }
  0xb3   : > { %3157 = vmatmul.mubr.msk.f32.gmra.mxu0 %vm308_vm1, %v4297_v26 }
  0xb4   : > { %3231 = vmatmul.mubr.msk.f32.gmra.mxu1 %vm308_vm1, %v4298_v27  ;;  %3159 = vmatprep.mubr.msk.f32.mxu0 %vm308_vm1, %v4299_v28 }
  0xb5   : > { %3233 = vmatprep.mubr.msk.f32.mxu1 %vm308_vm1, %v4300_v29 }
  0xb7   : > { %3160 = vmatmul.mubr.msk.f32.gmra.mxu0 %vm308_vm1, %v4301_v30 }
  0xb8   : > { %3234 = vmatmul.mubr.msk.f32.gmra.mxu1 %vm308_vm1, %v4302_v31  ;;  %3162 = vmatprep.mubr.msk.f32.mxu0 %vm308_vm1, %v4303_v32 }
  0xb9   : > { %3236 = vmatprep.mubr.msk.f32.mxu1 %vm308_vm1, %v4304_v33 }
  0xbb   : > { %3163 = vmatmul.mubr.msk.f32.gmra.mxu0 %vm308_vm1, %v3730_v11 }
  0xbc   : > { %3237 = vmatmul.mubr.msk.f32.gmra.mxu1 %vm308_vm1, %v3727_v10  ;;  %3165 = vmatprep.mubr.msk.f32.mxu0 %vm308_vm1, %v4305_v34 }
  0xbd   : > { %3239 = vmatprep.mubr.msk.f32.mxu1 %vm308_vm1, %v4306_v35 }
  0xbf   : > { %3166 = vmatmul.mubr.msk.f32.gmra.mxu0 %vm308_vm1, %v3750_v15 }
  0xc0   : > { %3240 = vmatmul.mubr.msk.f32.gmra.mxu1 %vm308_vm1, %v3747_v14  ;;  %3168 = vmatprep.mubr.msk.f32.mxu0 %vm308_vm1, %v3756_v9 }
  0xc1   : > { %3242 = vmatprep.mubr.msk.f32.mxu1 %vm308_vm1, %v3753_v8 }
  0xc3   : > { %3169 = vmatmul.mubr.msk.f32.gmra.mxu0 %vm308_vm1, %v3770_v13 }
  0xc4   : > { %3243 = vmatmul.mubr.msk.f32.gmra.mxu1 %vm308_vm1, %v3767_v12  ;;  %3171 = vmatprep.mubr.msk.f32.mxu0 %vm308_vm1, %v1224_v36 }
  0xc5   : > { %3245 = vmatprep.mubr.msk.f32.mxu1 %vm308_vm1, %v1742_v37 }
  0xc7   : > { %3172 = vmatmul.mubr.msk.f32.gmra.mxu0 %vm308_vm1, %v1225_v38 }
  0xc8   : > { %3246 = vmatmul.mubr.msk.f32.gmra.mxu1 %vm308_vm1, %v1743_v39  ;;  %3174 = vmatprep.mubr.msk.f32.mxu0 %vm308_vm1, %v1226_v40 }
  0xc9   : > { %3248 = vmatprep.mubr.msk.f32.mxu1 %vm308_vm1, %v1744_v41 }
  0xcb   : > { %3175 = vmatmul.mubr.msk.f32.gmra.mxu0 %vm308_vm1, %v1227_v42 }
  0xcc   : > { %3249 = vmatmul.mubr.msk.f32.gmra.mxu1 %vm308_vm1, %v1745_v43  ;;  %3177 = vmatprep.mubr.msk.f32.mxu0 %vm308_vm1, %v1228_v44 }
  0xcd   : > { %3251 = vmatprep.mubr.msk.f32.mxu1 %vm308_vm1, %v1746_v45 }
  0xcf   : > { %3178 = vmatmul.mubr.msk.f32.gmra.mxu0 %vm308_vm1, %v1229_v46 }
  0xd0   : > { %3252 = vmatmul.mubr.msk.f32.gmra.mxu1 %vm308_vm1, %v1747_v47 }
  0xd3   : > { %v2962_v48 = vpop.f32.mrf.mxu0 }
  0xd4   : > { %v3036_v49 = vpop.f32.mrf.mxu1 }
  0xd5   : > { %v3968_v50 = vadd.f32 %v3036_v49, %v2962_v48  ;;  %v523_v51 = vpop.f32.mrf.mxu0 }
  0xd6   : > { %v959_v52 = vpop.f32.mrf.mxu1 }
  0xd7   : > { %v3970_v53 = vadd.f32 %v959_v52, %v523_v51  ;;  %v2965_v54 = vpop.f32.mrf.mxu0 }
  0xd8   : > { %v3039_v55 = vpop.f32.mrf.mxu1 }
  0xd9   : > { %v3972_v56 = vadd.f32 %v3039_v55, %v2965_v54  ;;  %v533_v57 = vpop.f32.mrf.mxu0 }
  0xda   : > { %v969_v58 = vpop.f32.mrf.mxu1 }
  0xdb   : > { %v2968_v59 = vpop.f32.mrf.mxu0 }
  0xdc   : > { %v3042_v60 = vpop.f32.mrf.mxu1 }
  0xdd   : > { %v542_v61 = vpop.f32.mrf.mxu0 }
  0xde   : > { %v978_v62 = vpop.f32.mrf.mxu1 }
  0xdf   : > { %v3974_v63 = vadd.f32 %v978_v62, %v542_v61  ;;  %v2971_v0 = vpop.f32.mrf.mxu0 }
  0xe0   : > { %v3045_v1 = vpop.f32.mrf.mxu1 }
  0xe1   : > { %v3976_v2 = vadd.f32 %v3045_v1, %v2971_v0  ;;  %v551_v3 = vpop.f32.mrf.mxu0 }
  0xe2   : > { %v987_v4 = vpop.f32.mrf.mxu1 }
  0xe3   : > { %v3978_v5 = vadd.f32 %v987_v4, %v551_v3  ;;  %v2974_v6 = vpop.f32.mrf.mxu0 }
  0xe4   : > { %v3048_v7 = vpop.f32.mrf.mxu1 }
  0xe5   : > { %v3980_v8 = vadd.f32 %v3048_v7, %v2974_v6  ;;  %v561_v9 = vpop.f32.mrf.mxu0 }
  0xe6   : > { %v997_v10 = vpop.f32.mrf.mxu1 }
  0xe7   : > { %v2977_v11 = vpop.f32.mrf.mxu0 }
  0xe8   : > { %v3051_v12 = vpop.f32.mrf.mxu1 }
  0xe9   : > { %v570_v13 = vpop.f32.mrf.mxu0 }
  0xea   : > { %v1006_v14 = vpop.f32.mrf.mxu1 }
  0xeb   : > { %v3982_v15 = vadd.f32 %v1006_v14, %v570_v13  ;;  %v2980_v16 = vpop.f32.mrf.mxu0 }
  0xec   : > { %v3054_v17 = vpop.f32.mrf.mxu1 }
  0xed   : > { %v3984_v18 = vadd.f32 %v3054_v17, %v2980_v16  ;;  %v579_v19 = vpop.f32.mrf.mxu0 }
  0xee   : > { %v1015_v20 = vpop.f32.mrf.mxu1 }
  0xef   : > { %v3986_v21 = vadd.f32 %v1015_v20, %v579_v19  ;;  %v2983_v22 = vpop.f32.mrf.mxu0 }
  0xf0   : > { %v3057_v23 = vpop.f32.mrf.mxu1 }
  0xf1   : > { %v3988_v24 = vadd.f32 %v3057_v23, %v2983_v22  ;;  %v589_v25 = vpop.f32.mrf.mxu0 }
  0xf2   : > { %v1025_v26 = vpop.f32.mrf.mxu1 }
  0xf3   : > { %v2986_v27 = vpop.f32.mrf.mxu0 }
  0xf4   : > { %v3060_v28 = vpop.f32.mrf.mxu1 }
  0xf5   : > { %v598_v29 = vpop.f32.mrf.mxu0 }
  0xf6   : > { %v1034_v30 = vpop.f32.mrf.mxu1 }
  0xf7   : > { %v3990_v31 = vadd.f32 %v1034_v30, %v598_v29  ;;  %v2989_v32 = vpop.f32.mrf.mxu0 }
  0xf8   : > { %v3063_v33 = vpop.f32.mrf.mxu1 }
  0xf9   : > { %v3992_v34 = vadd.f32 %v3063_v33, %v2989_v32  ;;  %v607_v35 = vpop.f32.mrf.mxu0 }
  0xfa   : > { %v1043_v36 = vpop.f32.mrf.mxu1 }
  0xfb   : > { %v3994_v37 = vadd.f32 %v1043_v36, %v607_v35  ;;  %v2992_v38 = vpop.f32.mrf.mxu0 }
  0xfc   : > { %v3066_v39 = vpop.f32.mrf.mxu1 }
  0xfd   : > { %v3996_v40 = vadd.f32 %v3066_v39, %v2992_v38  ;;  %v617_v41 = vpop.f32.mrf.mxu0 }
  0xfe   : > { %v1053_v42 = vpop.f32.mrf.mxu1 }
  0xff   : > { %v2995_v43 = vpop.f32.mrf.mxu0 }
 0x100   : > { %v3069_v44 = vpop.f32.mrf.mxu1 }
 0x101   : > { %v626_v45 = vpop.f32.mrf.mxu0 }
 0x102   : > { %v1062_v46 = vpop.f32.mrf.mxu1 }
 0x103   : > { %v3998_v47 = vadd.f32 %v1062_v46, %v626_v45  ;;  %v2998_v48 = vpop.f32.mrf.mxu0 }
 0x104   : > { %v3072_v49 = vpop.f32.mrf.mxu1 }
 0x105   : > { %v4000_v51 = vadd.f32 %v3072_v49, %v2998_v48  ;;  %v635_v52 = vpop.f32.mrf.mxu0 }
 0x106   : > { %v1071_v54 = vpop.f32.mrf.mxu1 }
 0x107   : > { %v4002_v55 = vadd.f32 %v1071_v54, %v635_v52  ;;  %v3001_v57 = vpop.f32.mrf.mxu0 }
 0x108   : > { %v3075_v58 = vpop.f32.mrf.mxu1 }
 0x109   : > { %v4004_v59 = vadd.f32 %v3075_v58, %v3001_v57  ;;  %v645_v60 = vpop.f32.mrf.mxu0 }
 0x10a   : > { %v1081_v61 = vpop.f32.mrf.mxu1 }
 0x10b   : > { %v3004_v62 = vpop.f32.mrf.mxu0 }
 0x10c   : > { %v3078_v0 = vpop.f32.mrf.mxu1 }
 0x10d   : > { %v654_v1 = vpop.f32.mrf.mxu0 }
 0x10e   : > { %v1090_v3 = vpop.f32.mrf.mxu1 }
 0x10f   : > { %v4006_v4 = vadd.f32 %v1090_v3, %v654_v1  ;;  %v3007_v6 = vpop.f32.mrf.mxu0 }
 0x110   : > { %v3081_v7 = vpop.f32.mrf.mxu1 }
 0x111   : > { %v4008_v9 = vadd.f32 %v3081_v7, %v3007_v6  ;;  %v663_v10 = vpop.f32.mrf.mxu0 }
 0x112   : > { %v1099_v11 = vpop.f32.mrf.mxu1 }
 0x113   : > { %v4010_v12 = vadd.f32 %v1099_v11, %v663_v10  ;;  %v3010_v13 = vpop.f32.mrf.mxu0 }
 0x114   : > { %v3084_v14 = vpop.f32.mrf.mxu1 }
 0x115   : > { %v4012_v16 = vadd.f32 %v3084_v14, %v3010_v13  ;;  %v673_v17 = vpop.f32.mrf.mxu0 }
 0x116   : > { %v1109_v19 = vpop.f32.mrf.mxu1 }
 0x117   : > { %v3013_v20 = vpop.f32.mrf.mxu0  ;;  %v4037_v19 = vld [vmem:[%s4244_s2] ss:$0 sm:$0xff] }
 0x118   : > { %v3087_v22 = vpop.f32.mrf.mxu1 }
 0x119   : > { %v682_v23 = vpop.f32.mrf.mxu0 }
 0x11a   : > { %v1118_v25 = vpop.f32.mrf.mxu1 }
 0x11b   : > { %v4014_v26 = vadd.f32 %v1118_v25, %v682_v23  ;;  %v3016_v27 = vpop.f32.mrf.mxu0 }
 0x11c   : > { %v3090_v28 = vpop.f32.mrf.mxu1 }
 0x11d   : > { %v4016_v29 = vadd.f32 %v3090_v28, %v3016_v27  ;;  %v691_v30 = vpop.f32.mrf.mxu0 }
 0x11e   : > { %v1127_v32 = vpop.f32.mrf.mxu1 }
 0x11f   : > { %v4018_v33 = vadd.f32 %v1127_v32, %v691_v30  ;;  %v3019_v35 = vpop.f32.mrf.mxu0 }
 0x120   : > { %v3093_v36 = vpop.f32.mrf.mxu1 }
 0x121   : > { %v4020_v38 = vadd.f32 %v3093_v36, %v3019_v35  ;;  %v701_v39 = vpop.f32.mrf.mxu0 }
 0x122   : > { %v1137_v41 = vpop.f32.mrf.mxu1 }
 0x123   : > { %v3022_v42 = vpop.f32.mrf.mxu0 }
 0x124   : > { %v3096_v43 = vpop.f32.mrf.mxu1 }
 0x125   : > { %v710_v44 = vpop.f32.mrf.mxu0 }
 0x126   : > { %v1146_v45 = vpop.f32.mrf.mxu1 }
 0x127   : > { %v4022_v46 = vadd.f32 %v1146_v45, %v710_v44  ;;  %v3025_v48 = vpop.f32.mrf.mxu0 }
 0x128   : > { %v3099_v49 = vpop.f32.mrf.mxu1 }
 0x129   : > { %v4024_v52 = vadd.f32 %v3099_v49, %v3025_v48  ;;  %v719_v54 = vpop.f32.mrf.mxu0 }
 0x12a   : > { %v1155_v57 = vpop.f32.mrf.mxu1 }
 0x12b   : > { %v4026_v58 = vadd.f32 %v1155_v57, %v719_v54  ;;  %v3028_v60 = vpop.f32.mrf.mxu0 }
 0x12c   : > { %v3102_v61 = vpop.f32.mrf.mxu1 }
 0x12d   : > { %v4028_v62 = vadd.f32 %v3102_v61, %v3028_v60  ;;  %v729_v0 = vpop.f32.mrf.mxu0 }
 0x12e   : > { %v1165_v1 = vpop.f32.mrf.mxu1 }
 0x12f   : > { %v3031_v3 = vpop.f32.mrf.mxu0 }
 0x130   : > { %v3105_v6 = vpop.f32.mrf.mxu1 }
 0x131   : > { %v738_v7 = vpop.f32.mrf.mxu0 }
 0x132   : > { %v1174_v10 = vpop.f32.mrf.mxu1 }
 0x133   : > { %v4030_v11 = vadd.f32 %v1174_v10, %v738_v7  ;;  %v3110_v13 = vpop.f32.mrf.mxu0 }
 0x134   : > { %v3184_v14 = vpop.f32.mrf.mxu1  ;;  %v1669_v17 = vadd.f32 %v3110_v13, %v3968_v50 }
 0x135   : > { %v1445_v20 = vpop.f32.mrf.mxu0 }
 0x136   : > { %v1963_v22 = vpop.f32.mrf.mxu1  ;;  %v2187_v23 = vadd.f32 %v3184_v14, %v1669_v17  ;;  %v1668_v25 = vadd.f32 %v1445_v20, %v3970_v53 }
 0x137   : > { %v3113_v50 = vpop.f32.mrf.mxu0 }
 0x138   : > { %v3187_v27 = vpop.f32.mrf.mxu1  ;;  %v2226_v28 = vadd.f32 %v4037_v19, %v2187_v23  ;;  %v2186_v30 = vadd.f32 %v1963_v22, %v1668_v25  ;;  %v1670_v32 = vadd.f32 %v3113_v50, %v3972_v56 }
 0x139   : > { %v1455_v35 = vpop.f32.mrf.mxu0 }
 0x13a   : > { %v1973_v36 = vpop.f32.mrf.mxu1  ;;  %2259 = vst.msk [vmem:[%s4043_s8 + $0x8] sm:$0xff] %vm2257_vm2, %v2226_v28  ;;  %v2360_v53 = vmul.f32 %v2226_v28, %v2226_v28  ;;  %v2225_v39 = vadd.f32 %v4037_v19, %v2186_v30  ;;  %v2188_v41 = vadd.f32 %v3187_v27, %v1670_v32  ;;  %v2291_v44 = vsel %vm2257_vm2, %v2226_v28, 0.0 }
 0x13b   : > { %v3116_v42 = vpop.f32.mrf.mxu0 }
 0x13c   : > { %v3190_v43 = vpop.f32.mrf.mxu1  ;;  %2258 = vst.msk [vmem:[%s4043_s8] sm:$0xff] %vm2257_vm2, %v2225_v39  ;;  %v2290_v45 = vsel %vm2257_vm2, %v2225_v39, 0.0  ;;  %v2359_v48 = vmul.f32 %v2225_v39, %v2225_v39  ;;  %v2227_v56 = vadd.f32 %v4037_v19, %v2188_v41  ;;  %v2392_v49 = vsel %vm2257_vm2, %v2360_v53, 0.0 }
 0x13d   : > { %v2292_v54 = vadd.f32 %v2291_v44, %v2290_v45  ;;  %v1464_v57 = vpop.f32.mrf.mxu0 }
 0x13e   : > { %v1982_v60 = vpop.f32.mrf.mxu1  ;;  %v2391_v61 = vsel %vm2257_vm2, %v2359_v48, 0.0  ;;  %2260 = vst.msk [vmem:[%s4043_s8 + $0x10] sm:$0xff] %vm2257_vm2, %v2227_v56  ;;  %v2293_v0 = vsel %vm2257_vm2, %v2227_v56, 0.0  ;;  %v2361_v1 = vmul.f32 %v2227_v56, %v2227_v56  ;;  %v1671_v3 = vadd.f32 %v1464_v57, %v3974_v63 }
 0x13f   : > { %v2393_v6 = vadd.f32 %v2392_v49, %v2391_v61  ;;  %v2294_v7 = vadd.f32 %v2293_v0, %v2292_v54  ;;  %v3119_v10 = vpop.f32.mrf.mxu0 }
 0x140   : > { %v3193_v13 = vpop.f32.mrf.mxu1  ;;  %v2394_v14 = vsel %vm2257_vm2, %v2361_v1, 0.0  ;;  %v2189_v17 = vadd.f32 %v1982_v60, %v1671_v3  ;;  %v1673_v20 = vadd.f32 %v3119_v10, %v3976_v2 }
 0x141   : > { %v2395_v22 = vadd.f32 %v2394_v14, %v2393_v6  ;;  %v1473_v23 = vpop.f32.mrf.mxu0 }
 0x142   : > { %v1991_v25 = vpop.f32.mrf.mxu1  ;;  %v2228_v50 = vadd.f32 %v4037_v19, %v2189_v17  ;;  %v2191_v27 = vadd.f32 %v3193_v13, %v1673_v20  ;;  %v1672_v28 = vadd.f32 %v1473_v23, %v3978_v5 }
 0x143   : > { %v3122_v63 = vpop.f32.mrf.mxu0 }
 0x144   : > { %v3196_v30 = vpop.f32.mrf.mxu1  ;;  %2261 = vst.msk [vmem:[%s4043_s8 + $0x18] sm:$0xff] %vm2257_vm2, %v2228_v50  ;;  %v2295_v32 = vsel %vm2257_vm2, %v2228_v50, 0.0  ;;  %v2362_v35 = vmul.f32 %v2228_v50, %v2228_v50  ;;  %v2230_v36 = vadd.f32 %v4037_v19, %v2191_v27  ;;  %v2190_v2 = vadd.f32 %v1991_v25, %v1672_v28 }
 0x145   : > { %v2296_v53 = vadd.f32 %v2295_v32, %v2294_v7  ;;  %v1674_v39 = vadd.f32 %v3122_v63, %v3980_v8  ;;  %v1483_v41 = vpop.f32.mrf.mxu0 }
 0x146   : > { %v2001_v42 = vpop.f32.mrf.mxu1  ;;  %v2396_v43 = vsel %vm2257_vm2, %v2362_v35, 0.0  ;;  %2263 = vst.msk [vmem:[%s4043_s8 + $0x28] sm:$0xff] %vm2257_vm2, %v2230_v36  ;;  %v2229_v5 = vadd.f32 %v4037_v19, %v2190_v2  ;;  %v2364_v49 = vmul.f32 %v2230_v36, %v2230_v36  ;;  %v2299_v1 = vsel %vm2257_vm2, %v2230_v36, 0.0 }
 0x147   : > { %v2397_v44 = vadd.f32 %v2396_v43, %v2395_v22  ;;  %v2192_v45 = vadd.f32 %v3196_v30, %v1674_v39  ;;  %v3125_v48 = vpop.f32.mrf.mxu0 }
 0x148   : > { %v3199_v56 = vpop.f32.mrf.mxu1  ;;  %2262 = vst.msk [vmem:[%s4043_s8 + $0x20] sm:$0xff] %vm2257_vm2, %v2229_v5  ;;  %v2297_v54 = vsel %vm2257_vm2, %v2229_v5, 0.0  ;;  %v2363_v57 = vmul.f32 %v2229_v5, %v2229_v5  ;;  %v2400_v20 = vsel %vm2257_vm2, %v2364_v49, 0.0 }
 0x149   : > { %v2298_v8 = vadd.f32 %v2297_v54, %v2296_v53  ;;  %v2231_v60 = vadd.f32 %v4037_v19, %v2192_v45  ;;  %v1492_v61 = vpop.f32.mrf.mxu0 }
 0x14a   : > { %v2010_v0 = vpop.f32.mrf.mxu1  ;;  %v2398_v3 = vsel %vm2257_vm2, %v2363_v57, 0.0  ;;  %v1675_v6 = vadd.f32 %v1492_v61, %v3982_v15 }
 0x14b   : > { %v2399_v7 = vadd.f32 %v2398_v3, %v2397_v44  ;;  %2264 = vst.msk [vmem:[%s4043_s8 + $0x30] sm:$0xff] %vm2257_vm2, %v2231_v60  ;;  %v2300_v10 = vadd.f32 %v2299_v1, %v2298_v8  ;;  %v2365_v13 = vmul.f32 %v2231_v60, %v2231_v60  ;;  %v3128_v14 = vpop.f32.mrf.mxu0  ;;  %v2301_v22 = vsel %vm2257_vm2, %v2231_v60, 0.0 }
 0x14c   : > { %v3202_v17 = vpop.f32.mrf.mxu1  ;;  %v2193_v23 = vadd.f32 %v2010_v0, %v1675_v6  ;;  %v1677_v25 = vadd.f32 %v3128_v14, %v3984_v18 }
 0x14d   : > { %v2302_v50 = vadd.f32 %v2301_v22, %v2300_v10  ;;  %v2401_v27 = vadd.f32 %v2400_v20, %v2399_v7  ;;  %v1501_v28 = vpop.f32.mrf.mxu0  ;;  %v2402_v15 = vsel %vm2257_vm2, %v2365_v13, 0.0 }
 0x14e   : > { %v2019_v63 = vpop.f32.mrf.mxu1  ;;  %v2232_v30 = vadd.f32 %v4037_v19, %v2193_v23  ;;  %v2195_v32 = vadd.f32 %v3202_v17, %v1677_v25  ;;  %v1676_v35 = vadd.f32 %v1501_v28, %v3986_v21 }
 0x14f   : > { %v2403_v36 = vadd.f32 %v2402_v15, %v2401_v27  ;;  %v3131_v2 = vpop.f32.mrf.mxu0 }
 0x150   : > { %v3205_v53 = vpop.f32.mrf.mxu1  ;;  %2265 = vst.msk [vmem:[%s4043_s8 + $0x38] sm:$0xff] %vm2257_vm2, %v2232_v30  ;;  %v2303_v39 = vsel %vm2257_vm2, %v2232_v30, 0.0  ;;  %v2366_v18 = vmul.f32 %v2232_v30, %v2232_v30  ;;  %v2234_v41 = vadd.f32 %v4037_v19, %v2195_v32  ;;  %v2194_v42 = vadd.f32 %v2019_v63, %v1676_v35 }
 0x151   : > { %v2304_v43 = vadd.f32 %v2303_v39, %v2302_v50  ;;  %v1678_v5 = vadd.f32 %v3131_v2, %v3988_v24  ;;  %v1511_v44 = vpop.f32.mrf.mxu0 }
 0x152   : > { %v2029_v45 = vpop.f32.mrf.mxu1  ;;  %v2404_v48 = vsel %vm2257_vm2, %v2366_v18, 0.0  ;;  %2267 = vst.msk [vmem:[%s4043_s8 + $0x48] sm:$0xff] %vm2257_vm2, %v2234_v41  ;;  %v2233_v21 = vadd.f32 %v4037_v19, %v2194_v42  ;;  %v2368_v8 = vmul.f32 %v2234_v41, %v2234_v41  ;;  %v2307_v6 = vsel %vm2257_vm2, %v2234_v41, 0.0 }
 0x153   : > { %v2405_v56 = vadd.f32 %v2404_v48, %v2403_v36  ;;  %v2196_v49 = vadd.f32 %v3205_v53, %v1678_v5  ;;  %v3134_v54 = vpop.f32.mrf.mxu0 }
 0x154   : > { %v3208_v57 = vpop.f32.mrf.mxu1  ;;  %2266 = vst.msk [vmem:[%s4043_s8 + $0x40] sm:$0xff] %vm2257_vm2, %v2233_v21  ;;  %v2305_v60 = vsel %vm2257_vm2, %v2233_v21, 0.0  ;;  %v2367_v61 = vmul.f32 %v2233_v21, %v2233_v21  ;;  %v2408_v23 = vsel %vm2257_vm2, %v2368_v8, 0.0 }
 0x155   : > { %v2306_v24 = vadd.f32 %v2305_v60, %v2304_v43  ;;  %v2235_v0 = vadd.f32 %v4037_v19, %v2196_v49  ;;  %v1520_v1 = vpop.f32.mrf.mxu0 }
 0x156   : > { %v2038_v3 = vpop.f32.mrf.mxu1  ;;  %v2406_v7 = vsel %vm2257_vm2, %v2367_v61, 0.0  ;;  %v1679_v10 = vadd.f32 %v1520_v1, %v3990_v31 }
 0x157   : > { %v2407_v13 = vadd.f32 %v2406_v7, %v2405_v56  ;;  %2268 = vst.msk [vmem:[%s4043_s8 + $0x50] sm:$0xff] %vm2257_vm2, %v2235_v0  ;;  %v2308_v14 = vadd.f32 %v2307_v6, %v2306_v24  ;;  %v2369_v17 = vmul.f32 %v2235_v0, %v2235_v0  ;;  %v3137_v20 = vpop.f32.mrf.mxu0  ;;  %v2309_v25 = vsel %vm2257_vm2, %v2235_v0, 0.0 }
 0x158   : > { %v3211_v22 = vpop.f32.mrf.mxu1  ;;  %v2197_v50 = vadd.f32 %v2038_v3, %v1679_v10  ;;  %v1681_v27 = vadd.f32 %v3137_v20, %v3992_v34 }
 0x159   : > { %v2310_v28 = vadd.f32 %v2309_v25, %v2308_v14  ;;  %v2409_v63 = vadd.f32 %v2408_v23, %v2407_v13  ;;  %v1529_v15 = vpop.f32.mrf.mxu0  ;;  %v2410_v31 = vsel %vm2257_vm2, %v2369_v17, 0.0 }
 0x15a   : > { %v2047_v30 = vpop.f32.mrf.mxu1  ;;  %v2236_v32 = vadd.f32 %v4037_v19, %v2197_v50  ;;  %v2199_v35 = vadd.f32 %v3211_v22, %v1681_v27  ;;  %v1680_v36 = vadd.f32 %v1529_v15, %v3994_v37 }
 0x15b   : > { %v2411_v2 = vadd.f32 %v2410_v31, %v2409_v63  ;;  %v3140_v53 = vpop.f32.mrf.mxu0 }
 0x15c   : > { %v3214_v39 = vpop.f32.mrf.mxu1  ;;  %2269 = vst.msk [vmem:[%s4043_s8 + $0x58] sm:$0xff] %vm2257_vm2, %v2236_v32  ;;  %v2311_v18 = vsel %vm2257_vm2, %v2236_v32, 0.0  ;;  %v2370_v34 = vmul.f32 %v2236_v32, %v2236_v32  ;;  %v2238_v41 = vadd.f32 %v4037_v19, %v2199_v35  ;;  %v2198_v42 = vadd.f32 %v2047_v30, %v1680_v36 }
 0x15d   : > { %v2312_v43 = vadd.f32 %v2311_v18, %v2310_v28  ;;  %v1682_v5 = vadd.f32 %v3140_v53, %v3996_v40  ;;  %v1539_v44 = vpop.f32.mrf.mxu0 }
 0x15e   : > { %v2057_v45 = vpop.f32.mrf.mxu1  ;;  %v2412_v48 = vsel %vm2257_vm2, %v2370_v34, 0.0  ;;  %2271 = vst.msk [vmem:[%s4043_s8 + $0x68] sm:$0xff] %vm2257_vm2, %v2238_v41  ;;  %v2237_v37 = vadd.f32 %v4037_v19, %v2198_v42  ;;  %v2372_v57 = vmul.f32 %v2238_v41, %v2238_v41  ;;  %v2315_v1 = vsel %vm2257_vm2, %v2238_v41, 0.0 }
 0x15f   : > { %v2413_v21 = vadd.f32 %v2412_v48, %v2411_v2  ;;  %v2200_v56 = vadd.f32 %v3214_v39, %v1682_v5  ;;  %v3143_v49 = vpop.f32.mrf.mxu0 }
 0x160   : > { %v3217_v54 = vpop.f32.mrf.mxu1  ;;  %2270 = vst.msk [vmem:[%s4043_s8 + $0x60] sm:$0xff] %vm2257_vm2, %v2237_v37  ;;  %v2313_v8 = vsel %vm2257_vm2, %v2237_v37, 0.0  ;;  %v2371_v60 = vmul.f32 %v2237_v37, %v2237_v37  ;;  %v2416_v20 = vsel %vm2257_vm2, %v2372_v57, 0.0 }
 0x161   : > { %v2314_v40 = vadd.f32 %v2313_v8, %v2312_v43  ;;  %v2239_v61 = vadd.f32 %v4037_v19, %v2200_v56  ;;  %v1548_v24 = vpop.f32.mrf.mxu0 }
 0x162   : > { %v2066_v0 = vpop.f32.mrf.mxu1  ;;  %v2414_v3 = vsel %vm2257_vm2, %v2371_v60, 0.0  ;;  %v1683_v6 = vadd.f32 %v1548_v24, %v3998_v47 }
 0x163   : > { %v2415_v7 = vadd.f32 %v2414_v3, %v2413_v21  ;;  %2272 = vst.msk [vmem:[%s4043_s8 + $0x70] sm:$0xff] %vm2257_vm2, %v2239_v61  ;;  %v2316_v10 = vadd.f32 %v2315_v1, %v2314_v40  ;;  %v2373_v13 = vmul.f32 %v2239_v61, %v2239_v61  ;;  %v3146_v14 = vpop.f32.mrf.mxu0  ;;  %v2317_v22 = vsel %vm2257_vm2, %v2239_v61, 0.0 }
 0x164   : > { %v3220_v17 = vpop.f32.mrf.mxu1  ;;  %v2201_v23 = vadd.f32 %v2066_v0, %v1683_v6  ;;  %v1685_v25 = vadd.f32 %v3146_v14, %v4000_v51 }
 0x165   : > { %v2318_v50 = vadd.f32 %v2317_v22, %v2316_v10  ;;  %v2417_v27 = vadd.f32 %v2416_v20, %v2415_v7  ;;  %v1557_v28 = vpop.f32.mrf.mxu0  ;;  %v2418_v47 = vsel %vm2257_vm2, %v2373_v13, 0.0 }
 0x166   : > { %v2075_v63 = vpop.f32.mrf.mxu1  ;;  %v2240_v15 = vadd.f32 %v4037_v19, %v2201_v23  ;;  %v2203_v30 = vadd.f32 %v3220_v17, %v1685_v25  ;;  %v1684_v31 = vadd.f32 %v1557_v28, %v4002_v55 }
 0x167   : > { %v2419_v32 = vadd.f32 %v2418_v47, %v2417_v27  ;;  %v3149_v35 = vpop.f32.mrf.mxu0 }
 0x168   : > { %v3223_v36 = vpop.f32.mrf.mxu1  ;;  %2273 = vst.msk [vmem:[%s4043_s8 + $0x78] sm:$0xff] %vm2257_vm2, %v2240_v15  ;;  %v2319_v2 = vsel %vm2257_vm2, %v2240_v15, 0.0  ;;  %v2374_v51 = vmul.f32 %v2240_v15, %v2240_v15  ;;  %v2242_v53 = vadd.f32 %v4037_v19, %v2203_v30  ;;  %v2202_v39 = vadd.f32 %v2075_v63, %v1684_v31 }
 0x169   : > { %v2320_v18 = vadd.f32 %v2319_v2, %v2318_v50  ;;  %v1686_v34 = vadd.f32 %v3149_v35, %v4004_v59  ;;  %v1567_v41 = vpop.f32.mrf.mxu0 }
 0x16a   : > { %v2085_v42 = vpop.f32.mrf.mxu1  ;;  %v2420_v43 = vsel %vm2257_vm2, %v2374_v51, 0.0  ;;  %2275 = vst.msk [vmem:[%s4043_s8 + $0x88] sm:$0xff] %vm2257_vm2, %v2242_v53  ;;  %v2241_v55 = vadd.f32 %v4037_v19, %v2202_v39  ;;  %v2376_v37 = vmul.f32 %v2242_v53, %v2242_v53  ;;  %v2323_v8 = vsel %vm2257_vm2, %v2242_v53, 0.0 }
 0x16b   : > { %v2421_v5 = vadd.f32 %v2420_v43, %v2419_v32  ;;  %v2204_v44 = vadd.f32 %v3223_v36, %v1686_v34  ;;  %v3152_v45 = vpop.f32.mrf.mxu0 }
 0x16c   : > { %v3226_v48 = vpop.f32.mrf.mxu1  ;;  %2274 = vst.msk [vmem:[%s4043_s8 + $0x80] sm:$0xff] %vm2257_vm2, %v2241_v55  ;;  %v2321_v21 = vsel %vm2257_vm2, %v2241_v55, 0.0  ;;  %v2375_v56 = vmul.f32 %v2241_v55, %v2241_v55  ;;  %v2424_v6 = vsel %vm2257_vm2, %v2376_v37, 0.0 }
 0x16d   : > { %v2322_v59 = vadd.f32 %v2321_v21, %v2320_v18  ;;  %v2243_v49 = vadd.f32 %v4037_v19, %v2204_v44  ;;  %v1576_v54 = vpop.f32.mrf.mxu0 }
 0x16e   : > { %v2094_v57 = vpop.f32.mrf.mxu1  ;;  %v2422_v60 = vsel %vm2257_vm2, %v2375_v56, 0.0  ;;  %v1687_v40 = vadd.f32 %v1576_v54, %v4006_v4 }
 0x16f   : > { %v2423_v61 = vadd.f32 %v2422_v60, %v2421_v5  ;;  %2276 = vst.msk [vmem:[%s4043_s8 + $0x90] sm:$0xff] %vm2257_vm2, %v2243_v49  ;;  %v2324_v24 = vadd.f32 %v2323_v8, %v2322_v59  ;;  %v2377_v0 = vmul.f32 %v2243_v49, %v2243_v49  ;;  %v3155_v1 = vpop.f32.mrf.mxu0  ;;  %v2325_v7 = vsel %vm2257_vm2, %v2243_v49, 0.0 }
 0x170   : > { %v3229_v3 = vpop.f32.mrf.mxu1  ;;  %v2205_v10 = vadd.f32 %v2094_v57, %v1687_v40  ;;  %v1689_v13 = vadd.f32 %v3155_v1, %v4008_v9 }
 0x171   : > { %v2326_v14 = vadd.f32 %v2325_v7, %v2324_v24  ;;  %v2425_v17 = vadd.f32 %v2424_v6, %v2423_v61  ;;  %v1585_v20 = vpop.f32.mrf.mxu0  ;;  %v2426_v4 = vsel %vm2257_vm2, %v2377_v0, 0.0 }
 0x172   : > { %v2103_v22 = vpop.f32.mrf.mxu1  ;;  %v2244_v23 = vadd.f32 %v4037_v19, %v2205_v10  ;;  %v2207_v25 = vadd.f32 %v3229_v3, %v1689_v13  ;;  %v1688_v50 = vadd.f32 %v1585_v20, %v4010_v12 }
 0x173   : > { %v2427_v27 = vadd.f32 %v2426_v4, %v2425_v17  ;;  %v3158_v28 = vpop.f32.mrf.mxu0 }
 0x174   : > { %v3232_v63 = vpop.f32.mrf.mxu1  ;;  %2277 = vst.msk [vmem:[%s4043_s8 + $0x98] sm:$0xff] %vm2257_vm2, %v2244_v23  ;;  %v2327_v47 = vsel %vm2257_vm2, %v2244_v23, 0.0  ;;  %v2378_v9 = vmul.f32 %v2244_v23, %v2244_v23  ;;  %v2246_v15 = vadd.f32 %v4037_v19, %v2207_v25  ;;  %v2206_v30 = vadd.f32 %v2103_v22, %v1688_v50 }
 0x175   : > { %v2328_v31 = vadd.f32 %v2327_v47, %v2326_v14  ;;  %v1690_v32 = vadd.f32 %v3158_v28, %v4012_v16  ;;  %v1595_v35 = vpop.f32.mrf.mxu0 }
 0x176   : > { %v2113_v36 = vpop.f32.mrf.mxu1  ;;  %v2428_v2 = vsel %vm2257_vm2, %v2378_v9, 0.0  ;;  %2279 = vst.msk [vmem:[%s4043_s8 + $0xa8] sm:$0xff] %vm2257_vm2, %v2246_v15  ;;  %v2245_v12 = vadd.f32 %v4037_v19, %v2206_v30  ;;  %v2380_v34 = vmul.f32 %v2246_v15, %v2246_v15  ;;  %v2331_v44 = vsel %vm2257_vm2, %v2246_v15, 0.0 }
 0x177   : > { %v2429_v51 = vadd.f32 %v2428_v2, %v2427_v27  ;;  %v2208_v53 = vadd.f32 %v3232_v63, %v1690_v32  ;;  %v3161_v39 = vpop.f32.mrf.mxu0 }
 0x178   : > { %v3235_v18 = vpop.f32.mrf.mxu1  ;;  %2278 = vst.msk [vmem:[%s4043_s8 + $0xa0] sm:$0xff] %vm2257_vm2, %v2245_v12  ;;  %v2329_v41 = vsel %vm2257_vm2, %v2245_v12, 0.0  ;;  %v2379_v42 = vmul.f32 %v2245_v12, %v2245_v12  ;;  %v2432_v54 = vsel %vm2257_vm2, %v2380_v34, 0.0 }
 0x179   : > { %v2330_v16 = vadd.f32 %v2329_v41, %v2328_v31  ;;  %v2247_v43 = vadd.f32 %v4037_v19, %v2208_v53  ;;  %v1604_v55 = vpop.f32.mrf.mxu0 }
 0x17a   : > { %v2122_v5 = vpop.f32.mrf.mxu1  ;;  %v2430_v45 = vsel %vm2257_vm2, %v2379_v42, 0.0  ;;  %v1691_v48 = vadd.f32 %v1604_v55, %v4014_v26 }
 0x17b   : > { %v2431_v37 = vadd.f32 %v2430_v45, %v2429_v51  ;;  %2280 = vst.msk [vmem:[%s4043_s8 + $0xb0] sm:$0xff] %vm2257_vm2, %v2247_v43  ;;  %v2332_v21 = vadd.f32 %v2331_v44, %v2330_v16  ;;  %v2381_v56 = vmul.f32 %v2247_v43, %v2247_v43  ;;  %v3164_v59 = vpop.f32.mrf.mxu0  ;;  %v2333_v57 = vsel %vm2257_vm2, %v2247_v43, 0.0 }
 0x17c   : > { %v3238_v49 = vpop.f32.mrf.mxu1  ;;  %v2209_v8 = vadd.f32 %v2122_v5, %v1691_v48  ;;  %v1693_v60 = vadd.f32 %v3164_v59, %v4016_v29 }
 0x17d   : > { %v2334_v40 = vadd.f32 %v2333_v57, %v2332_v21  ;;  %v2433_v61 = vadd.f32 %v2432_v54, %v2431_v37  ;;  %v1613_v24 = vpop.f32.mrf.mxu0  ;;  %v2434_v26 = vsel %vm2257_vm2, %v2381_v56, 0.0 }
 0x17e   : > { %v2131_v0 = vpop.f32.mrf.mxu1  ;;  %v2248_v1 = vadd.f32 %v4037_v19, %v2209_v8  ;;  %v2211_v3 = vadd.f32 %v3238_v49, %v1693_v60  ;;  %v1692_v6 = vadd.f32 %v1613_v24, %v4018_v33 }
 0x17f   : > { %v2435_v7 = vadd.f32 %v2434_v26, %v2433_v61  ;;  %v3167_v10 = vpop.f32.mrf.mxu0 }
 0x180   : > { %v3241_v13 = vpop.f32.mrf.mxu1  ;;  %2281 = vst.msk [vmem:[%s4043_s8 + $0xb8] sm:$0xff] %vm2257_vm2, %v2248_v1  ;;  %v2335_v14 = vsel %vm2257_vm2, %v2248_v1, 0.0  ;;  %v2382_v29 = vmul.f32 %v2248_v1, %v2248_v1  ;;  %v2250_v17 = vadd.f32 %v4037_v19, %v2211_v3  ;;  %v2210_v20 = vadd.f32 %v2131_v0, %v1692_v6 }
 0x181   : > { %v2336_v22 = vadd.f32 %v2335_v14, %v2334_v40  ;;  %v1694_v4 = vadd.f32 %v3167_v10, %v4020_v38  ;;  %v1623_v23 = vpop.f32.mrf.mxu0 }
 0x182   : > { %v2141_v25 = vpop.f32.mrf.mxu1  ;;  %v2436_v50 = vsel %vm2257_vm2, %v2382_v29, 0.0  ;;  %2283 = vst.msk [vmem:[%s4043_s8 + $0xc8] sm:$0xff] %vm2257_vm2, %v2250_v17  ;;  %v2249_v33 = vadd.f32 %v4037_v19, %v2210_v20  ;;  %v2384_v9 = vmul.f32 %v2250_v17, %v2250_v17  ;;  %v2339_v36 = vsel %vm2257_vm2, %v2250_v17, 0.0 }
 0x183   : > { %v2437_v27 = vadd.f32 %v2436_v50, %v2435_v7  ;;  %v2212_v28 = vadd.f32 %v3241_v13, %v1694_v4  ;;  %v3170_v63 = vpop.f32.mrf.mxu0 }
 0x184   : > { %v3244_v47 = vpop.f32.mrf.mxu1  ;;  %2282 = vst.msk [vmem:[%s4043_s8 + $0xc0] sm:$0xff] %vm2257_vm2, %v2249_v33  ;;  %v2337_v15 = vsel %vm2257_vm2, %v2249_v33, 0.0  ;;  %v2383_v30 = vmul.f32 %v2249_v33, %v2249_v33  ;;  %v2440_v41 = vsel %vm2257_vm2, %v2384_v9, 0.0 }
 0x185   : > { %v2338_v38 = vadd.f32 %v2337_v15, %v2336_v22  ;;  %v2251_v31 = vadd.f32 %v4037_v19, %v2212_v28  ;;  %v1632_v32 = vpop.f32.mrf.mxu0 }
 0x186   : > { %v2150_v35 = vpop.f32.mrf.mxu1  ;;  %v2438_v2 = vsel %vm2257_vm2, %v2383_v30, 0.0  ;;  %v1695_v12 = vadd.f32 %v1632_v32, %v4022_v46 }
 0x187   : > { %v2439_v51 = vadd.f32 %v2438_v2, %v2437_v27  ;;  %2284 = vst.msk [vmem:[%s4043_s8 + $0xd0] sm:$0xff] %vm2257_vm2, %v2251_v31  ;;  %v2340_v53 = vadd.f32 %v2339_v36, %v2338_v38  ;;  %v2385_v39 = vmul.f32 %v2251_v31, %v2251_v31  ;;  %v3173_v18 = vpop.f32.mrf.mxu0  ;;  %v2341_v42 = vsel %vm2257_vm2, %v2251_v31, 0.0 }
 0x188   : > { %v3247_v34 = vpop.f32.mrf.mxu1  ;;  %v2213_v16 = vadd.f32 %v2150_v35, %v1695_v12  ;;  %v1697_v43 = vadd.f32 %v3173_v18, %v4024_v52 }
 0x189   : > { %v2342_v55 = vadd.f32 %v2341_v42, %v2340_v53  ;;  %v2441_v5 = vadd.f32 %v2440_v41, %v2439_v51  ;;  %v1641_v44 = vpop.f32.mrf.mxu0  ;;  %v2442_v46 = vsel %vm2257_vm2, %v2385_v39, 0.0 }
 0x18a   : > { %v2159_v45 = vpop.f32.mrf.mxu1  ;;  %v2252_v48 = vadd.f32 %v4037_v19, %v2213_v16  ;;  %v2215_v37 = vadd.f32 %v3247_v34, %v1697_v43  ;;  %v1696_v21 = vadd.f32 %v1641_v44, %v4026_v58 }
 0x18b   : > { %v2443_v56 = vadd.f32 %v2442_v46, %v2441_v5  ;;  %v3176_v59 = vpop.f32.mrf.mxu0 }
 0x18c   : > { %v3250_v49 = vpop.f32.mrf.mxu1  ;;  %2285 = vst.msk [vmem:[%s4043_s8 + $0xd8] sm:$0xff] %vm2257_vm2, %v2252_v48  ;;  %v2343_v54 = vsel %vm2257_vm2, %v2252_v48, 0.0  ;;  %v2386_v52 = vmul.f32 %v2252_v48, %v2252_v48  ;;  %v2254_v57 = vadd.f32 %v4037_v19, %v2215_v37  ;;  %v2214_v8 = vadd.f32 %v2159_v45, %v1696_v21 }
 0x18d   : > { %v2344_v60 = vadd.f32 %v2343_v54, %v2342_v55  ;;  %v1698_v40 = vadd.f32 %v3176_v59, %v4028_v62  ;;  %v1651_v61 = vpop.f32.mrf.mxu0 }
 0x18e   : > { %v2169_v24 = vpop.f32.mrf.mxu1  ;;  %v2444_v0 = vsel %vm2257_vm2, %v2386_v52, 0.0  ;;  %2287 = vst.msk [vmem:[%s4043_s8 + $0xe8] sm:$0xff] %vm2257_vm2, %v2254_v57  ;;  %v2253_v58 = vadd.f32 %v4037_v19, %v2214_v8  ;;  %v2388_v7 = vmul.f32 %v2254_v57, %v2254_v57  ;;  %v2347_v17 = vsel %vm2257_vm2, %v2254_v57, 0.0 }
 0x18f   : > { %v2445_v26 = vadd.f32 %v2444_v0, %v2443_v56  ;;  %v2216_v1 = vadd.f32 %v3250_v49, %v1698_v40  ;;  %v3179_v3 = vpop.f32.mrf.mxu0 }
 0x190   : > { %v3253_v6 = vpop.f32.mrf.mxu1  ;;  %2286 = vst.msk [vmem:[%s4043_s8 + $0xe0] sm:$0xff] %vm2257_vm2, %v2253_v58  ;;  %v2345_v10 = vsel %vm2257_vm2, %v2253_v58, 0.0  ;;  %v2387_v13 = vmul.f32 %v2253_v58, %v2253_v58  ;;  %v2448_v33 = vsel %vm2257_vm2, %v2388_v7, 0.0 }
 0x191   : > { %v2346_v62 = vadd.f32 %v2345_v10, %v2344_v60  ;;  %v2255_v14 = vadd.f32 %v4037_v19, %v2216_v1  ;;  %v1660_v29 = vpop.f32.mrf.mxu0 }
 0x192   : > { %v2446_v20 = vsel %vm2257_vm2, %v2387_v13, 0.0  ;;  %v1699_v22 = vadd.f32 %v1660_v29, %v4030_v11  ;;  %v2178_v50 = vpop.f32.mrf.mxu1 }
 0x193   : > { %v2447_v4 = vadd.f32 %v2446_v20, %v2445_v26  ;;  %2288 = vst.msk [vmem:[%s4043_s8 + $0xf0] sm:$0xff] %vm2257_vm2, %v2255_v14  ;;  %v2348_v23 = vadd.f32 %v2347_v17, %v2346_v62  ;;  %v2389_v25 = vmul.f32 %v2255_v14, %v2255_v14  ;;  %v2349_v27 = vsel %vm2257_vm2, %v2255_v14, 0.0 }
 0x194   : > { %v2217_v28 = vadd.f32 %v2178_v50, %v1699_v22 }
 0x195   : > { %v2350_v63 = vadd.f32 %v2349_v27, %v2348_v23  ;;  %v2449_v47 = vadd.f32 %v2448_v33, %v2447_v4  ;;  %v2450_v9 = vsel %vm2257_vm2, %v2389_v25, 0.0 }
 0x196   : > { %v2256_v15 = vadd.f32 %v4037_v19, %v2217_v28 }
 0x197   : > { %v2451_v30 = vadd.f32 %v2450_v9, %v2449_v47 }
 0x198   : > { %2289 = vst.msk [vmem:[%s4043_s8 + $0xf8] sm:$0xff] %vm2257_vm2, %v2256_v15  ;;  %v2351_v11 = vsel %vm2257_vm2, %v2256_v15, 0.0  ;;  %v2390_v38 = vmul.f32 %v2256_v15, %v2256_v15 }
 0x199   : > { %v2352_v31 = vadd.f32 %v2351_v11, %v2350_v63 }
 0x19a   : > { %v2452_v32 = vsel %vm2257_vm2, %v2390_v38, 0.0 }
 0x19b   : > { %v2353_v35 = vrot.slane %v2352_v31, 4  ;;  %v2453_v36 = vadd.f32 %v2452_v32, %v2451_v30 }
 0x19d   : > { %v2354_v2 = vadd.f32 %v2353_v35, %v2352_v31  ;;  %v2454_v12 = vrot.slane %v2453_v36, 4 }
 0x19f   : > { %v2355_v51 = vrot.slane %v2354_v2, 2  ;;  %v2455_v53 = vadd.f32 %v2454_v12, %v2453_v36 }
 0x1a1   : > { %v2356_v39 = vadd.f32 %v2355_v51, %v2354_v2  ;;  %v2456_v18 = vrot.slane %v2455_v53, 2 }
 0x1a3   : > { %v2357_v34 = vrot.slane %v2356_v39, 1  ;;  %v2457_v19 = vadd.f32 %v2456_v18, %v2455_v53 }
 0x1a5   : > { %v2458_v41 = vrot.slane %v2457_v19, 1  ;;  %v2358_v42 = vadd.f32 %v2357_v34, %v2356_v39 }
 0x1a7   : > { %v2459_v16 = vadd.f32 %v2458_v41, %v2457_v19 }
 0x1a9   : > { %v2461_v43 = vsel %vm2460_vm3, %v2358_v42, %v2459_v16 }
 0x1aa   : > { %2463 = vst.msk [vmem:[%s208_s12] sm:$0x3] %vm2462_vm4, %v2461_v43 }
 0x1ab PF: > { %s15_s15 = sadd.s32 1, %s3269_s15  }
 0x1ac   : > { %p12_p4 = scmp.ge.s32.totalorder %s15_s15, 4  }
 0x1ae   :  { %14 = sbr.rel (!%p12_p4) target bundleno = 1 (0x1), region = 77 }

// kernel: aspp_forward.7
= control target key start
LH: loop header
LB: loop body
LE: loop exit
PB: predicated region body
PF: predicated region fallthrough
CT: control target
= control target key end

     0   :  { %s75_s0 = inlined_call_operand.vmem [shape: f32[8,128], index: 0, kind: input, shape index: {}]   ;;  %s76_s1 = inlined_call_operand.vmem [shape: f32[1,128], index: 1, kind: input, shape index: {}]   ;;  %s77_s2 = inlined_call_operand.vmem [shape: f32[1,128], index: 2, kind: input, shape index: {}]   ;;  %s78_s3 = inlined_call_operand.vmem [shape: f32[8,128], index: 3, kind: output, shape index: {}]  }
   0x1   :  { %v14_v0 = vld [vmem:[%s75_s0] sm:$0xff] }
   0x2   :  { %v41_v1 = vld [vmem:[%s76_s1] ss:$0 sm:$0xff] }
   0x3   :  { %v42_v2 = vld [vmem:[%s77_s2] ss:$0 sm:$0xff]  ;;  %v22_v3 = vmul.f32 %v41_v1, %v14_v0 }
   0x5   :  { %v30_v4 = vadd.f32 %v42_v2, %v22_v3 }
   0x7   :  { %v31_v5 = vadd.f32 3.0, %v30_v4 }
   0x9   :  { %v32_v6 = vmax.f32 %v31_v5, 0.0 }
   0xb   :  { %v33_v7 = vmin.f32 %v32_v6, 6.0 }
   0xd   :  { %v34_v8 = vmul.f32 %v33_v7, %v30_v4 }
   0xf   :  { %v35_v9 = vmul.f32 0.16666667, %v34_v8 }
  0x11   :  { %36 = vst [vmem:[%s78_s3] sm:$0xff] %v35_v9 }

// kernel: aspp_forward.4
= control target key start
LH: loop header
LB: loop body
LE: loop exit
PB: predicated region body
PF: predicated region fallthrough
CT: control target
= control target key end

     0   :  { %s12625_s12 = smov 0   ;;  %s16355_s0 = inlined_call_operand.vmem [shape: f32[2,600,4], index: 0, kind: input, shape index: {}]   ;;  %s16356_s1 = inlined_call_operand.vmem [shape: bf16[25,4,4], index: 1, kind: input, shape index: {}]   ;;  %s16357_s2 = inlined_call_operand.vmem [shape: f32[1,4], index: 2, kind: input, shape index: {}]   ;;  %s16358_s3 = inlined_call_operand.vmem [shape: f32[2,16,16,4], index: 3, kind: output, shape index: {}]  }
   0x1 LB: > { %s10017_s13 = sadd.s32 4294967295, %s12603_s12   ;;  %p10021_p0 = scmp.ge.s32.totalorder %s12603_s12, 1  ;;  %s12603_s12 = sphi %s12625_s12, %s13_s12  }
   0x2   : > { %p137_p1 = scmp.lt.s32.totalorder %s12603_s12, 3 }
   0x4   : > { %p138_p2 = pnand %p10021_p0, %p137_p1 }
   0x6   : > { %141 = sbr.rel (%p138_p2) target bundleno = 1422 (0x58e), region = 32 }
   0xb   : > { %v10025_v0 = vld [vmem:[%s16356_s1 + $0x2] sm:$0x3]  ;;  %vm392_vm0 = vcmask 1041408   ;;  %p161_p3 = scmp.lt.s32.totalorder %s10017_s13, 1  ;;  %v244_v2 = vld [vmem:[%s16356_s1] sm:$0x3] }
   0xc   : > { %12531 = vmatprep.subr.msk.bf16.mxu1 %vm392_vm0, %v10025_v0  ;;  %12530 = vmatprep.subr.msk.bf16.mxu0 %vm392_vm0, %v10025_v0  ;;  %v394_v1 = vsel %vm392_vm0, %v10025_v0, 0  ;;  %v10074_v3 = vld [vmem:[%s16356_s1 + $0x4] sm:$0x3]  ;;  %vm319_vm1 = vcmask 31744   ;;  %v678_v18 = vsel %vm392_vm0, %v244_v2, 0 }
   0xd   : > { %12529 = vmatpush3.bf16.msra.mxu1 %v394_v1  ;;  %11279 = vmatpush3.bf16.msra.mxu0 %v394_v1  ;;  %s16531_s13 = smov (!%p161_p3, %s10017_s13), 1  ;;  %v1036_v15 = vsel %vm392_vm0, %v10074_v3, 0  ;;  %v12702_v24 = vld [vmem:[%s16356_s1 + $0x6] sm:$0x3]  ;;  %v12707_v25 = vld [vmem:[%s16356_s1 + $0x8] sm:$0x3] }
   0xe   : > { %12532 = vmatprep.subr.msk.bf16.mxu1 %vm392_vm0, %v244_v2  ;;  %12533 = vmatprep.subr.msk.bf16.mxu0 %vm392_vm0, %v10074_v3  ;;  %s12556_s20 = smul.u32 600, %s16531_s13  ;;  %s10652_s21 = sshll.u32 %s16531_s13, 8 }
   0xf   : > { %s16194_s25 = scalar_lea.vmem %s16358_s3, %s10652_s21 }
  0x10   : > { %s12653_s23 = scalar_lea.vmem %s16355_s0, %s12556_s20 }
  0x11   : > { %v245_v4 = vld [vmem:[%s12653_s23 + $0x4] sm:$0xff]  ;;  %v246_v5 = vld [vmem:[%s12653_s23 + $0xc] sm:$0xff]  ;;  %v247_v9 = vld [vmem:[%s12653_s23 + $0x14] sm:$0xff] }
  0x12   : > { %v12658_v6 = vld [vmem:[%s12653_s23 + $0xc4] sm:$0xff]  ;;  %v293_v7 = vpack.c.bf16 %v246_v5, %v245_v4  ;;  %v12661_v8 = vld [vmem:[%s12653_s23 + $0xcc] sm:$0xff]  ;;  %v12665_v10 = vld [vmem:[%s12653_s23 + $0x1c] sm:$0xff] }
  0x13   : > { %v305_v11 = vpack.c.bf16 %v12661_v8, %v12658_v6  ;;  %v294_v12 = vpack.c.bf16 %v12665_v10, %v247_v9  ;;  %v12671_v13 = vld [vmem:[%s12653_s23 + $0xd4] sm:$0xff]  ;;  %v12674_v14 = vld [vmem:[%s12653_s23 + $0xdc] sm:$0xff]  ;;  %v12678_v16 = vld [vmem:[%s12653_s23 + $0x24] sm:$0xff] }
  0x14   : > { %11280 = vmatprep.mubr.msk.bf16.mxu0 %vm319_vm1, %v293_v7  ;;  %v306_v17 = vpack.c.bf16 %v12674_v14, %v12671_v13  ;;  %v12685_v19 = vld [vmem:[%s12653_s23 + $0x2c] sm:$0xff]  ;;  %v12688_v20 = vld [vmem:[%s12653_s23 + $0xe4] sm:$0xff]  ;;  %v12711_v26 = vld [vmem:[%s12653_s23 + $0x34] sm:$0xff]  ;;  %v1717_v44 = vpack.c.bf16 %v12678_v16, %v12665_v10 }
  0x15   : > { %v12691_v21 = vld [vmem:[%s12653_s23 + $0xec] sm:$0xff]  ;;  %11304 = vmatprep.mubr.msk.bf16.mxu1 %vm319_vm1, %v305_v11  ;;  %11281 = vmatmul.mubr.msk.bf16.vlgmr.msra.gmra.mxu0 %vm319_vm1, %v294_v12  ;;  %v295_v22 = vpack.c.bf16 %v12685_v19, %v12678_v16  ;;  %v12714_v27 = vld [vmem:[%s12653_s23 + $0x3c] sm:$0xff]  ;;  %v12717_v28 = vld [vmem:[%s12653_s23 + $0xf4] sm:$0xff]  ;;  %v1718_v51 = vpack.c.bf16 %v12711_v26, %v12685_v19 }
  0x16   : > { %v307_v23 = vpack.c.bf16 %v12691_v21, %v12688_v20  ;;  %11305 = vmatmul.mubr.msk.bf16.vlgmr.msra.gmra.mxu1 %vm319_vm1, %v306_v17  ;;  %11379 = vmatpush3.bf16.msra.mxu0 %v1036_v15  ;;  %v12721_v29 = vld [vmem:[%s12653_s23 + $0xfc] sm:$0xff]  ;;  %v12724_v30 = vld [vmem:[%s12653_s23 + $0x44] sm:$0xff]  ;;  %v12727_v31 = vld [vmem:[%s12653_s23 + $0x4c] sm:$0xff]  ;;  %v296_v34 = vpack.c.bf16 %v12714_v27, %v12711_v26 }
  0x17   : > { %11329 = vmatpush3.bf16.msra.mxu1 %v678_v18  ;;  %11284 = vmatprep.mubr.msk.bf16.mxu0 %vm319_vm1, %v295_v22  ;;  %v12731_v32 = vld [vmem:[%s12653_s23 + $0x104] sm:$0xff]  ;;  %v12734_v33 = vld [vmem:[%s12653_s23 + $0x10c] sm:$0xff]  ;;  %v308_v35 = vpack.c.bf16 %v12721_v29, %v12717_v28  ;;  %v297_v36 = vpack.c.bf16 %v12727_v31, %v12724_v30  ;;  %v12752_v38 = vld [vmem:[%s12653_s23 + $0x54] sm:$0xff]  ;;  %v1719_v58 = vpack.c.bf16 %v12724_v30, %v12714_v27 }
  0x18   : > { %11308 = vmatprep.mubr.msk.bf16.mxu1 %vm319_vm1, %v307_v23  ;;  %12534 = vmatprep.subr.msk.bf16.mxu1 %vm392_vm0, %v12702_v24  ;;  %v309_v37 = vpack.c.bf16 %v12734_v33, %v12731_v32  ;;  %v12755_v39 = vld [vmem:[%s12653_s23 + $0x5c] sm:$0xff]  ;;  %v12758_v40 = vld [vmem:[%s12653_s23 + $0x114] sm:$0xff]  ;;  %v12765_v42 = vld [vmem:[%s12653_s23 + $0x64] sm:$0xff] }
  0x19   : > { %12535 = vmatprep.subr.msk.bf16.mxu0 %vm392_vm0, %v12707_v25  ;;  %v12762_v41 = vld [vmem:[%s12653_s23 + $0x11c] sm:$0xff]  ;;  %v12768_v43 = vld [vmem:[%s12653_s23 + $0x6c] sm:$0xff]  ;;  %v12773_v45 = vld [vmem:[%s12653_s23 + $0x124] sm:$0xff]  ;;  %v298_v47 = vpack.c.bf16 %v12755_v39, %v12752_v38  ;;  %v16394_v27 = vpack.c.bf16 %v12765_v42, %v12755_v39 }
  0x1a   : > { %v12776_v46 = vld [vmem:[%s12653_s23 + $0x12c] sm:$0xff]  ;;  %v310_v48 = vpack.c.bf16 %v12762_v41, %v12758_v40  ;;  %v299_v49 = vpack.c.bf16 %v12768_v43, %v12765_v42  ;;  %v12792_v52 = vld [vmem:[%s12653_s23 + $0x74] sm:$0xff]  ;;  %v12795_v53 = vld [vmem:[%s12653_s23 + $0x7c] sm:$0xff] }
  0x1b   : > { %v311_v50 = vpack.c.bf16 %v12776_v46, %v12773_v45  ;;  %v12798_v54 = vld [vmem:[%s12653_s23 + $0x134] sm:$0xff]  ;;  %v12802_v55 = vld [vmem:[%s12653_s23 + $0x13c] sm:$0xff]  ;;  %v12805_v56 = vld [vmem:[%s12653_s23 + $0x84] sm:$0xff]  ;;  %v300_v61 = vpack.c.bf16 %v12795_v53, %v12792_v52 }
  0x1c   : > { %v12808_v57 = vld [vmem:[%s12653_s23 + $0x8c] sm:$0xff]  ;;  %v12813_v59 = vld [vmem:[%s12653_s23 + $0x144] sm:$0xff]  ;;  %v312_v62 = vpack.c.bf16 %v12802_v55, %v12798_v54  ;;  %v12832_v2 = vld [vmem:[%s12653_s23 + $0x94] sm:$0xff]  ;;  %v16396_v39 = vpack.c.bf16 %v12805_v56, %v12795_v53 }
  0x1d   : > { %11285 = vmatmul.mubr.msk.bf16.gmra.mxu0 %vm319_vm1, %v296_v34  ;;  %v12816_v60 = vld [vmem:[%s12653_s23 + $0x14c] sm:$0xff]  ;;  %v301_v63 = vpack.c.bf16 %v12808_v57, %v12805_v56  ;;  %v12835_v3 = vld [vmem:[%s12653_s23 + $0x9c] sm:$0xff]  ;;  %v12838_v4 = vld [vmem:[%s12653_s23 + $0x154] sm:$0xff] }
  0x1e   : > { %11309 = vmatmul.mubr.msk.bf16.gmra.mxu1 %vm319_vm1, %v308_v35  ;;  %11288 = vmatprep.mubr.msk.bf16.mxu0 %vm319_vm1, %v297_v36  ;;  %v313_v0 = vpack.c.bf16 %v12816_v60, %v12813_v59  ;;  %v12842_v5 = vld [vmem:[%s12653_s23 + $0x15c] sm:$0xff]  ;;  %v12845_v7 = vld [vmem:[%s12653_s23 + $0xa4] sm:$0xff]  ;;  %v12848_v9 = vld [vmem:[%s12653_s23 + $0xac] sm:$0xff]  ;;  %v302_v17 = vpack.c.bf16 %v12835_v3, %v12832_v2 }
  0x1f   : > { %11312 = vmatprep.mubr.msk.bf16.mxu1 %vm319_vm1, %v309_v37  ;;  %v12853_v12 = vld [vmem:[%s12653_s23 + $0x164] sm:$0xff]  ;;  %v12856_v15 = vld [vmem:[%s12653_s23 + $0x16c] sm:$0xff]  ;;  %v314_v18 = vpack.c.bf16 %v12842_v5, %v12838_v4  ;;  %v303_v22 = vpack.c.bf16 %v12848_v9, %v12845_v7  ;;  %v12872_v35 = vld [vmem:[%s12653_s23 + $0xb4] sm:$0xff]  ;;  %v16398_v53 = vpack.c.bf16 %v12845_v7, %v12835_v3 }
  0x20   : > { %v315_v23 = vpack.c.bf16 %v12856_v15, %v12853_v12  ;;  %v12875_v36 = vld [vmem:[%s12653_s23 + $0xbc] sm:$0xff]  ;;  %v12878_v37 = vld [vmem:[%s12653_s23 + $0x174] sm:$0xff]  ;;  %v177_v34 = vld [vmem:[%s12653_s23 + $0x28] sm:$0xff] }
  0x21   : > { %v13043_v16 = vld [vmem:[%s16356_s1 + $0xe] sm:$0x3]  ;;  %v1286_v26 = vld [vmem:[%s12653_s23 + $0x51] sm:$0xff]  ;;  %v16400_v3 = vpack.c.bf16 %v12658_v6, %v12875_v36  ;;  %v16402_v6 = vpack.c.bf16 %v12688_v20, %v12674_v14  ;;  %v16403_v14 = vpack.c.bf16 %v12717_v28, %v12691_v21  ;;  %v1732_v21 = vpack.c.bf16 %v12758_v40, %v12734_v33 }
  0x22   : > { %v1285_v19 = vld [vmem:[%s12653_s23 + $0x49] sm:$0xff] }
  0x23   : > { %v1289_v30 = vld [vmem:[%s12653_s23 + $0x69] sm:$0xff] }
  0x24   : > { %v1293_v42 = vld [vmem:[%s12653_s23 + $0x89] sm:$0xff] }
  0x25   : > { %11289 = vmatmul.mubr.msk.bf16.gmra.mxu0 %vm319_vm1, %v298_v47  ;;  %v12882_v47 = vld [vmem:[%s12653_s23 + $0x17c] sm:$0xff]  ;;  %v1297_v56 = vld [vmem:[%s12653_s23 + $0xa9] sm:$0xff] }
  0x26   : > { %11313 = vmatmul.mubr.msk.bf16.gmra.mxu1 %vm319_vm1, %v310_v48  ;;  %11292 = vmatprep.mubr.msk.bf16.mxu0 %vm319_vm1, %v299_v49  ;;  %v173_v48 = vld [vmem:[%s12653_s23 + $0x8] sm:$0xff]  ;;  %v890_v49 = vld [vmem:[%s12653_s23 + $0x10] sm:$0xff] }
  0x27   : > { %11316 = vmatprep.mubr.msk.bf16.mxu1 %vm319_vm1, %v311_v50  ;;  %v12915_v50 = vld [vmem:[%s16356_s1 + $0xa] sm:$0x3] }
  0x28   : > { %v2206_v10 = vsel %vm392_vm0, %v12915_v50, 0  ;;  %v1301_v7 = vld [vmem:[%s12653_s23 + $0xc9] sm:$0xff] }
  0x29   : > { %v1313_v40 = vld [vmem:[%s12653_s23 + $0x129] sm:$0xff] }
  0x2d   : > { %11293 = vmatmul.mubr.msk.bf16.gmra.mxu0 %vm319_vm1, %v300_v61  ;;  %v172_v61 = vld [vmem:[%s12653_s23] sm:$0xff] }
  0x2e   : > { %11317 = vmatmul.mubr.msk.bf16.gmra.mxu1 %vm319_vm1, %v312_v62  ;;  %11296 = vmatprep.mubr.msk.bf16.mxu0 %vm319_vm1, %v301_v63  ;;  %v304_v62 = vpack.c.bf16 %v12875_v36, %v12872_v35  ;;  %v316_v63 = vpack.c.bf16 %v12882_v47, %v12878_v37  ;;  %v1305_v36 = vld [vmem:[%s12653_s23 + $0xe9] sm:$0xff] }
  0x2f   : > { %11320 = vmatprep.mubr.msk.bf16.mxu1 %vm319_vm1, %v313_v0  ;;  %v937_v0 = vpack.c.bf16 %v890_v49, %v173_v48 }
  0x35   : > { %11297 = vmatmul.mubr.msk.bf16.gmra.mxu0 %vm319_vm1, %v302_v17  ;;  %v220_v17 = vpack.c.bf16 %v173_v48, %v172_v61  ;;  %v894_v61 = vld [vmem:[%s12653_s23 + $0x30] sm:$0xff] }
  0x36   : > { %11321 = vmatmul.mubr.msk.bf16.gmra.mxu1 %vm319_vm1, %v314_v18  ;;  %11300 = vmatprep.mubr.msk.bf16.mxu0 %vm319_vm1, %v303_v22  ;;  %v175_v22 = vld [vmem:[%s12653_s23 + $0x18] sm:$0xff]  ;;  %v939_v11 = vpack.c.bf16 %v894_v61, %v177_v34 }
  0x37   : > { %11324 = vmatprep.mubr.msk.bf16.mxu1 %vm319_vm1, %v315_v23  ;;  %v892_v23 = vld [vmem:[%s12653_s23 + $0x20] sm:$0xff]  ;;  %v221_v18 = vpack.c.bf16 %v175_v22, %v890_v49  ;;  %v179_v49 = vld [vmem:[%s12653_s23 + $0x38] sm:$0xff] }
  0x38   : > { %v938_v48 = vpack.c.bf16 %v892_v23, %v175_v22  ;;  %v898_v22 = vld [vmem:[%s12653_s23 + $0x50] sm:$0xff] }
  0x3d   : > { %11301 = vmatmul.mubr.msk.bf16.gmra.mxu0 %vm319_vm1, %v304_v62  ;;  %v1816_v62 = vsel %vm392_vm0, %v12707_v25, 0  ;;  %v896_v25 = vld [vmem:[%s12653_s23 + $0x40] sm:$0xff] }
  0x3e   : > { %11325 = vmatmul.mubr.msk.bf16.gmra.mxu1 %vm319_vm1, %v316_v63  ;;  %11380 = vmatprep.mubr.msk.bf16.mxu0 %vm319_vm1, %v937_v0  ;;  %v222_v63 = vpack.c.bf16 %v177_v34, %v892_v23  ;;  %v1426_v0 = vsel %vm392_vm0, %v12702_v24, 0  ;;  %v12923_v24 = vld [vmem:[%s16356_s1 + $0xc] sm:$0x3]  ;;  %v900_v23 = vld [vmem:[%s12653_s23 + $0x60] sm:$0xff] }
  0x3f   : > { %11330 = vmatprep.mubr.msk.bf16.mxu1 %vm319_vm1, %v220_v17  ;;  %v181_v34 = vld [vmem:[%s12653_s23 + $0x48] sm:$0xff] }
  0x45   : > { %11381 = vmatmul.mubr.msk.bf16.vlgmr.msra.gmra.mxu0 %vm319_vm1, %v938_v48  ;;  %v223_v48 = vpack.c.bf16 %v179_v49, %v894_v61  ;;  %v185_v61 = vld [vmem:[%s12653_s23 + $0x68] sm:$0xff] }
  0x46   : > { %11331 = vmatmul.mubr.msk.bf16.vlgmr.msra.gmra.mxu1 %vm319_vm1, %v221_v18  ;;  %11479 = vmatpush3.bf16.msra.mxu0 %v1816_v62  ;;  %v940_v18 = vpack.c.bf16 %v896_v25, %v179_v49  ;;  %v941_v62 = vpack.c.bf16 %v898_v22, %v181_v34  ;;  %v902_v49 = vld [vmem:[%s12653_s23 + $0x70] sm:$0xff]  ;;  %v226_v17 = vpack.c.bf16 %v185_v61, %v900_v23 }
  0x47   : > { %11429 = vmatpush3.bf16.msra.mxu1 %v1426_v0  ;;  %11334 = vmatprep.mubr.msk.bf16.mxu1 %vm319_vm1, %v222_v63  ;;  %v224_v63 = vpack.c.bf16 %v181_v34, %v896_v25 }
  0x48   : > { %11384 = vmatprep.mubr.msk.bf16.mxu0 %vm319_vm1, %v939_v11  ;;  %12536 = vmatprep.subr.msk.bf16.mxu1 %vm392_vm0, %v12915_v50  ;;  %v183_v11 = vld [vmem:[%s12653_s23 + $0x58] sm:$0xff]  ;;  %v1288_v50 = vld [vmem:[%s12653_s23 + $0x61] sm:$0xff] }
  0x49   : > { %12537 = vmatprep.subr.msk.bf16.mxu0 %vm392_vm0, %v12923_v24  ;;  %v942_v34 = vpack.c.bf16 %v900_v23, %v183_v11  ;;  %v225_v0 = vpack.c.bf16 %v183_v11, %v898_v22  ;;  %v189_v22 = vld [vmem:[%s12653_s23 + $0x88] sm:$0xff]  ;;  %v906_v11 = vld [vmem:[%s12653_s23 + $0x90] sm:$0xff] }
  0x4a   : > { %v945_v25 = vpack.c.bf16 %v906_v11, %v189_v22 }
  0x4d   : > { %11385 = vmatmul.mubr.msk.bf16.gmra.mxu0 %vm319_vm1, %v940_v18  ;;  %v943_v18 = vpack.c.bf16 %v902_v49, %v185_v61 }
  0x4e   : > { %11335 = vmatmul.mubr.msk.bf16.gmra.mxu1 %vm319_vm1, %v223_v48  ;;  %11388 = vmatprep.mubr.msk.bf16.mxu0 %vm319_vm1, %v941_v62  ;;  %v187_v62 = vld [vmem:[%s12653_s23 + $0x78] sm:$0xff] }
  0x4f   : > { %11338 = vmatprep.mubr.msk.bf16.mxu1 %vm319_vm1, %v224_v63  ;;  %v904_v63 = vld [vmem:[%s12653_s23 + $0x80] sm:$0xff]  ;;  %v227_v61 = vpack.c.bf16 %v187_v62, %v902_v49 }
  0x50   : > { %v944_v23 = vpack.c.bf16 %v904_v63, %v187_v62  ;;  %v228_v48 = vpack.c.bf16 %v189_v22, %v904_v63  ;;  %v912_v22 = vld [vmem:[%s12653_s23 + $0xc0] sm:$0xff] }
  0x55   : > { %11389 = vmatmul.mubr.msk.bf16.gmra.mxu0 %vm319_vm1, %v942_v34  ;;  %v908_v34 = vld [vmem:[%s12653_s23 + $0xa0] sm:$0xff] }
  0x56   : > { %11339 = vmatmul.mubr.msk.bf16.gmra.mxu1 %vm319_vm1, %v225_v0  ;;  %11392 = vmatprep.mubr.msk.bf16.mxu0 %vm319_vm1, %v943_v18  ;;  %v191_v0 = vld [vmem:[%s12653_s23 + $0x98] sm:$0xff]  ;;  %v910_v18 = vld [vmem:[%s12653_s23 + $0xb0] sm:$0xff] }
  0x57   : > { %11342 = vmatprep.mubr.msk.bf16.mxu1 %vm319_vm1, %v226_v17  ;;  %v193_v17 = vld [vmem:[%s12653_s23 + $0xa8] sm:$0xff]  ;;  %v946_v1 = vpack.c.bf16 %v908_v34, %v191_v0  ;;  %v229_v49 = vpack.c.bf16 %v191_v0, %v906_v11 }
  0x58   : > { %v947_v62 = vpack.c.bf16 %v910_v18, %v193_v17  ;;  %v230_v63 = vpack.c.bf16 %v193_v17, %v908_v34  ;;  %v916_v17 = vld [vmem:[%s12653_s23 + $0xe0] sm:$0xff] }
  0x5d   : > { %11393 = vmatmul.mubr.msk.bf16.gmra.mxu0 %vm319_vm1, %v944_v23  ;;  %v914_v23 = vld [vmem:[%s12653_s23 + $0xd0] sm:$0xff] }
  0x5e   : > { %11343 = vmatmul.mubr.msk.bf16.gmra.mxu1 %vm319_vm1, %v227_v61  ;;  %11396 = vmatprep.mubr.msk.bf16.mxu0 %vm319_vm1, %v945_v25  ;;  %v195_v25 = vld [vmem:[%s12653_s23 + $0xb8] sm:$0xff] }
  0x5f   : > { %11346 = vmatprep.mubr.msk.bf16.mxu1 %vm319_vm1, %v228_v48  ;;  %v197_v48 = vld [vmem:[%s12653_s23 + $0xc8] sm:$0xff]  ;;  %v948_v61 = vpack.c.bf16 %v912_v22, %v195_v25  ;;  %v231_v11 = vpack.c.bf16 %v195_v25, %v910_v18 }
  0x60   : > { %v949_v0 = vpack.c.bf16 %v914_v23, %v197_v48  ;;  %v232_v34 = vpack.c.bf16 %v197_v48, %v912_v22  ;;  %v203_v48 = vld [vmem:[%s12653_s23 + $0xf8] sm:$0xff] }
  0x65   : > { %11397 = vmatmul.mubr.msk.bf16.gmra.mxu0 %vm319_vm1, %v946_v1  ;;  %v199_v1 = vld [vmem:[%s12653_s23 + $0xd8] sm:$0xff] }
  0x66   : > { %11347 = vmatmul.mubr.msk.bf16.gmra.mxu1 %vm319_vm1, %v229_v49  ;;  %11400 = vmatprep.mubr.msk.bf16.mxu0 %vm319_vm1, %v947_v62  ;;  %v201_v49 = vld [vmem:[%s12653_s23 + $0xe8] sm:$0xff]  ;;  %v918_v62 = vld [vmem:[%s12653_s23 + $0xf0] sm:$0xff]  ;;  %v233_v18 = vpack.c.bf16 %v199_v1, %v914_v23 }
  0x67   : > { %11350 = vmatprep.mubr.msk.bf16.mxu1 %vm319_vm1, %v230_v63  ;;  %v950_v63 = vpack.c.bf16 %v916_v17, %v199_v1  ;;  %v951_v25 = vpack.c.bf16 %v918_v62, %v201_v49  ;;  %v234_v22 = vpack.c.bf16 %v201_v49, %v916_v17  ;;  %v235_v23 = vpack.c.bf16 %v203_v48, %v918_v62  ;;  %v207_v49 = vld [vmem:[%s12653_s23 + $0x118] sm:$0xff] }
  0x6d   : > { %11401 = vmatmul.mubr.msk.bf16.gmra.mxu0 %vm319_vm1, %v948_v61  ;;  %v920_v61 = vld [vmem:[%s12653_s23 + $0x100] sm:$0xff] }
  0x6e   : > { %11351 = vmatmul.mubr.msk.bf16.gmra.mxu1 %vm319_vm1, %v231_v11  ;;  %11404 = vmatprep.mubr.msk.bf16.mxu0 %vm319_vm1, %v949_v0  ;;  %v205_v11 = vld [vmem:[%s12653_s23 + $0x108] sm:$0xff]  ;;  %v922_v0 = vld [vmem:[%s12653_s23 + $0x110] sm:$0xff] }
  0x6f   : > { %11354 = vmatprep.mubr.msk.bf16.mxu1 %vm319_vm1, %v232_v34  ;;  %v952_v34 = vpack.c.bf16 %v920_v61, %v203_v48  ;;  %v953_v1 = vpack.c.bf16 %v922_v0, %v205_v11  ;;  %v236_v17 = vpack.c.bf16 %v205_v11, %v920_v61  ;;  %v237_v62 = vpack.c.bf16 %v207_v49, %v922_v0  ;;  %v211_v11 = vld [vmem:[%s12653_s23 + $0x138] sm:$0xff] }
  0x75   : > { %11405 = vmatmul.mubr.msk.bf16.gmra.mxu0 %vm319_vm1, %v950_v63  ;;  %v924_v63 = vld [vmem:[%s12653_s23 + $0x120] sm:$0xff] }
  0x76   : > { %11355 = vmatmul.mubr.msk.bf16.gmra.mxu1 %vm319_vm1, %v233_v18  ;;  %11408 = vmatprep.mubr.msk.bf16.mxu0 %vm319_vm1, %v951_v25  ;;  %v209_v18 = vld [vmem:[%s12653_s23 + $0x128] sm:$0xff]  ;;  %v926_v25 = vld [vmem:[%s12653_s23 + $0x130] sm:$0xff] }
  0x77   : > { %11358 = vmatprep.mubr.msk.bf16.mxu1 %vm319_vm1, %v234_v22  ;;  %v954_v22 = vpack.c.bf16 %v924_v63, %v207_v49  ;;  %v955_v48 = vpack.c.bf16 %v926_v25, %v209_v18  ;;  %v238_v61 = vpack.c.bf16 %v209_v18, %v924_v63  ;;  %v239_v0 = vpack.c.bf16 %v211_v11, %v926_v25  ;;  %v215_v18 = vld [vmem:[%s12653_s23 + $0x158] sm:$0xff] }
  0x7d   : > { %11409 = vmatmul.mubr.msk.bf16.gmra.mxu0 %vm319_vm1, %v952_v34  ;;  %v928_v34 = vld [vmem:[%s12653_s23 + $0x140] sm:$0xff] }
  0x7e   : > { %11359 = vmatmul.mubr.msk.bf16.gmra.mxu1 %vm319_vm1, %v235_v23  ;;  %11412 = vmatprep.mubr.msk.bf16.mxu0 %vm319_vm1, %v953_v1  ;;  %v213_v23 = vld [vmem:[%s12653_s23 + $0x148] sm:$0xff]  ;;  %v930_v1 = vld [vmem:[%s12653_s23 + $0x150] sm:$0xff] }
  0x7f   : > { %11362 = vmatprep.mubr.msk.bf16.mxu1 %vm319_vm1, %v236_v17  ;;  %v956_v17 = vpack.c.bf16 %v928_v34, %v211_v11  ;;  %v957_v49 = vpack.c.bf16 %v930_v1, %v213_v23  ;;  %v240_v63 = vpack.c.bf16 %v213_v23, %v928_v34  ;;  %v241_v25 = vpack.c.bf16 %v215_v18, %v930_v1  ;;  %v219_v23 = vld [vmem:[%s12653_s23 + $0x178] sm:$0xff] }
  0x85   : > { %11413 = vmatmul.mubr.msk.bf16.gmra.mxu0 %vm319_vm1, %v954_v22  ;;  %v932_v22 = vld [vmem:[%s12653_s23 + $0x160] sm:$0xff] }
  0x86   : > { %11363 = vmatmul.mubr.msk.bf16.gmra.mxu1 %vm319_vm1, %v237_v62  ;;  %11416 = vmatprep.mubr.msk.bf16.mxu0 %vm319_vm1, %v955_v48  ;;  %v217_v62 = vld [vmem:[%s12653_s23 + $0x168] sm:$0xff]  ;;  %v934_v48 = vld [vmem:[%s12653_s23 + $0x170] sm:$0xff] }
  0x87   : > { %11366 = vmatprep.mubr.msk.bf16.mxu1 %vm319_vm1, %v238_v61  ;;  %v958_v61 = vpack.c.bf16 %v932_v22, %v215_v18  ;;  %v959_v11 = vpack.c.bf16 %v934_v48, %v217_v62  ;;  %v242_v34 = vpack.c.bf16 %v217_v62, %v932_v22  ;;  %v243_v1 = vpack.c.bf16 %v219_v23, %v934_v48  ;;  %v1281_v22 = vld [vmem:[%s12653_s23 + $0x29] sm:$0xff]  ;;  %v1282_v62 = vld [vmem:[%s12653_s23 + $0x31] sm:$0xff] }
  0x88   : > { %v1328_v48 = vpack.c.bf16 %v1282_v62, %v1281_v22  ;;  %v1296_v22 = vld [vmem:[%s12653_s23 + $0xa1] sm:$0xff] }
  0x8d   : > { %11417 = vmatmul.mubr.msk.bf16.gmra.mxu0 %vm319_vm1, %v956_v17  ;;  %v936_v17 = vld [vmem:[%s12653_s23 + $0x180] sm:$0xff] }
  0x8e   : > { %11367 = vmatmul.mubr.msk.bf16.gmra.mxu1 %vm319_vm1, %v239_v0  ;;  %11420 = vmatprep.mubr.msk.bf16.mxu0 %vm319_vm1, %v957_v49  ;;  %v1279_v0 = vld [vmem:[%s12653_s23 + $0x19] sm:$0xff]  ;;  %v1280_v49 = vld [vmem:[%s12653_s23 + $0x21] sm:$0xff] }
  0x8f   : > { %11370 = vmatprep.mubr.msk.bf16.mxu1 %vm319_vm1, %v240_v63  ;;  %v960_v63 = vpack.c.bf16 %v936_v17, %v219_v23  ;;  %v1327_v18 = vpack.c.bf16 %v1280_v49, %v1279_v0  ;;  %v16393_v17 = vpack.c.bf16 %v12752_v38, %v12727_v31  ;;  %v1291_v0 = vld [vmem:[%s12653_s23 + $0x79] sm:$0xff]  ;;  %v1292_v49 = vld [vmem:[%s12653_s23 + $0x81] sm:$0xff]  ;;  %v16395_v38 = vpack.c.bf16 %v12792_v52, %v12768_v43 }
  0x90   : > { %v1333_v31 = vpack.c.bf16 %v1292_v49, %v1291_v0  ;;  %v16397_v52 = vpack.c.bf16 %v12832_v2, %v12808_v57  ;;  %v16399_v2 = vpack.c.bf16 %v12872_v35, %v12848_v9  ;;  %v16401_v35 = vpack.c.bf16 %v12671_v13, %v12661_v8 }
  0x91   : > { %v1731_v13 = vpack.c.bf16 %v12731_v32, %v12721_v29  ;;  %v1311_v29 = vld [vmem:[%s12653_s23 + $0x119] sm:$0xff]  ;;  %v1312_v32 = vld [vmem:[%s12653_s23 + $0x121] sm:$0xff] }
  0x95   : > { %11421 = vmatmul.mubr.msk.bf16.gmra.mxu0 %vm319_vm1, %v958_v61  ;;  %v1283_v61 = vld [vmem:[%s12653_s23 + $0x39] sm:$0xff] }
  0x96   : > { %11371 = vmatmul.mubr.msk.bf16.gmra.mxu1 %vm319_vm1, %v241_v25  ;;  %11424 = vmatprep.mubr.msk.bf16.mxu0 %vm319_vm1, %v959_v11  ;;  %v1284_v25 = vld [vmem:[%s12653_s23 + $0x41] sm:$0xff]  ;;  %v2596_v11 = vsel %vm392_vm0, %v12923_v24, 0  ;;  %v1330_v24 = vpack.c.bf16 %v1286_v26, %v1285_v19 }
  0x97   : > { %11374 = vmatprep.mubr.msk.bf16.mxu1 %vm319_vm1, %v242_v34  ;;  %v1329_v34 = vpack.c.bf16 %v1284_v25, %v1283_v61  ;;  %v1298_v61 = vld [vmem:[%s12653_s23 + $0xb1] sm:$0xff]  ;;  %v1299_v25 = vld [vmem:[%s12653_s23 + $0xb9] sm:$0xff]  ;;  %v1304_v19 = vld [vmem:[%s12653_s23 + $0xe1] sm:$0xff] }
  0x9d   : > { %11425 = vmatmul.mubr.msk.bf16.gmra.mxu0 %vm319_vm1, %v960_v63 }
  0x9e   : > { %11375 = vmatmul.mubr.msk.bf16.gmra.mxu1 %vm319_vm1, %v243_v1  ;;  %11480 = vmatprep.mubr.msk.bf16.mxu0 %vm319_vm1, %v1717_v44  ;;  %v13049_v44 = vld [vmem:[%s16356_s1 + $0x10] sm:$0x3] }
  0x9f   : > { %11430 = vmatprep.mubr.msk.bf16.mxu1 %vm319_vm1, %v1327_v18  ;;  %v1294_v1 = vld [vmem:[%s12653_s23 + $0x91] sm:$0xff]  ;;  %v1295_v18 = vld [vmem:[%s12653_s23 + $0x99] sm:$0xff] }
  0xa0   : > { %v1334_v62 = vpack.c.bf16 %v1294_v1, %v1293_v42  ;;  %v1335_v43 = vpack.c.bf16 %v1296_v22, %v1295_v18  ;;  %v1315_v22 = vld [vmem:[%s12653_s23 + $0x139] sm:$0xff] }
  0xa5   : > { %11481 = vmatmul.mubr.msk.bf16.vlgmr.msra.gmra.mxu0 %vm319_vm1, %v1718_v51  ;;  %v1287_v51 = vld [vmem:[%s12653_s23 + $0x59] sm:$0xff] }
  0xa6   : > { %11431 = vmatmul.mubr.msk.bf16.vlgmr.msra.gmra.mxu1 %vm319_vm1, %v1328_v48  ;;  %11579 = vmatpush3.bf16.msra.mxu0 %v2596_v11  ;;  %v1331_v23 = vpack.c.bf16 %v1288_v50, %v1287_v51  ;;  %v1300_v48 = vld [vmem:[%s12653_s23 + $0xc1] sm:$0xff]  ;;  %v1336_v11 = vpack.c.bf16 %v1298_v61, %v1297_v56  ;;  %v1306_v51 = vld [vmem:[%s12653_s23 + $0xf1] sm:$0xff]  ;;  %v1307_v50 = vld [vmem:[%s12653_s23 + $0xf9] sm:$0xff]  ;;  %v1735_v61 = vpack.c.bf16 %v12813_v59, %v12802_v55 }
  0xa7   : > { %11529 = vmatpush3.bf16.msra.mxu1 %v2206_v10  ;;  %11434 = vmatprep.mubr.msk.bf16.mxu1 %vm319_vm1, %v1329_v34  ;;  %v1337_v57 = vpack.c.bf16 %v1300_v48, %v1299_v25  ;;  %v1302_v34 = vld [vmem:[%s12653_s23 + $0xd1] sm:$0xff]  ;;  %v1303_v10 = vld [vmem:[%s12653_s23 + $0xd9] sm:$0xff]  ;;  %v1340_v8 = vpack.c.bf16 %v1306_v51, %v1305_v36  ;;  %v1320_v59 = vld [vmem:[%s12653_s23 + $0x161] sm:$0xff] }
  0xa8   : > { %11484 = vmatprep.mubr.msk.bf16.mxu0 %vm319_vm1, %v1719_v58  ;;  %12538 = vmatprep.subr.msk.bf16.mxu1 %vm392_vm0, %v13043_v16  ;;  %v1290_v58 = vld [vmem:[%s12653_s23 + $0x71] sm:$0xff]  ;;  %v1338_v26 = vpack.c.bf16 %v1302_v34, %v1301_v7  ;;  %v1339_v9 = vpack.c.bf16 %v1304_v19, %v1303_v10  ;;  %v1319_v55 = vld [vmem:[%s12653_s23 + $0x159] sm:$0xff]  ;;  %v1736_v10 = vpack.c.bf16 %v12838_v4, %v12816_v60  ;;  %v1321_v4 = vld [vmem:[%s12653_s23 + $0x169] sm:$0xff] }
  0xa9   : > { %12539 = vmatprep.subr.msk.bf16.mxu0 %vm392_vm0, %v13049_v44  ;;  %v1332_v63 = vpack.c.bf16 %v1290_v58, %v1289_v30  ;;  %v1309_v30 = vld [vmem:[%s12653_s23 + $0x109] sm:$0xff]  ;;  %v1310_v58 = vld [vmem:[%s12653_s23 + $0x111] sm:$0xff] }
  0xad   : > { %11485 = vmatmul.mubr.msk.bf16.gmra.mxu0 %vm319_vm1, %v16393_v17 }
  0xae   : > { %11435 = vmatmul.mubr.msk.bf16.gmra.mxu1 %vm319_vm1, %v1330_v24  ;;  %11488 = vmatprep.mubr.msk.bf16.mxu0 %vm319_vm1, %v16394_v27  ;;  %v1308_v24 = vld [vmem:[%s12653_s23 + $0x101] sm:$0xff] }
  0xaf   : > { %11438 = vmatprep.mubr.msk.bf16.mxu1 %vm319_vm1, %v1331_v23  ;;  %v1341_v23 = vpack.c.bf16 %v1308_v24, %v1307_v50 }
  0xb5   : > { %11489 = vmatmul.mubr.msk.bf16.gmra.mxu0 %vm319_vm1, %v16395_v38 }
  0xb6   : > { %11439 = vmatmul.mubr.msk.bf16.gmra.mxu1 %vm319_vm1, %v1332_v63  ;;  %11492 = vmatprep.mubr.msk.bf16.mxu0 %vm319_vm1, %v16396_v39  ;;  %v1342_v63 = vpack.c.bf16 %v1310_v58, %v1309_v30  ;;  %v1343_v39 = vpack.c.bf16 %v1312_v32, %v1311_v29 }
  0xb7   : > { %11442 = vmatprep.mubr.msk.bf16.mxu1 %vm319_vm1, %v1333_v31  ;;  %v1733_v31 = vpack.c.bf16 %v12773_v45, %v12762_v41  ;;  %v1314_v41 = vld [vmem:[%s12653_s23 + $0x131] sm:$0xff] }
  0xb8   : > { %v1344_v56 = vpack.c.bf16 %v1314_v41, %v1313_v40  ;;  %v2449_v40 = vld [vmem:[%s12653_s23 + $0x32] sm:$0xff]  ;;  %v2450_v41 = vld [vmem:[%s12653_s23 + $0x3a] sm:$0xff] }
  0xbd   : > { %11493 = vmatmul.mubr.msk.bf16.gmra.mxu0 %vm319_vm1, %v16397_v52  ;;  %v1734_v52 = vpack.c.bf16 %v12798_v54, %v12776_v46  ;;  %v1317_v54 = vld [vmem:[%s12653_s23 + $0x149] sm:$0xff] }
  0xbe   : > { %11443 = vmatmul.mubr.msk.bf16.gmra.mxu1 %vm319_vm1, %v1334_v62  ;;  %11496 = vmatprep.mubr.msk.bf16.mxu0 %vm319_vm1, %v16398_v53  ;;  %v1316_v62 = vld [vmem:[%s12653_s23 + $0x141] sm:$0xff] }
  0xbf   : > { %11446 = vmatprep.mubr.msk.bf16.mxu1 %vm319_vm1, %v1335_v43  ;;  %v1345_v48 = vpack.c.bf16 %v1316_v62, %v1315_v22  ;;  %v2059_v62 = vld [vmem:[%s12653_s23 + $0x1f] sm:$0xff] }
  0xc5   : > { %11497 = vmatmul.mubr.msk.bf16.gmra.mxu0 %vm319_vm1, %v16399_v2 }
  0xc6   : > { %11447 = vmatmul.mubr.msk.bf16.gmra.mxu1 %vm319_vm1, %v1336_v11  ;;  %11500 = vmatprep.mubr.msk.bf16.mxu0 %vm319_vm1, %v16400_v3  ;;  %v1318_v3 = vld [vmem:[%s12653_s23 + $0x151] sm:$0xff] }
  0xc7   : > { %11450 = vmatprep.mubr.msk.bf16.mxu1 %vm319_vm1, %v1337_v57 }
  0xcd   : > { %11501 = vmatmul.mubr.msk.bf16.gmra.mxu0 %vm319_vm1, %v16401_v35 }
  0xce   : > { %11451 = vmatmul.mubr.msk.bf16.gmra.mxu1 %vm319_vm1, %v1338_v26  ;;  %11504 = vmatprep.mubr.msk.bf16.mxu0 %vm319_vm1, %v16402_v6  ;;  %v1346_v26 = vpack.c.bf16 %v1318_v3, %v1317_v54  ;;  %v1347_v6 = vpack.c.bf16 %v1320_v59, %v1319_v55  ;;  %v2451_v59 = vld [vmem:[%s12653_s23 + $0x42] sm:$0xff] }
  0xcf   : > { %11454 = vmatprep.mubr.msk.bf16.mxu1 %vm319_vm1, %v1339_v9  ;;  %v1737_v9 = vpack.c.bf16 %v12853_v12, %v12842_v5  ;;  %v1322_v5 = vld [vmem:[%s12653_s23 + $0x171] sm:$0xff]  ;;  %v1714_v12 = vld [vmem:[%s12653_s23 + $0x184] sm:$0xff] }
  0xd0   : > { %v1739_v30 = vpack.c.bf16 %v1714_v12, %v12882_v47  ;;  %v1715_v47 = vld [vmem:[%s12653_s23 + $0x18c] sm:$0xff]  ;;  %v2454_v12 = vld [vmem:[%s12653_s23 + $0x5a] sm:$0xff] }
  0xd5   : > { %v11282_v17 = vpop.f32.mrf.mxu0  ;;  %11505 = vmatmul.mubr.msk.bf16.gmra.mxu0 %vm319_vm1, %v16403_v14 }
  0xd6   : > { %v11306_v20 = vpop.f32.mrf.mxu1  ;;  %11455 = vmatmul.mubr.msk.bf16.gmra.mxu1 %vm319_vm1, %v1340_v8  ;;  %11508 = vmatprep.mubr.msk.bf16.mxu0 %vm319_vm1, %v1731_v13  ;;  %v1323_v8 = vld [vmem:[%s12653_s23 + $0x179] sm:$0xff]  ;;  %v1324_v13 = vld [vmem:[%s12653_s23 + $0x181] sm:$0xff]  ;;  %v1738_v17 = vpack.c.bf16 %v12878_v37, %v12856_v15  ;;  %v1325_v37 = vld [vmem:[%s12653_s23 + $0x189] sm:$0xff] }
  0xd7   : > { %v13142_v27 = vpop.f32.mrf.mxu0  ;;  %11458 = vmatprep.mubr.msk.bf16.mxu1 %vm319_vm1, %v1341_v23  ;;  %v1348_v20 = vpack.c.bf16 %v1322_v5, %v1321_v4  ;;  %v1349_v29 = vpack.c.bf16 %v1324_v13, %v1323_v8  ;;  %v2453_v5 = vld [vmem:[%s12653_s23 + $0x52] sm:$0xff] }
  0xd8   : > { %v13147_v0 = vpop.f32.mrf.mxu1 }
  0xd9   : > { %v13151_v49 = vpop.f32.mrf.mxu0 }
  0xda   : > { %v13155_v28 = vpop.f32.mrf.mxu1 }
  0xdb   : > { %v13159_v38 = vpop.f32.mrf.mxu0 }
  0xdc   : > { %v13161_v42 = vpop.f32.mrf.mxu1 }
  0xdd   : > { %v13163_v1 = vpop.f32.mrf.mxu0  ;;  %11509 = vmatmul.mubr.msk.bf16.gmra.mxu0 %vm319_vm1, %v1732_v21 }
  0xde   : > { %v13166_v18 = vpop.f32.mrf.mxu1  ;;  %11459 = vmatmul.mubr.msk.bf16.gmra.mxu1 %vm319_vm1, %v1342_v63  ;;  %11512 = vmatprep.mubr.msk.bf16.mxu0 %vm319_vm1, %v1733_v31  ;;  %v1716_v63 = vld [vmem:[%s12653_s23 + $0x194] sm:$0xff] }
  0xdf   : > { %v13170_v33 = vpop.f32.mrf.mxu0  ;;  %11462 = vmatprep.mubr.msk.bf16.mxu1 %vm319_vm1, %v1343_v39  ;;  %v1326_v39 = vld [vmem:[%s12653_s23 + $0x191] sm:$0xff] }
  0xe0   : > { %v13175_v45 = vpop.f32.mrf.mxu1 }
  0xe1   : > { %v13179_v43 = vpop.f32.mrf.mxu0 }
  0xe2   : > { %v13183_v53 = vpop.f32.mrf.mxu1 }
  0xe3   : > { %v448_v25 = vpop.f32.mrf.mxu0 }
  0xe4   : > { %v536_v11 = vpop.f32.mrf.mxu1 }
  0xe5   : > { %v13187_v57 = vpop.f32.mrf.mxu0  ;;  %11513 = vmatmul.mubr.msk.bf16.gmra.mxu0 %vm319_vm1, %v1734_v52  ;;  %v2060_v52 = vld [vmem:[%s12653_s23 + $0x27] sm:$0xff]  ;;  %v2497_v11 = vpack.c.bf16 %v2450_v41, %v2449_v40  ;;  %v13284_v40 = vld [vmem:[%s16356_s1 + $0x12] sm:$0x3] }
  0xe6   : > { %v13190_v2 = vpop.f32.mrf.mxu1  ;;  %11463 = vmatmul.mubr.msk.bf16.gmra.mxu1 %vm319_vm1, %v1344_v56  ;;  %11516 = vmatprep.mubr.msk.bf16.mxu0 %vm319_vm1, %v1735_v61  ;;  %v1740_v61 = vpack.c.bf16 %v1716_v63, %v1715_v47  ;;  %v2107_v54 = vpack.c.bf16 %v2060_v52, %v2059_v62  ;;  %v2499_v47 = vpack.c.bf16 %v2454_v12, %v2453_v5  ;;  %v2455_v41 = vld [vmem:[%s12653_s23 + $0x62] sm:$0xff]  ;;  %v13292_v62 = vld [vmem:[%s16356_s1 + $0x14] sm:$0x3] }
  0xe7   : > { %v460_v46 = vpop.f32.mrf.mxu0  ;;  %11466 = vmatprep.mubr.msk.bf16.mxu1 %vm319_vm1, %v1345_v48  ;;  %v1350_v48 = vpack.c.bf16 %v1326_v39, %v1325_v37  ;;  %v2986_v37 = vsel %vm392_vm0, %v13043_v16, 0  ;;  %v2065_v39 = vld [vmem:[%s12653_s23 + $0x4f] sm:$0xff] }
  0xe8   : > { %v548_v7 = vpop.f32.mrf.mxu1  ;;  %v2456_v16 = vld [vmem:[%s12653_s23 + $0x6a] sm:$0xff] }
  0xe9   : > { %v11291_v34 = vpop.f32.mrf.mxu0 }
  0xea   : > { %v11315_v19 = vpop.f32.mrf.mxu1  ;;  %v2452_v34 = vld [vmem:[%s12653_s23 + $0x4a] sm:$0xff] }
  0xeb   : > { %v13203_v35 = vpop.f32.mrf.mxu0  ;;  %v2061_v19 = vld [vmem:[%s12653_s23 + $0x2f] sm:$0xff]  ;;  %v2498_v4 = vpack.c.bf16 %v2452_v34, %v2451_v59 }
  0xec   : > { %v13205_v36 = vpop.f32.mrf.mxu1 }
  0xed   : > { %v11294_v51 = vpop.f32.mrf.mxu0  ;;  %11517 = vmatmul.mubr.msk.bf16.gmra.mxu0 %vm319_vm1, %v1736_v10 }
  0xee   : > { %v11318_v50 = vpop.f32.mrf.mxu1  ;;  %11467 = vmatmul.mubr.msk.bf16.gmra.mxu1 %vm319_vm1, %v1346_v26  ;;  %11520 = vmatprep.mubr.msk.bf16.mxu0 %vm319_vm1, %v1737_v9  ;;  %v2062_v26 = vld [vmem:[%s12653_s23 + $0x37] sm:$0xff]  ;;  %v2064_v51 = vld [vmem:[%s12653_s23 + $0x47] sm:$0xff] }
  0xef   : > { %v13210_v60 = vpop.f32.mrf.mxu0  ;;  %11470 = vmatprep.mubr.msk.bf16.mxu1 %vm319_vm1, %v1347_v6  ;;  %v2063_v6 = vld [vmem:[%s12653_s23 + $0x3f] sm:$0xff]  ;;  %v2108_v13 = vpack.c.bf16 %v2062_v26, %v2061_v19 }
  0xf0   : > { %v13216_v24 = vpop.f32.mrf.mxu1 }
  0xf1   : > { %v13220_v23 = vpop.f32.mrf.mxu0 }
  0xf2   : > { %v13224_v14 = vpop.f32.mrf.mxu1 }
  0xf3   : > { %v13227_v58 = vpop.f32.mrf.mxu0 }
  0xf4   : > { %v13229_v32 = vpop.f32.mrf.mxu1 }
  0xf5   : > { %v13231_v21 = vpop.f32.mrf.mxu0  ;;  %11521 = vmatmul.mubr.msk.bf16.gmra.mxu0 %vm319_vm1, %v1738_v17 }
  0xf6   : > { %v13234_v15 = vpop.f32.mrf.mxu1  ;;  %11471 = vmatmul.mubr.msk.bf16.gmra.mxu1 %vm319_vm1, %v1348_v20  ;;  %11524 = vmatprep.mubr.msk.bf16.mxu0 %vm319_vm1, %v1739_v30  ;;  %v3376_v20 = vsel %vm392_vm0, %v13049_v44, 0  ;;  %v2109_v30 = vpack.c.bf16 %v2064_v51, %v2063_v6 }
  0xf7   : > { %v13241_v31 = vpop.f32.mrf.mxu0  ;;  %11474 = vmatprep.mubr.msk.bf16.mxu1 %vm319_vm1, %v1349_v29 }
  0xf8   : > { %v13247_v22 = vpop.f32.mrf.mxu1 }
  0xf9   : > { %v13251_v56 = vpop.f32.mrf.mxu0 }
  0xfa   : > { %v13253_v25 = vpop.f32.mrf.mxu1 }
  0xfb   : > { %v492_v46 = vpop.f32.mrf.mxu0 }
  0xfc   : > { %v580_v3 = vpop.f32.mrf.mxu1 }
  0xfd   : > { %v13255_v7 = vpop.f32.mrf.mxu0  ;;  %11525 = vmatmul.mubr.msk.bf16.gmra.mxu0 %vm319_vm1, %v1740_v61  ;;  %v2066_v61 = vld [vmem:[%s12653_s23 + $0x57] sm:$0xff]  ;;  %v2068_v3 = vld [vmem:[%s12653_s23 + $0x67] sm:$0xff] }
  0xfe   : > { %v13258_v55 = vpop.f32.mrf.mxu1  ;;  %11475 = vmatmul.mubr.msk.bf16.gmra.mxu1 %vm319_vm1, %v1350_v48  ;;  %11580 = vmatprep.mubr.msk.bf16.mxu0 %vm319_vm1, %v2497_v11  ;;  %v2457_v48 = vld [vmem:[%s12653_s23 + $0x72] sm:$0xff]  ;;  %v2458_v11 = vld [vmem:[%s12653_s23 + $0x7a] sm:$0xff]  ;;  %v2110_v26 = vpack.c.bf16 %v2066_v61, %v2065_v39 }
  0xff   : > { %v504_v10 = vpop.f32.mrf.mxu0  ;;  %11530 = vmatprep.mubr.msk.bf16.mxu1 %vm319_vm1, %v2107_v54  ;;  %v2067_v54 = vld [vmem:[%s12653_s23 + $0x5f] sm:$0xff]  ;;  %v2461_v39 = vld [vmem:[%s12653_s23 + $0x92] sm:$0xff] }
 0x100   : > { %v592_v9 = vpop.f32.mrf.mxu1  ;;  %v2500_v10 = vpack.c.bf16 %v2456_v16, %v2455_v41  ;;  %v2071_v16 = vld [vmem:[%s12653_s23 + $0x7f] sm:$0xff] }
 0x101   : > { %v11303_v50 = vpop.f32.mrf.mxu0  ;;  %v2501_v9 = vpack.c.bf16 %v2458_v11, %v2457_v48 }
 0x102   : > { %v11327_v8 = vpop.f32.mrf.mxu1 }
 0x103   : > { %v13271_v17 = vpop.f32.mrf.mxu0 }
 0x104   : > { %v13275_v29 = vpop.f32.mrf.mxu1 }
 0x105   : > { %v11382_v63 = vpop.f32.mrf.mxu0  ;;  %11581 = vmatmul.mubr.msk.bf16.vlgmr.msra.gmra.mxu0 %vm319_vm1, %v2498_v4  ;;  %v2111_v4 = vpack.c.bf16 %v2068_v3, %v2067_v54 }
 0x106   : > { %v11332_v44 = vpop.f32.mrf.mxu1  ;;  %11531 = vmatmul.mubr.msk.bf16.vlgmr.msra.gmra.mxu1 %vm319_vm1, %v2108_v13  ;;  %11679 = vmatpush3.bf16.msra.mxu0 %v3376_v20  ;;  %v2459_v20 = vld [vmem:[%s12653_s23 + $0x82] sm:$0xff] }
 0x107   : > { %11629 = vmatpush3.bf16.msra.mxu1 %v2986_v37  ;;  %v1072_v52 = vpop.f32.mrf.mxu0  ;;  %11534 = vmatprep.mubr.msk.bf16.mxu1 %vm319_vm1, %v2109_v30  ;;  %v2460_v30 = vld [vmem:[%s12653_s23 + $0x8a] sm:$0xff]  ;;  %v2462_v44 = vld [vmem:[%s12653_s23 + $0x9a] sm:$0xff] }
 0x108   : > { %v714_v46 = vpop.f32.mrf.mxu1  ;;  %11584 = vmatprep.mubr.msk.bf16.mxu0 %vm319_vm1, %v2499_v47  ;;  %12540 = vmatprep.subr.msk.bf16.mxu1 %vm392_vm0, %v13284_v40  ;;  %v2503_v3 = vpack.c.bf16 %v2462_v44, %v2461_v39 }
 0x109   : > { %v715_v59 = vadd.f32 %v714_v46, %v13142_v27  ;;  %v11383_v34 = vpop.f32.mrf.mxu0  ;;  %12541 = vmatprep.subr.msk.bf16.mxu0 %vm392_vm0, %v13292_v62  ;;  %v2502_v46 = vpack.c.bf16 %v2460_v30, %v2459_v20  ;;  %v2075_v30 = vld [vmem:[%s12653_s23 + $0x9f] sm:$0xff] }
 0x10a   : > { %v11333_v19 = vpop.f32.mrf.mxu1 }
 0x10b   : > { %v13306_v6 = vadd.f32 %v1072_v52, %v715_v59  ;;  %v725_v51 = vadd.f32 %v11333_v19, %v13151_v49  ;;  %v1075_v50 = vpop.f32.mrf.mxu0  ;;  %v2069_v49 = vld [vmem:[%s12653_s23 + $0x6f] sm:$0xff]  ;;  %v2072_v52 = vld [vmem:[%s12653_s23 + $0x87] sm:$0xff] }
 0x10c   : > { %v717_v5 = vpop.f32.mrf.mxu1  ;;  %v2113_v19 = vpack.c.bf16 %v2072_v52, %v2071_v16 }
 0x10d   : > { %v13309_v27 = vadd.f32 %v11383_v34, %v725_v51  ;;  %v718_v12 = vadd.f32 %v717_v5, %v13159_v38  ;;  %v11386_v8 = vpop.f32.mrf.mxu0  ;;  %11585 = vmatmul.mubr.msk.bf16.gmra.mxu0 %vm319_vm1, %v2500_v10  ;;  %v2070_v38 = vld [vmem:[%s12653_s23 + $0x77] sm:$0xff] }
 0x10e   : > { %v11336_v13 = vpop.f32.mrf.mxu1  ;;  %11535 = vmatmul.mubr.msk.bf16.gmra.mxu1 %vm319_vm1, %v2110_v26  ;;  %11588 = vmatprep.mubr.msk.bf16.mxu0 %vm319_vm1, %v2501_v9 }
 0x10f   : > { %v13318_v37 = vadd.f32 %v1075_v50, %v718_v12  ;;  %v737_v47 = vadd.f32 %v11336_v13, %v13163_v1  ;;  %v1087_v63 = vpop.f32.mrf.mxu0  ;;  %11538 = vmatprep.mubr.msk.bf16.mxu1 %vm319_vm1, %v2111_v4  ;;  %v2112_v1 = vpack.c.bf16 %v2070_v38, %v2069_v49  ;;  %v2073_v50 = vld [vmem:[%s12653_s23 + $0x8f] sm:$0xff]  ;;  %v2466_v49 = vld [vmem:[%s12653_s23 + $0xba] sm:$0xff] }
 0x110   : > { %v729_v41 = vpop.f32.mrf.mxu1  ;;  %v2464_v4 = vld [vmem:[%s12653_s23 + $0xaa] sm:$0xff]  ;;  %v2465_v13 = vld [vmem:[%s12653_s23 + $0xb2] sm:$0xff] }
 0x111   : > { %v13327_v61 = vadd.f32 %v11386_v8, %v737_v47  ;;  %v730_v48 = vadd.f32 %v729_v41, %v13170_v33  ;;  %v11387_v11 = vpop.f32.mrf.mxu0  ;;  %v2074_v8 = vld [vmem:[%s12653_s23 + $0x97] sm:$0xff]  ;;  %v2076_v47 = vld [vmem:[%s12653_s23 + $0xa7] sm:$0xff]  ;;  %v2505_v16 = vpack.c.bf16 %v2466_v49, %v2465_v13 }
 0x112   : > { %v11337_v54 = vpop.f32.mrf.mxu1  ;;  %v2114_v41 = vpack.c.bf16 %v2074_v8, %v2073_v50  ;;  %v2115_v52 = vpack.c.bf16 %v2076_v47, %v2075_v30  ;;  %v2079_v50 = vld [vmem:[%s12653_s23 + $0xbf] sm:$0xff] }
 0x113   : > { %v13330_v59 = vadd.f32 %v1087_v63, %v730_v48  ;;  %v740_v34 = vadd.f32 %v11337_v54, %v13179_v43  ;;  %v1090_v10 = vpop.f32.mrf.mxu0  ;;  %v2463_v43 = vld [vmem:[%s12653_s23 + $0xa2] sm:$0xff] }
 0x114   : > { %v732_v26 = vpop.f32.mrf.mxu1  ;;  %v2504_v39 = vpack.c.bf16 %v2464_v4, %v2463_v43  ;;  %v2080_v43 = vld [vmem:[%s12653_s23 + $0xc7] sm:$0xff] }
 0x115   : > { %v13333_v9 = vadd.f32 %v11387_v11, %v740_v34  ;;  %v11390_v33 = vpop.f32.mrf.mxu0  ;;  %11589 = vmatmul.mubr.msk.bf16.gmra.mxu0 %vm319_vm1, %v2502_v46  ;;  %v2468_v34 = vld [vmem:[%s12653_s23 + $0xca] sm:$0xff]  ;;  %v2078_v26 = vld [vmem:[%s12653_s23 + $0xb7] sm:$0xff] }
 0x116   : > { %v11340_v51 = vpop.f32.mrf.mxu1  ;;  %11539 = vmatmul.mubr.msk.bf16.gmra.mxu1 %vm319_vm1, %v2112_v1  ;;  %11592 = vmatprep.mubr.msk.bf16.mxu0 %vm319_vm1, %v2503_v3  ;;  %v2077_v1 = vld [vmem:[%s12653_s23 + $0xaf] sm:$0xff]  ;;  %v2467_v3 = vld [vmem:[%s12653_s23 + $0xc2] sm:$0xff] }
 0x117   : > { %v752_v5 = vadd.f32 %v11340_v51, %v13187_v57  ;;  %v1102_v12 = vpop.f32.mrf.mxu0  ;;  %11542 = vmatprep.mubr.msk.bf16.mxu1 %vm319_vm1, %v2113_v19  ;;  %v2116_v13 = vpack.c.bf16 %v2078_v26, %v2077_v1  ;;  %v2474_v1 = vld [vmem:[%s12653_s23 + $0xfa] sm:$0xff] }
 0x118   : > { %v744_v20 = vpop.f32.mrf.mxu1  ;;  %v2506_v12 = vpack.c.bf16 %v2468_v34, %v2467_v3  ;;  %v2083_v34 = vld [vmem:[%s12653_s23 + $0xdf] sm:$0xff] }
 0x119   : > { %v13348_v63 = vadd.f32 %v11390_v33, %v752_v5  ;;  %v11391_v38 = vpop.f32.mrf.mxu0  ;;  %v2470_v33 = vld [vmem:[%s12653_s23 + $0xda] sm:$0xff] }
 0x11a   : > { %v11341_v44 = vpop.f32.mrf.mxu1  ;;  %v2117_v38 = vpack.c.bf16 %v2080_v43, %v2079_v50 }
 0x11b   : > { %v1104_v57 = vpop.f32.mrf.mxu0 }
 0x11c   : > { %v746_v48 = vpop.f32.mrf.mxu1 }
 0x11d   : > { %v747_v11 = vadd.f32 %v746_v48, %v13203_v35  ;;  %v11394_v46 = vpop.f32.mrf.mxu0  ;;  %11593 = vmatmul.mubr.msk.bf16.gmra.mxu0 %vm319_vm1, %v2504_v39  ;;  %v2469_v35 = vld [vmem:[%s12653_s23 + $0xd2] sm:$0xff] }
 0x11e   : > { %v11344_v54 = vpop.f32.mrf.mxu1  ;;  %11543 = vmatmul.mubr.msk.bf16.gmra.mxu1 %vm319_vm1, %v2114_v41  ;;  %11596 = vmatprep.mubr.msk.bf16.mxu0 %vm319_vm1, %v2505_v16  ;;  %v2507_v49 = vpack.c.bf16 %v2470_v33, %v2469_v35 }
 0x11f   : > { %v13357_v10 = vadd.f32 %v1104_v57, %v747_v11  ;;  %v1116_v19 = vpop.f32.mrf.mxu0  ;;  %11546 = vmatprep.mubr.msk.bf16.mxu1 %vm319_vm1, %v2115_v52  ;;  %v2471_v57 = vld [vmem:[%s12653_s23 + $0xe2] sm:$0xff]  ;;  %v2472_v52 = vld [vmem:[%s12653_s23 + $0xea] sm:$0xff]  ;;  %v2473_v54 = vld [vmem:[%s12653_s23 + $0xf2] sm:$0xff] }
 0x120   : > { %v758_v51 = vpop.f32.mrf.mxu1  ;;  %v2509_v43 = vpack.c.bf16 %v2474_v1, %v2473_v54 }
 0x121   : > { %v759_v4 = vadd.f32 %v758_v51, %v13210_v60  ;;  %v11395_v5 = vpop.f32.mrf.mxu0  ;;  %v2508_v51 = vpack.c.bf16 %v2472_v52, %v2471_v57  ;;  %v2087_v52 = vld [vmem:[%s12653_s23 + $0xff] sm:$0xff] }
 0x122   : > { %v11345_v8 = vpop.f32.mrf.mxu1 }
 0x123   : > { %v13366_v20 = vadd.f32 %v1116_v19, %v759_v4  ;;  %v769_v30 = vadd.f32 %v11345_v8, %v13220_v23  ;;  %v1119_v47 = vpop.f32.mrf.mxu0  ;;  %v2081_v23 = vld [vmem:[%s12653_s23 + $0xcf] sm:$0xff]  ;;  %v2084_v19 = vld [vmem:[%s12653_s23 + $0xe7] sm:$0xff] }
 0x124   : > { %v761_v39 = vpop.f32.mrf.mxu1  ;;  %v2119_v8 = vpack.c.bf16 %v2084_v19, %v2083_v34 }
 0x125   : > { %v13369_v44 = vadd.f32 %v11395_v5, %v769_v30  ;;  %v762_v60 = vadd.f32 %v761_v39, %v13227_v58  ;;  %v11398_v41 = vpop.f32.mrf.mxu0  ;;  %11597 = vmatmul.mubr.msk.bf16.gmra.mxu0 %vm319_vm1, %v2506_v12  ;;  %v2082_v58 = vld [vmem:[%s12653_s23 + $0xd7] sm:$0xff] }
 0x126   : > { %v11348_v16 = vpop.f32.mrf.mxu1  ;;  %11547 = vmatmul.mubr.msk.bf16.gmra.mxu1 %vm319_vm1, %v2116_v13  ;;  %11600 = vmatprep.mubr.msk.bf16.mxu0 %vm319_vm1, %v2507_v49 }
 0x127   : > { %v13378_v48 = vadd.f32 %v1119_v47, %v762_v60  ;;  %v781_v11 = vadd.f32 %v11348_v16, %v13231_v21  ;;  %v1131_v46 = vpop.f32.mrf.mxu0  ;;  %11550 = vmatprep.mubr.msk.bf16.mxu1 %vm319_vm1, %v2117_v38  ;;  %v2118_v21 = vpack.c.bf16 %v2082_v58, %v2081_v23  ;;  %v2085_v47 = vld [vmem:[%s12653_s23 + $0xef] sm:$0xff]  ;;  %v2478_v23 = vld [vmem:[%s12653_s23 + $0x11a] sm:$0xff] }
 0x128   : > { %v773_v3 = vpop.f32.mrf.mxu1  ;;  %v2476_v38 = vld [vmem:[%s12653_s23 + $0x10a] sm:$0xff]  ;;  %v2477_v16 = vld [vmem:[%s12653_s23 + $0x112] sm:$0xff] }
 0x129   : > { %v13387_v26 = vadd.f32 %v11398_v41, %v781_v11  ;;  %v774_v35 = vadd.f32 %v773_v3, %v13241_v31  ;;  %v11399_v33 = vpop.f32.mrf.mxu0  ;;  %v2086_v41 = vld [vmem:[%s12653_s23 + $0xf7] sm:$0xff]  ;;  %v2088_v11 = vld [vmem:[%s12653_s23 + $0x107] sm:$0xff]  ;;  %v2511_v34 = vpack.c.bf16 %v2478_v23, %v2477_v16 }
 0x12a   : > { %v11349_v50 = vpop.f32.mrf.mxu1  ;;  %v2120_v3 = vpack.c.bf16 %v2086_v41, %v2085_v47  ;;  %v2121_v19 = vpack.c.bf16 %v2088_v11, %v2087_v52  ;;  %v2091_v47 = vld [vmem:[%s12653_s23 + $0x11f] sm:$0xff] }
 0x12b   : > { %v13390_v4 = vadd.f32 %v1131_v46, %v774_v35  ;;  %v784_v5 = vadd.f32 %v11349_v50, %v13251_v56  ;;  %v1134_v12 = vpop.f32.mrf.mxu0  ;;  %v2475_v56 = vld [vmem:[%s12653_s23 + $0x102] sm:$0xff] }
 0x12c   : > { %v776_v13 = vpop.f32.mrf.mxu1  ;;  %v2510_v54 = vpack.c.bf16 %v2476_v38, %v2475_v56  ;;  %v2092_v56 = vld [vmem:[%s12653_s23 + $0x127] sm:$0xff] }
 0x12d   : > { %v13393_v49 = vadd.f32 %v11399_v33, %v784_v5  ;;  %v11402_v31 = vpop.f32.mrf.mxu0  ;;  %11601 = vmatmul.mubr.msk.bf16.gmra.mxu0 %vm319_vm1, %v2508_v51  ;;  %v2480_v5 = vld [vmem:[%s12653_s23 + $0x12a] sm:$0xff]  ;;  %v2090_v13 = vld [vmem:[%s12653_s23 + $0x117] sm:$0xff] }
 0x12e   : > { %v11352_v30 = vpop.f32.mrf.mxu1  ;;  %11551 = vmatmul.mubr.msk.bf16.gmra.mxu1 %vm319_vm1, %v2118_v21  ;;  %11604 = vmatprep.mubr.msk.bf16.mxu0 %vm319_vm1, %v2509_v43  ;;  %v2089_v21 = vld [vmem:[%s12653_s23 + $0x10f] sm:$0xff]  ;;  %v2479_v43 = vld [vmem:[%s12653_s23 + $0x122] sm:$0xff] }
 0x12f   : > { %v796_v39 = vadd.f32 %v11352_v30, %v13255_v7  ;;  %v1146_v60 = vpop.f32.mrf.mxu0  ;;  %11554 = vmatprep.mubr.msk.bf16.mxu1 %vm319_vm1, %v2119_v8  ;;  %v2122_v16 = vpack.c.bf16 %v2090_v13, %v2089_v21  ;;  %v2486_v21 = vld [vmem:[%s12653_s23 + $0x15a] sm:$0xff] }
 0x130   : > { %v788_v57 = vpop.f32.mrf.mxu1  ;;  %v2512_v60 = vpack.c.bf16 %v2480_v5, %v2479_v43  ;;  %v2095_v5 = vld [vmem:[%s12653_s23 + $0x13f] sm:$0xff] }
 0x131   : > { %v13408_v46 = vadd.f32 %v11402_v31, %v796_v39  ;;  %v11403_v58 = vpop.f32.mrf.mxu0  ;;  %v2482_v31 = vld [vmem:[%s12653_s23 + $0x13a] sm:$0xff] }
 0x132   : > { %v11353_v1 = vpop.f32.mrf.mxu1  ;;  %v2123_v58 = vpack.c.bf16 %v2092_v56, %v2091_v47 }
 0x133   : > { %v1148_v7 = vpop.f32.mrf.mxu0 }
 0x134   : > { %v790_v35 = vpop.f32.mrf.mxu1 }
 0x135   : > { %v791_v33 = vadd.f32 %v790_v35, %v13271_v17  ;;  %v11406_v51 = vpop.f32.mrf.mxu0  ;;  %11605 = vmatmul.mubr.msk.bf16.gmra.mxu0 %vm319_vm1, %v2510_v54  ;;  %v2481_v17 = vld [vmem:[%s12653_s23 + $0x132] sm:$0xff] }
 0x136   : > { %v11356_v50 = vpop.f32.mrf.mxu1  ;;  %11555 = vmatmul.mubr.msk.bf16.gmra.mxu1 %vm319_vm1, %v2120_v3  ;;  %11608 = vmatprep.mubr.msk.bf16.mxu0 %vm319_vm1, %v2511_v34  ;;  %v2513_v23 = vpack.c.bf16 %v2482_v31, %v2481_v17 }
 0x137   : > { %v13417_v12 = vadd.f32 %v1148_v7, %v791_v33  ;;  %v1160_v8 = vpop.f32.mrf.mxu0  ;;  %11558 = vmatprep.mubr.msk.bf16.mxu1 %vm319_vm1, %v2121_v19  ;;  %v2483_v7 = vld [vmem:[%s12653_s23 + $0x142] sm:$0xff]  ;;  %v2484_v19 = vld [vmem:[%s12653_s23 + $0x14a] sm:$0xff]  ;;  %v2485_v50 = vld [vmem:[%s12653_s23 + $0x152] sm:$0xff] }
 0x138   : > { %v802_v30 = vpop.f32.mrf.mxu1  ;;  %v2515_v56 = vpack.c.bf16 %v2486_v21, %v2485_v50 }
 0x139   : > { %v803_v38 = vadd.f32 %v802_v30, %v13147_v0  ;;  %v11407_v39 = vpop.f32.mrf.mxu0  ;;  %v2514_v30 = vpack.c.bf16 %v2484_v19, %v2483_v7  ;;  %v2099_v19 = vld [vmem:[%s12653_s23 + $0x15f] sm:$0xff] }
 0x13a   : > { %v11357_v41 = vpop.f32.mrf.mxu1 }
 0x13b   : > { %v13426_v57 = vadd.f32 %v1160_v8, %v803_v38  ;;  %v813_v52 = vadd.f32 %v11357_v41, %v13155_v28  ;;  %v1163_v11 = vpop.f32.mrf.mxu0  ;;  %v2093_v28 = vld [vmem:[%s12653_s23 + $0x12f] sm:$0xff]  ;;  %v2096_v8 = vld [vmem:[%s12653_s23 + $0x147] sm:$0xff] }
 0x13c   : > { %v805_v54 = vpop.f32.mrf.mxu1  ;;  %v2125_v41 = vpack.c.bf16 %v2096_v8, %v2095_v5 }
 0x13d   : > { %v13429_v1 = vadd.f32 %v11407_v39, %v813_v52  ;;  %v806_v0 = vadd.f32 %v805_v54, %v13161_v42  ;;  %v11410_v3 = vpop.f32.mrf.mxu0  ;;  %11609 = vmatmul.mubr.msk.bf16.gmra.mxu0 %vm319_vm1, %v2512_v60  ;;  %v2094_v42 = vld [vmem:[%s12653_s23 + $0x137] sm:$0xff] }
 0x13e   : > { %v11360_v34 = vpop.f32.mrf.mxu1  ;;  %11559 = vmatmul.mubr.msk.bf16.gmra.mxu1 %vm319_vm1, %v2122_v16  ;;  %11612 = vmatprep.mubr.msk.bf16.mxu0 %vm319_vm1, %v2513_v23 }
 0x13f   : > { %v13438_v35 = vadd.f32 %v1163_v11, %v806_v0  ;;  %v825_v33 = vadd.f32 %v11360_v34, %v13166_v18  ;;  %v1175_v51 = vpop.f32.mrf.mxu0  ;;  %11562 = vmatprep.mubr.msk.bf16.mxu1 %vm319_vm1, %v2123_v58  ;;  %v2124_v18 = vpack.c.bf16 %v2094_v42, %v2093_v28  ;;  %v2097_v11 = vld [vmem:[%s12653_s23 + $0x14f] sm:$0xff]  ;;  %v2490_v28 = vld [vmem:[%s12653_s23 + $0x17a] sm:$0xff] }
 0x140   : > { %v817_v43 = vpop.f32.mrf.mxu1  ;;  %v2488_v58 = vld [vmem:[%s12653_s23 + $0x16a] sm:$0xff]  ;;  %v2489_v34 = vld [vmem:[%s12653_s23 + $0x172] sm:$0xff] }
 0x141   : > { %v13447_v13 = vadd.f32 %v11410_v3, %v825_v33  ;;  %v818_v17 = vadd.f32 %v817_v43, %v13175_v45  ;;  %v11411_v31 = vpop.f32.mrf.mxu0  ;;  %v2098_v3 = vld [vmem:[%s12653_s23 + $0x157] sm:$0xff]  ;;  %v2100_v33 = vld [vmem:[%s12653_s23 + $0x167] sm:$0xff]  ;;  %v2517_v5 = vpack.c.bf16 %v2490_v28, %v2489_v34 }
 0x142   : > { %v11361_v47 = vpop.f32.mrf.mxu1  ;;  %v2126_v43 = vpack.c.bf16 %v2098_v3, %v2097_v11  ;;  %v2127_v8 = vpack.c.bf16 %v2100_v33, %v2099_v19  ;;  %v2103_v11 = vld [vmem:[%s12653_s23 + $0x17f] sm:$0xff] }
 0x143   : > { %v13450_v38 = vadd.f32 %v1175_v51, %v818_v17  ;;  %v828_v39 = vadd.f32 %v11361_v47, %v13183_v53  ;;  %v1178_v60 = vpop.f32.mrf.mxu0  ;;  %v2487_v53 = vld [vmem:[%s12653_s23 + $0x162] sm:$0xff] }
 0x144   : > { %v820_v16 = vpop.f32.mrf.mxu1  ;;  %v2516_v50 = vpack.c.bf16 %v2488_v58, %v2487_v53  ;;  %v2104_v53 = vld [vmem:[%s12653_s23 + $0x187] sm:$0xff] }
 0x145   : > { %v13453_v23 = vadd.f32 %v11411_v31, %v828_v39  ;;  %v11414_v45 = vpop.f32.mrf.mxu0  ;;  %11613 = vmatmul.mubr.msk.bf16.gmra.mxu0 %vm319_vm1, %v2514_v30  ;;  %v2492_v39 = vld [vmem:[%s12653_s23 + $0x18a] sm:$0xff]  ;;  %v2102_v16 = vld [vmem:[%s12653_s23 + $0x177] sm:$0xff] }
 0x146   : > { %v11364_v52 = vpop.f32.mrf.mxu1  ;;  %11563 = vmatmul.mubr.msk.bf16.gmra.mxu1 %vm319_vm1, %v2124_v18  ;;  %11616 = vmatprep.mubr.msk.bf16.mxu0 %vm319_vm1, %v2515_v56  ;;  %v2101_v18 = vld [vmem:[%s12653_s23 + $0x16f] sm:$0xff]  ;;  %v2491_v56 = vld [vmem:[%s12653_s23 + $0x182] sm:$0xff] }
 0x147   : > { %v840_v54 = vadd.f32 %v11364_v52, %v13190_v2  ;;  %v1190_v0 = vpop.f32.mrf.mxu0  ;;  %11566 = vmatprep.mubr.msk.bf16.mxu1 %vm319_vm1, %v2125_v41  ;;  %v2128_v34 = vpack.c.bf16 %v2102_v16, %v2101_v18  ;;  %v3230_v18 = vld [vmem:[%s12653_s23 + $0x3e] sm:$0xff] }
 0x148   : > { %v832_v7 = vpop.f32.mrf.mxu1  ;;  %v2518_v0 = vpack.c.bf16 %v2492_v39, %v2491_v56  ;;  %v2839_v39 = vld [vmem:[%s12653_s23 + $0x34] sm:$0xff] }
 0x149   : > { %v13468_v51 = vadd.f32 %v11414_v45, %v840_v54  ;;  %v11415_v42 = vpop.f32.mrf.mxu0  ;;  %v2494_v45 = vld [vmem:[%s12653_s23 + $0x19a] sm:$0xff] }
 0x14a   : > { %v11365_v21 = vpop.f32.mrf.mxu1  ;;  %v2129_v42 = vpack.c.bf16 %v2104_v53, %v2103_v11 }
 0x14b   : > { %v1192_v2 = vpop.f32.mrf.mxu0 }
 0x14c   : > { %v834_v17 = vpop.f32.mrf.mxu1 }
 0x14d   : > { %v835_v31 = vadd.f32 %v834_v17, %v13205_v36  ;;  %v11418_v30 = vpop.f32.mrf.mxu0  ;;  %11617 = vmatmul.mubr.msk.bf16.gmra.mxu0 %vm319_vm1, %v2516_v50  ;;  %v2493_v36 = vld [vmem:[%s12653_s23 + $0x192] sm:$0xff] }
 0x14e   : > { %v11368_v47 = vpop.f32.mrf.mxu1  ;;  %11567 = vmatmul.mubr.msk.bf16.gmra.mxu1 %vm319_vm1, %v2126_v43  ;;  %11620 = vmatprep.mubr.msk.bf16.mxu0 %vm319_vm1, %v2517_v5  ;;  %v2519_v28 = vpack.c.bf16 %v2494_v45, %v2493_v36 }
 0x14f   : > { %v13477_v60 = vadd.f32 %v1192_v2, %v835_v31  ;;  %v1204_v41 = vpop.f32.mrf.mxu0  ;;  %11570 = vmatprep.mubr.msk.bf16.mxu1 %vm319_vm1, %v2127_v8  ;;  %v2495_v2 = vld [vmem:[%s12653_s23 + $0x1a2] sm:$0xff]  ;;  %v2496_v8 = vld [vmem:[%s12653_s23 + $0x1aa] sm:$0xff]  ;;  %v3229_v47 = vld [vmem:[%s12653_s23 + $0x36] sm:$0xff] }
 0x150   : > { %v846_v52 = vpop.f32.mrf.mxu1 }
 0x151   : > { %v847_v58 = vadd.f32 %v846_v52, %v13216_v24  ;;  %v11419_v54 = vpop.f32.mrf.mxu0  ;;  %v2520_v52 = vpack.c.bf16 %v2496_v8, %v2495_v2  ;;  %v2844_v2 = vld [vmem:[%s12653_s23 + $0x5c] sm:$0xff] }
 0x152   : > { %v11369_v3 = vpop.f32.mrf.mxu1 }
 0x153   : > { %v13486_v7 = vadd.f32 %v1204_v41, %v847_v58  ;;  %v857_v19 = vadd.f32 %v11369_v3, %v13224_v14  ;;  %v1207_v33 = vpop.f32.mrf.mxu0  ;;  %v2105_v14 = vld [vmem:[%s12653_s23 + $0x18f] sm:$0xff]  ;;  %v2840_v41 = vld [vmem:[%s12653_s23 + $0x3c] sm:$0xff] }
 0x154   : > { %v849_v50 = vpop.f32.mrf.mxu1  ;;  %v2887_v3 = vpack.c.bf16 %v2840_v41, %v2839_v39  ;;  %v4156_v39 = vsel %vm392_vm0, %v13292_v62, 0 }
 0x155   : > { %v13489_v21 = vadd.f32 %v11419_v54, %v857_v19  ;;  %v850_v24 = vadd.f32 %v849_v50, %v13229_v32  ;;  %v11422_v43 = vpop.f32.mrf.mxu0  ;;  %11621 = vmatmul.mubr.msk.bf16.gmra.mxu0 %vm319_vm1, %v2518_v0  ;;  %v2106_v32 = vld [vmem:[%s12653_s23 + $0x197] sm:$0xff] }
 0x156   : > { %v11372_v5 = vpop.f32.mrf.mxu1  ;;  %11571 = vmatmul.mubr.msk.bf16.gmra.mxu1 %vm319_vm1, %v2128_v34  ;;  %11624 = vmatprep.mubr.msk.bf16.mxu0 %vm319_vm1, %v2519_v28  ;;  %v2130_v53 = vpack.c.bf16 %v2106_v32, %v2105_v14  ;;  %v2843_v14 = vld [vmem:[%s12653_s23 + $0x54] sm:$0xff] }
 0x157   : > { %v13498_v17 = vadd.f32 %v1207_v33, %v850_v24  ;;  %v869_v31 = vadd.f32 %v11372_v5, %v13234_v15  ;;  %v1219_v30 = vpop.f32.mrf.mxu0  ;;  %11574 = vmatprep.mubr.msk.bf16.mxu1 %vm319_vm1, %v2129_v42  ;;  %v3277_v15 = vpack.c.bf16 %v3230_v18, %v3229_v47  ;;  %v3231_v33 = vld [vmem:[%s12653_s23 + $0x46] sm:$0xff]  ;;  %v3233_v32 = vld [vmem:[%s12653_s23 + $0x56] sm:$0xff]  ;;  %v3234_v47 = vld [vmem:[%s12653_s23 + $0x5e] sm:$0xff]  ;;  %v2889_v41 = vpack.c.bf16 %v2844_v2, %v2843_v14 }
 0x158   : > { %v861_v56 = vpop.f32.mrf.mxu1  ;;  %v2841_v24 = vld [vmem:[%s12653_s23 + $0x44] sm:$0xff] }
 0x159   : > { %v13507_v16 = vadd.f32 %v11422_v43, %v869_v31  ;;  %v862_v36 = vadd.f32 %v861_v56, %v13247_v22  ;;  %v11423_v45 = vpop.f32.mrf.mxu0  ;;  %v2842_v43 = vld [vmem:[%s12653_s23 + $0x4c] sm:$0xff] }
 0x15a   : > { %v11373_v11 = vpop.f32.mrf.mxu1  ;;  %v2888_v56 = vpack.c.bf16 %v2842_v43, %v2841_v24 }
 0x15b   : > { %v13510_v58 = vadd.f32 %v1219_v30, %v862_v36  ;;  %v872_v54 = vadd.f32 %v11373_v11, %v13253_v25  ;;  %v1222_v0 = vpop.f32.mrf.mxu0  ;;  %v3232_v25 = vld [vmem:[%s12653_s23 + $0x4e] sm:$0xff] }
 0x15c   : > { %v864_v34 = vpop.f32.mrf.mxu1  ;;  %v3278_v30 = vpack.c.bf16 %v3232_v25, %v3231_v33  ;;  %v3236_v0 = vld [vmem:[%s12653_s23 + $0x6e] sm:$0xff]  ;;  %v3238_v33 = vld [vmem:[%s12653_s23 + $0x7e] sm:$0xff] }
 0x15d   : > { %v13513_v28 = vadd.f32 %v11423_v45, %v872_v54  ;;  %v11426_v22 = vpop.f32.mrf.mxu0  ;;  %11625 = vmatmul.mubr.msk.bf16.gmra.mxu0 %vm319_vm1, %v2520_v52  ;;  %v3766_v45 = vsel %vm392_vm0, %v13284_v40, 0  ;;  %v3279_v52 = vpack.c.bf16 %v3234_v47, %v3233_v32  ;;  %v13540_v54 = vld [vmem:[%s16356_s1 + $0x16] sm:$0x3]  ;;  %v3235_v40 = vld [vmem:[%s12653_s23 + $0x66] sm:$0xff] }
 0x15e   : > { %v11376_v19 = vpop.f32.mrf.mxu1  ;;  %11575 = vmatmul.mubr.msk.bf16.gmra.mxu1 %vm319_vm1, %v2130_v53  ;;  %11680 = vmatprep.mubr.msk.bf16.mxu0 %vm319_vm1, %v3277_v15  ;;  %v2845_v15 = vld [vmem:[%s12653_s23 + $0x64] sm:$0xff] }
 0x15f   : > { %v884_v42 = vadd.f32 %v11376_v19, %v13258_v55  ;;  %v1234_v50 = vpop.f32.mrf.mxu0  ;;  %11630 = vmatprep.mubr.msk.bf16.mxu1 %vm319_vm1, %v2887_v3  ;;  %v3237_v19 = vld [vmem:[%s12653_s23 + $0x76] sm:$0xff] }
 0x160   : > { %v876_v5 = vpop.f32.mrf.mxu1  ;;  %v2848_v50 = vld [vmem:[%s12653_s23 + $0x7c] sm:$0xff] }
 0x161   : > { %v13526_v8 = vadd.f32 %v11426_v22, %v884_v42  ;;  %v11427_v31 = vpop.f32.mrf.mxu0  ;;  %v2846_v22 = vld [vmem:[%s12653_s23 + $0x6c] sm:$0xff]  ;;  %v2847_v42 = vld [vmem:[%s12653_s23 + $0x74] sm:$0xff]  ;;  %v3280_v5 = vpack.c.bf16 %v3236_v0, %v3235_v40 }
 0x162   : > { %v11377_v18 = vpop.f32.mrf.mxu1  ;;  %v2890_v2 = vpack.c.bf16 %v2846_v22, %v2845_v15  ;;  %v3281_v31 = vpack.c.bf16 %v3238_v33, %v3237_v19  ;;  %v3241_v15 = vld [vmem:[%s12653_s23 + $0x96] sm:$0xff] }
 0x163   : > { %v1236_v55 = vpop.f32.mrf.mxu0  ;;  %v2891_v18 = vpack.c.bf16 %v2848_v50, %v2847_v42  ;;  %v2851_v0 = vld [vmem:[%s12653_s23 + $0x94] sm:$0xff] }
 0x164   : > { %v878_v36 = vpop.f32.mrf.mxu1 }
 0x165   : > { %v879_v11 = vadd.f32 %v878_v36, %v13275_v29  ;;  %v11482_v53 = vpop.f32.mrf.mxu0  ;;  %11681 = vmatmul.mubr.msk.bf16.vlgmr.msra.gmra.mxu0 %vm319_vm1, %v3278_v30  ;;  %v13548_v29 = vld [vmem:[%s16356_s1 + $0x18] sm:$0x3]  ;;  %v3239_v36 = vld [vmem:[%s12653_s23 + $0x86] sm:$0xff] }
 0x166   : > { %v11432_v62 = vpop.f32.mrf.mxu1  ;;  %11631 = vmatmul.mubr.msk.bf16.vlgmr.msra.gmra.mxu1 %vm319_vm1, %v2888_v56  ;;  %11779 = vmatpush3.bf16.msra.mxu0 %v4156_v39 }
 0x167   : > { %v13550_v3 = vadd.f32 %v1236_v55, %v879_v11  ;;  %11729 = vmatpush3.bf16.msra.mxu1 %v3766_v45  ;;  %v1852_v34 = vpop.f32.mrf.mxu0  ;;  %11634 = vmatprep.mubr.msk.bf16.mxu1 %vm319_vm1, %v2889_v41  ;;  %v3240_v45 = vld [vmem:[%s12653_s23 + $0x8e] sm:$0xff]  ;;  %v3242_v62 = vld [vmem:[%s12653_s23 + $0x9e] sm:$0xff] }
 0x168   : > { %v1462_v25 = vpop.f32.mrf.mxu1  ;;  %11684 = vmatprep.mubr.msk.bf16.mxu0 %vm319_vm1, %v3279_v52  ;;  %12542 = vmatprep.subr.msk.bf16.mxu1 %vm392_vm0, %v13540_v54  ;;  %v3283_v50 = vpack.c.bf16 %v3242_v62, %v3241_v15 }
 0x169   : > { %v1637_v24 = vadd.f32 %v1462_v25, %v13306_v6  ;;  %v11483_v43 = vpop.f32.mrf.mxu0  ;;  %12543 = vmatprep.subr.msk.bf16.mxu0 %vm392_vm0, %v13548_v29  ;;  %v3282_v25 = vpack.c.bf16 %v3240_v45, %v3239_v36  ;;  %v2855_v45 = vld [vmem:[%s12653_s23 + $0xb4] sm:$0xff] }
 0x16a   : > { %v11433_v14 = vpop.f32.mrf.mxu1 }
 0x16b   : > { %v13564_v30 = vadd.f32 %v1852_v34, %v1637_v24  ;;  %v1639_v32 = vadd.f32 %v11433_v14, %v13309_v27  ;;  %v1855_v47 = vpop.f32.mrf.mxu0  ;;  %v2849_v27 = vld [vmem:[%s12653_s23 + $0x84] sm:$0xff]  ;;  %v2852_v34 = vld [vmem:[%s12653_s23 + $0x9c] sm:$0xff] }
 0x16c   : > { %v1465_v56 = vpop.f32.mrf.mxu1  ;;  %v2893_v14 = vpack.c.bf16 %v2852_v34, %v2851_v0 }
 0x16d   : > { %v13567_v6 = vadd.f32 %v11483_v43, %v1639_v32  ;;  %v1638_v55 = vadd.f32 %v1465_v56, %v13318_v37  ;;  %v11486_v39 = vpop.f32.mrf.mxu0  ;;  %11685 = vmatmul.mubr.msk.bf16.gmra.mxu0 %vm319_vm1, %v3280_v5  ;;  %v2850_v37 = vld [vmem:[%s12653_s23 + $0x8c] sm:$0xff] }
 0x16e   : > { %v11436_v41 = vpop.f32.mrf.mxu1  ;;  %11635 = vmatmul.mubr.msk.bf16.gmra.mxu1 %vm319_vm1, %v2890_v2  ;;  %11688 = vmatprep.mubr.msk.bf16.mxu0 %vm319_vm1, %v3281_v31 }
 0x16f   : > { %v13576_v52 = vadd.f32 %v1855_v47, %v1638_v55  ;;  %v1641_v11 = vadd.f32 %v11436_v41, %v13327_v61  ;;  %v1867_v53 = vpop.f32.mrf.mxu0  ;;  %11638 = vmatprep.mubr.msk.bf16.mxu1 %vm319_vm1, %v2891_v18  ;;  %v2892_v61 = vpack.c.bf16 %v2850_v37, %v2849_v27  ;;  %v2853_v47 = vld [vmem:[%s12653_s23 + $0xa4] sm:$0xff]  ;;  %v3244_v18 = vld [vmem:[%s12653_s23 + $0xae] sm:$0xff]  ;;  %v3245_v41 = vld [vmem:[%s12653_s23 + $0xb6] sm:$0xff] }
 0x170   : > { %v1477_v40 = vpop.f32.mrf.mxu1  ;;  %v3246_v27 = vld [vmem:[%s12653_s23 + $0xbe] sm:$0xff] }
 0x171   : > { %v13585_v22 = vadd.f32 %v11486_v39, %v1641_v11  ;;  %v1640_v19 = vadd.f32 %v1477_v40, %v13330_v59  ;;  %v11487_v33 = vpop.f32.mrf.mxu0  ;;  %v2854_v39 = vld [vmem:[%s12653_s23 + $0xac] sm:$0xff]  ;;  %v2856_v11 = vld [vmem:[%s12653_s23 + $0xbc] sm:$0xff]  ;;  %v3285_v0 = vpack.c.bf16 %v3246_v27, %v3245_v41 }
 0x172   : > { %v11437_v42 = vpop.f32.mrf.mxu1  ;;  %v2894_v40 = vpack.c.bf16 %v2854_v39, %v2853_v47  ;;  %v2895_v34 = vpack.c.bf16 %v2856_v11, %v2855_v45  ;;  %v2859_v47 = vld [vmem:[%s12653_s23 + $0xd4] sm:$0xff] }
 0x173   : > { %v13588_v24 = vadd.f32 %v1867_v53, %v1640_v19  ;;  %v1642_v43 = vadd.f32 %v11437_v42, %v13333_v9  ;;  %v1870_v5 = vpop.f32.mrf.mxu0  ;;  %v3243_v9 = vld [vmem:[%s12653_s23 + $0xa6] sm:$0xff] }
 0x174   : > { %v1480_v2 = vpop.f32.mrf.mxu1  ;;  %v3284_v15 = vpack.c.bf16 %v3244_v18, %v3243_v9  ;;  %v2860_v9 = vld [vmem:[%s12653_s23 + $0xdc] sm:$0xff] }
 0x175   : > { %v13591_v31 = vadd.f32 %v11487_v33, %v1642_v43  ;;  %v11490_v59 = vpop.f32.mrf.mxu0  ;;  %11689 = vmatmul.mubr.msk.bf16.gmra.mxu0 %vm319_vm1, %v3282_v25  ;;  %v3248_v43 = vld [vmem:[%s12653_s23 + $0xce] sm:$0xff] }
 0x176   : > { %v11440_v32 = vpop.f32.mrf.mxu1  ;;  %11639 = vmatmul.mubr.msk.bf16.gmra.mxu1 %vm319_vm1, %v2892_v61  ;;  %11692 = vmatprep.mubr.msk.bf16.mxu0 %vm319_vm1, %v3283_v50  ;;  %v2857_v61 = vld [vmem:[%s12653_s23 + $0xc4] sm:$0xff]  ;;  %v2858_v2 = vld [vmem:[%s12653_s23 + $0xcc] sm:$0xff] }
 0x177   : > { %v1644_v56 = vadd.f32 %v11440_v32, %v13348_v63  ;;  %v1882_v55 = vpop.f32.mrf.mxu0  ;;  %11642 = vmatprep.mubr.msk.bf16.mxu1 %vm319_vm1, %v2893_v14  ;;  %v3247_v50 = vld [vmem:[%s12653_s23 + $0xc6] sm:$0xff]  ;;  %v2896_v41 = vpack.c.bf16 %v2858_v2, %v2857_v61  ;;  %v3254_v61 = vld [vmem:[%s12653_s23 + $0xfe] sm:$0xff] }
 0x178   : > { %v1492_v36 = vpop.f32.mrf.mxu1  ;;  %v3286_v55 = vpack.c.bf16 %v3248_v43, %v3247_v50  ;;  %v2863_v43 = vld [vmem:[%s12653_s23 + $0xf4] sm:$0xff] }
 0x179   : > { %v13606_v53 = vadd.f32 %v11490_v59, %v1644_v56  ;;  %v11491_v37 = vpop.f32.mrf.mxu0  ;;  %v3250_v59 = vld [vmem:[%s12653_s23 + $0xde] sm:$0xff] }
 0x17a   : > { %v11441_v62 = vpop.f32.mrf.mxu1  ;;  %v2897_v37 = vpack.c.bf16 %v2860_v9, %v2859_v47 }
 0x17b   : > { %v1884_v63 = vpop.f32.mrf.mxu0 }
 0x17c   : > { %v1494_v19 = vpop.f32.mrf.mxu1 }
 0x17d   : > { %v1643_v33 = vadd.f32 %v1494_v19, %v13357_v10  ;;  %v11494_v25 = vpop.f32.mrf.mxu0  ;;  %11693 = vmatmul.mubr.msk.bf16.gmra.mxu0 %vm319_vm1, %v3284_v15  ;;  %v3249_v10 = vld [vmem:[%s12653_s23 + $0xd6] sm:$0xff] }
 0x17e   : > { %v11444_v42 = vpop.f32.mrf.mxu1  ;;  %11643 = vmatmul.mubr.msk.bf16.gmra.mxu1 %vm319_vm1, %v2894_v40  ;;  %11696 = vmatprep.mubr.msk.bf16.mxu0 %vm319_vm1, %v3285_v0  ;;  %v3287_v27 = vpack.c.bf16 %v3250_v59, %v3249_v10 }
 0x17f   : > { %v13615_v5 = vadd.f32 %v1884_v63, %v1643_v33  ;;  %v1896_v14 = vpop.f32.mrf.mxu0  ;;  %11646 = vmatprep.mubr.msk.bf16.mxu1 %vm319_vm1, %v2895_v34  ;;  %v3251_v63 = vld [vmem:[%s12653_s23 + $0xe6] sm:$0xff]  ;;  %v3252_v34 = vld [vmem:[%s12653_s23 + $0xee] sm:$0xff]  ;;  %v3253_v42 = vld [vmem:[%s12653_s23 + $0xf6] sm:$0xff] }
 0x180   : > { %v1506_v32 = vpop.f32.mrf.mxu1  ;;  %v3289_v9 = vpack.c.bf16 %v3254_v61, %v3253_v42 }
 0x181   : > { %v1645_v18 = vadd.f32 %v1506_v32, %v13366_v20  ;;  %v11495_v56 = vpop.f32.mrf.mxu0  ;;  %v3288_v32 = vpack.c.bf16 %v3252_v34, %v3251_v63  ;;  %v2867_v34 = vld [vmem:[%s12653_s23 + $0x114] sm:$0xff] }
 0x182   : > { %v11445_v39 = vpop.f32.mrf.mxu1 }
 0x183   : > { %v13624_v36 = vadd.f32 %v1896_v14, %v1645_v18  ;;  %v1647_v45 = vadd.f32 %v11445_v39, %v13369_v44  ;;  %v1899_v11 = vpop.f32.mrf.mxu0  ;;  %v2861_v44 = vld [vmem:[%s12653_s23 + $0xe4] sm:$0xff]  ;;  %v2864_v14 = vld [vmem:[%s12653_s23 + $0xfc] sm:$0xff] }
 0x184   : > { %v1509_v15 = vpop.f32.mrf.mxu1  ;;  %v2899_v39 = vpack.c.bf16 %v2864_v14, %v2863_v43 }
 0x185   : > { %v13627_v62 = vadd.f32 %v11495_v56, %v1647_v45  ;;  %v1646_v20 = vadd.f32 %v1509_v15, %v13378_v48  ;;  %v11498_v40 = vpop.f32.mrf.mxu0  ;;  %11697 = vmatmul.mubr.msk.bf16.gmra.mxu0 %vm319_vm1, %v3286_v55  ;;  %v2862_v48 = vld [vmem:[%s12653_s23 + $0xec] sm:$0xff] }
 0x186   : > { %v11448_v0 = vpop.f32.mrf.mxu1  ;;  %11647 = vmatmul.mubr.msk.bf16.gmra.mxu1 %vm319_vm1, %v2896_v41  ;;  %11700 = vmatprep.mubr.msk.bf16.mxu0 %vm319_vm1, %v3287_v27 }
 0x187   : > { %v13636_v19 = vadd.f32 %v1899_v11, %v1646_v20  ;;  %v1649_v33 = vadd.f32 %v11448_v0, %v13387_v26  ;;  %v1911_v25 = vpop.f32.mrf.mxu0  ;;  %11650 = vmatprep.mubr.msk.bf16.mxu1 %vm319_vm1, %v2897_v37  ;;  %v2898_v26 = vpack.c.bf16 %v2862_v48, %v2861_v44  ;;  %v2865_v11 = vld [vmem:[%s12653_s23 + $0x104] sm:$0xff]  ;;  %v3256_v37 = vld [vmem:[%s12653_s23 + $0x10e] sm:$0xff]  ;;  %v3257_v0 = vld [vmem:[%s12653_s23 + $0x116] sm:$0xff] }
 0x188   : > { %v1521_v50 = vpop.f32.mrf.mxu1  ;;  %v3258_v44 = vld [vmem:[%s12653_s23 + $0x11e] sm:$0xff] }
 0x189   : > { %v13645_v2 = vadd.f32 %v11498_v40, %v1649_v33  ;;  %v1648_v10 = vadd.f32 %v1521_v50, %v13390_v4  ;;  %v11499_v59 = vpop.f32.mrf.mxu0  ;;  %v2866_v40 = vld [vmem:[%s12653_s23 + $0x10c] sm:$0xff]  ;;  %v2868_v33 = vld [vmem:[%s12653_s23 + $0x11c] sm:$0xff]  ;;  %v3291_v43 = vpack.c.bf16 %v3258_v44, %v3257_v0 }
 0x18a   : > { %v11449_v47 = vpop.f32.mrf.mxu1  ;;  %v2900_v50 = vpack.c.bf16 %v2866_v40, %v2865_v11  ;;  %v2901_v14 = vpack.c.bf16 %v2868_v33, %v2867_v34  ;;  %v2871_v11 = vld [vmem:[%s12653_s23 + $0x134] sm:$0xff] }
 0x18b   : > { %v13648_v18 = vadd.f32 %v1911_v25, %v1648_v10  ;;  %v1650_v56 = vadd.f32 %v11449_v47, %v13393_v49  ;;  %v1914_v55 = vpop.f32.mrf.mxu0  ;;  %v3255_v49 = vld [vmem:[%s12653_s23 + $0x106] sm:$0xff] }
 0x18c   : > { %v1524_v41 = vpop.f32.mrf.mxu1  ;;  %v3290_v42 = vpack.c.bf16 %v3256_v37, %v3255_v49  ;;  %v2872_v49 = vld [vmem:[%s12653_s23 + $0x13c] sm:$0xff] }
 0x18d   : > { %v13651_v27 = vadd.f32 %v11499_v59, %v1650_v56  ;;  %v11502_v4 = vpop.f32.mrf.mxu0  ;;  %11701 = vmatmul.mubr.msk.bf16.gmra.mxu0 %vm319_vm1, %v3288_v32  ;;  %v3260_v56 = vld [vmem:[%s12653_s23 + $0x12e] sm:$0xff] }
 0x18e   : > { %v11452_v45 = vpop.f32.mrf.mxu1  ;;  %11651 = vmatmul.mubr.msk.bf16.gmra.mxu1 %vm319_vm1, %v2898_v26  ;;  %11704 = vmatprep.mubr.msk.bf16.mxu0 %vm319_vm1, %v3289_v9  ;;  %v2869_v26 = vld [vmem:[%s12653_s23 + $0x124] sm:$0xff]  ;;  %v2870_v41 = vld [vmem:[%s12653_s23 + $0x12c] sm:$0xff] }
 0x18f   : > { %v1652_v15 = vadd.f32 %v11452_v45, %v13408_v46  ;;  %v1926_v20 = vpop.f32.mrf.mxu0  ;;  %11654 = vmatprep.mubr.msk.bf16.mxu1 %vm319_vm1, %v2899_v39  ;;  %v3259_v9 = vld [vmem:[%s12653_s23 + $0x126] sm:$0xff]  ;;  %v2902_v0 = vpack.c.bf16 %v2870_v41, %v2869_v26  ;;  %v3266_v26 = vld [vmem:[%s12653_s23 + $0x15e] sm:$0xff] }
 0x190   : > { %v1536_v63 = vpop.f32.mrf.mxu1  ;;  %v3292_v20 = vpack.c.bf16 %v3260_v56, %v3259_v9  ;;  %v2875_v56 = vld [vmem:[%s12653_s23 + $0x154] sm:$0xff] }
 0x191   : > { %v13666_v25 = vadd.f32 %v11502_v4, %v1652_v15  ;;  %v11503_v48 = vpop.f32.mrf.mxu0  ;;  %v3262_v4 = vld [vmem:[%s12653_s23 + $0x13e] sm:$0xff] }
 0x192   : > { %v11453_v61 = vpop.f32.mrf.mxu1  ;;  %v2903_v48 = vpack.c.bf16 %v2872_v49, %v2871_v11 }
 0x193   : > { %v1928_v46 = vpop.f32.mrf.mxu0 }
 0x194   : > { %v1538_v10 = vpop.f32.mrf.mxu1 }
 0x195   : > { %v1651_v59 = vadd.f32 %v1538_v10, %v13417_v12  ;;  %v11506_v32 = vpop.f32.mrf.mxu0  ;;  %11705 = vmatmul.mubr.msk.bf16.gmra.mxu0 %vm319_vm1, %v3290_v42  ;;  %v3261_v12 = vld [vmem:[%s12653_s23 + $0x136] sm:$0xff] }
 0x196   : > { %v11456_v47 = vpop.f32.mrf.mxu1  ;;  %11655 = vmatmul.mubr.msk.bf16.gmra.mxu1 %vm319_vm1, %v2900_v50  ;;  %11708 = vmatprep.mubr.msk.bf16.mxu0 %vm319_vm1, %v3291_v43  ;;  %v3293_v44 = vpack.c.bf16 %v3262_v4, %v3261_v12 }
 0x197   : > { %v13675_v55 = vadd.f32 %v1928_v46, %v1651_v59  ;;  %v1940_v39 = vpop.f32.mrf.mxu0  ;;  %11658 = vmatprep.mubr.msk.bf16.mxu1 %vm319_vm1, %v2901_v14  ;;  %v3263_v46 = vld [vmem:[%s12653_s23 + $0x146] sm:$0xff]  ;;  %v3264_v14 = vld [vmem:[%s12653_s23 + $0x14e] sm:$0xff]  ;;  %v3265_v47 = vld [vmem:[%s12653_s23 + $0x156] sm:$0xff] }
 0x198   : > { %v1550_v45 = vpop.f32.mrf.mxu1  ;;  %v3295_v49 = vpack.c.bf16 %v3266_v26, %v3265_v47 }
 0x199   : > { %v1653_v37 = vadd.f32 %v1550_v45, %v13426_v57  ;;  %v11507_v15 = vpop.f32.mrf.mxu0  ;;  %v3294_v45 = vpack.c.bf16 %v3264_v14, %v3263_v46  ;;  %v2879_v14 = vld [vmem:[%s12653_s23 + $0x174] sm:$0xff] }
 0x19a   : > { %v11457_v40 = vpop.f32.mrf.mxu1 }
 0x19b   : > { %v13684_v63 = vadd.f32 %v1940_v39, %v1653_v37  ;;  %v1655_v34 = vadd.f32 %v11457_v40, %v13429_v1  ;;  %v1943_v33 = vpop.f32.mrf.mxu0  ;;  %v2873_v1 = vld [vmem:[%s12653_s23 + $0x144] sm:$0xff]  ;;  %v2876_v39 = vld [vmem:[%s12653_s23 + $0x15c] sm:$0xff] }
 0x19c   : > { %v1553_v42 = vpop.f32.mrf.mxu1  ;;  %v2905_v40 = vpack.c.bf16 %v2876_v39, %v2875_v56 }
 0x19d   : > { %v13687_v61 = vadd.f32 %v11507_v15, %v1655_v34  ;;  %v1654_v57 = vadd.f32 %v1553_v42, %v13438_v35  ;;  %v11510_v50 = vpop.f32.mrf.mxu0  ;;  %11709 = vmatmul.mubr.msk.bf16.gmra.mxu0 %vm319_vm1, %v3292_v20  ;;  %v2874_v35 = vld [vmem:[%s12653_s23 + $0x14c] sm:$0xff] }
 0x19e   : > { %v11460_v43 = vpop.f32.mrf.mxu1  ;;  %11659 = vmatmul.mubr.msk.bf16.gmra.mxu1 %vm319_vm1, %v2902_v0  ;;  %11712 = vmatprep.mubr.msk.bf16.mxu0 %vm319_vm1, %v3293_v44 }
 0x19f   : > { %v13696_v10 = vadd.f32 %v1943_v33, %v1654_v57  ;;  %v1657_v59 = vadd.f32 %v11460_v43, %v13447_v13  ;;  %v1955_v32 = vpop.f32.mrf.mxu0  ;;  %11662 = vmatprep.mubr.msk.bf16.mxu1 %vm319_vm1, %v2903_v48  ;;  %v2904_v13 = vpack.c.bf16 %v2874_v35, %v2873_v1  ;;  %v2877_v33 = vld [vmem:[%s12653_s23 + $0x164] sm:$0xff]  ;;  %v3268_v48 = vld [vmem:[%s12653_s23 + $0x16e] sm:$0xff]  ;;  %v3269_v43 = vld [vmem:[%s12653_s23 + $0x176] sm:$0xff] }
 0x1a0   : > { %v1565_v9 = vpop.f32.mrf.mxu1  ;;  %v3270_v1 = vld [vmem:[%s12653_s23 + $0x17e] sm:$0xff] }
 0x1a1   : > { %v13705_v41 = vadd.f32 %v11510_v50, %v1657_v59  ;;  %v1656_v12 = vadd.f32 %v1565_v9, %v13450_v38  ;;  %v11511_v4 = vpop.f32.mrf.mxu0  ;;  %v2878_v50 = vld [vmem:[%s12653_s23 + $0x16c] sm:$0xff]  ;;  %v2880_v59 = vld [vmem:[%s12653_s23 + $0x17c] sm:$0xff]  ;;  %v3297_v56 = vpack.c.bf16 %v3270_v1, %v3269_v43 }
 0x1a2   : > { %v11461_v11 = vpop.f32.mrf.mxu1  ;;  %v2906_v9 = vpack.c.bf16 %v2878_v50, %v2877_v33  ;;  %v2907_v39 = vpack.c.bf16 %v2880_v59, %v2879_v14  ;;  %v2883_v33 = vld [vmem:[%s12653_s23 + $0x194] sm:$0xff] }
 0x1a3   : > { %v13708_v37 = vadd.f32 %v1955_v32, %v1656_v12  ;;  %v1658_v15 = vadd.f32 %v11461_v11, %v13453_v23  ;;  %v1958_v20 = vpop.f32.mrf.mxu0  ;;  %v3267_v23 = vld [vmem:[%s12653_s23 + $0x166] sm:$0xff] }
 0x1a4   : > { %v1568_v0 = vpop.f32.mrf.mxu1  ;;  %v3296_v47 = vpack.c.bf16 %v3268_v48, %v3267_v23  ;;  %v2884_v23 = vld [vmem:[%s12653_s23 + $0x19c] sm:$0xff] }
 0x1a5   : > { %v13711_v44 = vadd.f32 %v11511_v4, %v1658_v15  ;;  %v11514_v38 = vpop.f32.mrf.mxu0  ;;  %11713 = vmatmul.mubr.msk.bf16.gmra.mxu0 %vm319_vm1, %v3294_v45  ;;  %v3272_v15 = vld [vmem:[%s12653_s23 + $0x18e] sm:$0xff] }
 0x1a6   : > { %v11464_v34 = vpop.f32.mrf.mxu1  ;;  %11663 = vmatmul.mubr.msk.bf16.gmra.mxu1 %vm319_vm1, %v2904_v13  ;;  %11716 = vmatprep.mubr.msk.bf16.mxu0 %vm319_vm1, %v3295_v49  ;;  %v2881_v13 = vld [vmem:[%s12653_s23 + $0x184] sm:$0xff]  ;;  %v2882_v0 = vld [vmem:[%s12653_s23 + $0x18c] sm:$0xff] }
 0x1a7   : > { %v1660_v42 = vadd.f32 %v11464_v34, %v13468_v51  ;;  %v1970_v57 = vpop.f32.mrf.mxu0  ;;  %11666 = vmatprep.mubr.msk.bf16.mxu1 %vm319_vm1, %v2905_v40  ;;  %v3271_v49 = vld [vmem:[%s12653_s23 + $0x186] sm:$0xff]  ;;  %v2908_v43 = vpack.c.bf16 %v2882_v0, %v2881_v13 }
 0x1a8   : > { %v1580_v46 = vpop.f32.mrf.mxu1  ;;  %v3298_v57 = vpack.c.bf16 %v3272_v15, %v3271_v49  ;;  %v4010_v13 = vld [vmem:[%s12653_s23 + $0x69] sm:$0xff]  ;;  %v3619_v15 = vld [vmem:[%s12653_s23 + $0x60] sm:$0xff] }
 0x1a9   : > { %v13726_v32 = vadd.f32 %v11514_v38, %v1660_v42  ;;  %v11515_v35 = vpop.f32.mrf.mxu0  ;;  %v3274_v38 = vld [vmem:[%s12653_s23 + $0x19e] sm:$0xff] }
 0x1aa   : > { %v11465_v26 = vpop.f32.mrf.mxu1  ;;  %v2909_v35 = vpack.c.bf16 %v2884_v23, %v2883_v33 }
 0x1ab   : > { %v1972_v51 = vpop.f32.mrf.mxu0 }
 0x1ac   : > { %v1582_v12 = vpop.f32.mrf.mxu1 }
 0x1ad   : > { %v1659_v4 = vadd.f32 %v1582_v12, %v13477_v60  ;;  %v11518_v45 = vpop.f32.mrf.mxu0  ;;  %11717 = vmatmul.mubr.msk.bf16.gmra.mxu0 %vm319_vm1, %v3296_v47  ;;  %v3273_v60 = vld [vmem:[%s12653_s23 + $0x196] sm:$0xff] }
 0x1ae   : > { %v11468_v11 = vpop.f32.mrf.mxu1  ;;  %11667 = vmatmul.mubr.msk.bf16.gmra.mxu1 %vm319_vm1, %v2906_v9  ;;  %11720 = vmatprep.mubr.msk.bf16.mxu0 %vm319_vm1, %v3297_v56  ;;  %v3299_v1 = vpack.c.bf16 %v3274_v38, %v3273_v60 }
 0x1af   : > { %v13735_v20 = vadd.f32 %v1972_v51, %v1659_v4  ;;  %v1984_v40 = vpop.f32.mrf.mxu0  ;;  %11670 = vmatprep.mubr.msk.bf16.mxu1 %vm319_vm1, %v2907_v39  ;;  %v3275_v51 = vld [vmem:[%s12653_s23 + $0x1a6] sm:$0xff]  ;;  %v3276_v39 = vld [vmem:[%s12653_s23 + $0x1ae] sm:$0xff] }
 0x1b0   : > { %v1594_v34 = vpop.f32.mrf.mxu1  ;;  %v4009_v11 = vld [vmem:[%s12653_s23 + $0x61] sm:$0xff] }
 0x1b1   : > { %v1661_v48 = vadd.f32 %v1594_v34, %v13486_v7  ;;  %v11519_v42 = vpop.f32.mrf.mxu0  ;;  %v3300_v34 = vpack.c.bf16 %v3276_v39, %v3275_v51  ;;  %v3624_v51 = vld [vmem:[%s12653_s23 + $0x88] sm:$0xff] }
 0x1b2   : > { %v11469_v50 = vpop.f32.mrf.mxu1 }
 0x1b3   : > { %v13744_v46 = vadd.f32 %v1984_v40, %v1661_v48  ;;  %v1663_v14 = vadd.f32 %v11469_v50, %v13489_v21  ;;  %v1987_v59 = vpop.f32.mrf.mxu0  ;;  %v2885_v21 = vld [vmem:[%s12653_s23 + $0x1a4] sm:$0xff] }
 0x1b4   : > { %v1597_v47 = vpop.f32.mrf.mxu1  ;;  %v3620_v40 = vld [vmem:[%s12653_s23 + $0x68] sm:$0xff] }
 0x1b5   : > { %v13747_v26 = vadd.f32 %v11519_v42, %v1663_v14  ;;  %v1662_v7 = vadd.f32 %v1597_v47, %v13498_v17  ;;  %v11522_v9 = vpop.f32.mrf.mxu0  ;;  %11721 = vmatmul.mubr.msk.bf16.gmra.mxu0 %vm319_vm1, %v3298_v57  ;;  %v2886_v17 = vld [vmem:[%s12653_s23 + $0x1ac] sm:$0xff]  ;;  %v3667_v50 = vpack.c.bf16 %v3620_v40, %v3619_v15  ;;  %v4936_v15 = vsel %vm392_vm0, %v13548_v29, 0 }
 0x1b6   : > { %v11472_v56 = vpop.f32.mrf.mxu1  ;;  %11671 = vmatmul.mubr.msk.bf16.gmra.mxu1 %vm319_vm1, %v2908_v43  ;;  %11724 = vmatprep.mubr.msk.bf16.mxu0 %vm319_vm1, %v3299_v1  ;;  %v2910_v23 = vpack.c.bf16 %v2886_v17, %v2885_v21  ;;  %v3623_v21 = vld [vmem:[%s12653_s23 + $0x80] sm:$0xff] }
 0x1b7   : > { %v13756_v12 = vadd.f32 %v1987_v59, %v1662_v7  ;;  %v1665_v4 = vadd.f32 %v11472_v56, %v13507_v16  ;;  %v1999_v45 = vpop.f32.mrf.mxu0  ;;  %11674 = vmatprep.mubr.msk.bf16.mxu1 %vm319_vm1, %v2909_v35  ;;  %v4057_v16 = vpack.c.bf16 %v4010_v13, %v4009_v11  ;;  %v4011_v59 = vld [vmem:[%s12653_s23 + $0x71] sm:$0xff]  ;;  %v4013_v17 = vld [vmem:[%s12653_s23 + $0x81] sm:$0xff]  ;;  %v4014_v11 = vld [vmem:[%s12653_s23 + $0x89] sm:$0xff]  ;;  %v3669_v40 = vpack.c.bf16 %v3624_v51, %v3623_v21 }
 0x1b8   : > { %v1609_v49 = vpop.f32.mrf.mxu1  ;;  %v3621_v7 = vld [vmem:[%s12653_s23 + $0x70] sm:$0xff] }
 0x1b9   : > { %v13765_v0 = vadd.f32 %v11522_v9, %v1665_v4  ;;  %v1664_v60 = vadd.f32 %v1609_v49, %v13510_v58  ;;  %v11523_v38 = vpop.f32.mrf.mxu0  ;;  %v3622_v9 = vld [vmem:[%s12653_s23 + $0x78] sm:$0xff] }
 0x1ba   : > { %v11473_v33 = vpop.f32.mrf.mxu1  ;;  %v3668_v49 = vpack.c.bf16 %v3622_v9, %v3621_v7 }
 0x1bb   : > { %v13768_v48 = vadd.f32 %v1999_v45, %v1664_v60  ;;  %v1666_v42 = vadd.f32 %v11473_v33, %v13513_v28  ;;  %v2002_v57 = vpop.f32.mrf.mxu0  ;;  %v4012_v28 = vld [vmem:[%s12653_s23 + $0x79] sm:$0xff] }
 0x1bc   : > { %v1612_v43 = vpop.f32.mrf.mxu1  ;;  %v4058_v45 = vpack.c.bf16 %v4012_v28, %v4011_v59  ;;  %v4016_v57 = vld [vmem:[%s12653_s23 + $0x99] sm:$0xff]  ;;  %v4018_v59 = vld [vmem:[%s12653_s23 + $0xa9] sm:$0xff] }
 0x1bd   : > { %v13771_v1 = vadd.f32 %v11523_v38, %v1666_v42  ;;  %v11526_v58 = vpop.f32.mrf.mxu0  ;;  %11725 = vmatmul.mubr.msk.bf16.gmra.mxu0 %vm319_vm1, %v3300_v34  ;;  %v4546_v38 = vsel %vm392_vm0, %v13540_v54, 0  ;;  %v4059_v34 = vpack.c.bf16 %v4014_v11, %v4013_v17  ;;  %v13798_v42 = vld [vmem:[%s16356_s1 + $0x1a] sm:$0x3]  ;;  %v4015_v54 = vld [vmem:[%s12653_s23 + $0x91] sm:$0xff] }
 0x1be   : > { %v11476_v14 = vpop.f32.mrf.mxu1  ;;  %11675 = vmatmul.mubr.msk.bf16.gmra.mxu1 %vm319_vm1, %v2910_v23  ;;  %11780 = vmatprep.mubr.msk.bf16.mxu0 %vm319_vm1, %v4057_v16  ;;  %v3625_v16 = vld [vmem:[%s12653_s23 + $0x90] sm:$0xff] }
 0x1bf   : > { %v1668_v35 = vadd.f32 %v11476_v14, %v13526_v8  ;;  %v2014_v47 = vpop.f32.mrf.mxu0  ;;  %11730 = vmatprep.mubr.msk.bf16.mxu1 %vm319_vm1, %v3667_v50  ;;  %v4017_v14 = vld [vmem:[%s12653_s23 + $0xa1] sm:$0xff] }
 0x1c0   : > { %v1624_v56 = vpop.f32.mrf.mxu1  ;;  %v3628_v47 = vld [vmem:[%s12653_s23 + $0xa8] sm:$0xff] }
 0x1c1   : > { %v13784_v39 = vadd.f32 %v11526_v58, %v1668_v35  ;;  %v11527_v4 = vpop.f32.mrf.mxu0  ;;  %v3626_v58 = vld [vmem:[%s12653_s23 + $0x98] sm:$0xff]  ;;  %v3627_v35 = vld [vmem:[%s12653_s23 + $0xa0] sm:$0xff]  ;;  %v4060_v56 = vpack.c.bf16 %v4016_v57, %v4015_v54 }
 0x1c2   : > { %v11477_v13 = vpop.f32.mrf.mxu1  ;;  %v3670_v51 = vpack.c.bf16 %v3626_v58, %v3625_v16  ;;  %v4061_v4 = vpack.c.bf16 %v4018_v59, %v4017_v14  ;;  %v4021_v16 = vld [vmem:[%s12653_s23 + $0xc1] sm:$0xff] }
 0x1c3   : > { %v2016_v8 = vpop.f32.mrf.mxu0  ;;  %v3671_v13 = vpack.c.bf16 %v3628_v47, %v3627_v35  ;;  %v3631_v57 = vld [vmem:[%s12653_s23 + $0xc0] sm:$0xff] }
 0x1c4   : > { %v1626_v60 = vpop.f32.mrf.mxu1 }
 0x1c5   : > { %v1667_v33 = vadd.f32 %v1626_v60, %v13550_v3  ;;  %v11582_v23 = vpop.f32.mrf.mxu0  ;;  %11781 = vmatmul.mubr.msk.bf16.vlgmr.msra.gmra.mxu0 %vm319_vm1, %v4058_v45  ;;  %v13806_v3 = vld [vmem:[%s16356_s1 + $0x1c] sm:$0x3]  ;;  %v4019_v60 = vld [vmem:[%s12653_s23 + $0xb1] sm:$0xff] }
 0x1c6   : > { %v11532_v29 = vpop.f32.mrf.mxu1  ;;  %11731 = vmatmul.mubr.msk.bf16.vlgmr.msra.gmra.mxu1 %vm319_vm1, %v3668_v49  ;;  %11879 = vmatpush3.bf16.msra.mxu0 %v4936_v15 }
 0x1c7   : > { %v13808_v50 = vadd.f32 %v2016_v8, %v1667_v33  ;;  %11829 = vmatpush3.bf16.msra.mxu1 %v4546_v38  ;;  %v2632_v43 = vpop.f32.mrf.mxu0  ;;  %11734 = vmatprep.mubr.msk.bf16.mxu1 %vm319_vm1, %v3669_v40  ;;  %v4020_v38 = vld [vmem:[%s12653_s23 + $0xb9] sm:$0xff]  ;;  %v4022_v29 = vld [vmem:[%s12653_s23 + $0xc9] sm:$0xff] }
 0x1c8   : > { %v2242_v28 = vpop.f32.mrf.mxu1  ;;  %11784 = vmatprep.mubr.msk.bf16.mxu0 %vm319_vm1, %v4059_v34  ;;  %12544 = vmatprep.subr.msk.bf16.mxu1 %vm392_vm0, %v13798_v42  ;;  %v4063_v47 = vpack.c.bf16 %v4022_v29, %v4021_v16 }
 0x1c9   : > { %v2417_v7 = vadd.f32 %v2242_v28, %v13564_v30  ;;  %v11583_v9 = vpop.f32.mrf.mxu0  ;;  %12545 = vmatprep.subr.msk.bf16.mxu0 %vm392_vm0, %v13806_v3  ;;  %v4062_v28 = vpack.c.bf16 %v4020_v38, %v4019_v60  ;;  %v3635_v38 = vld [vmem:[%s12653_s23 + $0xe0] sm:$0xff] }
 0x1ca   : > { %v11533_v21 = vpop.f32.mrf.mxu1 }
 0x1cb   : > { %v13822_v45 = vadd.f32 %v2632_v43, %v2417_v7  ;;  %v2419_v17 = vadd.f32 %v11533_v21, %v13567_v6  ;;  %v2635_v11 = vpop.f32.mrf.mxu0  ;;  %v3629_v6 = vld [vmem:[%s12653_s23 + $0xb0] sm:$0xff]  ;;  %v3632_v43 = vld [vmem:[%s12653_s23 + $0xc8] sm:$0xff] }
 0x1cc   : > { %v2245_v49 = vpop.f32.mrf.mxu1  ;;  %v3673_v21 = vpack.c.bf16 %v3632_v43, %v3631_v57 }
 0x1cd   : > { %v13825_v30 = vadd.f32 %v11583_v9, %v2419_v17  ;;  %v2418_v8 = vadd.f32 %v2245_v49, %v13576_v52  ;;  %v11586_v15 = vpop.f32.mrf.mxu0  ;;  %11785 = vmatmul.mubr.msk.bf16.gmra.mxu0 %vm319_vm1, %v4060_v56  ;;  %v3630_v52 = vld [vmem:[%s12653_s23 + $0xb8] sm:$0xff] }
 0x1ce   : > { %v11536_v40 = vpop.f32.mrf.mxu1  ;;  %11735 = vmatmul.mubr.msk.bf16.gmra.mxu1 %vm319_vm1, %v3670_v51  ;;  %11788 = vmatprep.mubr.msk.bf16.mxu0 %vm319_vm1, %v4061_v4 }
 0x1cf   : > { %v13834_v34 = vadd.f32 %v2635_v11, %v2418_v8  ;;  %v2421_v33 = vadd.f32 %v11536_v40, %v13585_v22  ;;  %v2647_v23 = vpop.f32.mrf.mxu0  ;;  %11738 = vmatprep.mubr.msk.bf16.mxu1 %vm319_vm1, %v3671_v13  ;;  %v3672_v22 = vpack.c.bf16 %v3630_v52, %v3629_v6  ;;  %v3633_v11 = vld [vmem:[%s12653_s23 + $0xd0] sm:$0xff]  ;;  %v4024_v13 = vld [vmem:[%s12653_s23 + $0xd9] sm:$0xff]  ;;  %v4025_v40 = vld [vmem:[%s12653_s23 + $0xe1] sm:$0xff] }
 0x1d0   : > { %v2257_v54 = vpop.f32.mrf.mxu1  ;;  %v4026_v6 = vld [vmem:[%s12653_s23 + $0xe9] sm:$0xff] }
 0x1d1   : > { %v13843_v58 = vadd.f32 %v11586_v15, %v2421_v33  ;;  %v2420_v14 = vadd.f32 %v2257_v54, %v13588_v24  ;;  %v11587_v59 = vpop.f32.mrf.mxu0  ;;  %v3634_v15 = vld [vmem:[%s12653_s23 + $0xd8] sm:$0xff]  ;;  %v3636_v33 = vld [vmem:[%s12653_s23 + $0xe8] sm:$0xff]  ;;  %v4065_v57 = vpack.c.bf16 %v4026_v6, %v4025_v40 }
 0x1d2   : > { %v11537_v35 = vpop.f32.mrf.mxu1  ;;  %v3674_v54 = vpack.c.bf16 %v3634_v15, %v3633_v11  ;;  %v3675_v43 = vpack.c.bf16 %v3636_v33, %v3635_v38  ;;  %v3639_v11 = vld [vmem:[%s12653_s23 + $0x100] sm:$0xff] }
 0x1d3   : > { %v13846_v7 = vadd.f32 %v2647_v23, %v2420_v14  ;;  %v2422_v9 = vadd.f32 %v11537_v35, %v13591_v31  ;;  %v2650_v56 = vpop.f32.mrf.mxu0  ;;  %v4023_v31 = vld [vmem:[%s12653_s23 + $0xd1] sm:$0xff] }
 0x1d4   : > { %v2260_v51 = vpop.f32.mrf.mxu1  ;;  %v4064_v16 = vpack.c.bf16 %v4024_v13, %v4023_v31  ;;  %v3640_v31 = vld [vmem:[%s12653_s23 + $0x108] sm:$0xff] }
 0x1d5   : > { %v13849_v4 = vadd.f32 %v11587_v59, %v2422_v9  ;;  %v11590_v24 = vpop.f32.mrf.mxu0  ;;  %11789 = vmatmul.mubr.msk.bf16.gmra.mxu0 %vm319_vm1, %v4062_v28  ;;  %v4028_v9 = vld [vmem:[%s12653_s23 + $0xf9] sm:$0xff] }
 0x1d6   : > { %v11540_v17 = vpop.f32.mrf.mxu1  ;;  %11739 = vmatmul.mubr.msk.bf16.gmra.mxu1 %vm319_vm1, %v3672_v22  ;;  %11792 = vmatprep.mubr.msk.bf16.mxu0 %vm319_vm1, %v4063_v47  ;;  %v3637_v22 = vld [vmem:[%s12653_s23 + $0xf0] sm:$0xff]  ;;  %v3638_v51 = vld [vmem:[%s12653_s23 + $0xf8] sm:$0xff] }
 0x1d7   : > { %v2424_v49 = vadd.f32 %v11540_v17, %v13606_v53  ;;  %v2662_v8 = vpop.f32.mrf.mxu0  ;;  %11742 = vmatprep.mubr.msk.bf16.mxu1 %vm319_vm1, %v3673_v21  ;;  %v4027_v47 = vld [vmem:[%s12653_s23 + $0xf1] sm:$0xff]  ;;  %v3676_v40 = vpack.c.bf16 %v3638_v51, %v3637_v22  ;;  %v4034_v22 = vld [vmem:[%s12653_s23 + $0x129] sm:$0xff] }
 0x1d8   : > { %v2272_v60 = vpop.f32.mrf.mxu1  ;;  %v4066_v8 = vpack.c.bf16 %v4028_v9, %v4027_v47  ;;  %v3643_v9 = vld [vmem:[%s12653_s23 + $0x120] sm:$0xff] }
 0x1d9   : > { %v13864_v23 = vadd.f32 %v11590_v24, %v2424_v49  ;;  %v11591_v52 = vpop.f32.mrf.mxu0  ;;  %v4030_v24 = vld [vmem:[%s12653_s23 + $0x109] sm:$0xff] }
 0x1da   : > { %v11541_v29 = vpop.f32.mrf.mxu1  ;;  %v3677_v52 = vpack.c.bf16 %v3640_v31, %v3639_v11 }
 0x1db   : > { %v2664_v53 = vpop.f32.mrf.mxu0 }
 0x1dc   : > { %v2274_v14 = vpop.f32.mrf.mxu1 }
 0x1dd   : > { %v2423_v59 = vadd.f32 %v2274_v14, %v13615_v5  ;;  %v11594_v28 = vpop.f32.mrf.mxu0  ;;  %11793 = vmatmul.mubr.msk.bf16.gmra.mxu0 %vm319_vm1, %v4064_v16  ;;  %v4029_v5 = vld [vmem:[%s12653_s23 + $0x101] sm:$0xff] }
 0x1de   : > { %v11544_v35 = vpop.f32.mrf.mxu1  ;;  %11743 = vmatmul.mubr.msk.bf16.gmra.mxu1 %vm319_vm1, %v3674_v54  ;;  %11796 = vmatprep.mubr.msk.bf16.mxu0 %vm319_vm1, %v4065_v57  ;;  %v4067_v6 = vpack.c.bf16 %v4030_v24, %v4029_v5 }
 0x1df   : > { %v13873_v56 = vadd.f32 %v2664_v53, %v2423_v59  ;;  %v2676_v21 = vpop.f32.mrf.mxu0  ;;  %11746 = vmatprep.mubr.msk.bf16.mxu1 %vm319_vm1, %v3675_v43  ;;  %v4031_v53 = vld [vmem:[%s12653_s23 + $0x111] sm:$0xff]  ;;  %v4032_v43 = vld [vmem:[%s12653_s23 + $0x119] sm:$0xff]  ;;  %v4033_v35 = vld [vmem:[%s12653_s23 + $0x121] sm:$0xff] }
 0x1e0   : > { %v2286_v17 = vpop.f32.mrf.mxu1  ;;  %v4069_v31 = vpack.c.bf16 %v4034_v22, %v4033_v35 }
 0x1e1   : > { %v2425_v13 = vadd.f32 %v2286_v17, %v13624_v36  ;;  %v11595_v49 = vpop.f32.mrf.mxu0  ;;  %v4068_v17 = vpack.c.bf16 %v4032_v43, %v4031_v53  ;;  %v3647_v43 = vld [vmem:[%s12653_s23 + $0x140] sm:$0xff] }
 0x1e2   : > { %v11545_v15 = vpop.f32.mrf.mxu1 }
 0x1e3   : > { %v13882_v60 = vadd.f32 %v2676_v21, %v2425_v13  ;;  %v2427_v38 = vadd.f32 %v11545_v15, %v13627_v62  ;;  %v2679_v33 = vpop.f32.mrf.mxu0  ;;  %v3641_v62 = vld [vmem:[%s12653_s23 + $0x110] sm:$0xff]  ;;  %v3644_v21 = vld [vmem:[%s12653_s23 + $0x128] sm:$0xff] }
 0x1e4   : > { %v2289_v16 = vpop.f32.mrf.mxu1  ;;  %v3679_v15 = vpack.c.bf16 %v3644_v21, %v3643_v9 }
 0x1e5   : > { %v13885_v29 = vadd.f32 %v11595_v49, %v2427_v38  ;;  %v2426_v36 = vadd.f32 %v2289_v16, %v13636_v19  ;;  %v11598_v54 = vpop.f32.mrf.mxu0  ;;  %11797 = vmatmul.mubr.msk.bf16.gmra.mxu0 %vm319_vm1, %v4066_v8  ;;  %v3642_v19 = vld [vmem:[%s12653_s23 + $0x118] sm:$0xff] }
 0x1e6   : > { %v11548_v57 = vpop.f32.mrf.mxu1  ;;  %11747 = vmatmul.mubr.msk.bf16.gmra.mxu1 %vm319_vm1, %v3676_v40  ;;  %11800 = vmatprep.mubr.msk.bf16.mxu0 %vm319_vm1, %v4067_v6 }
 0x1e7   : > { %v13894_v14 = vadd.f32 %v2679_v33, %v2426_v36  ;;  %v2429_v59 = vadd.f32 %v11548_v57, %v13645_v2  ;;  %v2691_v28 = vpop.f32.mrf.mxu0  ;;  %11750 = vmatprep.mubr.msk.bf16.mxu1 %vm319_vm1, %v3677_v52  ;;  %v3678_v2 = vpack.c.bf16 %v3642_v19, %v3641_v62  ;;  %v3645_v33 = vld [vmem:[%s12653_s23 + $0x130] sm:$0xff]  ;;  %v4036_v52 = vld [vmem:[%s12653_s23 + $0x139] sm:$0xff]  ;;  %v4037_v57 = vld [vmem:[%s12653_s23 + $0x141] sm:$0xff] }
 0x1e8   : > { %v2301_v47 = vpop.f32.mrf.mxu1  ;;  %v4038_v62 = vld [vmem:[%s12653_s23 + $0x149] sm:$0xff] }
 0x1e9   : > { %v13903_v51 = vadd.f32 %v11598_v54, %v2429_v59  ;;  %v2428_v5 = vadd.f32 %v2301_v47, %v13648_v18  ;;  %v11599_v24 = vpop.f32.mrf.mxu0  ;;  %v3646_v54 = vld [vmem:[%s12653_s23 + $0x138] sm:$0xff]  ;;  %v3648_v59 = vld [vmem:[%s12653_s23 + $0x148] sm:$0xff]  ;;  %v4071_v9 = vpack.c.bf16 %v4038_v62, %v4037_v57 }
 0x1ea   : > { %v11549_v11 = vpop.f32.mrf.mxu1  ;;  %v3680_v47 = vpack.c.bf16 %v3646_v54, %v3645_v33  ;;  %v3681_v21 = vpack.c.bf16 %v3648_v59, %v3647_v43  ;;  %v3651_v33 = vld [vmem:[%s12653_s23 + $0x160] sm:$0xff] }
 0x1eb   : > { %v13906_v13 = vadd.f32 %v2691_v28, %v2428_v5  ;;  %v2430_v49 = vadd.f32 %v11549_v11, %v13651_v27  ;;  %v2694_v8 = vpop.f32.mrf.mxu0  ;;  %v4035_v27 = vld [vmem:[%s12653_s23 + $0x131] sm:$0xff] }
 0x1ec   : > { %v2304_v40 = vpop.f32.mrf.mxu1  ;;  %v4070_v35 = vpack.c.bf16 %v4036_v52, %v4035_v27  ;;  %v3652_v27 = vld [vmem:[%s12653_s23 + $0x168] sm:$0xff] }
 0x1ed   : > { %v13909_v6 = vadd.f32 %v11599_v24, %v2430_v49  ;;  %v11602_v18 = vpop.f32.mrf.mxu0  ;;  %11801 = vmatmul.mubr.msk.bf16.gmra.mxu0 %vm319_vm1, %v4068_v17  ;;  %v4040_v49 = vld [vmem:[%s12653_s23 + $0x159] sm:$0xff] }
 0x1ee   : > { %v11552_v38 = vpop.f32.mrf.mxu1  ;;  %11751 = vmatmul.mubr.msk.bf16.gmra.mxu1 %vm319_vm1, %v3678_v2  ;;  %11804 = vmatprep.mubr.msk.bf16.mxu0 %vm319_vm1, %v4069_v31  ;;  %v3649_v2 = vld [vmem:[%s12653_s23 + $0x150] sm:$0xff]  ;;  %v3650_v40 = vld [vmem:[%s12653_s23 + $0x158] sm:$0xff] }
 0x1ef   : > { %v2432_v16 = vadd.f32 %v11552_v38, %v13666_v25  ;;  %v2706_v36 = vpop.f32.mrf.mxu0  ;;  %11754 = vmatprep.mubr.msk.bf16.mxu1 %vm319_vm1, %v3679_v15  ;;  %v4039_v31 = vld [vmem:[%s12653_s23 + $0x151] sm:$0xff]  ;;  %v3682_v57 = vpack.c.bf16 %v3650_v40, %v3649_v2  ;;  %v4046_v2 = vld [vmem:[%s12653_s23 + $0x189] sm:$0xff] }
 0x1f0   : > { %v2316_v53 = vpop.f32.mrf.mxu1  ;;  %v4072_v36 = vpack.c.bf16 %v4040_v49, %v4039_v31  ;;  %v3655_v49 = vld [vmem:[%s12653_s23 + $0x180] sm:$0xff] }
 0x1f1   : > { %v13924_v28 = vadd.f32 %v11602_v18, %v2432_v16  ;;  %v11603_v19 = vpop.f32.mrf.mxu0  ;;  %v4042_v18 = vld [vmem:[%s12653_s23 + $0x169] sm:$0xff] }
 0x1f2   : > { %v11553_v22 = vpop.f32.mrf.mxu1  ;;  %v3683_v19 = vpack.c.bf16 %v3652_v27, %v3651_v33 }
 0x1f3   : > { %v2708_v25 = vpop.f32.mrf.mxu0 }
 0x1f4   : > { %v2318_v5 = vpop.f32.mrf.mxu1 }
 0x1f5   : > { %v2431_v24 = vadd.f32 %v2318_v5, %v13675_v55  ;;  %v11606_v17 = vpop.f32.mrf.mxu0  ;;  %11805 = vmatmul.mubr.msk.bf16.gmra.mxu0 %vm319_vm1, %v4070_v35  ;;  %v4041_v55 = vld [vmem:[%s12653_s23 + $0x161] sm:$0xff] }
 0x1f6   : > { %v11556_v11 = vpop.f32.mrf.mxu1  ;;  %11755 = vmatmul.mubr.msk.bf16.gmra.mxu1 %vm319_vm1, %v3680_v47  ;;  %11808 = vmatprep.mubr.msk.bf16.mxu0 %vm319_vm1, %v4071_v9  ;;  %v4073_v62 = vpack.c.bf16 %v4042_v18, %v4041_v55 }
 0x1f7   : > { %v13933_v8 = vadd.f32 %v2708_v25, %v2431_v24  ;;  %v2720_v15 = vpop.f32.mrf.mxu0  ;;  %11758 = vmatprep.mubr.msk.bf16.mxu1 %vm319_vm1, %v3681_v21  ;;  %v4043_v25 = vld [vmem:[%s12653_s23 + $0x171] sm:$0xff]  ;;  %v4044_v21 = vld [vmem:[%s12653_s23 + $0x179] sm:$0xff]  ;;  %v4045_v11 = vld [vmem:[%s12653_s23 + $0x181] sm:$0xff] }
 0x1f8   : > { %v2330_v38 = vpop.f32.mrf.mxu1  ;;  %v4075_v27 = vpack.c.bf16 %v4046_v2, %v4045_v11 }
 0x1f9   : > { %v2433_v52 = vadd.f32 %v2330_v38, %v13684_v63  ;;  %v11607_v16 = vpop.f32.mrf.mxu0  ;;  %v4074_v38 = vpack.c.bf16 %v4044_v21, %v4043_v25  ;;  %v3659_v21 = vld [vmem:[%s12653_s23 + $0x1a0] sm:$0xff] }
 0x1fa   : > { %v11557_v54 = vpop.f32.mrf.mxu1 }
 0x1fb   : > { %v13942_v53 = vadd.f32 %v2720_v15, %v2433_v52  ;;  %v2435_v43 = vadd.f32 %v11557_v54, %v13687_v61  ;;  %v2723_v59 = vpop.f32.mrf.mxu0  ;;  %v3653_v61 = vld [vmem:[%s12653_s23 + $0x170] sm:$0xff]  ;;  %v3656_v15 = vld [vmem:[%s12653_s23 + $0x188] sm:$0xff] }
 0x1fc   : > { %v2333_v35 = vpop.f32.mrf.mxu1  ;;  %v3685_v54 = vpack.c.bf16 %v3656_v15, %v3655_v49 }
 0x1fd   : > { %v13945_v22 = vadd.f32 %v11607_v16, %v2435_v43  ;;  %v2434_v63 = vadd.f32 %v2333_v35, %v13696_v10  ;;  %v11610_v47 = vpop.f32.mrf.mxu0  ;;  %11809 = vmatmul.mubr.msk.bf16.gmra.mxu0 %vm319_vm1, %v4072_v36  ;;  %v3654_v10 = vld [vmem:[%s12653_s23 + $0x178] sm:$0xff] }
 0x1fe   : > { %v11560_v9 = vpop.f32.mrf.mxu1  ;;  %11759 = vmatmul.mubr.msk.bf16.gmra.mxu1 %vm319_vm1, %v3682_v57  ;;  %11812 = vmatprep.mubr.msk.bf16.mxu0 %vm319_vm1, %v4073_v62 }
 0x1ff   : > { %v13954_v5 = vadd.f32 %v2723_v59, %v2434_v63  ;;  %v2437_v24 = vadd.f32 %v11560_v9, %v13705_v41  ;;  %v2735_v17 = vpop.f32.mrf.mxu0  ;;  %11762 = vmatprep.mubr.msk.bf16.mxu1 %vm319_vm1, %v3683_v19  ;;  %v3684_v41 = vpack.c.bf16 %v3654_v10, %v3653_v61  ;;  %v3657_v59 = vld [vmem:[%s12653_s23 + $0x190] sm:$0xff]  ;;  %v4048_v19 = vld [vmem:[%s12653_s23 + $0x199] sm:$0xff]  ;;  %v4049_v9 = vld [vmem:[%s12653_s23 + $0x1a1] sm:$0xff] }
 0x200   : > { %v2345_v31 = vpop.f32.mrf.mxu1  ;;  %v4050_v61 = vld [vmem:[%s12653_s23 + $0x1a9] sm:$0xff] }
 0x201   : > { %v13963_v40 = vadd.f32 %v11610_v47, %v2437_v24  ;;  %v2436_v55 = vadd.f32 %v2345_v31, %v13708_v37  ;;  %v11611_v18 = vpop.f32.mrf.mxu0  ;;  %v3658_v47 = vld [vmem:[%s12653_s23 + $0x198] sm:$0xff]  ;;  %v3660_v24 = vld [vmem:[%s12653_s23 + $0x1a8] sm:$0xff]  ;;  %v4077_v49 = vpack.c.bf16 %v4050_v61, %v4049_v9 }
 0x202   : > { %v11561_v33 = vpop.f32.mrf.mxu1  ;;  %v3686_v31 = vpack.c.bf16 %v3658_v47, %v3657_v59  ;;  %v3687_v15 = vpack.c.bf16 %v3660_v24, %v3659_v21  ;;  %v3663_v59 = vld [vmem:[%s12653_s23 + $0x1c0] sm:$0xff] }
 0x203   : > { %v13966_v52 = vadd.f32 %v2735_v17, %v2436_v55  ;;  %v2438_v16 = vadd.f32 %v11561_v33, %v13711_v44  ;;  %v2738_v36 = vpop.f32.mrf.mxu0  ;;  %v4047_v44 = vld [vmem:[%s12653_s23 + $0x191] sm:$0xff] }
 0x204   : > { %v2348_v57 = vpop.f32.mrf.mxu1  ;;  %v4076_v11 = vpack.c.bf16 %v4048_v19, %v4047_v44  ;;  %v3664_v44 = vld [vmem:[%s12653_s23 + $0x1c8] sm:$0xff] }
 0x205   : > { %v13969_v62 = vadd.f32 %v11611_v18, %v2438_v16  ;;  %v11614_v37 = vpop.f32.mrf.mxu0  ;;  %11813 = vmatmul.mubr.msk.bf16.gmra.mxu0 %vm319_vm1, %v4074_v38  ;;  %v4052_v16 = vld [vmem:[%s12653_s23 + $0x1b9] sm:$0xff] }
 0x206   : > { %v11564_v43 = vpop.f32.mrf.mxu1  ;;  %11763 = vmatmul.mubr.msk.bf16.gmra.mxu1 %vm319_vm1, %v3684_v41  ;;  %11816 = vmatprep.mubr.msk.bf16.mxu0 %vm319_vm1, %v4075_v27  ;;  %v3661_v41 = vld [vmem:[%s12653_s23 + $0x1b0] sm:$0xff]  ;;  %v3662_v57 = vld [vmem:[%s12653_s23 + $0x1b8] sm:$0xff] }
 0x207   : > { %v2440_v35 = vadd.f32 %v11564_v43, %v13726_v32  ;;  %v2750_v63 = vpop.f32.mrf.mxu0  ;;  %11766 = vmatprep.mubr.msk.bf16.mxu1 %vm319_vm1, %v3685_v54  ;;  %v4051_v27 = vld [vmem:[%s12653_s23 + $0x1b1] sm:$0xff]  ;;  %v3688_v9 = vpack.c.bf16 %v3662_v57, %v3661_v41 }
 0x208   : > { %v2360_v25 = vpop.f32.mrf.mxu1  ;;  %v4078_v63 = vpack.c.bf16 %v4052_v16, %v4051_v27  ;;  %v4790_v41 = vld [vmem:[%s12653_s23 + $0x6c] sm:$0xff]  ;;  %v4399_v16 = vld [vmem:[%s12653_s23 + $0x62] sm:$0xff] }
 0x209   : > { %v13984_v17 = vadd.f32 %v11614_v37, %v2440_v35  ;;  %v11615_v10 = vpop.f32.mrf.mxu0  ;;  %v4054_v37 = vld [vmem:[%s12653_s23 + $0x1c9] sm:$0xff] }
 0x20a   : > { %v11565_v2 = vpop.f32.mrf.mxu1  ;;  %v3689_v10 = vpack.c.bf16 %v3664_v44, %v3663_v59 }
 0x20b   : > { %v2752_v32 = vpop.f32.mrf.mxu0 }
 0x20c   : > { %v2362_v55 = vpop.f32.mrf.mxu1 }
 0x20d   : > { %v2439_v18 = vadd.f32 %v2362_v55, %v13735_v20  ;;  %v11618_v38 = vpop.f32.mrf.mxu0  ;;  %11817 = vmatmul.mubr.msk.bf16.gmra.mxu0 %vm319_vm1, %v4076_v11  ;;  %v4053_v20 = vld [vmem:[%s12653_s23 + $0x1c1] sm:$0xff] }
 0x20e   : > { %v11568_v33 = vpop.f32.mrf.mxu1  ;;  %11767 = vmatmul.mubr.msk.bf16.gmra.mxu1 %vm319_vm1, %v3686_v31  ;;  %11820 = vmatprep.mubr.msk.bf16.mxu0 %vm319_vm1, %v4077_v49  ;;  %v4079_v61 = vpack.c.bf16 %v4054_v37, %v4053_v20 }
 0x20f   : > { %v13993_v36 = vadd.f32 %v2752_v32, %v2439_v18  ;;  %v2764_v54 = vpop.f32.mrf.mxu0  ;;  %11770 = vmatprep.mubr.msk.bf16.mxu1 %vm319_vm1, %v3687_v15  ;;  %v4055_v32 = vld [vmem:[%s12653_s23 + $0x1d1] sm:$0xff]  ;;  %v4056_v15 = vld [vmem:[%s12653_s23 + $0x1d9] sm:$0xff]  ;;  %v4789_v33 = vld [vmem:[%s12653_s23 + $0x64] sm:$0xff] }
 0x210   : > { %v2374_v43 = vpop.f32.mrf.mxu1 }
 0x211   : > { %v2441_v19 = vadd.f32 %v2374_v43, %v13744_v46  ;;  %v11619_v35 = vpop.f32.mrf.mxu0  ;;  %v4080_v43 = vpack.c.bf16 %v4056_v15, %v4055_v32  ;;  %v4404_v32 = vld [vmem:[%s12653_s23 + $0x8a] sm:$0xff] }
 0x212   : > { %v11569_v47 = vpop.f32.mrf.mxu1 }
 0x213   : > { %v14002_v25 = vadd.f32 %v2764_v54, %v2441_v19  ;;  %v2443_v21 = vadd.f32 %v11569_v47, %v13747_v26  ;;  %v2767_v24 = vpop.f32.mrf.mxu0  ;;  %v3665_v26 = vld [vmem:[%s12653_s23 + $0x1d0] sm:$0xff] }
 0x214   : > { %v2377_v11 = vpop.f32.mrf.mxu1  ;;  %v4400_v54 = vld [vmem:[%s12653_s23 + $0x6a] sm:$0xff] }
 0x215   : > { %v14005_v2 = vadd.f32 %v11619_v35, %v2443_v21  ;;  %v2442_v46 = vadd.f32 %v2377_v11, %v13756_v12  ;;  %v11622_v31 = vpop.f32.mrf.mxu0  ;;  %11821 = vmatmul.mubr.msk.bf16.gmra.mxu0 %vm319_vm1, %v4078_v63  ;;  %v3666_v12 = vld [vmem:[%s12653_s23 + $0x1d8] sm:$0xff]  ;;  %v4447_v47 = vpack.c.bf16 %v4400_v54, %v4399_v16  ;;  %v5716_v16 = vsel %vm392_vm0, %v13806_v3, 0 }
 0x216   : > { %v11572_v49 = vpop.f32.mrf.mxu1  ;;  %11771 = vmatmul.mubr.msk.bf16.gmra.mxu1 %vm319_vm1, %v3688_v9  ;;  %11824 = vmatprep.mubr.msk.bf16.mxu0 %vm319_vm1, %v4079_v61  ;;  %v3690_v44 = vpack.c.bf16 %v3666_v12, %v3665_v26  ;;  %v4403_v26 = vld [vmem:[%s12653_s23 + $0x82] sm:$0xff] }
 0x217   : > { %v14014_v55 = vadd.f32 %v2767_v24, %v2442_v46  ;;  %v2445_v18 = vadd.f32 %v11572_v49, %v13765_v0  ;;  %v2779_v38 = vpop.f32.mrf.mxu0  ;;  %11774 = vmatprep.mubr.msk.bf16.mxu1 %vm319_vm1, %v3689_v10  ;;  %v4837_v0 = vpack.c.bf16 %v4790_v41, %v4789_v33  ;;  %v4791_v24 = vld [vmem:[%s12653_s23 + $0x74] sm:$0xff]  ;;  %v4793_v12 = vld [vmem:[%s12653_s23 + $0x84] sm:$0xff]  ;;  %v4794_v33 = vld [vmem:[%s12653_s23 + $0x8c] sm:$0xff]  ;;  %v4449_v54 = vpack.c.bf16 %v4404_v32, %v4403_v26 }
 0x218   : > { %v2389_v27 = vpop.f32.mrf.mxu1  ;;  %v4401_v46 = vld [vmem:[%s12653_s23 + $0x72] sm:$0xff] }
 0x219   : > { %v14023_v57 = vadd.f32 %v11622_v31, %v2445_v18  ;;  %v2444_v20 = vadd.f32 %v2389_v27, %v13768_v48  ;;  %v11623_v37 = vpop.f32.mrf.mxu0  ;;  %v4402_v31 = vld [vmem:[%s12653_s23 + $0x7a] sm:$0xff] }
 0x21a   : > { %v11573_v59 = vpop.f32.mrf.mxu1  ;;  %v4448_v27 = vpack.c.bf16 %v4402_v31, %v4401_v46 }
 0x21b   : > { %v14026_v19 = vadd.f32 %v2779_v38, %v2444_v20  ;;  %v2446_v35 = vadd.f32 %v11573_v59, %v13771_v1  ;;  %v2782_v63 = vpop.f32.mrf.mxu0  ;;  %v4792_v1 = vld [vmem:[%s12653_s23 + $0x7c] sm:$0xff] }
 0x21c   : > { %v2392_v9 = vpop.f32.mrf.mxu1  ;;  %v4838_v38 = vpack.c.bf16 %v4792_v1, %v4791_v24  ;;  %v4796_v63 = vld [vmem:[%s12653_s23 + $0x9c] sm:$0xff]  ;;  %v4798_v24 = vld [vmem:[%s12653_s23 + $0xac] sm:$0xff] }
 0x21d   : > { %v14029_v61 = vadd.f32 %v11623_v37, %v2446_v35  ;;  %v11626_v48 = vpop.f32.mrf.mxu0  ;;  %11825 = vmatmul.mubr.msk.bf16.gmra.mxu0 %vm319_vm1, %v4080_v43  ;;  %v5326_v37 = vsel %vm392_vm0, %v13798_v42, 0  ;;  %v4839_v43 = vpack.c.bf16 %v4794_v33, %v4793_v12  ;;  %v14056_v35 = vld [vmem:[%s16356_s1 + $0x1e] sm:$0x3]  ;;  %v4795_v42 = vld [vmem:[%s12653_s23 + $0x94] sm:$0xff] }
 0x21e   : > { %v11576_v21 = vpop.f32.mrf.mxu1  ;;  %11775 = vmatmul.mubr.msk.bf16.gmra.mxu1 %vm319_vm1, %v3690_v44  ;;  %11880 = vmatprep.mubr.msk.bf16.mxu0 %vm319_vm1, %v4837_v0  ;;  %v4405_v0 = vld [vmem:[%s12653_s23 + $0x92] sm:$0xff] }
 0x21f   : > { %v2448_v10 = vadd.f32 %v11576_v21, %v13784_v39  ;;  %v2794_v11 = vpop.f32.mrf.mxu0  ;;  %11830 = vmatprep.mubr.msk.bf16.mxu1 %vm319_vm1, %v4447_v47  ;;  %v4797_v21 = vld [vmem:[%s12653_s23 + $0xa4] sm:$0xff] }
 0x220   : > { %v2404_v49 = vpop.f32.mrf.mxu1  ;;  %v4408_v11 = vld [vmem:[%s12653_s23 + $0xaa] sm:$0xff] }
 0x221   : > { %v14042_v15 = vadd.f32 %v11626_v48, %v2448_v10  ;;  %v11627_v18 = vpop.f32.mrf.mxu0  ;;  %v4406_v48 = vld [vmem:[%s12653_s23 + $0x9a] sm:$0xff]  ;;  %v4407_v10 = vld [vmem:[%s12653_s23 + $0xa2] sm:$0xff]  ;;  %v4840_v49 = vpack.c.bf16 %v4796_v63, %v4795_v42 }
 0x222   : > { %v11577_v41 = vpop.f32.mrf.mxu1  ;;  %v4450_v32 = vpack.c.bf16 %v4406_v48, %v4405_v0  ;;  %v4841_v18 = vpack.c.bf16 %v4798_v24, %v4797_v21  ;;  %v4801_v0 = vld [vmem:[%s12653_s23 + $0xc4] sm:$0xff] }
 0x223   : > { %v2796_v39 = vpop.f32.mrf.mxu0  ;;  %v4451_v41 = vpack.c.bf16 %v4408_v11, %v4407_v10  ;;  %v4411_v63 = vld [vmem:[%s12653_s23 + $0xc2] sm:$0xff] }
 0x224   : > { %v2406_v20 = vpop.f32.mrf.mxu1 }
 0x225   : > { %v2447_v59 = vadd.f32 %v2406_v20, %v13808_v50  ;;  %v11682_v44 = vpop.f32.mrf.mxu0  ;;  %11881 = vmatmul.mubr.msk.bf16.vlgmr.msra.gmra.mxu0 %vm319_vm1, %v4838_v38  ;;  %v14064_v50 = vld [vmem:[%s16356_s1 + $0x20] sm:$0x3]  ;;  %v4799_v20 = vld [vmem:[%s12653_s23 + $0xb4] sm:$0xff] }
 0x226   : > { %v11632_v3 = vpop.f32.mrf.mxu1  ;;  %11831 = vmatmul.mubr.msk.bf16.vlgmr.msra.gmra.mxu1 %vm319_vm1, %v4448_v27  ;;  %11979 = vmatpush3.bf16.msra.mxu0 %v5716_v16 }
 0x227   : > { %v14066_v47 = vadd.f32 %v2796_v39, %v2447_v59  ;;  %11929 = vmatpush3.bf16.msra.mxu1 %v5326_v37  ;;  %v3412_v9 = vpop.f32.mrf.mxu0  ;;  %11834 = vmatprep.mubr.msk.bf16.mxu1 %vm319_vm1, %v4449_v54  ;;  %v4800_v37 = vld [vmem:[%s12653_s23 + $0xbc] sm:$0xff]  ;;  %v4802_v3 = vld [vmem:[%s12653_s23 + $0xcc] sm:$0xff] }
 0x228   : > { %v3022_v1 = vpop.f32.mrf.mxu1  ;;  %11884 = vmatprep.mubr.msk.bf16.mxu0 %vm319_vm1, %v4839_v43  ;;  %12546 = vmatprep.subr.msk.bf16.mxu1 %vm392_vm0, %v14056_v35  ;;  %v4843_v11 = vpack.c.bf16 %v4802_v3, %v4801_v0 }
 0x229   : > { %v3197_v46 = vadd.f32 %v3022_v1, %v13822_v45  ;;  %v11683_v31 = vpop.f32.mrf.mxu0  ;;  %12547 = vmatprep.subr.msk.bf16.mxu0 %vm392_vm0, %v14064_v50  ;;  %v4842_v1 = vpack.c.bf16 %v4800_v37, %v4799_v20  ;;  %v4415_v37 = vld [vmem:[%s12653_s23 + $0xe2] sm:$0xff] }
 0x22a   : > { %v11633_v26 = vpop.f32.mrf.mxu1 }
 0x22b   : > { %v14080_v38 = vadd.f32 %v3412_v9, %v3197_v46  ;;  %v3199_v12 = vadd.f32 %v11633_v26, %v13825_v30  ;;  %v3415_v33 = vpop.f32.mrf.mxu0  ;;  %v4409_v30 = vld [vmem:[%s12653_s23 + $0xb2] sm:$0xff]  ;;  %v4412_v9 = vld [vmem:[%s12653_s23 + $0xca] sm:$0xff] }
 0x22c   : > { %v3025_v27 = vpop.f32.mrf.mxu1  ;;  %v4453_v26 = vpack.c.bf16 %v4412_v9, %v4411_v63 }
 0x22d   : > { %v14083_v45 = vadd.f32 %v11683_v31, %v3199_v12  ;;  %v3198_v39 = vadd.f32 %v3025_v27, %v13834_v34  ;;  %v11686_v16 = vpop.f32.mrf.mxu0  ;;  %11885 = vmatmul.mubr.msk.bf16.gmra.mxu0 %vm319_vm1, %v4840_v49  ;;  %v4410_v34 = vld [vmem:[%s12653_s23 + $0xba] sm:$0xff] }
 0x22e   : > { %v11636_v54 = vpop.f32.mrf.mxu1  ;;  %11835 = vmatmul.mubr.msk.bf16.gmra.mxu1 %vm319_vm1, %v4450_v32  ;;  %11888 = vmatprep.mubr.msk.bf16.mxu0 %vm319_vm1, %v4841_v18 }
 0x22f   : > { %v14092_v43 = vadd.f32 %v3415_v33, %v3198_v39  ;;  %v3201_v59 = vadd.f32 %v11636_v54, %v13843_v58  ;;  %v3427_v44 = vpop.f32.mrf.mxu0  ;;  %11838 = vmatprep.mubr.msk.bf16.mxu1 %vm319_vm1, %v4451_v41  ;;  %v4452_v58 = vpack.c.bf16 %v4410_v34, %v4409_v30  ;;  %v4413_v33 = vld [vmem:[%s12653_s23 + $0xd2] sm:$0xff]  ;;  %v4804_v41 = vld [vmem:[%s12653_s23 + $0xdc] sm:$0xff]  ;;  %v4805_v54 = vld [vmem:[%s12653_s23 + $0xe4] sm:$0xff] }
 0x230   : > { %v3037_v42 = vpop.f32.mrf.mxu1  ;;  %v4806_v30 = vld [vmem:[%s12653_s23 + $0xec] sm:$0xff] }
 0x231   : > { %v14101_v48 = vadd.f32 %v11686_v16, %v3201_v59  ;;  %v3200_v21 = vadd.f32 %v3037_v42, %v13846_v7  ;;  %v11687_v24 = vpop.f32.mrf.mxu0  ;;  %v4414_v16 = vld [vmem:[%s12653_s23 + $0xda] sm:$0xff]  ;;  %v4416_v59 = vld [vmem:[%s12653_s23 + $0xea] sm:$0xff]  ;;  %v4845_v63 = vpack.c.bf16 %v4806_v30, %v4805_v54 }
 0x232   : > { %v11637_v10 = vpop.f32.mrf.mxu1  ;;  %v4454_v42 = vpack.c.bf16 %v4414_v16, %v4413_v33  ;;  %v4455_v9 = vpack.c.bf16 %v4416_v59, %v4415_v37  ;;  %v4419_v33 = vld [vmem:[%s12653_s23 + $0x102] sm:$0xff] }
 0x233   : > { %v14104_v46 = vadd.f32 %v3427_v44, %v3200_v21  ;;  %v3202_v31 = vadd.f32 %v11637_v10, %v13849_v4  ;;  %v3430_v49 = vpop.f32.mrf.mxu0  ;;  %v4803_v4 = vld [vmem:[%s12653_s23 + $0xd4] sm:$0xff] }
 0x234   : > { %v3040_v32 = vpop.f32.mrf.mxu1  ;;  %v4844_v0 = vpack.c.bf16 %v4804_v41, %v4803_v4  ;;  %v4420_v4 = vld [vmem:[%s12653_s23 + $0x10a] sm:$0xff] }
 0x235   : > { %v14107_v18 = vadd.f32 %v11687_v24, %v3202_v31  ;;  %v11690_v7 = vpop.f32.mrf.mxu0  ;;  %11889 = vmatmul.mubr.msk.bf16.gmra.mxu0 %vm319_vm1, %v4842_v1  ;;  %v4808_v31 = vld [vmem:[%s12653_s23 + $0xfc] sm:$0xff] }
 0x236   : > { %v11640_v12 = vpop.f32.mrf.mxu1  ;;  %11839 = vmatmul.mubr.msk.bf16.gmra.mxu1 %vm319_vm1, %v4452_v58  ;;  %11892 = vmatprep.mubr.msk.bf16.mxu0 %vm319_vm1, %v4843_v11  ;;  %v4417_v58 = vld [vmem:[%s12653_s23 + $0xf2] sm:$0xff]  ;;  %v4418_v32 = vld [vmem:[%s12653_s23 + $0xfa] sm:$0xff] }
 0x237   : > { %v3204_v27 = vadd.f32 %v11640_v12, %v13864_v23  ;;  %v3442_v39 = vpop.f32.mrf.mxu0  ;;  %11842 = vmatprep.mubr.msk.bf16.mxu1 %vm319_vm1, %v4453_v26  ;;  %v4807_v11 = vld [vmem:[%s12653_s23 + $0xf4] sm:$0xff]  ;;  %v4456_v54 = vpack.c.bf16 %v4418_v32, %v4417_v58  ;;  %v4814_v58 = vld [vmem:[%s12653_s23 + $0x12c] sm:$0xff] }
 0x238   : > { %v3052_v20 = vpop.f32.mrf.mxu1  ;;  %v4846_v39 = vpack.c.bf16 %v4808_v31, %v4807_v11  ;;  %v4423_v31 = vld [vmem:[%s12653_s23 + $0x122] sm:$0xff] }
 0x239   : > { %v14122_v44 = vadd.f32 %v11690_v7, %v3204_v27  ;;  %v11691_v34 = vpop.f32.mrf.mxu0  ;;  %v4810_v7 = vld [vmem:[%s12653_s23 + $0x10c] sm:$0xff] }
 0x23a   : > { %v11641_v3 = vpop.f32.mrf.mxu1  ;;  %v4457_v34 = vpack.c.bf16 %v4420_v4, %v4419_v33 }
 0x23b   : > { %v3444_v23 = vpop.f32.mrf.mxu0 }
 0x23c   : > { %v3054_v21 = vpop.f32.mrf.mxu1 }
 0x23d   : > { %v3203_v24 = vadd.f32 %v3054_v21, %v13873_v56  ;;  %v11694_v1 = vpop.f32.mrf.mxu0  ;;  %11893 = vmatmul.mubr.msk.bf16.gmra.mxu0 %vm319_vm1, %v4844_v0  ;;  %v4809_v56 = vld [vmem:[%s12653_s23 + $0x104] sm:$0xff] }
 0x23e   : > { %v11644_v10 = vpop.f32.mrf.mxu1  ;;  %11843 = vmatmul.mubr.msk.bf16.gmra.mxu1 %vm319_vm1, %v4454_v42  ;;  %11896 = vmatprep.mubr.msk.bf16.mxu0 %vm319_vm1, %v4845_v63  ;;  %v4847_v30 = vpack.c.bf16 %v4810_v7, %v4809_v56 }
 0x23f   : > { %v14131_v49 = vadd.f32 %v3444_v23, %v3203_v24  ;;  %v3456_v26 = vpop.f32.mrf.mxu0  ;;  %11846 = vmatprep.mubr.msk.bf16.mxu1 %vm319_vm1, %v4455_v9  ;;  %v4811_v23 = vld [vmem:[%s12653_s23 + $0x114] sm:$0xff]  ;;  %v4812_v9 = vld [vmem:[%s12653_s23 + $0x11c] sm:$0xff]  ;;  %v4813_v10 = vld [vmem:[%s12653_s23 + $0x124] sm:$0xff] }
 0x240   : > { %v3066_v12 = vpop.f32.mrf.mxu1  ;;  %v4849_v4 = vpack.c.bf16 %v4814_v58, %v4813_v10 }
 0x241   : > { %v3205_v41 = vadd.f32 %v3066_v12, %v13882_v60  ;;  %v11695_v27 = vpop.f32.mrf.mxu0  ;;  %v4848_v12 = vpack.c.bf16 %v4812_v9, %v4811_v23  ;;  %v4427_v9 = vld [vmem:[%s12653_s23 + $0x142] sm:$0xff] }
 0x242   : > { %v11645_v16 = vpop.f32.mrf.mxu1 }
 0x243   : > { %v14140_v20 = vadd.f32 %v3456_v26, %v3205_v41  ;;  %v3207_v37 = vadd.f32 %v11645_v16, %v13885_v29  ;;  %v3459_v59 = vpop.f32.mrf.mxu0  ;;  %v4421_v29 = vld [vmem:[%s12653_s23 + $0x112] sm:$0xff]  ;;  %v4424_v26 = vld [vmem:[%s12653_s23 + $0x12a] sm:$0xff] }
 0x244   : > { %v3069_v0 = vpop.f32.mrf.mxu1  ;;  %v4459_v16 = vpack.c.bf16 %v4424_v26, %v4423_v31 }
 0x245   : > { %v14143_v3 = vadd.f32 %v11695_v27, %v3207_v37  ;;  %v3206_v60 = vadd.f32 %v3069_v0, %v13894_v14  ;;  %v11698_v42 = vpop.f32.mrf.mxu0  ;;  %11897 = vmatmul.mubr.msk.bf16.gmra.mxu0 %vm319_vm1, %v4846_v39  ;;  %v4422_v14 = vld [vmem:[%s12653_s23 + $0x11a] sm:$0xff] }
 0x246   : > { %v11648_v63 = vpop.f32.mrf.mxu1  ;;  %11847 = vmatmul.mubr.msk.bf16.gmra.mxu1 %vm319_vm1, %v4456_v54  ;;  %11900 = vmatprep.mubr.msk.bf16.mxu0 %vm319_vm1, %v4847_v30 }
 0x247   : > { %v14152_v21 = vadd.f32 %v3459_v59, %v3206_v60  ;;  %v3209_v24 = vadd.f32 %v11648_v63, %v13903_v51  ;;  %v3471_v1 = vpop.f32.mrf.mxu0  ;;  %11850 = vmatprep.mubr.msk.bf16.mxu1 %vm319_vm1, %v4457_v34  ;;  %v4458_v51 = vpack.c.bf16 %v4422_v14, %v4421_v29  ;;  %v4425_v59 = vld [vmem:[%s12653_s23 + $0x132] sm:$0xff]  ;;  %v4816_v34 = vld [vmem:[%s12653_s23 + $0x13c] sm:$0xff]  ;;  %v4817_v63 = vld [vmem:[%s12653_s23 + $0x144] sm:$0xff] }
 0x248   : > { %v3081_v11 = vpop.f32.mrf.mxu1  ;;  %v4818_v29 = vld [vmem:[%s12653_s23 + $0x14c] sm:$0xff] }
 0x249   : > { %v14161_v32 = vadd.f32 %v11698_v42, %v3209_v24  ;;  %v3208_v56 = vadd.f32 %v3081_v11, %v13906_v13  ;;  %v11699_v7 = vpop.f32.mrf.mxu0  ;;  %v4426_v42 = vld [vmem:[%s12653_s23 + $0x13a] sm:$0xff]  ;;  %v4428_v24 = vld [vmem:[%s12653_s23 + $0x14a] sm:$0xff]  ;;  %v4851_v31 = vpack.c.bf16 %v4818_v29, %v4817_v63 }
 0x24a   : > { %v11649_v33 = vpop.f32.mrf.mxu1  ;;  %v4460_v11 = vpack.c.bf16 %v4426_v42, %v4425_v59  ;;  %v4461_v26 = vpack.c.bf16 %v4428_v24, %v4427_v9  ;;  %v4431_v59 = vld [vmem:[%s12653_s23 + $0x162] sm:$0xff] }
 0x24b   : > { %v14164_v41 = vadd.f32 %v3471_v1, %v3208_v56  ;;  %v3210_v27 = vadd.f32 %v11649_v33, %v13909_v6  ;;  %v3474_v39 = vpop.f32.mrf.mxu0  ;;  %v4815_v6 = vld [vmem:[%s12653_s23 + $0x134] sm:$0xff] }
 0x24c   : > { %v3084_v54 = vpop.f32.mrf.mxu1  ;;  %v4850_v10 = vpack.c.bf16 %v4816_v34, %v4815_v6  ;;  %v4432_v6 = vld [vmem:[%s12653_s23 + $0x16a] sm:$0xff] }
 0x24d   : > { %v14167_v30 = vadd.f32 %v11699_v7, %v3210_v27  ;;  %v11702_v13 = vpop.f32.mrf.mxu0  ;;  %11901 = vmatmul.mubr.msk.bf16.gmra.mxu0 %vm319_vm1, %v4848_v12  ;;  %v4820_v27 = vld [vmem:[%s12653_s23 + $0x15c] sm:$0xff] }
 0x24e   : > { %v11652_v37 = vpop.f32.mrf.mxu1  ;;  %11851 = vmatmul.mubr.msk.bf16.gmra.mxu1 %vm319_vm1, %v4458_v51  ;;  %11904 = vmatprep.mubr.msk.bf16.mxu0 %vm319_vm1, %v4849_v4  ;;  %v4429_v51 = vld [vmem:[%s12653_s23 + $0x152] sm:$0xff]  ;;  %v4430_v54 = vld [vmem:[%s12653_s23 + $0x15a] sm:$0xff] }
 0x24f   : > { %v3212_v0 = vadd.f32 %v11652_v37, %v13924_v28  ;;  %v3486_v60 = vpop.f32.mrf.mxu0  ;;  %11854 = vmatprep.mubr.msk.bf16.mxu1 %vm319_vm1, %v4459_v16  ;;  %v4819_v4 = vld [vmem:[%s12653_s23 + $0x154] sm:$0xff]  ;;  %v4462_v63 = vpack.c.bf16 %v4430_v54, %v4429_v51  ;;  %v4826_v51 = vld [vmem:[%s12653_s23 + $0x18c] sm:$0xff] }
 0x250   : > { %v3096_v23 = vpop.f32.mrf.mxu1  ;;  %v4852_v60 = vpack.c.bf16 %v4820_v27, %v4819_v4  ;;  %v4435_v27 = vld [vmem:[%s12653_s23 + $0x182] sm:$0xff] }
 0x251   : > { %v14182_v1 = vadd.f32 %v11702_v13, %v3212_v0  ;;  %v11703_v14 = vpop.f32.mrf.mxu0  ;;  %v4822_v13 = vld [vmem:[%s12653_s23 + $0x16c] sm:$0xff] }
 0x252   : > { %v11653_v58 = vpop.f32.mrf.mxu1  ;;  %v4463_v14 = vpack.c.bf16 %v4432_v6, %v4431_v59 }
 0x253   : > { %v3488_v28 = vpop.f32.mrf.mxu0 }
 0x254   : > { %v3098_v56 = vpop.f32.mrf.mxu1 }
 0x255   : > { %v3211_v7 = vadd.f32 %v3098_v56, %v13933_v8  ;;  %v11706_v12 = vpop.f32.mrf.mxu0  ;;  %11905 = vmatmul.mubr.msk.bf16.gmra.mxu0 %vm319_vm1, %v4850_v10  ;;  %v4821_v8 = vld [vmem:[%s12653_s23 + $0x164] sm:$0xff] }
 0x256   : > { %v11656_v33 = vpop.f32.mrf.mxu1  ;;  %11855 = vmatmul.mubr.msk.bf16.gmra.mxu1 %vm319_vm1, %v4460_v11  ;;  %11908 = vmatprep.mubr.msk.bf16.mxu0 %vm319_vm1, %v4851_v31  ;;  %v4853_v29 = vpack.c.bf16 %v4822_v13, %v4821_v8 }
 0x257   : > { %v14191_v39 = vadd.f32 %v3488_v28, %v3211_v7  ;;  %v3500_v16 = vpop.f32.mrf.mxu0  ;;  %11858 = vmatprep.mubr.msk.bf16.mxu1 %vm319_vm1, %v4461_v26  ;;  %v4823_v28 = vld [vmem:[%s12653_s23 + $0x174] sm:$0xff]  ;;  %v4824_v26 = vld [vmem:[%s12653_s23 + $0x17c] sm:$0xff]  ;;  %v4825_v33 = vld [vmem:[%s12653_s23 + $0x184] sm:$0xff] }
 0x258   : > { %v3110_v37 = vpop.f32.mrf.mxu1  ;;  %v4855_v6 = vpack.c.bf16 %v4826_v51, %v4825_v33 }
 0x259   : > { %v3213_v34 = vadd.f32 %v3110_v37, %v13942_v53  ;;  %v11707_v0 = vpop.f32.mrf.mxu0  ;;  %v4854_v37 = vpack.c.bf16 %v4824_v26, %v4823_v28  ;;  %v4439_v26 = vld [vmem:[%s12653_s23 + $0x1a2] sm:$0xff] }
 0x25a   : > { %v11657_v42 = vpop.f32.mrf.mxu1 }
 0x25b   : > { %v14200_v23 = vadd.f32 %v3500_v16, %v3213_v34  ;;  %v3215_v9 = vadd.f32 %v11657_v42, %v13945_v22  ;;  %v3503_v24 = vpop.f32.mrf.mxu0  ;;  %v4433_v22 = vld [vmem:[%s12653_s23 + $0x172] sm:$0xff]  ;;  %v4436_v16 = vld [vmem:[%s12653_s23 + $0x18a] sm:$0xff] }
 0x25c   : > { %v3113_v10 = vpop.f32.mrf.mxu1  ;;  %v4465_v42 = vpack.c.bf16 %v4436_v16, %v4435_v27 }
 0x25d   : > { %v14203_v58 = vadd.f32 %v11707_v0, %v3215_v9  ;;  %v3214_v53 = vadd.f32 %v3113_v10, %v13954_v5  ;;  %v11710_v11 = vpop.f32.mrf.mxu0  ;;  %11909 = vmatmul.mubr.msk.bf16.gmra.mxu0 %vm319_vm1, %v4852_v60  ;;  %v4434_v5 = vld [vmem:[%s12653_s23 + $0x17a] sm:$0xff] }
 0x25e   : > { %v11660_v31 = vpop.f32.mrf.mxu1  ;;  %11859 = vmatmul.mubr.msk.bf16.gmra.mxu1 %vm319_vm1, %v4462_v63  ;;  %11912 = vmatprep.mubr.msk.bf16.mxu0 %vm319_vm1, %v4853_v29 }
 0x25f   : > { %v14212_v56 = vadd.f32 %v3503_v24, %v3214_v53  ;;  %v3217_v7 = vadd.f32 %v11660_v31, %v13963_v40  ;;  %v3515_v12 = vpop.f32.mrf.mxu0  ;;  %11862 = vmatprep.mubr.msk.bf16.mxu1 %vm319_vm1, %v4463_v14  ;;  %v4464_v40 = vpack.c.bf16 %v4434_v5, %v4433_v22  ;;  %v4437_v24 = vld [vmem:[%s12653_s23 + $0x192] sm:$0xff]  ;;  %v4828_v14 = vld [vmem:[%s12653_s23 + $0x19c] sm:$0xff]  ;;  %v4829_v31 = vld [vmem:[%s12653_s23 + $0x1a4] sm:$0xff] }
 0x260   : > { %v3125_v4 = vpop.f32.mrf.mxu1  ;;  %v4830_v22 = vld [vmem:[%s12653_s23 + $0x1ac] sm:$0xff] }
 0x261   : > { %v14221_v54 = vadd.f32 %v11710_v11, %v3217_v7  ;;  %v3216_v8 = vadd.f32 %v3125_v4, %v13966_v52  ;;  %v11711_v13 = vpop.f32.mrf.mxu0  ;;  %v4438_v11 = vld [vmem:[%s12653_s23 + $0x19a] sm:$0xff]  ;;  %v4440_v7 = vld [vmem:[%s12653_s23 + $0x1aa] sm:$0xff]  ;;  %v4857_v27 = vpack.c.bf16 %v4830_v22, %v4829_v31 }
 0x262   : > { %v11661_v59 = vpop.f32.mrf.mxu1  ;;  %v4466_v4 = vpack.c.bf16 %v4438_v11, %v4437_v24  ;;  %v4467_v16 = vpack.c.bf16 %v4440_v7, %v4439_v26  ;;  %v4443_v24 = vld [vmem:[%s12653_s23 + $0x1c2] sm:$0xff] }
 0x263   : > { %v14224_v34 = vadd.f32 %v3515_v12, %v3216_v8  ;;  %v3218_v0 = vadd.f32 %v11661_v59, %v13969_v62  ;;  %v3518_v60 = vpop.f32.mrf.mxu0  ;;  %v4827_v62 = vld [vmem:[%s12653_s23 + $0x194] sm:$0xff] }
 0x264   : > { %v3128_v63 = vpop.f32.mrf.mxu1  ;;  %v4856_v33 = vpack.c.bf16 %v4828_v14, %v4827_v62  ;;  %v4444_v62 = vld [vmem:[%s12653_s23 + $0x1ca] sm:$0xff] }
 0x265   : > { %v14227_v29 = vadd.f32 %v11711_v13, %v3218_v0  ;;  %v11714_v52 = vpop.f32.mrf.mxu0  ;;  %11913 = vmatmul.mubr.msk.bf16.gmra.mxu0 %vm319_vm1, %v4854_v37  ;;  %v4832_v0 = vld [vmem:[%s12653_s23 + $0x1bc] sm:$0xff] }
 0x266   : > { %v11664_v9 = vpop.f32.mrf.mxu1  ;;  %11863 = vmatmul.mubr.msk.bf16.gmra.mxu1 %vm319_vm1, %v4464_v40  ;;  %11916 = vmatprep.mubr.msk.bf16.mxu0 %vm319_vm1, %v4855_v6  ;;  %v4441_v40 = vld [vmem:[%s12653_s23 + $0x1b2] sm:$0xff]  ;;  %v4442_v63 = vld [vmem:[%s12653_s23 + $0x1ba] sm:$0xff] }
 0x267   : > { %v3220_v10 = vadd.f32 %v11664_v9, %v13984_v17  ;;  %v3530_v53 = vpop.f32.mrf.mxu0  ;;  %11866 = vmatprep.mubr.msk.bf16.mxu1 %vm319_vm1, %v4465_v42  ;;  %v4831_v6 = vld [vmem:[%s12653_s23 + $0x1b4] sm:$0xff]  ;;  %v4468_v31 = vpack.c.bf16 %v4442_v63, %v4441_v40 }
 0x268   : > { %v3140_v28 = vpop.f32.mrf.mxu1  ;;  %v4858_v53 = vpack.c.bf16 %v4832_v0, %v4831_v6  ;;  %v5570_v40 = vld [vmem:[%s12653_s23 + $0x6f] sm:$0xff]  ;;  %v5179_v0 = vld [vmem:[%s12653_s23 + $0x66] sm:$0xff] }
 0x269   : > { %v14242_v12 = vadd.f32 %v11714_v52, %v3220_v10  ;;  %v11715_v5 = vpop.f32.mrf.mxu0  ;;  %v4834_v52 = vld [vmem:[%s12653_s23 + $0x1cc] sm:$0xff] }
 0x26a   : > { %v11665_v51 = vpop.f32.mrf.mxu1  ;;  %v4469_v5 = vpack.c.bf16 %v4444_v62, %v4443_v24 }
 0x26b   : > { %v3532_v17 = vpop.f32.mrf.mxu0 }
 0x26c   : > { %v3142_v8 = vpop.f32.mrf.mxu1 }
 0x26d   : > { %v3219_v13 = vadd.f32 %v3142_v8, %v13993_v36  ;;  %v11718_v37 = vpop.f32.mrf.mxu0  ;;  %11917 = vmatmul.mubr.msk.bf16.gmra.mxu0 %vm319_vm1, %v4856_v33  ;;  %v4833_v36 = vld [vmem:[%s12653_s23 + $0x1c4] sm:$0xff] }
 0x26e   : > { %v11668_v59 = vpop.f32.mrf.mxu1  ;;  %11867 = vmatmul.mubr.msk.bf16.gmra.mxu1 %vm319_vm1, %v4466_v4  ;;  %11920 = vmatprep.mubr.msk.bf16.mxu0 %vm319_vm1, %v4857_v27  ;;  %v4859_v22 = vpack.c.bf16 %v4834_v52, %v4833_v36 }
 0x26f   : > { %v14251_v60 = vadd.f32 %v3532_v17, %v3219_v13  ;;  %v3544_v42 = vpop.f32.mrf.mxu0  ;;  %11870 = vmatprep.mubr.msk.bf16.mxu1 %vm319_vm1, %v4467_v16  ;;  %v4835_v17 = vld [vmem:[%s12653_s23 + $0x1d4] sm:$0xff]  ;;  %v4836_v16 = vld [vmem:[%s12653_s23 + $0x1dc] sm:$0xff]  ;;  %v5569_v59 = vld [vmem:[%s12653_s23 + $0x67] sm:$0xff] }
 0x270   : > { %v3154_v9 = vpop.f32.mrf.mxu1 }
 0x271   : > { %v3221_v14 = vadd.f32 %v3154_v9, %v14002_v25  ;;  %v11719_v10 = vpop.f32.mrf.mxu0  ;;  %v4860_v9 = vpack.c.bf16 %v4836_v16, %v4835_v17  ;;  %v5184_v17 = vld [vmem:[%s12653_s23 + $0x8e] sm:$0xff] }
 0x272   : > { %v11669_v11 = vpop.f32.mrf.mxu1 }
 0x273   : > { %v14260_v28 = vadd.f32 %v3544_v42, %v3221_v14  ;;  %v3223_v26 = vadd.f32 %v11669_v11, %v14005_v2  ;;  %v3547_v7 = vpop.f32.mrf.mxu0  ;;  %v4445_v2 = vld [vmem:[%s12653_s23 + $0x1d2] sm:$0xff] }
 0x274   : > { %v3157_v33 = vpop.f32.mrf.mxu1  ;;  %v5180_v42 = vld [vmem:[%s12653_s23 + $0x6e] sm:$0xff] }
 0x275   : > { %v14263_v51 = vadd.f32 %v11719_v10, %v3223_v26  ;;  %v3222_v25 = vadd.f32 %v3157_v33, %v14014_v55  ;;  %v11722_v4 = vpop.f32.mrf.mxu0  ;;  %11921 = vmatmul.mubr.msk.bf16.gmra.mxu0 %vm319_vm1, %v4858_v53  ;;  %v4446_v55 = vld [vmem:[%s12653_s23 + $0x1da] sm:$0xff]  ;;  %v5227_v11 = vpack.c.bf16 %v5180_v42, %v5179_v0  ;;  %v6496_v0 = vsel %vm392_vm0, %v14064_v50, 0 }
 0x276   : > { %v11672_v27 = vpop.f32.mrf.mxu1  ;;  %11871 = vmatmul.mubr.msk.bf16.gmra.mxu1 %vm319_vm1, %v4468_v31  ;;  %11924 = vmatprep.mubr.msk.bf16.mxu0 %vm319_vm1, %v4859_v22  ;;  %v4470_v62 = vpack.c.bf16 %v4446_v55, %v4445_v2  ;;  %v5183_v2 = vld [vmem:[%s12653_s23 + $0x86] sm:$0xff] }
 0x277   : > { %v14272_v8 = vadd.f32 %v3547_v7, %v3222_v25  ;;  %v3225_v13 = vadd.f32 %v11672_v27, %v14023_v57  ;;  %v3559_v37 = vpop.f32.mrf.mxu0  ;;  %11874 = vmatprep.mubr.msk.bf16.mxu1 %vm319_vm1, %v4469_v5  ;;  %v5617_v57 = vpack.c.bf16 %v5570_v40, %v5569_v59  ;;  %v5571_v7 = vld [vmem:[%s12653_s23 + $0x77] sm:$0xff]  ;;  %v5573_v55 = vld [vmem:[%s12653_s23 + $0x87] sm:$0xff]  ;;  %v5574_v59 = vld [vmem:[%s12653_s23 + $0x8f] sm:$0xff]  ;;  %v5229_v42 = vpack.c.bf16 %v5184_v17, %v5183_v2 }
 0x278   : > { %v3169_v6 = vpop.f32.mrf.mxu1  ;;  %v5181_v25 = vld [vmem:[%s12653_s23 + $0x76] sm:$0xff] }
 0x279   : > { %v14281_v63 = vadd.f32 %v11722_v4, %v3225_v13  ;;  %v3224_v36 = vadd.f32 %v3169_v6, %v14026_v19  ;;  %v11723_v52 = vpop.f32.mrf.mxu0  ;;  %v5182_v4 = vld [vmem:[%s12653_s23 + $0x7e] sm:$0xff] }
 0x27a   : > { %v11673_v24 = vpop.f32.mrf.mxu1  ;;  %v5228_v6 = vpack.c.bf16 %v5182_v4, %v5181_v25 }
 0x27b   : > { %v14284_v14 = vadd.f32 %v3559_v37, %v3224_v36  ;;  %v3226_v10 = vadd.f32 %v11673_v24, %v14029_v61  ;;  %v3562_v53 = vpop.f32.mrf.mxu0  ;;  %v5572_v61 = vld [vmem:[%s12653_s23 + $0x7f] sm:$0xff] }
 0x27c   : > { %v3172_v31 = vpop.f32.mrf.mxu1  ;;  %v5618_v37 = vpack.c.bf16 %v5572_v61, %v5571_v7  ;;  %v5576_v53 = vld [vmem:[%s12653_s23 + $0x9f] sm:$0xff]  ;;  %v5578_v7 = vld [vmem:[%s12653_s23 + $0xaf] sm:$0xff] }
 0x27d   : > { %v14287_v22 = vadd.f32 %v11723_v52, %v3226_v10  ;;  %v11726_v19 = vpop.f32.mrf.mxu0  ;;  %11925 = vmatmul.mubr.msk.bf16.gmra.mxu0 %vm319_vm1, %v4860_v9  ;;  %v6106_v52 = vsel %vm392_vm0, %v14056_v35, 0  ;;  %v5619_v9 = vpack.c.bf16 %v5574_v59, %v5573_v55  ;;  %v14314_v10 = vld [vmem:[%s16356_s1 + $0x22] sm:$0x3]  ;;  %v5575_v35 = vld [vmem:[%s12653_s23 + $0x97] sm:$0xff] }
 0x27e   : > { %v11676_v26 = vpop.f32.mrf.mxu1  ;;  %11875 = vmatmul.mubr.msk.bf16.gmra.mxu1 %vm319_vm1, %v4470_v62  ;;  %11980 = vmatprep.mubr.msk.bf16.mxu0 %vm319_vm1, %v5617_v57  ;;  %v5185_v57 = vld [vmem:[%s12653_s23 + $0x96] sm:$0xff] }
 0x27f   : > { %v3228_v5 = vadd.f32 %v11676_v26, %v14042_v15  ;;  %v3574_v33 = vpop.f32.mrf.mxu0  ;;  %11930 = vmatprep.mubr.msk.bf16.mxu1 %vm319_vm1, %v5227_v11  ;;  %v5577_v26 = vld [vmem:[%s12653_s23 + $0xa7] sm:$0xff] }
 0x280   : > { %v3184_v27 = vpop.f32.mrf.mxu1  ;;  %v5188_v33 = vld [vmem:[%s12653_s23 + $0xae] sm:$0xff] }
 0x281   : > { %v14300_v16 = vadd.f32 %v11726_v19, %v3228_v5  ;;  %v11727_v13 = vpop.f32.mrf.mxu0  ;;  %v5186_v19 = vld [vmem:[%s12653_s23 + $0x9e] sm:$0xff]  ;;  %v5187_v5 = vld [vmem:[%s12653_s23 + $0xa6] sm:$0xff]  ;;  %v5620_v27 = vpack.c.bf16 %v5576_v53, %v5575_v35 }
 0x282   : > { %v11677_v40 = vpop.f32.mrf.mxu1  ;;  %v5230_v17 = vpack.c.bf16 %v5186_v19, %v5185_v57  ;;  %v5621_v13 = vpack.c.bf16 %v5578_v7, %v5577_v26  ;;  %v5581_v57 = vld [vmem:[%s12653_s23 + $0xc7] sm:$0xff] }
 0x283   : > { %v3576_v15 = vpop.f32.mrf.mxu0  ;;  %v5231_v40 = vpack.c.bf16 %v5188_v33, %v5187_v5  ;;  %v5191_v53 = vld [vmem:[%s12653_s23 + $0xc6] sm:$0xff] }
 0x284   : > { %v3186_v36 = vpop.f32.mrf.mxu1 }
 0x285   : > { %v3227_v24 = vadd.f32 %v3186_v36, %v14066_v47  ;;  %v11782_v62 = vpop.f32.mrf.mxu0  ;;  %11981 = vmatmul.mubr.msk.bf16.vlgmr.msra.gmra.mxu0 %vm319_vm1, %v5618_v37  ;;  %v14322_v47 = vld [vmem:[%s16356_s1 + $0x24] sm:$0x3]  ;;  %v5579_v36 = vld [vmem:[%s12653_s23 + $0xb7] sm:$0xff] }
 0x286   : > { %v11732_v50 = vpop.f32.mrf.mxu1  ;;  %11931 = vmatmul.mubr.msk.bf16.vlgmr.msra.gmra.mxu1 %vm319_vm1, %v5228_v6  ;;  %12079 = vmatpush3.bf16.msra.mxu0 %v6496_v0 }
 0x287   : > { %v14324_v11 = vadd.f32 %v3576_v15, %v3227_v24  ;;  %12029 = vmatpush3.bf16.msra.mxu1 %v6106_v52  ;;  %v4192_v31 = vpop.f32.mrf.mxu0  ;;  %11934 = vmatprep.mubr.msk.bf16.mxu1 %vm319_vm1, %v5229_v42  ;;  %v5580_v52 = vld [vmem:[%s12653_s23 + $0xbf] sm:$0xff]  ;;  %v5582_v50 = vld [vmem:[%s12653_s23 + $0xcf] sm:$0xff] }
 0x288   : > { %v3802_v61 = vpop.f32.mrf.mxu1  ;;  %11984 = vmatprep.mubr.msk.bf16.mxu0 %vm319_vm1, %v5619_v9  ;;  %12548 = vmatprep.subr.msk.bf16.mxu1 %vm392_vm0, %v14314_v10  ;;  %v5623_v33 = vpack.c.bf16 %v5582_v50, %v5581_v57 }
 0x289   : > { %v3977_v25 = vadd.f32 %v3802_v61, %v14080_v38  ;;  %v11783_v4 = vpop.f32.mrf.mxu0  ;;  %12549 = vmatprep.subr.msk.bf16.mxu0 %vm392_vm0, %v14322_v47  ;;  %v5622_v61 = vpack.c.bf16 %v5580_v52, %v5579_v36  ;;  %v5195_v52 = vld [vmem:[%s12653_s23 + $0xe6] sm:$0xff] }
 0x28a   : > { %v11733_v2 = vpop.f32.mrf.mxu1 }
 0x28b   : > { %v14338_v37 = vadd.f32 %v4192_v31, %v3977_v25  ;;  %v3979_v55 = vadd.f32 %v11733_v2, %v14083_v45  ;;  %v4195_v59 = vpop.f32.mrf.mxu0  ;;  %v5189_v45 = vld [vmem:[%s12653_s23 + $0xb6] sm:$0xff]  ;;  %v5192_v31 = vld [vmem:[%s12653_s23 + $0xce] sm:$0xff] }
 0x28c   : > { %v3805_v6 = vpop.f32.mrf.mxu1  ;;  %v5233_v2 = vpack.c.bf16 %v5192_v31, %v5191_v53 }
 0x28d   : > { %v14341_v38 = vadd.f32 %v11783_v4, %v3979_v55  ;;  %v3978_v15 = vadd.f32 %v3805_v6, %v14092_v43  ;;  %v11786_v0 = vpop.f32.mrf.mxu0  ;;  %11985 = vmatmul.mubr.msk.bf16.gmra.mxu0 %vm319_vm1, %v5620_v27  ;;  %v5190_v43 = vld [vmem:[%s12653_s23 + $0xbe] sm:$0xff] }
 0x28e   : > { %v11736_v42 = vpop.f32.mrf.mxu1  ;;  %11935 = vmatmul.mubr.msk.bf16.gmra.mxu1 %vm319_vm1, %v5230_v17  ;;  %11988 = vmatprep.mubr.msk.bf16.mxu0 %vm319_vm1, %v5621_v13 }
 0x28f   : > { %v14350_v9 = vadd.f32 %v4195_v59, %v3978_v15  ;;  %v3981_v24 = vadd.f32 %v11736_v42, %v14101_v48  ;;  %v4207_v62 = vpop.f32.mrf.mxu0  ;;  %11938 = vmatprep.mubr.msk.bf16.mxu1 %vm319_vm1, %v5231_v40  ;;  %v5232_v48 = vpack.c.bf16 %v5190_v43, %v5189_v45  ;;  %v5193_v59 = vld [vmem:[%s12653_s23 + $0xd6] sm:$0xff]  ;;  %v5584_v40 = vld [vmem:[%s12653_s23 + $0xdf] sm:$0xff]  ;;  %v5585_v42 = vld [vmem:[%s12653_s23 + $0xe7] sm:$0xff] }
 0x290   : > { %v3817_v35 = vpop.f32.mrf.mxu1  ;;  %v5586_v45 = vld [vmem:[%s12653_s23 + $0xef] sm:$0xff] }
 0x291   : > { %v14359_v19 = vadd.f32 %v11786_v0, %v3981_v24  ;;  %v3980_v26 = vadd.f32 %v3817_v35, %v14104_v46  ;;  %v11787_v7 = vpop.f32.mrf.mxu0  ;;  %v5194_v0 = vld [vmem:[%s12653_s23 + $0xde] sm:$0xff]  ;;  %v5196_v24 = vld [vmem:[%s12653_s23 + $0xee] sm:$0xff]  ;;  %v5625_v53 = vpack.c.bf16 %v5586_v45, %v5585_v42 }
 0x292   : > { %v11737_v5 = vpop.f32.mrf.mxu1  ;;  %v5234_v35 = vpack.c.bf16 %v5194_v0, %v5193_v59  ;;  %v5235_v31 = vpack.c.bf16 %v5196_v24, %v5195_v52  ;;  %v5199_v59 = vld [vmem:[%s12653_s23 + $0x106] sm:$0xff] }
 0x293   : > { %v14362_v25 = vadd.f32 %v4207_v62, %v3980_v26  ;;  %v3982_v4 = vadd.f32 %v11737_v5, %v14107_v18  ;;  %v4210_v27 = vpop.f32.mrf.mxu0  ;;  %v5583_v18 = vld [vmem:[%s12653_s23 + $0xd7] sm:$0xff] }
 0x294   : > { %v3820_v17 = vpop.f32.mrf.mxu1  ;;  %v5624_v57 = vpack.c.bf16 %v5584_v40, %v5583_v18  ;;  %v5200_v18 = vld [vmem:[%s12653_s23 + $0x10e] sm:$0xff] }
 0x295   : > { %v14365_v13 = vadd.f32 %v11787_v7, %v3982_v4  ;;  %v11790_v46 = vpop.f32.mrf.mxu0  ;;  %11989 = vmatmul.mubr.msk.bf16.gmra.mxu0 %vm319_vm1, %v5622_v61  ;;  %v5588_v4 = vld [vmem:[%s12653_s23 + $0xff] sm:$0xff] }
 0x296   : > { %v11740_v55 = vpop.f32.mrf.mxu1  ;;  %11939 = vmatmul.mubr.msk.bf16.gmra.mxu1 %vm319_vm1, %v5232_v48  ;;  %11992 = vmatprep.mubr.msk.bf16.mxu0 %vm319_vm1, %v5623_v33  ;;  %v5197_v48 = vld [vmem:[%s12653_s23 + $0xf6] sm:$0xff]  ;;  %v5198_v17 = vld [vmem:[%s12653_s23 + $0xfe] sm:$0xff] }
 0x297   : > { %v3984_v6 = vadd.f32 %v11740_v55, %v14122_v44  ;;  %v4222_v15 = vpop.f32.mrf.mxu0  ;;  %11942 = vmatprep.mubr.msk.bf16.mxu1 %vm319_vm1, %v5233_v2  ;;  %v5587_v33 = vld [vmem:[%s12653_s23 + $0xf7] sm:$0xff]  ;;  %v5236_v42 = vpack.c.bf16 %v5198_v17, %v5197_v48  ;;  %v5594_v48 = vld [vmem:[%s12653_s23 + $0x12f] sm:$0xff] }
 0x298   : > { %v3832_v36 = vpop.f32.mrf.mxu1  ;;  %v5626_v15 = vpack.c.bf16 %v5588_v4, %v5587_v33  ;;  %v5203_v4 = vld [vmem:[%s12653_s23 + $0x126] sm:$0xff] }
 0x299   : > { %v14380_v62 = vadd.f32 %v11790_v46, %v3984_v6  ;;  %v11791_v43 = vpop.f32.mrf.mxu0  ;;  %v5590_v46 = vld [vmem:[%s12653_s23 + $0x10f] sm:$0xff] }
 0x29a   : > { %v11741_v50 = vpop.f32.mrf.mxu1  ;;  %v5237_v43 = vpack.c.bf16 %v5200_v18, %v5199_v59 }
 0x29b   : > { %v4224_v44 = vpop.f32.mrf.mxu0 }
 0x29c   : > { %v3834_v26 = vpop.f32.mrf.mxu1 }
 0x29d   : > { %v3983_v7 = vadd.f32 %v3834_v26, %v14131_v49  ;;  %v11794_v61 = vpop.f32.mrf.mxu0  ;;  %11993 = vmatmul.mubr.msk.bf16.gmra.mxu0 %vm319_vm1, %v5624_v57  ;;  %v5589_v49 = vld [vmem:[%s12653_s23 + $0x107] sm:$0xff] }
 0x29e   : > { %v11744_v5 = vpop.f32.mrf.mxu1  ;;  %11943 = vmatmul.mubr.msk.bf16.gmra.mxu1 %vm319_vm1, %v5234_v35  ;;  %11996 = vmatprep.mubr.msk.bf16.mxu0 %vm319_vm1, %v5625_v53  ;;  %v5627_v45 = vpack.c.bf16 %v5590_v46, %v5589_v49 }
 0x29f   : > { %v14389_v27 = vadd.f32 %v4224_v44, %v3983_v7  ;;  %v4236_v2 = vpop.f32.mrf.mxu0  ;;  %11946 = vmatprep.mubr.msk.bf16.mxu1 %vm319_vm1, %v5235_v31  ;;  %v5591_v44 = vld [vmem:[%s12653_s23 + $0x117] sm:$0xff]  ;;  %v5592_v31 = vld [vmem:[%s12653_s23 + $0x11f] sm:$0xff]  ;;  %v5593_v5 = vld [vmem:[%s12653_s23 + $0x127] sm:$0xff] }
 0x2a0   : > { %v3846_v55 = vpop.f32.mrf.mxu1  ;;  %v5629_v18 = vpack.c.bf16 %v5594_v48, %v5593_v5 }
 0x2a1   : > { %v3985_v40 = vadd.f32 %v3846_v55, %v14140_v20  ;;  %v11795_v6 = vpop.f32.mrf.mxu0  ;;  %v5628_v55 = vpack.c.bf16 %v5592_v31, %v5591_v44  ;;  %v5207_v31 = vld [vmem:[%s12653_s23 + $0x146] sm:$0xff] }
 0x2a2   : > { %v11745_v0 = vpop.f32.mrf.mxu1 }
 0x2a3   : > { %v14398_v36 = vadd.f32 %v4236_v2, %v3985_v40  ;;  %v3987_v52 = vadd.f32 %v11745_v0, %v14143_v3  ;;  %v4239_v24 = vpop.f32.mrf.mxu0  ;;  %v5201_v3 = vld [vmem:[%s12653_s23 + $0x116] sm:$0xff]  ;;  %v5204_v2 = vld [vmem:[%s12653_s23 + $0x12e] sm:$0xff] }
 0x2a4   : > { %v3849_v57 = vpop.f32.mrf.mxu1  ;;  %v5239_v0 = vpack.c.bf16 %v5204_v2, %v5203_v4 }
 0x2a5   : > { %v14401_v50 = vadd.f32 %v11795_v6, %v3987_v52  ;;  %v3986_v20 = vadd.f32 %v3849_v57, %v14152_v21  ;;  %v11798_v35 = vpop.f32.mrf.mxu0  ;;  %11997 = vmatmul.mubr.msk.bf16.gmra.mxu0 %vm319_vm1, %v5626_v15  ;;  %v5202_v21 = vld [vmem:[%s12653_s23 + $0x11e] sm:$0xff] }
 0x2a6   : > { %v11748_v53 = vpop.f32.mrf.mxu1  ;;  %11947 = vmatmul.mubr.msk.bf16.gmra.mxu1 %vm319_vm1, %v5236_v42  ;;  %12000 = vmatprep.mubr.msk.bf16.mxu0 %vm319_vm1, %v5627_v45 }
 0x2a7   : > { %v14410_v26 = vadd.f32 %v4239_v24, %v3986_v20  ;;  %v3989_v7 = vadd.f32 %v11748_v53, %v14161_v32  ;;  %v4251_v61 = vpop.f32.mrf.mxu0  ;;  %11950 = vmatprep.mubr.msk.bf16.mxu1 %vm319_vm1, %v5237_v43  ;;  %v5238_v32 = vpack.c.bf16 %v5202_v21, %v5201_v3  ;;  %v5205_v24 = vld [vmem:[%s12653_s23 + $0x136] sm:$0xff]  ;;  %v5596_v43 = vld [vmem:[%s12653_s23 + $0x13f] sm:$0xff]  ;;  %v5597_v53 = vld [vmem:[%s12653_s23 + $0x147] sm:$0xff] }
 0x2a8   : > { %v3861_v33 = vpop.f32.mrf.mxu1  ;;  %v5598_v3 = vld [vmem:[%s12653_s23 + $0x14f] sm:$0xff] }
 0x2a9   : > { %v14419_v17 = vadd.f32 %v11798_v35, %v3989_v7  ;;  %v3988_v49 = vadd.f32 %v3861_v33, %v14164_v41  ;;  %v11799_v46 = vpop.f32.mrf.mxu0  ;;  %v5206_v35 = vld [vmem:[%s12653_s23 + $0x13e] sm:$0xff]  ;;  %v5208_v7 = vld [vmem:[%s12653_s23 + $0x14e] sm:$0xff]  ;;  %v5631_v4 = vpack.c.bf16 %v5598_v3, %v5597_v53 }
 0x2aa   : > { %v11749_v59 = vpop.f32.mrf.mxu1  ;;  %v5240_v33 = vpack.c.bf16 %v5206_v35, %v5205_v24  ;;  %v5241_v2 = vpack.c.bf16 %v5208_v7, %v5207_v31  ;;  %v5211_v24 = vld [vmem:[%s12653_s23 + $0x166] sm:$0xff] }
 0x2ab   : > { %v14422_v40 = vadd.f32 %v4251_v61, %v3988_v49  ;;  %v3990_v6 = vadd.f32 %v11749_v59, %v14167_v30  ;;  %v4254_v15 = vpop.f32.mrf.mxu0  ;;  %v5595_v30 = vld [vmem:[%s12653_s23 + $0x137] sm:$0xff] }
 0x2ac   : > { %v3864_v42 = vpop.f32.mrf.mxu1  ;;  %v5630_v5 = vpack.c.bf16 %v5596_v43, %v5595_v30  ;;  %v5212_v30 = vld [vmem:[%s12653_s23 + $0x16e] sm:$0xff] }
 0x2ad   : > { %v14425_v45 = vadd.f32 %v11799_v46, %v3990_v6  ;;  %v11802_v41 = vpop.f32.mrf.mxu0  ;;  %12001 = vmatmul.mubr.msk.bf16.gmra.mxu0 %vm319_vm1, %v5628_v55  ;;  %v5600_v6 = vld [vmem:[%s12653_s23 + $0x15f] sm:$0xff] }
 0x2ae   : > { %v11752_v52 = vpop.f32.mrf.mxu1  ;;  %11951 = vmatmul.mubr.msk.bf16.gmra.mxu1 %vm319_vm1, %v5238_v32  ;;  %12004 = vmatprep.mubr.msk.bf16.mxu0 %vm319_vm1, %v5629_v18  ;;  %v5209_v32 = vld [vmem:[%s12653_s23 + $0x156] sm:$0xff]  ;;  %v5210_v42 = vld [vmem:[%s12653_s23 + $0x15e] sm:$0xff] }
 0x2af   : > { %v3992_v57 = vadd.f32 %v11752_v52, %v14182_v1  ;;  %v4266_v20 = vpop.f32.mrf.mxu0  ;;  %11954 = vmatprep.mubr.msk.bf16.mxu1 %vm319_vm1, %v5239_v0  ;;  %v5599_v18 = vld [vmem:[%s12653_s23 + $0x157] sm:$0xff]  ;;  %v5242_v53 = vpack.c.bf16 %v5210_v42, %v5209_v32  ;;  %v5606_v32 = vld [vmem:[%s12653_s23 + $0x18f] sm:$0xff] }
 0x2b0   : > { %v3876_v44 = vpop.f32.mrf.mxu1  ;;  %v5632_v20 = vpack.c.bf16 %v5600_v6, %v5599_v18  ;;  %v5215_v6 = vld [vmem:[%s12653_s23 + $0x186] sm:$0xff] }
 0x2b1   : > { %v14440_v61 = vadd.f32 %v11802_v41, %v3992_v57  ;;  %v11803_v21 = vpop.f32.mrf.mxu0  ;;  %v5602_v41 = vld [vmem:[%s12653_s23 + $0x16f] sm:$0xff] }
 0x2b2   : > { %v11753_v48 = vpop.f32.mrf.mxu1  ;;  %v5243_v21 = vpack.c.bf16 %v5212_v30, %v5211_v24 }
 0x2b3   : > { %v4268_v1 = vpop.f32.mrf.mxu0 }
 0x2b4   : > { %v3878_v49 = vpop.f32.mrf.mxu1 }
 0x2b5   : > { %v3991_v46 = vadd.f32 %v3878_v49, %v14191_v39  ;;  %v11806_v55 = vpop.f32.mrf.mxu0  ;;  %12005 = vmatmul.mubr.msk.bf16.gmra.mxu0 %vm319_vm1, %v5630_v5  ;;  %v5601_v39 = vld [vmem:[%s12653_s23 + $0x167] sm:$0xff] }
 0x2b6   : > { %v11756_v59 = vpop.f32.mrf.mxu1  ;;  %11955 = vmatmul.mubr.msk.bf16.gmra.mxu1 %vm319_vm1, %v5240_v33  ;;  %12008 = vmatprep.mubr.msk.bf16.mxu0 %vm319_vm1, %v5631_v4  ;;  %v5633_v3 = vpack.c.bf16 %v5602_v41, %v5601_v39 }
 0x2b7   : > { %v14449_v15 = vadd.f32 %v4268_v1, %v3991_v46  ;;  %v4280_v0 = vpop.f32.mrf.mxu0  ;;  %11958 = vmatprep.mubr.msk.bf16.mxu1 %vm319_vm1, %v5241_v2  ;;  %v5603_v1 = vld [vmem:[%s12653_s23 + $0x177] sm:$0xff]  ;;  %v5604_v2 = vld [vmem:[%s12653_s23 + $0x17f] sm:$0xff]  ;;  %v5605_v59 = vld [vmem:[%s12653_s23 + $0x187] sm:$0xff] }
 0x2b8   : > { %v3890_v52 = vpop.f32.mrf.mxu1  ;;  %v5635_v30 = vpack.c.bf16 %v5606_v32, %v5605_v59 }
 0x2b9   : > { %v3993_v43 = vadd.f32 %v3890_v52, %v14200_v23  ;;  %v11807_v57 = vpop.f32.mrf.mxu0  ;;  %v5634_v52 = vpack.c.bf16 %v5604_v2, %v5603_v1  ;;  %v5219_v2 = vld [vmem:[%s12653_s23 + $0x1a6] sm:$0xff] }
 0x2ba   : > { %v11757_v35 = vpop.f32.mrf.mxu1 }
 0x2bb   : > { %v14458_v44 = vadd.f32 %v4280_v0, %v3993_v43  ;;  %v3995_v31 = vadd.f32 %v11757_v35, %v14203_v58  ;;  %v4283_v7 = vpop.f32.mrf.mxu0  ;;  %v5213_v58 = vld [vmem:[%s12653_s23 + $0x176] sm:$0xff]  ;;  %v5216_v0 = vld [vmem:[%s12653_s23 + $0x18e] sm:$0xff] }
 0x2bc   : > { %v3893_v5 = vpop.f32.mrf.mxu1  ;;  %v5245_v35 = vpack.c.bf16 %v5216_v0, %v5215_v6 }
 0x2bd   : > { %v14461_v48 = vadd.f32 %v11807_v57, %v3995_v31  ;;  %v3994_v23 = vadd.f32 %v3893_v5, %v14212_v56  ;;  %v11810_v33 = vpop.f32.mrf.mxu0  ;;  %12009 = vmatmul.mubr.msk.bf16.gmra.mxu0 %vm319_vm1, %v5632_v20  ;;  %v5214_v56 = vld [vmem:[%s12653_s23 + $0x17e] sm:$0xff] }
 0x2be   : > { %v11760_v4 = vpop.f32.mrf.mxu1  ;;  %11959 = vmatmul.mubr.msk.bf16.gmra.mxu1 %vm319_vm1, %v5242_v53  ;;  %12012 = vmatprep.mubr.msk.bf16.mxu0 %vm319_vm1, %v5633_v3 }
 0x2bf   : > { %v14470_v49 = vadd.f32 %v4283_v7, %v3994_v23  ;;  %v3997_v46 = vadd.f32 %v11760_v4, %v14221_v54  ;;  %v4295_v55 = vpop.f32.mrf.mxu0  ;;  %11962 = vmatprep.mubr.msk.bf16.mxu1 %vm319_vm1, %v5243_v21  ;;  %v5244_v54 = vpack.c.bf16 %v5214_v56, %v5213_v58  ;;  %v5217_v7 = vld [vmem:[%s12653_s23 + $0x196] sm:$0xff]  ;;  %v5608_v21 = vld [vmem:[%s12653_s23 + $0x19f] sm:$0xff]  ;;  %v5609_v4 = vld [vmem:[%s12653_s23 + $0x1a7] sm:$0xff] }
 0x2c0   : > { %v3905_v18 = vpop.f32.mrf.mxu1  ;;  %v5610_v58 = vld [vmem:[%s12653_s23 + $0x1af] sm:$0xff] }
 0x2c1   : > { %v14479_v42 = vadd.f32 %v11810_v33, %v3997_v46  ;;  %v3996_v39 = vadd.f32 %v3905_v18, %v14224_v34  ;;  %v11811_v41 = vpop.f32.mrf.mxu0  ;;  %v5218_v33 = vld [vmem:[%s12653_s23 + $0x19e] sm:$0xff]  ;;  %v5220_v46 = vld [vmem:[%s12653_s23 + $0x1ae] sm:$0xff]  ;;  %v5637_v6 = vpack.c.bf16 %v5610_v58, %v5609_v4 }
 0x2c2   : > { %v11761_v24 = vpop.f32.mrf.mxu1  ;;  %v5246_v18 = vpack.c.bf16 %v5218_v33, %v5217_v7  ;;  %v5247_v0 = vpack.c.bf16 %v5220_v46, %v5219_v2  ;;  %v5223_v7 = vld [vmem:[%s12653_s23 + $0x1c6] sm:$0xff] }
 0x2c3   : > { %v14482_v43 = vadd.f32 %v4295_v55, %v3996_v39  ;;  %v3998_v57 = vadd.f32 %v11761_v24, %v14227_v29  ;;  %v4298_v20 = vpop.f32.mrf.mxu0  ;;  %v5607_v29 = vld [vmem:[%s12653_s23 + $0x197] sm:$0xff] }
 0x2c4   : > { %v3908_v53 = vpop.f32.mrf.mxu1  ;;  %v5636_v59 = vpack.c.bf16 %v5608_v21, %v5607_v29  ;;  %v5224_v29 = vld [vmem:[%s12653_s23 + $0x1ce] sm:$0xff] }
 0x2c5   : > { %v14485_v3 = vadd.f32 %v11811_v41, %v3998_v57  ;;  %v11814_v34 = vpop.f32.mrf.mxu0  ;;  %12013 = vmatmul.mubr.msk.bf16.gmra.mxu0 %vm319_vm1, %v5634_v52  ;;  %v5612_v57 = vld [vmem:[%s12653_s23 + $0x1bf] sm:$0xff] }
 0x2c6   : > { %v11764_v31 = vpop.f32.mrf.mxu1  ;;  %11963 = vmatmul.mubr.msk.bf16.gmra.mxu1 %vm319_vm1, %v5244_v54  ;;  %12016 = vmatprep.mubr.msk.bf16.mxu0 %vm319_vm1, %v5635_v30  ;;  %v5221_v54 = vld [vmem:[%s12653_s23 + $0x1b6] sm:$0xff]  ;;  %v5222_v53 = vld [vmem:[%s12653_s23 + $0x1be] sm:$0xff] }
 0x2c7   : > { %v4000_v5 = vadd.f32 %v11764_v31, %v14242_v12  ;;  %v4310_v23 = vpop.f32.mrf.mxu0  ;;  %11966 = vmatprep.mubr.msk.bf16.mxu1 %vm319_vm1, %v5245_v35  ;;  %v5611_v30 = vld [vmem:[%s12653_s23 + $0x1b7] sm:$0xff]  ;;  %v5248_v4 = vpack.c.bf16 %v5222_v53, %v5221_v54 }
 0x2c8   : > { %v3920_v1 = vpop.f32.mrf.mxu1  ;;  %v5638_v23 = vpack.c.bf16 %v5612_v57, %v5611_v30  ;;  %v6350_v54 = vld [vmem:[%s12653_s23 + $0x9a] sm:$0xff]  ;;  %v5959_v57 = vld [vmem:[%s12653_s23 + $0x68] sm:$0xff] }
 0x2c9   : > { %v14500_v55 = vadd.f32 %v11814_v34, %v4000_v5  ;;  %v11815_v56 = vpop.f32.mrf.mxu0  ;;  %v5614_v34 = vld [vmem:[%s12653_s23 + $0x1cf] sm:$0xff] }
 0x2ca   : > { %v11765_v32 = vpop.f32.mrf.mxu1  ;;  %v5249_v56 = vpack.c.bf16 %v5224_v29, %v5223_v7 }
 0x2cb   : > { %v4312_v12 = vpop.f32.mrf.mxu0 }
 0x2cc   : > { %v3922_v39 = vpop.f32.mrf.mxu1 }
 0x2cd   : > { %v3999_v41 = vadd.f32 %v3922_v39, %v14251_v60  ;;  %v11818_v52 = vpop.f32.mrf.mxu0  ;;  %12017 = vmatmul.mubr.msk.bf16.gmra.mxu0 %vm319_vm1, %v5636_v59  ;;  %v5613_v60 = vld [vmem:[%s12653_s23 + $0x1c7] sm:$0xff] }
 0x2ce   : > { %v11768_v24 = vpop.f32.mrf.mxu1  ;;  %11967 = vmatmul.mubr.msk.bf16.gmra.mxu1 %vm319_vm1, %v5246_v18  ;;  %12020 = vmatprep.mubr.msk.bf16.mxu0 %vm319_vm1, %v5637_v6  ;;  %v5639_v58 = vpack.c.bf16 %v5614_v34, %v5613_v60 }
 0x2cf   : > { %v14509_v20 = vadd.f32 %v4312_v12, %v3999_v41  ;;  %v4324_v35 = vpop.f32.mrf.mxu0  ;;  %11970 = vmatprep.mubr.msk.bf16.mxu1 %vm319_vm1, %v5247_v0  ;;  %v5615_v12 = vld [vmem:[%s12653_s23 + $0x1d7] sm:$0xff]  ;;  %v5616_v0 = vld [vmem:[%s12653_s23 + $0x1df] sm:$0xff] }
 0x2d0   : > { %v3934_v31 = vpop.f32.mrf.mxu1  ;;  %v6349_v24 = vld [vmem:[%s12653_s23 + $0x92] sm:$0xff] }
 0x2d1   : > { %v4001_v21 = vadd.f32 %v3934_v31, %v14260_v28  ;;  %v11819_v5 = vpop.f32.mrf.mxu0  ;;  %v5640_v31 = vpack.c.bf16 %v5616_v0, %v5615_v12  ;;  %v5964_v12 = vld [vmem:[%s12653_s23 + $0x90] sm:$0xff] }
 0x2d2   : > { %v11769_v33 = vpop.f32.mrf.mxu1 }
 0x2d3   : > { %v14518_v1 = vadd.f32 %v4324_v35, %v4001_v21  ;;  %v4003_v2 = vadd.f32 %v11769_v33, %v14263_v51  ;;  %v4327_v46 = vpop.f32.mrf.mxu0  ;;  %v5225_v51 = vld [vmem:[%s12653_s23 + $0x1d6] sm:$0xff] }
 0x2d4   : > { %v3937_v59 = vpop.f32.mrf.mxu1  ;;  %v5960_v35 = vld [vmem:[%s12653_s23 + $0x70] sm:$0xff] }
 0x2d5   : > { %v14521_v32 = vadd.f32 %v11819_v5, %v4003_v2  ;;  %v4002_v28 = vadd.f32 %v3937_v59, %v14272_v8  ;;  %v11822_v18 = vpop.f32.mrf.mxu0  ;;  %12021 = vmatmul.mubr.msk.bf16.gmra.mxu0 %vm319_vm1, %v5638_v23  ;;  %v5226_v8 = vld [vmem:[%s12653_s23 + $0x1de] sm:$0xff]  ;;  %v6007_v33 = vpack.c.bf16 %v5960_v35, %v5959_v57  ;;  %v7276_v57 = vsel %vm392_vm0, %v14322_v47, 0 }
 0x2d6   : > { %v11772_v6 = vpop.f32.mrf.mxu1  ;;  %11971 = vmatmul.mubr.msk.bf16.gmra.mxu1 %vm319_vm1, %v5248_v4  ;;  %12024 = vmatprep.mubr.msk.bf16.mxu0 %vm319_vm1, %v5639_v58  ;;  %v5250_v29 = vpack.c.bf16 %v5226_v8, %v5225_v51  ;;  %v5963_v51 = vld [vmem:[%s12653_s23 + $0x88] sm:$0xff]  ;;  %v6353_v8 = vld [vmem:[%s12653_s23 + $0xb2] sm:$0xff] }
 0x2d7   : > { %v14530_v39 = vadd.f32 %v4327_v46, %v4002_v28  ;;  %v4005_v41 = vadd.f32 %v11772_v6, %v14281_v63  ;;  %v4339_v52 = vpop.f32.mrf.mxu0  ;;  %11974 = vmatprep.mubr.msk.bf16.mxu1 %vm319_vm1, %v5249_v56  ;;  %v6397_v63 = vpack.c.bf16 %v6350_v54, %v6349_v24  ;;  %v6351_v46 = vld [vmem:[%s12653_s23 + $0xa2] sm:$0xff]  ;;  %v5961_v28 = vld [vmem:[%s12653_s23 + $0x78] sm:$0xff]  ;;  %v6009_v35 = vpack.c.bf16 %v5964_v12, %v5963_v51 }
 0x2d8   : > { %v3949_v30 = vpop.f32.mrf.mxu1  ;;  %v6354_v24 = vld [vmem:[%s12653_s23 + $0xba] sm:$0xff] }
 0x2d9   : > { %v14539_v53 = vadd.f32 %v11822_v18, %v4005_v41  ;;  %v4004_v60 = vadd.f32 %v3949_v30, %v14284_v14  ;;  %v11823_v34 = vpop.f32.mrf.mxu0  ;;  %v5962_v18 = vld [vmem:[%s12653_s23 + $0x80] sm:$0xff] }
 0x2da   : > { %v11773_v7 = vpop.f32.mrf.mxu1  ;;  %v6008_v30 = vpack.c.bf16 %v5962_v18, %v5961_v28 }
 0x2db   : > { %v14542_v21 = vadd.f32 %v4339_v52, %v4004_v60  ;;  %v4006_v5 = vadd.f32 %v11773_v7, %v14287_v22  ;;  %v4342_v23 = vpop.f32.mrf.mxu0  ;;  %v6352_v22 = vld [vmem:[%s12653_s23 + $0xaa] sm:$0xff] }
 0x2dc   : > { %v3952_v4 = vpop.f32.mrf.mxu1  ;;  %v6398_v52 = vpack.c.bf16 %v6352_v22, %v6351_v46  ;;  %v6356_v23 = vld [vmem:[%s12653_s23 + $0xca] sm:$0xff]  ;;  %v6358_v46 = vld [vmem:[%s12653_s23 + $0xda] sm:$0xff] }
 0x2dd   : > { %v14545_v58 = vadd.f32 %v11823_v34, %v4006_v5  ;;  %v11826_v14 = vpop.f32.mrf.mxu0  ;;  %12025 = vmatmul.mubr.msk.bf16.gmra.mxu0 %vm319_vm1, %v5640_v31  ;;  %v6886_v34 = vsel %vm392_vm0, %v14314_v10, 0  ;;  %v6399_v31 = vpack.c.bf16 %v6354_v24, %v6353_v8  ;;  %v14572_v5 = vld [vmem:[%s16356_s1 + $0x26] sm:$0x3] }
 0x2de   : > { %v11776_v2 = vpop.f32.mrf.mxu1  ;;  %11975 = vmatmul.mubr.msk.bf16.gmra.mxu1 %vm319_vm1, %v5250_v29  ;;  %12080 = vmatprep.mubr.msk.bf16.mxu0 %vm319_vm1, %v6397_v63  ;;  %v5965_v63 = vld [vmem:[%s12653_s23 + $0x98] sm:$0xff]  ;;  %v6355_v10 = vld [vmem:[%s12653_s23 + $0xc2] sm:$0xff] }
 0x2df   : > { %v4008_v56 = vadd.f32 %v11776_v2, %v14300_v16  ;;  %v4354_v59 = vpop.f32.mrf.mxu0  ;;  %12030 = vmatprep.mubr.msk.bf16.mxu1 %vm319_vm1, %v6007_v33  ;;  %v6357_v2 = vld [vmem:[%s12653_s23 + $0xd2] sm:$0xff] }
 0x2e0   : > { %v3964_v6 = vpop.f32.mrf.mxu1  ;;  %v5968_v59 = vld [vmem:[%s12653_s23 + $0xb0] sm:$0xff] }
 0x2e1   : > { %v14558_v0 = vadd.f32 %v11826_v14, %v4008_v56  ;;  %v11827_v41 = vpop.f32.mrf.mxu0  ;;  %v5966_v14 = vld [vmem:[%s12653_s23 + $0xa0] sm:$0xff]  ;;  %v5967_v56 = vld [vmem:[%s12653_s23 + $0xa8] sm:$0xff]  ;;  %v6400_v6 = vpack.c.bf16 %v6356_v23, %v6355_v10 }
 0x2e2   : > { %v11777_v54 = vpop.f32.mrf.mxu1  ;;  %v6010_v12 = vpack.c.bf16 %v5966_v14, %v5965_v63  ;;  %v6401_v41 = vpack.c.bf16 %v6358_v46, %v6357_v2  ;;  %v6361_v63 = vld [vmem:[%s12653_s23 + $0xf2] sm:$0xff]  ;;  %v5971_v23 = vld [vmem:[%s12653_s23 + $0xc8] sm:$0xff] }
 0x2e3   : > { %v4356_v16 = vpop.f32.mrf.mxu0  ;;  %v6011_v54 = vpack.c.bf16 %v5968_v59, %v5967_v56 }
 0x2e4   : > { %v3966_v60 = vpop.f32.mrf.mxu1 }
 0x2e5   : > { %v4007_v7 = vadd.f32 %v3966_v60, %v14324_v11  ;;  %v11882_v29 = vpop.f32.mrf.mxu0  ;;  %12081 = vmatmul.mubr.msk.bf16.vlgmr.msra.gmra.mxu0 %vm319_vm1, %v6398_v52  ;;  %v14580_v11 = vld [vmem:[%s16356_s1 + $0x28] sm:$0x3] }
 0x2e6   : > { %v11832_v47 = vpop.f32.mrf.mxu1  ;;  %12031 = vmatmul.mubr.msk.bf16.vlgmr.msra.gmra.mxu1 %vm319_vm1, %v6008_v30  ;;  %12179 = vmatpush3.bf16.msra.mxu0 %v7276_v57  ;;  %v6359_v60 = vld [vmem:[%s12653_s23 + $0xe2] sm:$0xff] }
 0x2e7   : > { %v14582_v33 = vadd.f32 %v4356_v16, %v4007_v7  ;;  %12129 = vmatpush3.bf16.msra.mxu1 %v6886_v34  ;;  %v4972_v4 = vpop.f32.mrf.mxu0  ;;  %12034 = vmatprep.mubr.msk.bf16.mxu1 %vm319_vm1, %v6009_v35  ;;  %v6360_v34 = vld [vmem:[%s12653_s23 + $0xea] sm:$0xff]  ;;  %v6362_v47 = vld [vmem:[%s12653_s23 + $0xfa] sm:$0xff] }
 0x2e8   : > { %v4582_v22 = vpop.f32.mrf.mxu1  ;;  %12084 = vmatprep.mubr.msk.bf16.mxu0 %vm319_vm1, %v6399_v31  ;;  %12550 = vmatprep.subr.msk.bf16.mxu1 %vm392_vm0, %v14572_v5  ;;  %v6403_v59 = vpack.c.bf16 %v6362_v47, %v6361_v63 }
 0x2e9   : > { %v4757_v28 = vadd.f32 %v4582_v22, %v14338_v37  ;;  %v11883_v18 = vpop.f32.mrf.mxu0  ;;  %12551 = vmatprep.subr.msk.bf16.mxu0 %vm392_vm0, %v14580_v11  ;;  %v6402_v22 = vpack.c.bf16 %v6360_v34, %v6359_v60  ;;  %v5975_v34 = vld [vmem:[%s12653_s23 + $0xe8] sm:$0xff] }
 0x2ea   : > { %v11833_v51 = vpop.f32.mrf.mxu1 }
 0x2eb   : > { %v14596_v52 = vadd.f32 %v4972_v4, %v4757_v28  ;;  %v4759_v8 = vadd.f32 %v11833_v51, %v14341_v38  ;;  %v4975_v24 = vpop.f32.mrf.mxu0  ;;  %v5969_v38 = vld [vmem:[%s12653_s23 + $0xb8] sm:$0xff]  ;;  %v5972_v4 = vld [vmem:[%s12653_s23 + $0xd0] sm:$0xff] }
 0x2ec   : > { %v4585_v30 = vpop.f32.mrf.mxu1  ;;  %v6013_v51 = vpack.c.bf16 %v5972_v4, %v5971_v23 }
 0x2ed   : > { %v14599_v37 = vadd.f32 %v11883_v18, %v4759_v8  ;;  %v4758_v16 = vadd.f32 %v4585_v30, %v14350_v9  ;;  %v11886_v57 = vpop.f32.mrf.mxu0  ;;  %12085 = vmatmul.mubr.msk.bf16.gmra.mxu0 %vm319_vm1, %v6400_v6  ;;  %v5970_v9 = vld [vmem:[%s12653_s23 + $0xc0] sm:$0xff] }
 0x2ee   : > { %v11836_v35 = vpop.f32.mrf.mxu1  ;;  %12035 = vmatmul.mubr.msk.bf16.gmra.mxu1 %vm319_vm1, %v6010_v12  ;;  %12088 = vmatprep.mubr.msk.bf16.mxu0 %vm319_vm1, %v6401_v41 }
 0x2ef   : > { %v14608_v31 = vadd.f32 %v4975_v24, %v4758_v16  ;;  %v4761_v7 = vadd.f32 %v11836_v35, %v14359_v19  ;;  %v4987_v29 = vpop.f32.mrf.mxu0  ;;  %12038 = vmatprep.mubr.msk.bf16.mxu1 %vm319_vm1, %v6011_v54  ;;  %v6012_v19 = vpack.c.bf16 %v5970_v9, %v5969_v38  ;;  %v5973_v24 = vld [vmem:[%s12653_s23 + $0xd8] sm:$0xff]  ;;  %v6364_v54 = vld [vmem:[%s12653_s23 + $0x10a] sm:$0xff] }
 0x2f0   : > { %v4597_v10 = vpop.f32.mrf.mxu1  ;;  %v6365_v35 = vld [vmem:[%s12653_s23 + $0x112] sm:$0xff]  ;;  %v6366_v38 = vld [vmem:[%s12653_s23 + $0x11a] sm:$0xff] }
 0x2f1   : > { %v14617_v14 = vadd.f32 %v11886_v57, %v4761_v7  ;;  %v4760_v2 = vadd.f32 %v4597_v10, %v14362_v25  ;;  %v11887_v46 = vpop.f32.mrf.mxu0  ;;  %v5974_v57 = vld [vmem:[%s12653_s23 + $0xe0] sm:$0xff]  ;;  %v5976_v7 = vld [vmem:[%s12653_s23 + $0xf0] sm:$0xff]  ;;  %v6405_v23 = vpack.c.bf16 %v6366_v38, %v6365_v35 }
 0x2f2   : > { %v11837_v56 = vpop.f32.mrf.mxu1  ;;  %v6014_v10 = vpack.c.bf16 %v5974_v57, %v5973_v24  ;;  %v6015_v4 = vpack.c.bf16 %v5976_v7, %v5975_v34  ;;  %v5979_v24 = vld [vmem:[%s12653_s23 + $0x108] sm:$0xff] }
 0x2f3   : > { %v14620_v28 = vadd.f32 %v4987_v29, %v4760_v2  ;;  %v4762_v18 = vadd.f32 %v11837_v56, %v14365_v13  ;;  %v4990_v6 = vpop.f32.mrf.mxu0  ;;  %v6363_v13 = vld [vmem:[%s12653_s23 + $0x102] sm:$0xff] }
 0x2f4   : > { %v4600_v12 = vpop.f32.mrf.mxu1  ;;  %v6404_v63 = vpack.c.bf16 %v6364_v54, %v6363_v13  ;;  %v5980_v13 = vld [vmem:[%s12653_s23 + $0x110] sm:$0xff] }
 0x2f5   : > { %v14623_v41 = vadd.f32 %v11887_v46, %v4762_v18  ;;  %v11890_v25 = vpop.f32.mrf.mxu0  ;;  %12089 = vmatmul.mubr.msk.bf16.gmra.mxu0 %vm319_vm1, %v6402_v22  ;;  %v6368_v18 = vld [vmem:[%s12653_s23 + $0x12a] sm:$0xff]  ;;  %v5978_v12 = vld [vmem:[%s12653_s23 + $0x100] sm:$0xff] }
 0x2f6   : > { %v11840_v8 = vpop.f32.mrf.mxu1  ;;  %12039 = vmatmul.mubr.msk.bf16.gmra.mxu1 %vm319_vm1, %v6012_v19  ;;  %12092 = vmatprep.mubr.msk.bf16.mxu0 %vm319_vm1, %v6403_v59  ;;  %v5977_v19 = vld [vmem:[%s12653_s23 + $0xf8] sm:$0xff]  ;;  %v6367_v59 = vld [vmem:[%s12653_s23 + $0x122] sm:$0xff] }
 0x2f7   : > { %v4764_v30 = vadd.f32 %v11840_v8, %v14380_v62  ;;  %v5002_v16 = vpop.f32.mrf.mxu0  ;;  %12042 = vmatprep.mubr.msk.bf16.mxu1 %vm319_vm1, %v6013_v51  ;;  %v6016_v35 = vpack.c.bf16 %v5978_v12, %v5977_v19  ;;  %v6374_v19 = vld [vmem:[%s12653_s23 + $0x15a] sm:$0xff] }
 0x2f8   : > { %v4612_v60 = vpop.f32.mrf.mxu1  ;;  %v6406_v16 = vpack.c.bf16 %v6368_v18, %v6367_v59  ;;  %v5983_v18 = vld [vmem:[%s12653_s23 + $0x128] sm:$0xff] }
 0x2f9   : > { %v14638_v29 = vadd.f32 %v11890_v25, %v4764_v30  ;;  %v11891_v9 = vpop.f32.mrf.mxu0  ;;  %v6370_v25 = vld [vmem:[%s12653_s23 + $0x13a] sm:$0xff] }
 0x2fa   : > { %v11841_v47 = vpop.f32.mrf.mxu1  ;;  %v6017_v9 = vpack.c.bf16 %v5980_v13, %v5979_v24 }
 0x2fb   : > { %v5004_v62 = vpop.f32.mrf.mxu0 }
 0x2fc   : > { %v4614_v2 = vpop.f32.mrf.mxu1 }
 0x2fd   : > { %v4763_v46 = vadd.f32 %v4614_v2, %v14389_v27  ;;  %v11894_v22 = vpop.f32.mrf.mxu0  ;;  %12093 = vmatmul.mubr.msk.bf16.gmra.mxu0 %vm319_vm1, %v6404_v63  ;;  %v6369_v27 = vld [vmem:[%s12653_s23 + $0x132] sm:$0xff] }
 0x2fe   : > { %v11844_v56 = vpop.f32.mrf.mxu1  ;;  %12043 = vmatmul.mubr.msk.bf16.gmra.mxu1 %vm319_vm1, %v6014_v10  ;;  %12096 = vmatprep.mubr.msk.bf16.mxu0 %vm319_vm1, %v6405_v23  ;;  %v6407_v38 = vpack.c.bf16 %v6370_v25, %v6369_v27 }
 0x2ff   : > { %v14647_v6 = vadd.f32 %v5004_v62, %v4763_v46  ;;  %v5016_v51 = vpop.f32.mrf.mxu0  ;;  %12046 = vmatprep.mubr.msk.bf16.mxu1 %vm319_vm1, %v6015_v4  ;;  %v6371_v62 = vld [vmem:[%s12653_s23 + $0x142] sm:$0xff]  ;;  %v6372_v4 = vld [vmem:[%s12653_s23 + $0x14a] sm:$0xff]  ;;  %v6373_v56 = vld [vmem:[%s12653_s23 + $0x152] sm:$0xff] }
 0x300   : > { %v4626_v8 = vpop.f32.mrf.mxu1  ;;  %v6409_v13 = vpack.c.bf16 %v6374_v19, %v6373_v56 }
 0x301   : > { %v4765_v54 = vadd.f32 %v4626_v8, %v14398_v36  ;;  %v11895_v30 = vpop.f32.mrf.mxu0  ;;  %v6408_v8 = vpack.c.bf16 %v6372_v4, %v6371_v62  ;;  %v5987_v4 = vld [vmem:[%s12653_s23 + $0x148] sm:$0xff] }
 0x302   : > { %v11845_v57 = vpop.f32.mrf.mxu1 }
 0x303   : > { %v14656_v60 = vadd.f32 %v5016_v51, %v4765_v54  ;;  %v4767_v34 = vadd.f32 %v11845_v57, %v14401_v50  ;;  %v5019_v7 = vpop.f32.mrf.mxu0  ;;  %v5981_v50 = vld [vmem:[%s12653_s23 + $0x118] sm:$0xff]  ;;  %v5984_v51 = vld [vmem:[%s12653_s23 + $0x130] sm:$0xff] }
 0x304   : > { %v4629_v63 = vpop.f32.mrf.mxu1  ;;  %v6019_v57 = vpack.c.bf16 %v5984_v51, %v5983_v18 }
 0x305   : > { %v14659_v47 = vadd.f32 %v11895_v30, %v4767_v34  ;;  %v4766_v36 = vadd.f32 %v4629_v63, %v14410_v26  ;;  %v11898_v10 = vpop.f32.mrf.mxu0  ;;  %12097 = vmatmul.mubr.msk.bf16.gmra.mxu0 %vm319_vm1, %v6406_v16  ;;  %v5982_v26 = vld [vmem:[%s12653_s23 + $0x120] sm:$0xff] }
 0x306   : > { %v11848_v23 = vpop.f32.mrf.mxu1  ;;  %12047 = vmatmul.mubr.msk.bf16.gmra.mxu1 %vm319_vm1, %v6016_v35  ;;  %12100 = vmatprep.mubr.msk.bf16.mxu0 %vm319_vm1, %v6407_v38 }
 0x307   : > { %v14668_v2 = vadd.f32 %v5019_v7, %v4766_v36  ;;  %v4769_v46 = vadd.f32 %v11848_v23, %v14419_v17  ;;  %v5031_v22 = vpop.f32.mrf.mxu0  ;;  %12050 = vmatprep.mubr.msk.bf16.mxu1 %vm319_vm1, %v6017_v9  ;;  %v6018_v17 = vpack.c.bf16 %v5982_v26, %v5981_v50  ;;  %v5985_v7 = vld [vmem:[%s12653_s23 + $0x138] sm:$0xff]  ;;  %v6376_v9 = vld [vmem:[%s12653_s23 + $0x16a] sm:$0xff] }
 0x308   : > { %v4641_v59 = vpop.f32.mrf.mxu1  ;;  %v6377_v23 = vld [vmem:[%s12653_s23 + $0x172] sm:$0xff]  ;;  %v6378_v50 = vld [vmem:[%s12653_s23 + $0x17a] sm:$0xff] }
 0x309   : > { %v14677_v12 = vadd.f32 %v11898_v10, %v4769_v46  ;;  %v4768_v27 = vadd.f32 %v4641_v59, %v14422_v40  ;;  %v11899_v25 = vpop.f32.mrf.mxu0  ;;  %v5986_v10 = vld [vmem:[%s12653_s23 + $0x140] sm:$0xff]  ;;  %v5988_v46 = vld [vmem:[%s12653_s23 + $0x150] sm:$0xff]  ;;  %v6411_v18 = vpack.c.bf16 %v6378_v50, %v6377_v23 }
 0x30a   : > { %v11849_v24 = vpop.f32.mrf.mxu1  ;;  %v6020_v59 = vpack.c.bf16 %v5986_v10, %v5985_v7  ;;  %v6021_v51 = vpack.c.bf16 %v5988_v46, %v5987_v4  ;;  %v5991_v7 = vld [vmem:[%s12653_s23 + $0x168] sm:$0xff] }
 0x30b   : > { %v14680_v54 = vadd.f32 %v5031_v22, %v4768_v27  ;;  %v4770_v30 = vadd.f32 %v11849_v24, %v14425_v45  ;;  %v5034_v16 = vpop.f32.mrf.mxu0  ;;  %v6375_v45 = vld [vmem:[%s12653_s23 + $0x162] sm:$0xff] }
 0x30c   : > { %v4644_v35 = vpop.f32.mrf.mxu1  ;;  %v6410_v56 = vpack.c.bf16 %v6376_v9, %v6375_v45  ;;  %v5992_v45 = vld [vmem:[%s12653_s23 + $0x170] sm:$0xff] }
 0x30d   : > { %v14683_v38 = vadd.f32 %v11899_v25, %v4770_v30  ;;  %v11902_v40 = vpop.f32.mrf.mxu0  ;;  %12101 = vmatmul.mubr.msk.bf16.gmra.mxu0 %vm319_vm1, %v6408_v8  ;;  %v6380_v30 = vld [vmem:[%s12653_s23 + $0x18a] sm:$0xff]  ;;  %v5990_v35 = vld [vmem:[%s12653_s23 + $0x160] sm:$0xff] }
 0x30e   : > { %v11852_v34 = vpop.f32.mrf.mxu1  ;;  %12051 = vmatmul.mubr.msk.bf16.gmra.mxu1 %vm319_vm1, %v6018_v17  ;;  %12104 = vmatprep.mubr.msk.bf16.mxu0 %vm319_vm1, %v6409_v13  ;;  %v5989_v17 = vld [vmem:[%s12653_s23 + $0x158] sm:$0xff]  ;;  %v6379_v13 = vld [vmem:[%s12653_s23 + $0x182] sm:$0xff] }
 0x30f   : > { %v4772_v63 = vadd.f32 %v11852_v34, %v14440_v61  ;;  %v5046_v36 = vpop.f32.mrf.mxu0  ;;  %12054 = vmatprep.mubr.msk.bf16.mxu1 %vm319_vm1, %v6019_v57  ;;  %v6022_v23 = vpack.c.bf16 %v5990_v35, %v5989_v17  ;;  %v6386_v17 = vld [vmem:[%s12653_s23 + $0x1ba] sm:$0xff] }
 0x310   : > { %v4656_v62 = vpop.f32.mrf.mxu1  ;;  %v6412_v36 = vpack.c.bf16 %v6380_v30, %v6379_v13  ;;  %v5995_v30 = vld [vmem:[%s12653_s23 + $0x188] sm:$0xff] }
 0x311   : > { %v14698_v22 = vadd.f32 %v11902_v40, %v4772_v63  ;;  %v11903_v26 = vpop.f32.mrf.mxu0  ;;  %v6382_v40 = vld [vmem:[%s12653_s23 + $0x19a] sm:$0xff] }
 0x312   : > { %v11853_v19 = vpop.f32.mrf.mxu1  ;;  %v6023_v26 = vpack.c.bf16 %v5992_v45, %v5991_v7 }
 0x313   : > { %v5048_v61 = vpop.f32.mrf.mxu0 }
 0x314   : > { %v4658_v27 = vpop.f32.mrf.mxu1 }
 0x315   : > { %v4771_v25 = vadd.f32 %v4658_v27, %v14449_v15  ;;  %v11906_v8 = vpop.f32.mrf.mxu0  ;;  %12105 = vmatmul.mubr.msk.bf16.gmra.mxu0 %vm319_vm1, %v6410_v56  ;;  %v6381_v15 = vld [vmem:[%s12653_s23 + $0x192] sm:$0xff] }
 0x316   : > { %v11856_v24 = vpop.f32.mrf.mxu1  ;;  %12055 = vmatmul.mubr.msk.bf16.gmra.mxu1 %vm319_vm1, %v6020_v59  ;;  %12108 = vmatprep.mubr.msk.bf16.mxu0 %vm319_vm1, %v6411_v18  ;;  %v6413_v50 = vpack.c.bf16 %v6382_v40, %v6381_v15 }
 0x317   : > { %v14707_v16 = vadd.f32 %v5048_v61, %v4771_v25  ;;  %v5060_v57 = vpop.f32.mrf.mxu0  ;;  %12058 = vmatprep.mubr.msk.bf16.mxu1 %vm319_vm1, %v6021_v51  ;;  %v6383_v61 = vld [vmem:[%s12653_s23 + $0x1a2] sm:$0xff]  ;;  %v6384_v51 = vld [vmem:[%s12653_s23 + $0x1aa] sm:$0xff]  ;;  %v6385_v24 = vld [vmem:[%s12653_s23 + $0x1b2] sm:$0xff] }
 0x318   : > { %v4670_v34 = vpop.f32.mrf.mxu1  ;;  %v6415_v45 = vpack.c.bf16 %v6386_v17, %v6385_v24 }
 0x319   : > { %v4773_v9 = vadd.f32 %v4670_v34, %v14458_v44  ;;  %v11907_v63 = vpop.f32.mrf.mxu0  ;;  %v6414_v34 = vpack.c.bf16 %v6384_v51, %v6383_v61  ;;  %v5999_v51 = vld [vmem:[%s12653_s23 + $0x1a8] sm:$0xff] }
 0x31a   : > { %v11857_v10 = vpop.f32.mrf.mxu1 }
 0x31b   : > { %v14716_v62 = vadd.f32 %v5060_v57, %v4773_v9  ;;  %v4775_v4 = vadd.f32 %v11857_v10, %v14461_v48  ;;  %v5063_v46 = vpop.f32.mrf.mxu0  ;;  %v5993_v48 = vld [vmem:[%s12653_s23 + $0x178] sm:$0xff]  ;;  %v5996_v57 = vld [vmem:[%s12653_s23 + $0x190] sm:$0xff] }
 0x31c   : > { %v4673_v56 = vpop.f32.mrf.mxu1  ;;  %v6025_v10 = vpack.c.bf16 %v5996_v57, %v5995_v30 }
 0x31d   : > { %v14719_v19 = vadd.f32 %v11907_v63, %v4775_v4  ;;  %v4774_v44 = vadd.f32 %v4673_v56, %v14470_v49  ;;  %v11910_v59 = vpop.f32.mrf.mxu0  ;;  %12109 = vmatmul.mubr.msk.bf16.gmra.mxu0 %vm319_vm1, %v6412_v36  ;;  %v5994_v49 = vld [vmem:[%s12653_s23 + $0x180] sm:$0xff] }
 0x31e   : > { %v11860_v18 = vpop.f32.mrf.mxu1  ;;  %12059 = vmatmul.mubr.msk.bf16.gmra.mxu1 %vm319_vm1, %v6022_v23  ;;  %12112 = vmatprep.mubr.msk.bf16.mxu0 %vm319_vm1, %v6413_v50 }
 0x31f   : > { %v14728_v27 = vadd.f32 %v5063_v46, %v4774_v44  ;;  %v4777_v25 = vadd.f32 %v11860_v18, %v14479_v42  ;;  %v5075_v8 = vpop.f32.mrf.mxu0  ;;  %12062 = vmatprep.mubr.msk.bf16.mxu1 %vm319_vm1, %v6023_v26  ;;  %v6024_v42 = vpack.c.bf16 %v5994_v49, %v5993_v48  ;;  %v5997_v46 = vld [vmem:[%s12653_s23 + $0x198] sm:$0xff]  ;;  %v6388_v26 = vld [vmem:[%s12653_s23 + $0x1ca] sm:$0xff] }
 0x320   : > { %v4685_v13 = vpop.f32.mrf.mxu1  ;;  %v6389_v18 = vld [vmem:[%s12653_s23 + $0x1d2] sm:$0xff]  ;;  %v6390_v48 = vld [vmem:[%s12653_s23 + $0x1da] sm:$0xff] }
 0x321   : > { %v14737_v35 = vadd.f32 %v11910_v59, %v4777_v25  ;;  %v4776_v15 = vadd.f32 %v4685_v13, %v14482_v43  ;;  %v11911_v40 = vpop.f32.mrf.mxu0  ;;  %v5998_v59 = vld [vmem:[%s12653_s23 + $0x1a0] sm:$0xff]  ;;  %v6000_v25 = vld [vmem:[%s12653_s23 + $0x1b0] sm:$0xff]  ;;  %v6417_v30 = vpack.c.bf16 %v6390_v48, %v6389_v18 }
 0x322   : > { %v11861_v7 = vpop.f32.mrf.mxu1  ;;  %v6026_v13 = vpack.c.bf16 %v5998_v59, %v5997_v46  ;;  %v6027_v57 = vpack.c.bf16 %v6000_v25, %v5999_v51  ;;  %v6003_v46 = vld [vmem:[%s12653_s23 + $0x1c8] sm:$0xff] }
 0x323   : > { %v14740_v9 = vadd.f32 %v5075_v8, %v4776_v15  ;;  %v4778_v63 = vadd.f32 %v11861_v7, %v14485_v3  ;;  %v5078_v36 = vpop.f32.mrf.mxu0  ;;  %v6387_v3 = vld [vmem:[%s12653_s23 + $0x1c2] sm:$0xff] }
 0x324   : > { %v4688_v23 = vpop.f32.mrf.mxu1  ;;  %v6416_v24 = vpack.c.bf16 %v6388_v26, %v6387_v3  ;;  %v6004_v3 = vld [vmem:[%s12653_s23 + $0x1d0] sm:$0xff] }
 0x325   : > { %v14743_v50 = vadd.f32 %v11911_v40, %v4778_v63  ;;  %v11914_v43 = vpop.f32.mrf.mxu0  ;;  %12113 = vmatmul.mubr.msk.bf16.gmra.mxu0 %vm319_vm1, %v6414_v34  ;;  %v6392_v63 = vld [vmem:[%s12653_s23 + $0x1ea] sm:$0xff]  ;;  %v6002_v23 = vld [vmem:[%s12653_s23 + $0x1c0] sm:$0xff] }
 0x326   : > { %v11864_v4 = vpop.f32.mrf.mxu1  ;;  %12063 = vmatmul.mubr.msk.bf16.gmra.mxu1 %vm319_vm1, %v6024_v42  ;;  %12116 = vmatprep.mubr.msk.bf16.mxu0 %vm319_vm1, %v6415_v45  ;;  %v6001_v42 = vld [vmem:[%s12653_s23 + $0x1b8] sm:$0xff]  ;;  %v6391_v45 = vld [vmem:[%s12653_s23 + $0x1e2] sm:$0xff] }
 0x327   : > { %v4780_v56 = vadd.f32 %v11864_v4, %v14500_v55  ;;  %v5090_v44 = vpop.f32.mrf.mxu0  ;;  %12066 = vmatprep.mubr.msk.bf16.mxu1 %vm319_vm1, %v6025_v10  ;;  %v6028_v18 = vpack.c.bf16 %v6002_v23, %v6001_v42  ;;  %v7130_v42 = vld [vmem:[%s12653_s23 + $0x9e] sm:$0xff] }
 0x328   : > { %v4700_v61 = vpop.f32.mrf.mxu1  ;;  %v6418_v44 = vpack.c.bf16 %v6392_v63, %v6391_v45  ;;  %v6739_v63 = vld [vmem:[%s12653_s23 + $0x94] sm:$0xff] }
 0x329   : > { %v14758_v8 = vadd.f32 %v11914_v43, %v4780_v56  ;;  %v11915_v49 = vpop.f32.mrf.mxu0  ;;  %v6394_v43 = vld [vmem:[%s12653_s23 + $0x1fa] sm:$0xff] }
 0x32a   : > { %v11865_v17 = vpop.f32.mrf.mxu1  ;;  %v6029_v49 = vpack.c.bf16 %v6004_v3, %v6003_v46 }
 0x32b   : > { %v5092_v55 = vpop.f32.mrf.mxu0 }
 0x32c   : > { %v4702_v15 = vpop.f32.mrf.mxu1 }
 0x32d   : > { %v4779_v40 = vadd.f32 %v4702_v15, %v14509_v20  ;;  %v11918_v34 = vpop.f32.mrf.mxu0  ;;  %12117 = vmatmul.mubr.msk.bf16.gmra.mxu0 %vm319_vm1, %v6416_v24  ;;  %v6393_v20 = vld [vmem:[%s12653_s23 + $0x1f2] sm:$0xff] }
 0x32e   : > { %v11868_v7 = vpop.f32.mrf.mxu1  ;;  %12067 = vmatmul.mubr.msk.bf16.gmra.mxu1 %vm319_vm1, %v6026_v13  ;;  %12120 = vmatprep.mubr.msk.bf16.mxu0 %vm319_vm1, %v6417_v30  ;;  %v6419_v48 = vpack.c.bf16 %v6394_v43, %v6393_v20 }
 0x32f   : > { %v14767_v36 = vadd.f32 %v5092_v55, %v4779_v40  ;;  %v5104_v10 = vpop.f32.mrf.mxu0  ;;  %12070 = vmatprep.mubr.msk.bf16.mxu1 %vm319_vm1, %v6027_v57  ;;  %v6395_v55 = vld [vmem:[%s12653_s23 + $0x202] sm:$0xff]  ;;  %v6396_v57 = vld [vmem:[%s12653_s23 + $0x20a] sm:$0xff]  ;;  %v7129_v7 = vld [vmem:[%s12653_s23 + $0x96] sm:$0xff] }
 0x330   : > { %v4714_v4 = vpop.f32.mrf.mxu1 }
 0x331   : > { %v4781_v26 = vadd.f32 %v4714_v4, %v14518_v1  ;;  %v11919_v56 = vpop.f32.mrf.mxu0  ;;  %v6420_v4 = vpack.c.bf16 %v6396_v57, %v6395_v55  ;;  %v14820_v55 = vld [vmem:[%s12653_s23 + $0xbc] sm:$0xff] }
 0x332   : > { %v11869_v59 = vpop.f32.mrf.mxu1 }
 0x333   : > { %v14776_v61 = vadd.f32 %v5104_v10, %v4781_v26  ;;  %v4783_v51 = vadd.f32 %v11869_v59, %v14521_v32  ;;  %v5107_v25 = vpop.f32.mrf.mxu0  ;;  %v6005_v32 = vld [vmem:[%s12653_s23 + $0x1d8] sm:$0xff] }
 0x334   : > { %v4717_v24 = vpop.f32.mrf.mxu1  ;;  %v6740_v10 = vld [vmem:[%s12653_s23 + $0x9c] sm:$0xff] }
 0x335   : > { %v14779_v17 = vadd.f32 %v11919_v56, %v4783_v51  ;;  %v4782_v1 = vadd.f32 %v4717_v24, %v14530_v39  ;;  %v11922_v13 = vpop.f32.mrf.mxu0  ;;  %12121 = vmatmul.mubr.msk.bf16.gmra.mxu0 %vm319_vm1, %v6418_v44  ;;  %v6006_v39 = vld [vmem:[%s12653_s23 + $0x1e0] sm:$0xff]  ;;  %v6787_v59 = vpack.c.bf16 %v6740_v10, %v6739_v63  ;;  %v8056_v63 = vsel %vm392_vm0, %v14580_v11, 0  ;;  %v14841_v11 = vld [vmem:[%s16356_s1 + $0x2a] sm:$0x3] }
 0x336   : > { %v11872_v30 = vpop.f32.mrf.mxu1  ;;  %12071 = vmatmul.mubr.msk.bf16.gmra.mxu1 %vm319_vm1, %v6028_v18  ;;  %12124 = vmatprep.mubr.msk.bf16.mxu0 %vm319_vm1, %v6419_v48  ;;  %v6030_v3 = vpack.c.bf16 %v6006_v39, %v6005_v32  ;;  %v14817_v32 = vld [vmem:[%s12653_s23 + $0xb4] sm:$0xff] }
 0x337   : > { %v14788_v15 = vadd.f32 %v5107_v25, %v4782_v1  ;;  %v4785_v40 = vadd.f32 %v11872_v30, %v14539_v53  ;;  %v5119_v34 = vpop.f32.mrf.mxu0  ;;  %12074 = vmatprep.mubr.msk.bf16.mxu1 %vm319_vm1, %v6029_v49  ;;  %v7177_v53 = vpack.c.bf16 %v7130_v42, %v7129_v7  ;;  %v7131_v25 = vld [vmem:[%s12653_s23 + $0xa6] sm:$0xff]  ;;  %v7133_v39 = vld [vmem:[%s12653_s23 + $0xb6] sm:$0xff]  ;;  %v7134_v7 = vld [vmem:[%s12653_s23 + $0xbe] sm:$0xff]  ;;  %v6789_v10 = vpack.c.bf16 %v14820_v55, %v14817_v32 }
 0x338   : > { %v4729_v45 = vpop.f32.mrf.mxu1  ;;  %v6741_v1 = vld [vmem:[%s12653_s23 + $0xa4] sm:$0xff] }
 0x339   : > { %v14797_v23 = vadd.f32 %v11922_v13, %v4785_v40  ;;  %v4784_v20 = vadd.f32 %v4729_v45, %v14542_v21  ;;  %v11923_v43 = vpop.f32.mrf.mxu0  ;;  %v14814_v13 = vld [vmem:[%s12653_s23 + $0xac] sm:$0xff] }
 0x33a   : > { %v11873_v46 = vpop.f32.mrf.mxu1 }
 0x33b   : > { %v14800_v26 = vadd.f32 %v5119_v34, %v4784_v20  ;;  %v4786_v56 = vadd.f32 %v11873_v46, %v14545_v58  ;;  %v5122_v44 = vpop.f32.mrf.mxu0  ;;  %v7132_v58 = vld [vmem:[%s12653_s23 + $0xae] sm:$0xff] }
 0x33c   : > { %v4732_v18 = vpop.f32.mrf.mxu1  ;;  %v7178_v34 = vpack.c.bf16 %v7132_v58, %v7131_v25  ;;  %v14849_v44 = vld [vmem:[%s16356_s1 + $0x2c] sm:$0x3]  ;;  %v7138_v25 = vld [vmem:[%s12653_s23 + $0xde] sm:$0xff] }
 0x33d   : > { %v14803_v48 = vadd.f32 %v11923_v43, %v4786_v56  ;;  %v11926_v21 = vpop.f32.mrf.mxu0  ;;  %12125 = vmatmul.mubr.msk.bf16.gmra.mxu0 %vm319_vm1, %v6420_v4  ;;  %v7666_v43 = vsel %vm392_vm0, %v14572_v5, 0  ;;  %v7179_v4 = vpack.c.bf16 %v7134_v7, %v7133_v39  ;;  %v7135_v5 = vld [vmem:[%s12653_s23 + $0xc6] sm:$0xff] }
 0x33e   : > { %v11876_v51 = vpop.f32.mrf.mxu1  ;;  %12075 = vmatmul.mubr.msk.bf16.gmra.mxu1 %vm319_vm1, %v6030_v3  ;;  %12180 = vmatprep.mubr.msk.bf16.mxu0 %vm319_vm1, %v7177_v53  ;;  %v14836_v53 = vld [vmem:[%s12653_s23 + $0xc4] sm:$0xff] }
 0x33f   : > { %v4788_v49 = vadd.f32 %v11876_v51, %v14558_v0  ;;  %v5134_v24 = vpop.f32.mrf.mxu0  ;;  %12130 = vmatprep.mubr.msk.bf16.mxu1 %vm319_vm1, %v6787_v59  ;;  %v6788_v0 = vpack.c.bf16 %v14814_v13, %v6741_v1  ;;  %v7137_v51 = vld [vmem:[%s12653_s23 + $0xd6] sm:$0xff] }
 0x340   : > { %v4744_v30 = vpop.f32.mrf.mxu1  ;;  %v14864_v24 = vld [vmem:[%s12653_s23 + $0xdc] sm:$0xff]  ;;  %v7181_v7 = vpack.c.bf16 %v7138_v25, %v7137_v51 }
 0x341   : > { %v14822_v57 = vadd.f32 %v11926_v21, %v4788_v49  ;;  %v11927_v40 = vpop.f32.mrf.mxu0  ;;  %v14855_v21 = vld [vmem:[%s12653_s23 + $0xcc] sm:$0xff]  ;;  %v14861_v49 = vld [vmem:[%s12653_s23 + $0xd4] sm:$0xff]  ;;  %v7142_v51 = vld [vmem:[%s12653_s23 + $0xfe] sm:$0xff] }
 0x342   : > { %v11877_v42 = vpop.f32.mrf.mxu1  ;;  %v6790_v39 = vpack.c.bf16 %v14855_v21, %v14836_v53 }
 0x343   : > { %v5136_v45 = vpop.f32.mrf.mxu0 }
 0x344   : > { %v4746_v20 = vpop.f32.mrf.mxu1 }
 0x345   : > { %v4787_v46 = vadd.f32 %v4746_v20, %v14582_v33  ;;  %v11982_v3 = vpop.f32.mrf.mxu0  ;;  %12181 = vmatmul.mubr.msk.bf16.vlgmr.msra.gmra.mxu0 %vm319_vm1, %v7178_v34  ;;  %v7136_v33 = vld [vmem:[%s12653_s23 + $0xce] sm:$0xff] }
 0x346   : > { %v11932_v56 = vpop.f32.mrf.mxu1  ;;  %12131 = vmatmul.mubr.msk.bf16.vlgmr.msra.gmra.mxu1 %vm319_vm1, %v6788_v0  ;;  %12279 = vmatpush3.bf16.msra.mxu0 %v8056_v63  ;;  %v7180_v40 = vpack.c.bf16 %v7136_v33, %v7135_v5  ;;  %v7140_v3 = vld [vmem:[%s12653_s23 + $0xee] sm:$0xff] }
 0x347   : > { %v14851_v59 = vadd.f32 %v5136_v45, %v4787_v46  ;;  %12229 = vmatpush3.bf16.msra.mxu1 %v7666_v43  ;;  %v5752_v18 = vpop.f32.mrf.mxu0  ;;  %12134 = vmatprep.mubr.msk.bf16.mxu1 %vm319_vm1, %v6789_v10  ;;  %v7139_v46 = vld [vmem:[%s12653_s23 + $0xe6] sm:$0xff] }
 0x348   : > { %v5362_v58 = vpop.f32.mrf.mxu1  ;;  %12184 = vmatprep.mubr.msk.bf16.mxu0 %vm319_vm1, %v7179_v4  ;;  %12552 = vmatprep.subr.msk.bf16.mxu1 %vm392_vm0, %v14841_v11 }
 0x349   : > { %v5537_v1 = vadd.f32 %v5362_v58, %v14596_v52  ;;  %v11983_v30 = vpop.f32.mrf.mxu0  ;;  %12553 = vmatprep.subr.msk.bf16.mxu0 %vm392_vm0, %v14849_v44  ;;  %v6791_v52 = vpack.c.bf16 %v14864_v24, %v14861_v49  ;;  %v14899_v58 = vld [vmem:[%s12653_s23 + $0xf4] sm:$0xff] }
 0x34a   : > { %v11933_v34 = vpop.f32.mrf.mxu1 }
 0x34b   : > { %v14873_v42 = vadd.f32 %v5752_v18, %v5537_v1  ;;  %v5539_v0 = vadd.f32 %v11933_v34, %v14599_v37  ;;  %v5755_v45 = vpop.f32.mrf.mxu0  ;;  %v14885_v37 = vld [vmem:[%s12653_s23 + $0xe4] sm:$0xff]  ;;  %v7141_v18 = vld [vmem:[%s12653_s23 + $0xf6] sm:$0xff] }
 0x34c   : > { %v5365_v63 = vpop.f32.mrf.mxu1  ;;  %v14902_v1 = vld [vmem:[%s12653_s23 + $0xfc] sm:$0xff] }
 0x34d   : > { %v14878_v10 = vadd.f32 %v11983_v30, %v5539_v0  ;;  %v5538_v20 = vadd.f32 %v5365_v63, %v14608_v31  ;;  %v11986_v43 = vpop.f32.mrf.mxu0  ;;  %12185 = vmatmul.mubr.msk.bf16.gmra.mxu0 %vm319_vm1, %v7180_v40  ;;  %v14894_v31 = vld [vmem:[%s12653_s23 + $0xec] sm:$0xff]  ;;  %v7183_v0 = vpack.c.bf16 %v7142_v51, %v7141_v18 }
 0x34e   : > { %v11936_v4 = vpop.f32.mrf.mxu1  ;;  %12135 = vmatmul.mubr.msk.bf16.gmra.mxu1 %vm319_vm1, %v6790_v39  ;;  %12188 = vmatprep.mubr.msk.bf16.mxu0 %vm319_vm1, %v7181_v7  ;;  %v7182_v39 = vpack.c.bf16 %v7140_v3, %v7139_v46  ;;  %v6792_v7 = vpack.c.bf16 %v14894_v31, %v14885_v37  ;;  %v7143_v3 = vld [vmem:[%s12653_s23 + $0x106] sm:$0xff] }
 0x34f   : > { %v14889_v56 = vadd.f32 %v5755_v45, %v5538_v20  ;;  %v5541_v5 = vadd.f32 %v11936_v4, %v14617_v14  ;;  %v5767_v33 = vpop.f32.mrf.mxu0  ;;  %12138 = vmatprep.mubr.msk.bf16.mxu1 %vm319_vm1, %v6791_v52  ;;  %v14927_v51 = vld [vmem:[%s12653_s23 + $0x10c] sm:$0xff] }
 0x350   : > { %v5377_v25 = vpop.f32.mrf.mxu1 }
 0x351   : > { %v14904_v30 = vadd.f32 %v11986_v43, %v5541_v5  ;;  %v5540_v40 = vadd.f32 %v5377_v25, %v14620_v28  ;;  %v11987_v34 = vpop.f32.mrf.mxu0  ;;  %v6793_v28 = vpack.c.bf16 %v14902_v1, %v14899_v58  ;;  %v7144_v5 = vld [vmem:[%s12653_s23 + $0x10e] sm:$0xff]  ;;  %v7145_v25 = vld [vmem:[%s12653_s23 + $0x116] sm:$0xff] }
 0x352   : > { %v11937_v14 = vpop.f32.mrf.mxu1 }
 0x353   : > { %v14909_v45 = vadd.f32 %v5767_v33, %v5540_v40  ;;  %v5542_v52 = vadd.f32 %v11937_v14, %v14623_v41  ;;  %v5770_v63 = vpop.f32.mrf.mxu0  ;;  %v14920_v41 = vld [vmem:[%s12653_s23 + $0x104] sm:$0xff]  ;;  %v14935_v14 = vld [vmem:[%s12653_s23 + $0x11c] sm:$0xff] }
 0x354   : > { %v5380_v20 = vpop.f32.mrf.mxu1  ;;  %v7146_v40 = vld [vmem:[%s12653_s23 + $0x11e] sm:$0xff]  ;;  %16406 = vst [vmem:[#allocation4_spill] sm:$0xff] %v14935_v14  ;;  %v6794_v63 = vpack.c.bf16 %v14927_v51, %v14920_v41 }
 0x355   : > { %v14914_v43 = vadd.f32 %v11987_v34, %v5542_v52  ;;  %v11990_v4 = vpop.f32.mrf.mxu0  ;;  %12189 = vmatmul.mubr.msk.bf16.gmra.mxu0 %vm319_vm1, %v7182_v39  ;;  %v14932_v39 = vld [vmem:[%s12653_s23 + $0x114] sm:$0xff]  ;;  %v7184_v52 = vpack.c.bf16 %v7144_v5, %v7143_v3  ;;  %v14948_v5 = vld [vmem:[%s12653_s23 + $0x124] sm:$0xff] }
 0x356   : > { %v11940_v46 = vpop.f32.mrf.mxu1  ;;  %12139 = vmatmul.mubr.msk.bf16.gmra.mxu1 %vm319_vm1, %v6792_v7  ;;  %12192 = vmatprep.mubr.msk.bf16.mxu0 %vm319_vm1, %v7183_v0  ;;  %16405 = vst [vmem:[#allocation3_spill] sm:$0xff] %v14932_v39 }
 0x357   : > { %16404 = vst [vmem:[#allocation2_spill] sm:$0xff] %v14914_v43  ;;  %v5544_v33 = vadd.f32 %v11940_v46, %v14638_v29  ;;  %v5782_v18 = vpop.f32.mrf.mxu0  ;;  %12142 = vmatprep.mubr.msk.bf16.mxu1 %vm319_vm1, %v6793_v28  ;;  %v7185_v28 = vpack.c.bf16 %v7146_v40, %v7145_v25  ;;  %v6795_v46 = vpack.c.bf16 %v14935_v14, %v14932_v39  ;;  %v7147_v25 = vld [vmem:[%s12653_s23 + $0x126] sm:$0xff]  ;;  %v7148_v40 = vld [vmem:[%s12653_s23 + $0x12e] sm:$0xff] }
 0x358   : > { %v5392_v34 = vpop.f32.mrf.mxu1  ;;  %v7186_v14 = vpack.c.bf16 %v7148_v40, %v7147_v25 }
 0x359   : > { %v14937_v7 = vadd.f32 %v11990_v4, %v5544_v33  ;;  %v11991_v0 = vpop.f32.mrf.mxu0 }
 0x35a   : > { %v11941_v29 = vpop.f32.mrf.mxu1 }
 0x35b   : > { %16407 = vst [vmem:[#allocation5_spill] sm:$0xff] %v14937_v7  ;;  %v5784_v20 = vpop.f32.mrf.mxu0  ;;  %v7149_v29 = vld [vmem:[%s12653_s23 + $0x136] sm:$0xff] }
 0x35c   : > { %v5394_v18 = vpop.f32.mrf.mxu1 }
 0x35d   : > { %v5543_v4 = vadd.f32 %v5394_v18, %v14647_v6  ;;  %v11994_v33 = vpop.f32.mrf.mxu0  ;;  %12193 = vmatmul.mubr.msk.bf16.gmra.mxu0 %vm319_vm1, %v7184_v52  ;;  %v14956_v6 = vld [vmem:[%s12653_s23 + $0x12c] sm:$0xff]  ;;  %v7150_v18 = vld [vmem:[%s12653_s23 + $0x13e] sm:$0xff]  ;;  %v14961_v52 = vld [vmem:[%s12653_s23 + $0x134] sm:$0xff] }
 0x35e   : > { %v11944_v3 = vpop.f32.mrf.mxu1  ;;  %12143 = vmatmul.mubr.msk.bf16.gmra.mxu1 %vm319_vm1, %v6794_v63  ;;  %12196 = vmatprep.mubr.msk.bf16.mxu0 %vm319_vm1, %v7185_v28  ;;  %16409 = vst [vmem:[#allocation7_spill] sm:$0xff] %v14961_v52 }
 0x35f   : > { %v14952_v34 = vadd.f32 %v5784_v20, %v5543_v4  ;;  %v5796_v0 = vpop.f32.mrf.mxu0  ;;  %12146 = vmatprep.mubr.msk.bf16.mxu1 %vm319_vm1, %v6795_v46  ;;  %v14964_v3 = vld [vmem:[%s12653_s23 + $0x13c] sm:$0xff]  ;;  %v6796_v20 = vpack.c.bf16 %v14956_v6, %v14948_v5  ;;  %v7187_v46 = vpack.c.bf16 %v7150_v18, %v7149_v29  ;;  %v7152_v29 = vld [vmem:[%s12653_s23 + $0x14e] sm:$0xff] }
 0x360   : > { %v5406_v33 = vpop.f32.mrf.mxu1  ;;  %16410 = vst [vmem:[#allocation8_spill] sm:$0xff] %v14964_v3  ;;  %v6797_v39 = vpack.c.bf16 %v14964_v3, %v14961_v52 }
 0x361   : > { %16408 = vst [vmem:[#allocation6_spill] sm:$0xff] %v14952_v34  ;;  %v5545_v63 = vadd.f32 %v5406_v33, %v14656_v60  ;;  %v11995_v28 = vpop.f32.mrf.mxu0 }
 0x362   : > { %v11945_v7 = vpop.f32.mrf.mxu1 }
 0x363   : > { %v14969_v4 = vadd.f32 %v5796_v0, %v5545_v63  ;;  %v5547_v34 = vadd.f32 %v11945_v7, %v14659_v47  ;;  %v5799_v43 = vpop.f32.mrf.mxu0  ;;  %v14981_v47 = vld [vmem:[%s12653_s23 + $0x144] sm:$0xff] }
 0x364   : > { %v5409_v60 = vpop.f32.mrf.mxu1  ;;  %v7151_v7 = vld [vmem:[%s12653_s23 + $0x146] sm:$0xff] }
 0x365   : > { %16411 = vst [vmem:[#allocation9_spill] sm:$0xff] %v14969_v4  ;;  %v14974_v25 = vadd.f32 %v11995_v28, %v5547_v34  ;;  %v5546_v40 = vadd.f32 %v5409_v60, %v14668_v2  ;;  %v11998_v33 = vpop.f32.mrf.mxu0  ;;  %12197 = vmatmul.mubr.msk.bf16.gmra.mxu0 %vm319_vm1, %v7186_v14  ;;  %v14990_v2 = vld [vmem:[%s12653_s23 + $0x14c] sm:$0xff]  ;;  %v7153_v14 = vld [vmem:[%s12653_s23 + $0x156] sm:$0xff]  ;;  %v7154_v28 = vld [vmem:[%s12653_s23 + $0x15e] sm:$0xff] }
 0x366   : > { %v11948_v0 = vpop.f32.mrf.mxu1  ;;  %12147 = vmatmul.mubr.msk.bf16.gmra.mxu1 %vm319_vm1, %v6796_v20  ;;  %12200 = vmatprep.mubr.msk.bf16.mxu0 %vm319_vm1, %v7187_v46  ;;  %v14998_v20 = vld [vmem:[%s12653_s23 + $0x15c] sm:$0xff] }
 0x367   : > { %16412 = vst [vmem:[#allocation10_spill] sm:$0xff] %v14974_v25  ;;  %v14985_v18 = vadd.f32 %v5799_v43, %v5546_v40  ;;  %v5549_v34 = vadd.f32 %v11948_v0, %v14677_v12  ;;  %v5811_v63 = vpop.f32.mrf.mxu0  ;;  %12150 = vmatprep.mubr.msk.bf16.mxu1 %vm319_vm1, %v6797_v39  ;;  %v14995_v25 = vld [vmem:[%s12653_s23 + $0x154] sm:$0xff]  ;;  %v7188_v40 = vpack.c.bf16 %v7152_v29, %v7151_v7 }
 0x368   : > { %v5421_v60 = vpop.f32.mrf.mxu1  ;;  %v6798_v39 = vpack.c.bf16 %v14990_v2, %v14981_v47  ;;  %v7189_v0 = vpack.c.bf16 %v7154_v28, %v7153_v14  ;;  %v7157_v28 = vld [vmem:[%s12653_s23 + $0x176] sm:$0xff] }
 0x369   : > { %16413 = vst [vmem:[#allocation11_spill] sm:$0xff] %v14985_v18  ;;  %v15000_v46 = vadd.f32 %v11998_v33, %v5549_v34  ;;  %v5548_v3 = vadd.f32 %v5421_v60, %v14680_v54  ;;  %v11999_v43 = vpop.f32.mrf.mxu0  ;;  %v6799_v54 = vpack.c.bf16 %v14998_v20, %v14995_v25  ;;  %v7158_v60 = vld [vmem:[%s12653_s23 + $0x17e] sm:$0xff] }
 0x36a   : > { %v11949_v12 = vpop.f32.mrf.mxu1 }
 0x36b   : > { %v15005_v18 = vadd.f32 %v5811_v63, %v5548_v3  ;;  %v5550_v4 = vadd.f32 %v11949_v12, %v14683_v38  ;;  %v5814_v52 = vpop.f32.mrf.mxu0  ;;  %v15016_v38 = vld [vmem:[%s12653_s23 + $0x164] sm:$0xff]  ;;  %v7156_v3 = vld [vmem:[%s12653_s23 + $0x16e] sm:$0xff]  ;;  %v15031_v12 = vld [vmem:[%s12653_s23 + $0x17c] sm:$0xff] }
 0x36c   : > { %v5424_v33 = vpop.f32.mrf.mxu1  ;;  %16415 = vst [vmem:[#allocation13_spill] sm:$0xff] %v15016_v38  ;;  %v7155_v52 = vld [vmem:[%s12653_s23 + $0x166] sm:$0xff]  ;;  %16418 = vst [vmem:[#allocation16_spill] sm:$0xff] %v15031_v12 }
 0x36d   : > { %v15010_v7 = vadd.f32 %v11999_v43, %v5550_v4  ;;  %v12002_v29 = vpop.f32.mrf.mxu0  ;;  %12201 = vmatmul.mubr.msk.bf16.gmra.mxu0 %vm319_vm1, %v7188_v40  ;;  %v15023_v4 = vld [vmem:[%s12653_s23 + $0x16c] sm:$0xff]  ;;  %v15028_v40 = vld [vmem:[%s12653_s23 + $0x174] sm:$0xff]  ;;  %v7190_v33 = vpack.c.bf16 %v7156_v3, %v7155_v52  ;;  %v15044_v3 = vld [vmem:[%s12653_s23 + $0x184] sm:$0xff] }
 0x36e   : > { %v11952_v34 = vpop.f32.mrf.mxu1  ;;  %12151 = vmatmul.mubr.msk.bf16.gmra.mxu1 %vm319_vm1, %v6798_v39  ;;  %12204 = vmatprep.mubr.msk.bf16.mxu0 %vm319_vm1, %v7189_v0  ;;  %16416 = vst [vmem:[#allocation14_spill] sm:$0xff] %v15023_v4  ;;  %16417 = vst [vmem:[#allocation15_spill] sm:$0xff] %v15028_v40 }
 0x36f   : > { %16414 = vst [vmem:[#allocation12_spill] sm:$0xff] %v15010_v7  ;;  %v5552_v63 = vadd.f32 %v11952_v34, %v14698_v22  ;;  %v5826_v14 = vpop.f32.mrf.mxu0  ;;  %12154 = vmatprep.mubr.msk.bf16.mxu1 %vm319_vm1, %v6799_v54  ;;  %v6800_v54 = vpack.c.bf16 %v15023_v4, %v15016_v38  ;;  %v7191_v34 = vpack.c.bf16 %v7158_v60, %v7157_v28  ;;  %v7159_v28 = vld [vmem:[%s12653_s23 + $0x186] sm:$0xff]  ;;  %v7160_v60 = vld [vmem:[%s12653_s23 + $0x18e] sm:$0xff] }
 0x370   : > { %v5436_v43 = vpop.f32.mrf.mxu1 }
 0x371   : > { %v15033_v39 = vadd.f32 %v12002_v29, %v5552_v63  ;;  %v12003_v0 = vpop.f32.mrf.mxu0  ;;  %v6801_v43 = vpack.c.bf16 %v15031_v12, %v15028_v40 }
 0x372   : > { %v11953_v22 = vpop.f32.mrf.mxu1 }
 0x373   : > { %16419 = vst [vmem:[#allocation17_spill] sm:$0xff] %v15033_v39  ;;  %v5828_v14 = vpop.f32.mrf.mxu0  ;;  %v7192_v39 = vpack.c.bf16 %v7160_v60, %v7159_v28 }
 0x374   : > { %v5438_v7 = vpop.f32.mrf.mxu1 }
 0x375   : > { %v5551_v29 = vadd.f32 %v5438_v7, %v14707_v16  ;;  %v12006_v63 = vpop.f32.mrf.mxu0  ;;  %12205 = vmatmul.mubr.msk.bf16.gmra.mxu0 %vm319_vm1, %v7190_v33  ;;  %v15052_v16 = vld [vmem:[%s12653_s23 + $0x18c] sm:$0xff]  ;;  %v7161_v7 = vld [vmem:[%s12653_s23 + $0x196] sm:$0xff] }
 0x376   : > { %v11956_v52 = vpop.f32.mrf.mxu1  ;;  %12155 = vmatmul.mubr.msk.bf16.gmra.mxu1 %vm319_vm1, %v6800_v54  ;;  %12208 = vmatprep.mubr.msk.bf16.mxu0 %vm319_vm1, %v7191_v34  ;;  %v7162_v63 = vld [vmem:[%s12653_s23 + $0x19e] sm:$0xff]  ;;  %v15057_v33 = vld [vmem:[%s12653_s23 + $0x194] sm:$0xff] }
 0x377   : > { %v15048_v0 = vadd.f32 %v5828_v14, %v5551_v29  ;;  %v5840_v22 = vpop.f32.mrf.mxu0  ;;  %12158 = vmatprep.mubr.msk.bf16.mxu1 %vm319_vm1, %v6801_v43  ;;  %16421 = vst [vmem:[#allocation19_spill] sm:$0xff] %v15057_v33  ;;  %v15060_v52 = vld [vmem:[%s12653_s23 + $0x19c] sm:$0xff]  ;;  %v6802_v14 = vpack.c.bf16 %v15052_v16, %v15044_v3  ;;  %v7193_v43 = vpack.c.bf16 %v7162_v63, %v7161_v7  ;;  %v7164_v7 = vld [vmem:[%s12653_s23 + $0x1ae] sm:$0xff] }
 0x378   : > { %v5450_v12 = vpop.f32.mrf.mxu1  ;;  %16422 = vst [vmem:[#allocation20_spill] sm:$0xff] %v15060_v52  ;;  %v6803_v38 = vpack.c.bf16 %v15060_v52, %v15057_v33 }
 0x379   : > { %16420 = vst [vmem:[#allocation18_spill] sm:$0xff] %v15048_v0  ;;  %v5553_v54 = vadd.f32 %v5450_v12, %v14716_v62  ;;  %v12007_v34 = vpop.f32.mrf.mxu0 }
 0x37a   : > { %v11957_v40 = vpop.f32.mrf.mxu1 }
 0x37b   : > { %v15065_v29 = vadd.f32 %v5840_v22, %v5553_v54  ;;  %v5555_v0 = vadd.f32 %v11957_v40, %v14719_v19  ;;  %v5843_v4 = vpop.f32.mrf.mxu0  ;;  %v15077_v19 = vld [vmem:[%s12653_s23 + $0x1a4] sm:$0xff] }
 0x37c   : > { %v5453_v62 = vpop.f32.mrf.mxu1  ;;  %v7163_v40 = vld [vmem:[%s12653_s23 + $0x1a6] sm:$0xff] }
 0x37d   : > { %16423 = vst [vmem:[#allocation21_spill] sm:$0xff] %v15065_v29  ;;  %v15070_v12 = vadd.f32 %v12007_v34, %v5555_v0  ;;  %v5554_v28 = vadd.f32 %v5453_v62, %v14728_v27  ;;  %v12010_v60 = vpop.f32.mrf.mxu0  ;;  %12209 = vmatmul.mubr.msk.bf16.gmra.mxu0 %vm319_vm1, %v7192_v39  ;;  %v15086_v27 = vld [vmem:[%s12653_s23 + $0x1ac] sm:$0xff]  ;;  %v7165_v39 = vld [vmem:[%s12653_s23 + $0x1b6] sm:$0xff]  ;;  %v7166_v34 = vld [vmem:[%s12653_s23 + $0x1be] sm:$0xff] }
 0x37e   : > { %v11960_v22 = vpop.f32.mrf.mxu1  ;;  %12159 = vmatmul.mubr.msk.bf16.gmra.mxu1 %vm319_vm1, %v6802_v14  ;;  %12212 = vmatprep.mubr.msk.bf16.mxu0 %vm319_vm1, %v7193_v43  ;;  %v15094_v14 = vld [vmem:[%s12653_s23 + $0x1bc] sm:$0xff] }
 0x37f   : > { %16424 = vst [vmem:[#allocation22_spill] sm:$0xff] %v15070_v12  ;;  %v15081_v63 = vadd.f32 %v5843_v4, %v5554_v28  ;;  %v5557_v0 = vadd.f32 %v11960_v22, %v14737_v35  ;;  %v5855_v54 = vpop.f32.mrf.mxu0  ;;  %12162 = vmatprep.mubr.msk.bf16.mxu1 %vm319_vm1, %v6803_v38  ;;  %v15091_v12 = vld [vmem:[%s12653_s23 + $0x1b4] sm:$0xff]  ;;  %v7194_v28 = vpack.c.bf16 %v7164_v7, %v7163_v40 }
 0x380   : > { %v5465_v62 = vpop.f32.mrf.mxu1  ;;  %v6804_v38 = vpack.c.bf16 %v15086_v27, %v15077_v19  ;;  %v7195_v22 = vpack.c.bf16 %v7166_v34, %v7165_v39  ;;  %v7169_v34 = vld [vmem:[%s12653_s23 + $0x1d6] sm:$0xff] }
 0x381   : > { %16425 = vst [vmem:[#allocation23_spill] sm:$0xff] %v15081_v63  ;;  %v15096_v43 = vadd.f32 %v12010_v60, %v5557_v0  ;;  %v5556_v52 = vadd.f32 %v5465_v62, %v14740_v9  ;;  %v12011_v4 = vpop.f32.mrf.mxu0  ;;  %v6805_v9 = vpack.c.bf16 %v15094_v14, %v15091_v12  ;;  %v7170_v62 = vld [vmem:[%s12653_s23 + $0x1de] sm:$0xff] }
 0x382   : > { %v11961_v35 = vpop.f32.mrf.mxu1 }
 0x383   : > { %v15101_v63 = vadd.f32 %v5855_v54, %v5556_v52  ;;  %v5558_v29 = vadd.f32 %v11961_v35, %v14743_v50  ;;  %v5858_v33 = vpop.f32.mrf.mxu0  ;;  %v15112_v50 = vld [vmem:[%s12653_s23 + $0x1c4] sm:$0xff]  ;;  %v7168_v52 = vld [vmem:[%s12653_s23 + $0x1ce] sm:$0xff]  ;;  %v15127_v35 = vld [vmem:[%s12653_s23 + $0x1dc] sm:$0xff] }
 0x384   : > { %v5468_v60 = vpop.f32.mrf.mxu1  ;;  %16427 = vst [vmem:[#allocation25_spill] sm:$0xff] %v15112_v50  ;;  %v7167_v33 = vld [vmem:[%s12653_s23 + $0x1c6] sm:$0xff]  ;;  %16430 = vst [vmem:[#allocation28_spill] sm:$0xff] %v15127_v35 }
 0x385   : > { %v15106_v40 = vadd.f32 %v12011_v4, %v5558_v29  ;;  %v12014_v7 = vpop.f32.mrf.mxu0  ;;  %12213 = vmatmul.mubr.msk.bf16.gmra.mxu0 %vm319_vm1, %v7194_v28  ;;  %v15119_v29 = vld [vmem:[%s12653_s23 + $0x1cc] sm:$0xff]  ;;  %v15124_v28 = vld [vmem:[%s12653_s23 + $0x1d4] sm:$0xff]  ;;  %v7196_v60 = vpack.c.bf16 %v7168_v52, %v7167_v33  ;;  %v15140_v52 = vld [vmem:[%s12653_s23 + $0x1e4] sm:$0xff] }
 0x386   : > { %v11964_v0 = vpop.f32.mrf.mxu1  ;;  %12163 = vmatmul.mubr.msk.bf16.gmra.mxu1 %vm319_vm1, %v6804_v38  ;;  %12216 = vmatprep.mubr.msk.bf16.mxu0 %vm319_vm1, %v7195_v22  ;;  %16428 = vst [vmem:[#allocation26_spill] sm:$0xff] %v15119_v29  ;;  %16429 = vst [vmem:[#allocation27_spill] sm:$0xff] %v15124_v28 }
 0x387   : > { %16426 = vst [vmem:[#allocation24_spill] sm:$0xff] %v15106_v40  ;;  %v5560_v54 = vadd.f32 %v11964_v0, %v14758_v8  ;;  %v5870_v39 = vpop.f32.mrf.mxu0  ;;  %12166 = vmatprep.mubr.msk.bf16.mxu1 %vm319_vm1, %v6805_v9  ;;  %v6806_v9 = vpack.c.bf16 %v15119_v29, %v15112_v50  ;;  %v7197_v0 = vpack.c.bf16 %v7170_v62, %v7169_v34  ;;  %v7171_v34 = vld [vmem:[%s12653_s23 + $0x1e6] sm:$0xff]  ;;  %v7172_v62 = vld [vmem:[%s12653_s23 + $0x1ee] sm:$0xff] }
 0x388   : > { %v5480_v4 = vpop.f32.mrf.mxu1 }
 0x389   : > { %v15129_v38 = vadd.f32 %v12014_v7, %v5560_v54  ;;  %v12015_v22 = vpop.f32.mrf.mxu0  ;;  %v6807_v4 = vpack.c.bf16 %v15127_v35, %v15124_v28 }
 0x38a   : > { %v11965_v8 = vpop.f32.mrf.mxu1 }
 0x38b   : > { %16431 = vst [vmem:[#allocation29_spill] sm:$0xff] %v15129_v38  ;;  %v5872_v39 = vpop.f32.mrf.mxu0  ;;  %v7198_v38 = vpack.c.bf16 %v7172_v62, %v7171_v34 }
 0x38c   : > { %v5482_v40 = vpop.f32.mrf.mxu1 }
 0x38d   : > { %v5559_v7 = vadd.f32 %v5482_v40, %v14767_v36  ;;  %v12018_v54 = vpop.f32.mrf.mxu0  ;;  %12217 = vmatmul.mubr.msk.bf16.gmra.mxu0 %vm319_vm1, %v7196_v60  ;;  %v15148_v36 = vld [vmem:[%s12653_s23 + $0x1ec] sm:$0xff]  ;;  %v7173_v40 = vld [vmem:[%s12653_s23 + $0x1f6] sm:$0xff] }
 0x38e   : > { %v11968_v33 = vpop.f32.mrf.mxu1  ;;  %12167 = vmatmul.mubr.msk.bf16.gmra.mxu1 %vm319_vm1, %v6806_v9  ;;  %12220 = vmatprep.mubr.msk.bf16.mxu0 %vm319_vm1, %v7197_v0  ;;  %v7174_v54 = vld [vmem:[%s12653_s23 + $0x1fe] sm:$0xff]  ;;  %v15153_v60 = vld [vmem:[%s12653_s23 + $0x1f4] sm:$0xff] }
 0x38f   : > { %v15144_v22 = vadd.f32 %v5872_v39, %v5559_v7  ;;  %v5884_v8 = vpop.f32.mrf.mxu0  ;;  %12170 = vmatprep.mubr.msk.bf16.mxu1 %vm319_vm1, %v6807_v4  ;;  %v15156_v33 = vld [vmem:[%s12653_s23 + $0x1fc] sm:$0xff]  ;;  %v6808_v39 = vpack.c.bf16 %v15148_v36, %v15140_v52  ;;  %v7199_v4 = vpack.c.bf16 %v7174_v54, %v7173_v40 }
 0x390   : > { %v5494_v35 = vpop.f32.mrf.mxu1  ;;  %16433 = vst [vmem:[#allocation31_spill] sm:$0xff] %v15156_v33  ;;  %v6809_v50 = vpack.c.bf16 %v15156_v33, %v15153_v60 }
 0x391   : > { %16432 = vst [vmem:[#allocation30_spill] sm:$0xff] %v15144_v22  ;;  %v5561_v9 = vadd.f32 %v5494_v35, %v14776_v61  ;;  %v12019_v0 = vpop.f32.mrf.mxu0 }
 0x392   : > { %v11969_v28 = vpop.f32.mrf.mxu1 }
 0x393   : > { %v15161_v7 = vadd.f32 %v5884_v8, %v5561_v9  ;;  %v5563_v22 = vadd.f32 %v11969_v28, %v14779_v17  ;;  %v5887_v29 = vpop.f32.mrf.mxu0  ;;  %v7175_v17 = vld [vmem:[%s12653_s23 + $0x206] sm:$0xff]  ;;  %v7176_v28 = vld [vmem:[%s12653_s23 + $0x20e] sm:$0xff] }
 0x394   : > { %v5497_v61 = vpop.f32.mrf.mxu1  ;;  %v15179_v9 = vld [vmem:[%s12653_s23 + $0x204] sm:$0xff]  ;;  %v7200_v33 = vpack.c.bf16 %v7176_v28, %v7175_v17 }
 0x395   : > { %v15166_v35 = vadd.f32 %v12019_v0, %v5563_v22  ;;  %v5562_v34 = vadd.f32 %v5497_v61, %v14788_v15  ;;  %v12022_v62 = vpop.f32.mrf.mxu0  ;;  %12221 = vmatmul.mubr.msk.bf16.gmra.mxu0 %vm319_vm1, %v7198_v38  ;;  %v15182_v15 = vld [vmem:[%s12653_s23 + $0x20c] sm:$0xff] }
 0x396   : > { %v11972_v8 = vpop.f32.mrf.mxu1  ;;  %12171 = vmatmul.mubr.msk.bf16.gmra.mxu1 %vm319_vm1, %v6808_v39  ;;  %12224 = vmatprep.mubr.msk.bf16.mxu0 %vm319_vm1, %v7199_v4  ;;  %v7519_v38 = vld [vmem:[%s12653_s23 + $0xa9] sm:$0xff]  ;;  %v7520_v61 = vld [vmem:[%s12653_s23 + $0xb1] sm:$0xff] }
 0x397   : > { %16434 = vst [vmem:[#allocation32_spill] sm:$0xff] %v15166_v35  ;;  %v15174_v40 = vadd.f32 %v5887_v29, %v5562_v34  ;;  %v5565_v54 = vadd.f32 %v11972_v8, %v14797_v23  ;;  %v5899_v22 = vpop.f32.mrf.mxu0  ;;  %12174 = vmatprep.mubr.msk.bf16.mxu1 %vm319_vm1, %v6809_v50  ;;  %v6810_v23 = vpack.c.bf16 %v15182_v15, %v15179_v9 }
 0x398   : > { %v5509_v0 = vpop.f32.mrf.mxu1  ;;  %v7957_v50 = vpack.c.bf16 %v14817_v32, %v14814_v13 }
 0x399   : > { %v15186_v35 = vadd.f32 %v12022_v62, %v5565_v54  ;;  %v5564_v39 = vadd.f32 %v5509_v0, %v14800_v26  ;;  %v12023_v4 = vpop.f32.mrf.mxu0  ;;  %v7567_v54 = vpack.c.bf16 %v7520_v61, %v7519_v38  ;;  %v7523_v38 = vld [vmem:[%s12653_s23 + $0xc9] sm:$0xff]  ;;  %v7524_v61 = vld [vmem:[%s12653_s23 + $0xd1] sm:$0xff] }
 0x39a   : > { %v11973_v29 = vpop.f32.mrf.mxu1 }
 0x39b   : > { %v15193_v34 = vadd.f32 %v5899_v22, %v5564_v39  ;;  %v5566_v8 = vadd.f32 %v11973_v29, %v14803_v48  ;;  %v5902_v62 = vpop.f32.mrf.mxu0  ;;  %v7521_v48 = vld [vmem:[%s12653_s23 + $0xb9] sm:$0xff]  ;;  %v7522_v22 = vld [vmem:[%s12653_s23 + $0xc1] sm:$0xff] }
 0x39c   : > { %v5512_v26 = vpop.f32.mrf.mxu1 }
 0x39d   : > { %v15196_v0 = vadd.f32 %v12023_v4, %v5566_v8  ;;  %v12026_v17 = vpop.f32.mrf.mxu0  ;;  %12225 = vmatmul.mubr.msk.bf16.gmra.mxu0 %vm319_vm1, %v7200_v33  ;;  %v7958_v33 = vpack.c.bf16 %v14836_v53, %v14820_v55  ;;  %v8446_v26 = vsel %vm392_vm0, %v14841_v11, 0  ;;  %v15222_v53 = vld [vmem:[%s16356_s1 + $0x2e] sm:$0x3]  ;;  %v15228_v11 = vld [vmem:[%s16356_s1 + $0x30] sm:$0x3] }
 0x39e   : > { %v11976_v28 = vpop.f32.mrf.mxu1  ;;  %12175 = vmatmul.mubr.msk.bf16.gmra.mxu1 %vm319_vm1, %v6810_v23  ;;  %12280 = vmatprep.mubr.msk.bf16.mxu0 %vm319_vm1, %v7957_v50  ;;  %v7568_v23 = vpack.c.bf16 %v7522_v22, %v7521_v48  ;;  %v7569_v50 = vpack.c.bf16 %v7524_v61, %v7523_v38  ;;  %v7527_v48 = vld [vmem:[%s12653_s23 + $0xe9] sm:$0xff]  ;;  %v7528_v22 = vld [vmem:[%s12653_s23 + $0xf1] sm:$0xff]  ;;  %v7960_v61 = vpack.c.bf16 %v14885_v37, %v14864_v24 }
 0x39f   : > { %v5568_v13 = vadd.f32 %v11976_v28, %v14822_v57  ;;  %v5914_v32 = vpop.f32.mrf.mxu0  ;;  %12230 = vmatprep.mubr.msk.bf16.mxu1 %vm319_vm1, %v7567_v54  ;;  %v8836_v57 = vsel %vm392_vm0, %v14849_v44, 0 }
 0x3a0   : > { %v5524_v39 = vpop.f32.mrf.mxu1 }
 0x3a1   : > { %v15207_v4 = vadd.f32 %v12026_v17, %v5568_v13  ;;  %v12027_v29 = vpop.f32.mrf.mxu0  ;;  %v7959_v17 = vpack.c.bf16 %v14861_v49, %v14855_v21  ;;  %v7525_v49 = vld [vmem:[%s12653_s23 + $0xd9] sm:$0xff]  ;;  %v7526_v13 = vld [vmem:[%s12653_s23 + $0xe1] sm:$0xff] }
 0x3a2   : > { %v11977_v8 = vpop.f32.mrf.mxu1 }
 0x3a3   : > { %v5916_v62 = vpop.f32.mrf.mxu0  ;;  %v7961_v8 = vpack.c.bf16 %v14899_v58, %v14894_v31 }
 0x3a4   : > { %v5526_v54 = vpop.f32.mrf.mxu1 }
 0x3a5   : > { %v5567_v28 = vadd.f32 %v5526_v54, %v14851_v59  ;;  %v12082_v55 = vpop.f32.mrf.mxu0  ;;  %12281 = vmatmul.mubr.msk.bf16.vlgmr.msra.gmra.mxu0 %vm319_vm1, %v7958_v33  ;;  %v7570_v33 = vpack.c.bf16 %v7526_v13, %v7525_v49 }
 0x3a6   : > { %v12032_v44 = vpop.f32.mrf.mxu1  ;;  %12231 = vmatmul.mubr.msk.bf16.vlgmr.msra.gmra.mxu1 %vm319_vm1, %v7568_v23  ;;  %12379 = vmatpush3.bf16.msra.mxu0 %v8836_v57 }
 0x3a7   : > { %v15230_v59 = vadd.f32 %v5916_v62, %v5567_v28  ;;  %12329 = vmatpush3.bf16.msra.mxu1 %v8446_v26  ;;  %v6532_v21 = vpop.f32.mrf.mxu0  ;;  %12234 = vmatprep.mubr.msk.bf16.mxu1 %vm319_vm1, %v7569_v50  ;;  %v7530_v28 = vld [vmem:[%s12653_s23 + $0x101] sm:$0xff]  ;;  %v7531_v44 = vld [vmem:[%s12653_s23 + $0x109] sm:$0xff] }
 0x3a8   : > { %v6142_v32 = vpop.f32.mrf.mxu1  ;;  %12284 = vmatprep.mubr.msk.bf16.mxu0 %vm319_vm1, %v7959_v17  ;;  %12554 = vmatprep.subr.msk.bf16.mxu1 %vm392_vm0, %v15222_v53  ;;  %v7529_v17 = vld [vmem:[%s12653_s23 + $0xf9] sm:$0xff] }
 0x3a9   : > { %v6317_v39 = vadd.f32 %v6142_v32, %v14873_v42  ;;  %v12083_v38 = vpop.f32.mrf.mxu0  ;;  %12555 = vmatprep.subr.msk.bf16.mxu0 %vm392_vm0, %v15228_v11  ;;  %v7571_v42 = vpack.c.bf16 %v7528_v22, %v7527_v48  ;;  %v7962_v32 = vpack.c.bf16 %v14920_v41, %v14902_v1  ;;  %v7572_v22 = vpack.c.bf16 %v7530_v28, %v7529_v17  ;;  %v16437_v41 = vld [vmem:[#allocation5_spill] sm:$0xff]  ;;  %v16438_v28 = vld [vmem:[#allocation4_spill] sm:$0xff] }
 0x3aa   : > { %v12033_v29 = vpop.f32.mrf.mxu1 }
 0x3ab   : > { %v15247_v23 = vadd.f32 %v6532_v21, %v6317_v39  ;;  %v6319_v62 = vadd.f32 %v12033_v29, %v14878_v10  ;;  %v6535_v57 = vpop.f32.mrf.mxu0 }
 0x3ac   : > { %v6145_v50 = vpop.f32.mrf.mxu1 }
 0x3ad   : > { %v15250_v24 = vadd.f32 %v12083_v38, %v6319_v62  ;;  %v6318_v37 = vadd.f32 %v6145_v50, %v14889_v56  ;;  %v12086_v54 = vpop.f32.mrf.mxu0  ;;  %12285 = vmatmul.mubr.msk.bf16.gmra.mxu0 %vm319_vm1, %v7960_v61  ;;  %v7532_v56 = vld [vmem:[%s12653_s23 + $0x111] sm:$0xff]  ;;  %v16436_v61 = vld [vmem:[#allocation2_spill] sm:$0xff] }
 0x3ae   : > { %v12036_v26 = vpop.f32.mrf.mxu1  ;;  %12235 = vmatmul.mubr.msk.bf16.gmra.mxu1 %vm319_vm1, %v7570_v33  ;;  %12288 = vmatprep.mubr.msk.bf16.mxu0 %vm319_vm1, %v7961_v8  ;;  %v7573_v8 = vpack.c.bf16 %v7532_v56, %v7531_v44  ;;  %v7533_v50 = vld [vmem:[%s12653_s23 + $0x119] sm:$0xff] }
 0x3af   : > { %v15256_v31 = vadd.f32 %v6535_v57, %v6318_v37  ;;  %v6321_v10 = vadd.f32 %v12036_v26, %v14904_v30  ;;  %v6547_v58 = vpop.f32.mrf.mxu0  ;;  %12238 = vmatprep.mubr.msk.bf16.mxu1 %vm319_vm1, %v7571_v42  ;;  %v16435_v30 = vld [vmem:[#allocation3_spill] sm:$0xff] }
 0x3b0   : > { %v6157_v55 = vpop.f32.mrf.mxu1  ;;  %v7963_v39 = vpack.c.bf16 %v16435_v30, %v14927_v51  ;;  %v7534_v37 = vld [vmem:[%s12653_s23 + $0x121] sm:$0xff]  ;;  %v7535_v26 = vld [vmem:[%s12653_s23 + $0x129] sm:$0xff] }
 0x3b1   : > { %v15264_v21 = vadd.f32 %v12086_v54, %v6321_v10  ;;  %v6320_v49 = vadd.f32 %v6157_v55, %v14909_v45  ;;  %v12087_v13 = vpop.f32.mrf.mxu0  ;;  %v7536_v10 = vld [vmem:[%s12653_s23 + $0x131] sm:$0xff]  ;;  %v7964_v55 = vpack.c.bf16 %v14948_v5, %v16438_v28  ;;  %v7574_v56 = vpack.c.bf16 %v7534_v37, %v7533_v50  ;;  %v16440_v30 = vld [vmem:[#allocation6_spill] sm:$0xff] }
 0x3b2   : > { %v12037_v48 = vpop.f32.mrf.mxu1  ;;  %v16442_v50 = vld [vmem:[#allocation8_spill] sm:$0xff]  ;;  %v16443_v28 = vld [vmem:[#allocation10_spill] sm:$0xff] }
 0x3b3   : > { %v15271_v38 = vadd.f32 %v6547_v58, %v6320_v49  ;;  %v6322_v29 = vadd.f32 %v12037_v48, %v16436_v61  ;;  %v6550_v33 = vpop.f32.mrf.mxu0  ;;  %v16439_v49 = vld [vmem:[#allocation7_spill] sm:$0xff]  ;;  %v7575_v48 = vpack.c.bf16 %v7536_v10, %v7535_v26  ;;  %v7966_v37 = vpack.c.bf16 %v14981_v47, %v16442_v50  ;;  %v16446_v50 = vld [vmem:[#allocation14_spill] sm:$0xff] }
 0x3b4   : > { %v6160_v45 = vpop.f32.mrf.mxu1  ;;  %v7967_v10 = vpack.c.bf16 %v14995_v25, %v14990_v2 }
 0x3b5   : > { %v15274_v62 = vadd.f32 %v12087_v13, %v6322_v29  ;;  %v12090_v57 = vpop.f32.mrf.mxu0  ;;  %12289 = vmatmul.mubr.msk.bf16.gmra.mxu0 %vm319_vm1, %v7962_v32  ;;  %v7965_v13 = vpack.c.bf16 %v16439_v49, %v14956_v6  ;;  %v7537_v6 = vld [vmem:[%s12653_s23 + $0x139] sm:$0xff] }
 0x3b6   : > { %v12040_v1 = vpop.f32.mrf.mxu1  ;;  %12239 = vmatmul.mubr.msk.bf16.gmra.mxu1 %vm319_vm1, %v7572_v22  ;;  %12292 = vmatprep.mubr.msk.bf16.mxu0 %vm319_vm1, %v7963_v39 }
 0x3b7   : > { %v6324_v51 = vadd.f32 %v12040_v1, %v16437_v41  ;;  %v6562_v42 = vpop.f32.mrf.mxu0  ;;  %12242 = vmatprep.mubr.msk.bf16.mxu1 %vm319_vm1, %v7573_v8  ;;  %v7538_v8 = vld [vmem:[%s12653_s23 + $0x141] sm:$0xff]  ;;  %v7540_v1 = vld [vmem:[%s12653_s23 + $0x151] sm:$0xff] }
 0x3b8   : > { %v6172_v54 = vpop.f32.mrf.mxu1  ;;  %v16441_v41 = vld [vmem:[#allocation9_spill] sm:$0xff]  ;;  %v7576_v26 = vpack.c.bf16 %v7538_v8, %v7537_v6 }
 0x3b9   : > { %v15285_v58 = vadd.f32 %v12090_v57, %v6324_v51  ;;  %v12091_v17 = vpop.f32.mrf.mxu0  ;;  %v7539_v57 = vld [vmem:[%s12653_s23 + $0x149] sm:$0xff]  ;;  %v7544_v6 = vld [vmem:[%s12653_s23 + $0x171] sm:$0xff] }
 0x3ba   : > { %v12041_v44 = vpop.f32.mrf.mxu1 }
 0x3bb   : > { %v6564_v32 = vpop.f32.mrf.mxu0 }
 0x3bc   : > { %v6174_v22 = vpop.f32.mrf.mxu1 }
 0x3bd   : > { %v6323_v39 = vadd.f32 %v6174_v22, %v16440_v30  ;;  %v12094_v61 = vpop.f32.mrf.mxu0  ;;  %12293 = vmatmul.mubr.msk.bf16.gmra.mxu0 %vm319_vm1, %v7964_v55 }
 0x3be   : > { %v12044_v29 = vpop.f32.mrf.mxu1  ;;  %12243 = vmatmul.mubr.msk.bf16.gmra.mxu1 %vm319_vm1, %v7574_v56  ;;  %12296 = vmatprep.mubr.msk.bf16.mxu0 %vm319_vm1, %v7965_v13  ;;  %v7577_v56 = vpack.c.bf16 %v7540_v1, %v7539_v57  ;;  %v7542_v61 = vld [vmem:[%s12653_s23 + $0x161] sm:$0xff]  ;;  %v16445_v1 = vld [vmem:[#allocation13_spill] sm:$0xff] }
 0x3bf   : > { %v15295_v5 = vadd.f32 %v6564_v32, %v6323_v39  ;;  %v6576_v33 = vpop.f32.mrf.mxu0  ;;  %12246 = vmatprep.mubr.msk.bf16.mxu1 %vm319_vm1, %v7575_v48  ;;  %v16444_v32 = vld [vmem:[#allocation11_spill] sm:$0xff]  ;;  %v7541_v39 = vld [vmem:[%s12653_s23 + $0x159] sm:$0xff] }
 0x3c0   : > { %v6186_v45 = vpop.f32.mrf.mxu1 }
 0x3c1   : > { %v6325_v51 = vadd.f32 %v6186_v45, %v16441_v41  ;;  %v12095_v42 = vpop.f32.mrf.mxu0  ;;  %v7968_v41 = vpack.c.bf16 %v16445_v1, %v14998_v20  ;;  %v16451_v1 = vld [vmem:[#allocation19_spill] sm:$0xff] }
 0x3c2   : > { %v12045_v54 = vpop.f32.mrf.mxu1 }
 0x3c3   : > { %v15307_v17 = vadd.f32 %v6576_v33, %v6325_v51  ;;  %v6327_v55 = vadd.f32 %v12045_v54, %v16443_v28  ;;  %v6579_v44 = vpop.f32.mrf.mxu0  ;;  %v7543_v33 = vld [vmem:[%s12653_s23 + $0x169] sm:$0xff] }
 0x3c4   : > { %v6189_v49 = vpop.f32.mrf.mxu1 }
 0x3c5   : > { %v15310_v13 = vadd.f32 %v12095_v42, %v6327_v55  ;;  %v6326_v47 = vadd.f32 %v6189_v49, %v16444_v32  ;;  %v12098_v48 = vpop.f32.mrf.mxu0  ;;  %12297 = vmatmul.mubr.msk.bf16.gmra.mxu0 %vm319_vm1, %v7966_v37  ;;  %v7578_v42 = vpack.c.bf16 %v7542_v61, %v7541_v39  ;;  %v7579_v55 = vpack.c.bf16 %v7544_v6, %v7543_v33  ;;  %v16449_v49 = vld [vmem:[#allocation17_spill] sm:$0xff]  ;;  %v16450_v33 = vld [vmem:[#allocation16_spill] sm:$0xff] }
 0x3c6   : > { %v12048_v22 = vpop.f32.mrf.mxu1  ;;  %12247 = vmatmul.mubr.msk.bf16.gmra.mxu1 %vm319_vm1, %v7576_v26  ;;  %12300 = vmatprep.mubr.msk.bf16.mxu0 %vm319_vm1, %v7967_v10  ;;  %v16448_v26 = vld [vmem:[#allocation12_spill] sm:$0xff]  ;;  %v7970_v6 = vpack.c.bf16 %v15044_v3, %v16450_v33  ;;  %v16455_v33 = vld [vmem:[#allocation22_spill] sm:$0xff] }
 0x3c7   : > { %v15316_v25 = vadd.f32 %v6579_v44, %v6326_v47  ;;  %v6329_v2 = vadd.f32 %v12048_v22, %v15000_v46  ;;  %v6591_v30 = vpop.f32.mrf.mxu0  ;;  %12250 = vmatprep.mubr.msk.bf16.mxu1 %vm319_vm1, %v7577_v56  ;;  %v16447_v46 = vld [vmem:[#allocation15_spill] sm:$0xff]  ;;  %v7548_v39 = vld [vmem:[%s12653_s23 + $0x191] sm:$0xff] }
 0x3c8   : > { %v6201_v29 = vpop.f32.mrf.mxu1  ;;  %v7969_v37 = vpack.c.bf16 %v16447_v46, %v16446_v50  ;;  %v7546_v22 = vld [vmem:[%s12653_s23 + $0x181] sm:$0xff] }
 0x3c9   : > { %v15324_v8 = vadd.f32 %v12098_v48, %v6329_v2  ;;  %v6328_v45 = vadd.f32 %v6201_v29, %v15005_v18  ;;  %v12099_v57 = vpop.f32.mrf.mxu0  ;;  %v7545_v48 = vld [vmem:[%s12653_s23 + $0x179] sm:$0xff] }
 0x3ca   : > { %v12049_v51 = vpop.f32.mrf.mxu1  ;;  %v16452_v46 = vld [vmem:[#allocation18_spill] sm:$0xff] }
 0x3cb   : > { %v15331_v54 = vadd.f32 %v6591_v30, %v6328_v45  ;;  %v6330_v10 = vadd.f32 %v12049_v51, %v16448_v26  ;;  %v6594_v28 = vpop.f32.mrf.mxu0  ;;  %v7547_v30 = vld [vmem:[%s12653_s23 + $0x189] sm:$0xff] }
 0x3cc   : > { %v6204_v18 = vpop.f32.mrf.mxu1 }
 0x3cd   : > { %v15334_v44 = vadd.f32 %v12099_v57, %v6330_v10  ;;  %v12102_v56 = vpop.f32.mrf.mxu0  ;;  %12301 = vmatmul.mubr.msk.bf16.gmra.mxu0 %vm319_vm1, %v7968_v41  ;;  %v7580_v57 = vpack.c.bf16 %v7546_v22, %v7545_v48  ;;  %v7971_v41 = vpack.c.bf16 %v16451_v1, %v15052_v16  ;;  %v7549_v16 = vld [vmem:[%s12653_s23 + $0x199] sm:$0xff]  ;;  %v16454_v48 = vld [vmem:[#allocation20_spill] sm:$0xff] }
 0x3ce   : > { %v12052_v20 = vpop.f32.mrf.mxu1  ;;  %12251 = vmatmul.mubr.msk.bf16.gmra.mxu1 %vm319_vm1, %v7578_v42  ;;  %12304 = vmatprep.mubr.msk.bf16.mxu0 %vm319_vm1, %v7969_v37  ;;  %v7581_v42 = vpack.c.bf16 %v7548_v39, %v7547_v30  ;;  %v7972_v22 = vpack.c.bf16 %v15077_v19, %v16454_v48  ;;  %v7973_v39 = vpack.c.bf16 %v15091_v12, %v15086_v27  ;;  %v16458_v48 = vld [vmem:[#allocation26_spill] sm:$0xff] }
 0x3cf   : > { %v6332_v32 = vadd.f32 %v12052_v20, %v16449_v49  ;;  %v6606_v47 = vpop.f32.mrf.mxu0  ;;  %12254 = vmatprep.mubr.msk.bf16.mxu1 %vm319_vm1, %v7579_v55  ;;  %v7550_v55 = vld [vmem:[%s12653_s23 + $0x1a1] sm:$0xff]  ;;  %v7552_v20 = vld [vmem:[%s12653_s23 + $0x1b1] sm:$0xff] }
 0x3d0   : > { %v6216_v2 = vpop.f32.mrf.mxu1  ;;  %v16453_v49 = vld [vmem:[#allocation21_spill] sm:$0xff]  ;;  %v7582_v30 = vpack.c.bf16 %v7550_v55, %v7549_v16 }
 0x3d1   : > { %v15345_v61 = vadd.f32 %v12102_v56, %v6332_v32  ;;  %v12103_v29 = vpop.f32.mrf.mxu0  ;;  %v7551_v56 = vld [vmem:[%s12653_s23 + $0x1a9] sm:$0xff]  ;;  %v7556_v16 = vld [vmem:[%s12653_s23 + $0x1d1] sm:$0xff] }
 0x3d2   : > { %v12053_v45 = vpop.f32.mrf.mxu1 }
 0x3d3   : > { %v6608_v51 = vpop.f32.mrf.mxu0 }
 0x3d4   : > { %v6218_v50 = vpop.f32.mrf.mxu1 }
 0x3d5   : > { %v6331_v37 = vadd.f32 %v6218_v50, %v16452_v46  ;;  %v12106_v26 = vpop.f32.mrf.mxu0  ;;  %12305 = vmatmul.mubr.msk.bf16.gmra.mxu0 %vm319_vm1, %v7970_v6 }
 0x3d6   : > { %v12056_v10 = vpop.f32.mrf.mxu1  ;;  %12255 = vmatmul.mubr.msk.bf16.gmra.mxu1 %vm319_vm1, %v7580_v57  ;;  %12308 = vmatprep.mubr.msk.bf16.mxu0 %vm319_vm1, %v7971_v41  ;;  %v7583_v57 = vpack.c.bf16 %v7552_v20, %v7551_v56  ;;  %v7554_v26 = vld [vmem:[%s12653_s23 + $0x1c1] sm:$0xff]  ;;  %v16457_v20 = vld [vmem:[#allocation25_spill] sm:$0xff] }
 0x3d7   : > { %v15355_v3 = vadd.f32 %v6608_v51, %v6331_v37  ;;  %v6620_v28 = vpop.f32.mrf.mxu0  ;;  %12258 = vmatprep.mubr.msk.bf16.mxu1 %vm319_vm1, %v7581_v42  ;;  %v16456_v51 = vld [vmem:[#allocation23_spill] sm:$0xff]  ;;  %v7553_v37 = vld [vmem:[%s12653_s23 + $0x1b9] sm:$0xff] }
 0x3d8   : > { %v6230_v18 = vpop.f32.mrf.mxu1 }
 0x3d9   : > { %v6333_v32 = vadd.f32 %v6230_v18, %v16453_v49  ;;  %v12107_v47 = vpop.f32.mrf.mxu0  ;;  %v7974_v49 = vpack.c.bf16 %v16457_v20, %v15094_v14  ;;  %v7977_v20 = vpack.c.bf16 %v15153_v60, %v15148_v36  ;;  %v7561_v36 = vld [vmem:[%s12653_s23 + $0x1f9] sm:$0xff]  ;;  %v7562_v60 = vld [vmem:[%s12653_s23 + $0x201] sm:$0xff] }
 0x3da   : > { %v12057_v2 = vpop.f32.mrf.mxu1 }
 0x3db   : > { %v15367_v29 = vadd.f32 %v6620_v28, %v6333_v32  ;;  %v6335_v6 = vadd.f32 %v12057_v2, %v16455_v33  ;;  %v6623_v45 = vpop.f32.mrf.mxu0  ;;  %v7555_v28 = vld [vmem:[%s12653_s23 + $0x1c9] sm:$0xff] }
 0x3dc   : > { %v6233_v1 = vpop.f32.mrf.mxu1 }
 0x3dd   : > { %v15370_v41 = vadd.f32 %v12107_v47, %v6335_v6  ;;  %v6334_v19 = vadd.f32 %v6233_v1, %v16456_v51  ;;  %v12110_v42 = vpop.f32.mrf.mxu0  ;;  %12309 = vmatmul.mubr.msk.bf16.gmra.mxu0 %vm319_vm1, %v7972_v22  ;;  %v7584_v47 = vpack.c.bf16 %v7554_v26, %v7553_v37  ;;  %v7585_v6 = vpack.c.bf16 %v7556_v16, %v7555_v28  ;;  %v16461_v1 = vld [vmem:[#allocation29_spill] sm:$0xff]  ;;  %v16462_v28 = vld [vmem:[#allocation28_spill] sm:$0xff] }
 0x3de   : > { %v12060_v50 = vpop.f32.mrf.mxu1  ;;  %12259 = vmatmul.mubr.msk.bf16.gmra.mxu1 %vm319_vm1, %v7582_v30  ;;  %12312 = vmatprep.mubr.msk.bf16.mxu0 %vm319_vm1, %v7973_v39  ;;  %v16460_v30 = vld [vmem:[#allocation24_spill] sm:$0xff]  ;;  %v7976_v16 = vpack.c.bf16 %v15140_v52, %v16462_v28 }
 0x3df   : > { %v15376_v12 = vadd.f32 %v6623_v45, %v6334_v19  ;;  %v6337_v27 = vadd.f32 %v12060_v50, %v15096_v43  ;;  %v6635_v46 = vpop.f32.mrf.mxu0  ;;  %12262 = vmatprep.mubr.msk.bf16.mxu1 %vm319_vm1, %v7583_v57  ;;  %v16459_v43 = vld [vmem:[#allocation27_spill] sm:$0xff]  ;;  %v7560_v37 = vld [vmem:[%s12653_s23 + $0x1f1] sm:$0xff] }
 0x3e0   : > { %v6245_v10 = vpop.f32.mrf.mxu1  ;;  %v7975_v22 = vpack.c.bf16 %v16459_v43, %v16458_v48  ;;  %v7558_v50 = vld [vmem:[%s12653_s23 + $0x1e1] sm:$0xff] }
 0x3e1   : > { %v15384_v55 = vadd.f32 %v12110_v42, %v6337_v27  ;;  %v6336_v18 = vadd.f32 %v6245_v10, %v15101_v63  ;;  %v12111_v56 = vpop.f32.mrf.mxu0  ;;  %v7557_v42 = vld [vmem:[%s12653_s23 + $0x1d9] sm:$0xff] }
 0x3e2   : > { %v12061_v32 = vpop.f32.mrf.mxu1  ;;  %v16463_v48 = vld [vmem:[#allocation30_spill] sm:$0xff] }
 0x3e3   : > { %v15391_v2 = vadd.f32 %v6635_v46, %v6336_v18  ;;  %v6338_v39 = vadd.f32 %v12061_v32, %v16460_v30  ;;  %v6638_v33 = vpop.f32.mrf.mxu0  ;;  %v7559_v46 = vld [vmem:[%s12653_s23 + $0x1e9] sm:$0xff] }
 0x3e4   : > { %v6248_v63 = vpop.f32.mrf.mxu1  ;;  %v7587_v32 = vpack.c.bf16 %v7560_v37, %v7559_v46  ;;  %v7954_v33 = vld [vmem:[%s12653_s23 + $0x214] sm:$0xff] }
 0x3e5   : > { %v15394_v45 = vadd.f32 %v12111_v56, %v6338_v39  ;;  %v12114_v57 = vpop.f32.mrf.mxu0  ;;  %12313 = vmatmul.mubr.msk.bf16.gmra.mxu0 %vm319_vm1, %v7974_v49  ;;  %v7586_v56 = vpack.c.bf16 %v7558_v50, %v7557_v42  ;;  %v7563_v63 = vld [vmem:[%s12653_s23 + $0x209] sm:$0xff]  ;;  %v7588_v50 = vpack.c.bf16 %v7562_v60, %v7561_v36  ;;  %v8300_v60 = vld [vmem:[%s12653_s23 + $0xb7] sm:$0xff] }
 0x3e6   : > { %v12064_v14 = vpop.f32.mrf.mxu1  ;;  %12263 = vmatmul.mubr.msk.bf16.gmra.mxu1 %vm319_vm1, %v7584_v47  ;;  %12316 = vmatprep.mubr.msk.bf16.mxu0 %vm319_vm1, %v7975_v22  ;;  %v16465_v37 = vld [vmem:[#allocation32_spill] sm:$0xff] }
 0x3e7   : > { %v6340_v51 = vadd.f32 %v12064_v14, %v16461_v1  ;;  %v6650_v19 = vpop.f32.mrf.mxu0  ;;  %12266 = vmatprep.mubr.msk.bf16.mxu1 %vm319_vm1, %v7585_v6  ;;  %v8299_v36 = vld [vmem:[%s12653_s23 + $0xaf] sm:$0xff] }
 0x3e8   : > { %v6260_v27 = vpop.f32.mrf.mxu1 }
 0x3e9   : > { %v15405_v26 = vadd.f32 %v12114_v57, %v6340_v51  ;;  %v12115_v10 = vpop.f32.mrf.mxu0  ;;  %v7564_v57 = vld [vmem:[%s12653_s23 + $0x211] sm:$0xff]  ;;  %v16464_v51 = vld [vmem:[#allocation31_spill] sm:$0xff]  ;;  %v7979_v27 = vpack.c.bf16 %v7954_v33, %v15182_v15 }
 0x3ea   : > { %v12065_v18 = vpop.f32.mrf.mxu1  ;;  %v7978_v19 = vpack.c.bf16 %v15179_v9, %v16464_v51 }
 0x3eb   : > { %v6652_v49 = vpop.f32.mrf.mxu0 }
 0x3ec   : > { %v6262_v47 = vpop.f32.mrf.mxu1 }
 0x3ed   : > { %v6339_v43 = vadd.f32 %v6262_v47, %v16463_v48  ;;  %v12118_v22 = vpop.f32.mrf.mxu0  ;;  %12317 = vmatmul.mubr.msk.bf16.gmra.mxu0 %vm319_vm1, %v7976_v16  ;;  %v7589_v16 = vpack.c.bf16 %v7564_v57, %v7563_v63 }
 0x3ee   : > { %v12068_v30 = vpop.f32.mrf.mxu1  ;;  %12267 = vmatmul.mubr.msk.bf16.gmra.mxu1 %vm319_vm1, %v7586_v56  ;;  %12320 = vmatprep.mubr.msk.bf16.mxu0 %vm319_vm1, %v7977_v20  ;;  %v7565_v20 = vld [vmem:[%s12653_s23 + $0x219] sm:$0xff] }
 0x3ef   : > { %v15415_v52 = vadd.f32 %v6652_v49, %v6339_v43  ;;  %v6664_v39 = vpop.f32.mrf.mxu0  ;;  %12270 = vmatprep.mubr.msk.bf16.mxu1 %vm319_vm1, %v7587_v32  ;;  %v7955_v49 = vld [vmem:[%s12653_s23 + $0x21c] sm:$0xff]  ;;  %v7956_v32 = vld [vmem:[%s12653_s23 + $0x224] sm:$0xff] }
 0x3f0   : > { %v6274_v6 = vpop.f32.mrf.mxu1  ;;  %v8689_v22 = vld [vmem:[%s12653_s23 + $0xc0] sm:$0xff]  ;;  %v15446_v30 = vld [vmem:[%s12653_s23 + $0xc8] sm:$0xff]  ;;  %v7980_v57 = vpack.c.bf16 %v7956_v32, %v7955_v49  ;;  %v8304_v49 = vld [vmem:[%s12653_s23 + $0xd7] sm:$0xff] }
 0x3f1   : > { %v6341_v14 = vadd.f32 %v6274_v6, %v15161_v7  ;;  %v12119_v1 = vpop.f32.mrf.mxu0 }
 0x3f2   : > { %v12069_v42 = vpop.f32.mrf.mxu1 }
 0x3f3   : > { %v15427_v46 = vadd.f32 %v6664_v39, %v6341_v14  ;;  %v6343_v10 = vadd.f32 %v12069_v42, %v16465_v37  ;;  %v6667_v28 = vpop.f32.mrf.mxu0 }
 0x3f4   : > { %v6277_v18 = vpop.f32.mrf.mxu1 }
 0x3f5   : > { %v15430_v7 = vadd.f32 %v12119_v1, %v6343_v10  ;;  %v6342_v9 = vadd.f32 %v6277_v18, %v15174_v40  ;;  %v12122_v56 = vpop.f32.mrf.mxu0  ;;  %12321 = vmatmul.mubr.msk.bf16.gmra.mxu0 %vm319_vm1, %v7978_v19  ;;  %v7566_v40 = vld [vmem:[%s12653_s23 + $0x221] sm:$0xff]  ;;  %v8737_v1 = vpack.c.bf16 %v15446_v30, %v8689_v22 }
 0x3f6   : > { %v12072_v15 = vpop.f32.mrf.mxu1  ;;  %12271 = vmatmul.mubr.msk.bf16.gmra.mxu1 %vm319_vm1, %v7588_v50  ;;  %12324 = vmatprep.mubr.msk.bf16.mxu0 %vm319_vm1, %v7979_v27  ;;  %v8347_v50 = vpack.c.bf16 %v8300_v60, %v8299_v36  ;;  %v15482_v22 = vld [vmem:[%s12653_s23 + $0xe8] sm:$0xff]  ;;  %v9616_v60 = vsel %vm392_vm0, %v15228_v11, 0  ;;  %v8305_v11 = vld [vmem:[%s12653_s23 + $0xdf] sm:$0xff] }
 0x3f7   : > { %v15439_v47 = vadd.f32 %v6667_v28, %v6342_v9  ;;  %v6345_v48 = vadd.f32 %v12072_v15, %v15186_v35  ;;  %v6679_v43 = vpop.f32.mrf.mxu0  ;;  %12274 = vmatprep.mubr.msk.bf16.mxu1 %vm319_vm1, %v7589_v16  ;;  %v7590_v35 = vpack.c.bf16 %v7566_v40, %v7565_v20  ;;  %v15463_v28 = vld [vmem:[%s12653_s23 + $0xd0] sm:$0xff]  ;;  %v8301_v9 = vld [vmem:[%s12653_s23 + $0xbf] sm:$0xff] }
 0x3f8   : > { %v6289_v39 = vpop.f32.mrf.mxu1  ;;  %v8303_v20 = vld [vmem:[%s12653_s23 + $0xcf] sm:$0xff]  ;;  %v15479_v40 = vld [vmem:[%s12653_s23 + $0xe0] sm:$0xff] }
 0x3f9   : > { %v15450_v33 = vadd.f32 %v12122_v56, %v6345_v48  ;;  %v6344_v6 = vadd.f32 %v6289_v39, %v15193_v34  ;;  %v12123_v63 = vpop.f32.mrf.mxu0  ;;  %v8302_v56 = vld [vmem:[%s12653_s23 + $0xc7] sm:$0xff] }
 0x3fa   : > { %v12073_v14 = vpop.f32.mrf.mxu1  ;;  %v8348_v39 = vpack.c.bf16 %v8302_v56, %v8301_v9  ;;  %v8308_v9 = vld [vmem:[%s12653_s23 + $0xf7] sm:$0xff] }
 0x3fb   : > { %v15454_v51 = vadd.f32 %v6679_v43, %v6344_v6  ;;  %v6346_v19 = vadd.f32 %v12073_v14, %v15196_v0  ;;  %v6682_v42 = vpop.f32.mrf.mxu0  ;;  %v15466_v0 = vld [vmem:[%s12653_s23 + $0xd8] sm:$0xff]  ;;  %v8349_v6 = vpack.c.bf16 %v8304_v49, %v8303_v20  ;;  %v8739_v14 = vpack.c.bf16 %v15482_v22, %v15479_v40 }
 0x3fc   : > { %v6292_v27 = vpop.f32.mrf.mxu1  ;;  %v8738_v43 = vpack.c.bf16 %v15466_v0, %v15463_v28  ;;  %v15495_v42 = vld [vmem:[%s12653_s23 + $0xf0] sm:$0xff] }
 0x3fd   : > { %v15457_v34 = vadd.f32 %v12123_v63, %v6346_v19  ;;  %v12126_v37 = vpop.f32.mrf.mxu0  ;;  %12325 = vmatmul.mubr.msk.bf16.gmra.mxu0 %vm319_vm1, %v7980_v57  ;;  %v9226_v57 = vsel %vm392_vm0, %v15222_v53, 0  ;;  %v15498_v53 = vld [vmem:[%s12653_s23 + $0xf8] sm:$0xff] }
 0x3fe   : > { %v12076_v10 = vpop.f32.mrf.mxu1  ;;  %12275 = vmatmul.mubr.msk.bf16.gmra.mxu1 %vm319_vm1, %v7590_v35  ;;  %12380 = vmatprep.mubr.msk.bf16.mxu0 %vm319_vm1, %v8737_v1  ;;  %v8740_v20 = vpack.c.bf16 %v15498_v53, %v15495_v42 }
 0x3ff   : > { %v6348_v16 = vadd.f32 %v12076_v10, %v15207_v4  ;;  %v6694_v18 = vpop.f32.mrf.mxu0  ;;  %12330 = vmatprep.mubr.msk.bf16.mxu1 %vm319_vm1, %v8347_v50  ;;  %v15508_v10 = vld [vmem:[%s12653_s23 + $0x108] sm:$0xff] }
 0x400   : > { %v6304_v15 = vpop.f32.mrf.mxu1  ;;  %v8307_v18 = vld [vmem:[%s12653_s23 + $0xef] sm:$0xff] }
 0x401   : > { %v15474_v32 = vadd.f32 %v12126_v37, %v6348_v16  ;;  %v12127_v48 = vpop.f32.mrf.mxu0  ;;  %v15505_v37 = vld [vmem:[%s12653_s23 + $0x100] sm:$0xff] }
 0x402   : > { %v12077_v4 = vpop.f32.mrf.mxu1 }
 0x403   : > { %v6696_v36 = vpop.f32.mrf.mxu0 }
 0x404   : > { %v6306_v63 = vpop.f32.mrf.mxu1 }
 0x405   : > { %v6347_v35 = vadd.f32 %v6306_v63, %v15230_v59  ;;  %v12182_v1 = vpop.f32.mrf.mxu0  ;;  %12381 = vmatmul.mubr.msk.bf16.vlgmr.msra.gmra.mxu0 %vm319_vm1, %v8738_v43  ;;  %v8306_v59 = vld [vmem:[%s12653_s23 + $0xe7] sm:$0xff]  ;;  %v8741_v43 = vpack.c.bf16 %v15508_v10, %v15505_v37 }
 0x406   : > { %v12132_v19 = vpop.f32.mrf.mxu1  ;;  %12331 = vmatmul.mubr.msk.bf16.vlgmr.msra.gmra.mxu1 %vm319_vm1, %v8348_v39  ;;  %12479 = vmatpush3.bf16.msra.mxu0 %v9616_v60  ;;  %v8350_v48 = vpack.c.bf16 %v8306_v59, %v8305_v11  ;;  %v8351_v60 = vpack.c.bf16 %v8308_v9, %v8307_v18  ;;  %v15532_v1 = vld [vmem:[%s12653_s23 + $0x118] sm:$0xff]  ;;  %v15540_v59 = vld [vmem:[%s12653_s23 + $0x120] sm:$0xff]  ;;  %v8311_v9 = vld [vmem:[%s12653_s23 + $0x10f] sm:$0xff] }
 0x407   : > { %v15500_v50 = vadd.f32 %v6696_v36, %v6347_v35  ;;  %12429 = vmatpush3.bf16.msra.mxu1 %v9226_v57  ;;  %v7312_v27 = vpop.f32.mrf.mxu0  ;;  %12334 = vmatprep.mubr.msk.bf16.mxu1 %vm319_vm1, %v8349_v6  ;;  %v15529_v35 = vld [vmem:[%s12653_s23 + $0x110] sm:$0xff] }
 0x408   : > { %v6922_v16 = vpop.f32.mrf.mxu1  ;;  %12384 = vmatprep.mubr.msk.bf16.mxu0 %vm319_vm1, %v8739_v14 }
 0x409   : > { %v7097_v56 = vadd.f32 %v6922_v16, %v15247_v23  ;;  %v12183_v15 = vpop.f32.mrf.mxu0  ;;  %v15543_v16 = vld [vmem:[%s12653_s23 + $0x128] sm:$0xff] }
 0x40a   : > { %v12133_v49 = vpop.f32.mrf.mxu1 }
 0x40b   : > { %v15518_v4 = vadd.f32 %v7312_v27, %v7097_v56  ;;  %v7099_v39 = vadd.f32 %v12133_v49, %v15250_v24  ;;  %v7315_v36 = vpop.f32.mrf.mxu0  ;;  %v8309_v24 = vld [vmem:[%s12653_s23 + $0xff] sm:$0xff]  ;;  %v8310_v27 = vld [vmem:[%s12653_s23 + $0x107] sm:$0xff]  ;;  %v8312_v56 = vld [vmem:[%s12653_s23 + $0x117] sm:$0xff] }
 0x40c   : > { %v6925_v23 = vpop.f32.mrf.mxu1 }
 0x40d   : > { %v15521_v6 = vadd.f32 %v12183_v15, %v7099_v39  ;;  %v7098_v63 = vadd.f32 %v6925_v23, %v15256_v31  ;;  %v12186_v57 = vpop.f32.mrf.mxu0  ;;  %12385 = vmatmul.mubr.msk.bf16.gmra.mxu0 %vm319_vm1, %v8740_v20  ;;  %v8743_v39 = vpack.c.bf16 %v15543_v16, %v15540_v59 }
 0x40e   : > { %v12136_v14 = vpop.f32.mrf.mxu1  ;;  %12335 = vmatmul.mubr.msk.bf16.gmra.mxu1 %vm319_vm1, %v8350_v48  ;;  %12388 = vmatprep.mubr.msk.bf16.mxu0 %vm319_vm1, %v8741_v43  ;;  %v8352_v43 = vpack.c.bf16 %v8310_v27, %v8309_v24 }
 0x40f   : > { %v15534_v19 = vadd.f32 %v7315_v36, %v7098_v63  ;;  %v7101_v11 = vadd.f32 %v12136_v14, %v15264_v21  ;;  %v7327_v31 = vpop.f32.mrf.mxu0  ;;  %12338 = vmatprep.mubr.msk.bf16.mxu1 %vm319_vm1, %v8351_v60  ;;  %v8742_v21 = vpack.c.bf16 %v15532_v1, %v15529_v35 }
 0x410   : > { %v6937_v18 = vpop.f32.mrf.mxu1 }
 0x411   : > { %v15547_v15 = vadd.f32 %v12186_v57, %v7101_v11  ;;  %v7100_v20 = vadd.f32 %v6937_v18, %v15271_v38  ;;  %v12187_v49 = vpop.f32.mrf.mxu0  ;;  %v8353_v38 = vpack.c.bf16 %v8312_v56, %v8311_v9  ;;  %v8313_v11 = vld [vmem:[%s12653_s23 + $0x11f] sm:$0xff]  ;;  %v8314_v9 = vld [vmem:[%s12653_s23 + $0x127] sm:$0xff] }
 0x412   : > { %v12137_v48 = vpop.f32.mrf.mxu1  ;;  %v15573_v56 = vld [vmem:[%s12653_s23 + $0x140] sm:$0xff] }
 0x413   : > { %v15554_v36 = vadd.f32 %v7327_v31, %v7100_v20  ;;  %v7102_v60 = vadd.f32 %v12137_v48, %v15274_v62  ;;  %v7330_v23 = vpop.f32.mrf.mxu0  ;;  %v15564_v62 = vld [vmem:[%s12653_s23 + $0x130] sm:$0xff]  ;;  %v15567_v31 = vld [vmem:[%s12653_s23 + $0x138] sm:$0xff]  ;;  %16467 = vst [vmem:[#allocation2_spill] sm:$0xff] %v15573_v56  ;;  %v15576_v20 = vld [vmem:[%s12653_s23 + $0x148] sm:$0xff] }
 0x414   : > { %v6940_v63 = vpop.f32.mrf.mxu1  ;;  %16466 = vst [vmem:[#allocation3_spill] sm:$0xff] %v15567_v31  ;;  %16468 = vst [vmem:[#allocation5_spill] sm:$0xff] %v15576_v20  ;;  %v8316_v48 = vld [vmem:[%s12653_s23 + $0x137] sm:$0xff]  ;;  %v8354_v23 = vpack.c.bf16 %v8314_v9, %v8313_v11  ;;  %v8317_v11 = vld [vmem:[%s12653_s23 + $0x13f] sm:$0xff] }
 0x415   : > { %v15557_v57 = vadd.f32 %v12187_v49, %v7102_v60  ;;  %v12190_v14 = vpop.f32.mrf.mxu0  ;;  %12389 = vmatmul.mubr.msk.bf16.gmra.mxu0 %vm319_vm1, %v8742_v21  ;;  %v8315_v21 = vld [vmem:[%s12653_s23 + $0x12f] sm:$0xff] }
 0x416   : > { %v12140_v24 = vpop.f32.mrf.mxu1  ;;  %12339 = vmatmul.mubr.msk.bf16.gmra.mxu1 %vm319_vm1, %v8352_v43  ;;  %12392 = vmatprep.mubr.msk.bf16.mxu0 %vm319_vm1, %v8743_v39  ;;  %v15592_v9 = vld [vmem:[%s12653_s23 + $0x150] sm:$0xff] }
 0x417   : > { %v7104_v27 = vadd.f32 %v12140_v24, %v15285_v58  ;;  %v7342_v18 = vpop.f32.mrf.mxu0  ;;  %12342 = vmatprep.mubr.msk.bf16.mxu1 %vm319_vm1, %v8353_v38  ;;  %v8744_v58 = vpack.c.bf16 %v15567_v31, %v15564_v62  ;;  %v8745_v38 = vpack.c.bf16 %v15576_v20, %v15573_v56  ;;  %v8355_v24 = vpack.c.bf16 %v8316_v48, %v8315_v21 }
 0x418   : > { %v6952_v49 = vpop.f32.mrf.mxu1  ;;  %16470 = vst [vmem:[#allocation7_spill] sm:$0xff] %v15592_v9 }
 0x419   : > { %v15580_v43 = vadd.f32 %v12190_v14, %v7104_v27  ;;  %v12191_v39 = vpop.f32.mrf.mxu0 }
 0x41a   : > { %v12141_v60 = vpop.f32.mrf.mxu1  ;;  %v15595_v39 = vld [vmem:[%s12653_s23 + $0x158] sm:$0xff] }
 0x41b   : > { %16469 = vst [vmem:[#allocation4_spill] sm:$0xff] %v15580_v43  ;;  %v7344_v63 = vpop.f32.mrf.mxu0  ;;  %16471 = vst [vmem:[#allocation6_spill] sm:$0xff] %v15595_v39  ;;  %v15602_v60 = vld [vmem:[%s12653_s23 + $0x160] sm:$0xff]  ;;  %v8746_v20 = vpack.c.bf16 %v15595_v39, %v15592_v9 }
 0x41c   : > { %v6954_v18 = vpop.f32.mrf.mxu1 }
 0x41d   : > { %v7103_v14 = vadd.f32 %v6954_v18, %v15295_v5  ;;  %v12194_v27 = vpop.f32.mrf.mxu0  ;;  %12393 = vmatmul.mubr.msk.bf16.gmra.mxu0 %vm319_vm1, %v8744_v58  ;;  %v8318_v5 = vld [vmem:[%s12653_s23 + $0x147] sm:$0xff] }
 0x41e   : > { %v12144_v49 = vpop.f32.mrf.mxu1  ;;  %12343 = vmatmul.mubr.msk.bf16.gmra.mxu1 %vm319_vm1, %v8354_v23  ;;  %12396 = vmatprep.mubr.msk.bf16.mxu0 %vm319_vm1, %v8745_v38  ;;  %v15605_v18 = vld [vmem:[%s12653_s23 + $0x168] sm:$0xff]  ;;  %v8320_v23 = vld [vmem:[%s12653_s23 + $0x157] sm:$0xff] }
 0x41f   : > { %v15597_v21 = vadd.f32 %v7344_v63, %v7103_v14  ;;  %v7356_v48 = vpop.f32.mrf.mxu0  ;;  %12346 = vmatprep.mubr.msk.bf16.mxu1 %vm319_vm1, %v8355_v24  ;;  %v8319_v27 = vld [vmem:[%s12653_s23 + $0x14f] sm:$0xff]  ;;  %v8356_v14 = vpack.c.bf16 %v8318_v5, %v8317_v11  ;;  %v8747_v24 = vpack.c.bf16 %v15605_v18, %v15602_v60  ;;  %v15628_v5 = vld [vmem:[%s12653_s23 + $0x178] sm:$0xff] }
 0x420   : > { %v6966_v58 = vpop.f32.mrf.mxu1  ;;  %v8357_v43 = vpack.c.bf16 %v8320_v23, %v8319_v27  ;;  %16474 = vst [vmem:[#allocation10_spill] sm:$0xff] %v15628_v5  ;;  %v8322_v23 = vld [vmem:[%s12653_s23 + $0x167] sm:$0xff] }
 0x421   : > { %16472 = vst [vmem:[#allocation9_spill] sm:$0xff] %v15597_v21  ;;  %v7105_v38 = vadd.f32 %v6966_v58, %v15307_v17  ;;  %v12195_v49 = vpop.f32.mrf.mxu0 }
 0x422   : > { %v12145_v63 = vpop.f32.mrf.mxu1 }
 0x423   : > { %v15614_v21 = vadd.f32 %v7356_v48, %v7105_v38  ;;  %v7107_v56 = vadd.f32 %v12145_v63, %v15310_v13  ;;  %v7359_v31 = vpop.f32.mrf.mxu0  ;;  %v8321_v13 = vld [vmem:[%s12653_s23 + $0x15f] sm:$0xff]  ;;  %v15625_v48 = vld [vmem:[%s12653_s23 + $0x170] sm:$0xff]  ;;  %v15639_v38 = vld [vmem:[%s12653_s23 + $0x188] sm:$0xff] }
 0x424   : > { %v6969_v17 = vpop.f32.mrf.mxu1  ;;  %v8323_v63 = vld [vmem:[%s12653_s23 + $0x16f] sm:$0xff] }
 0x425   : > { %v15617_v58 = vadd.f32 %v12195_v49, %v7107_v56  ;;  %v7106_v39 = vadd.f32 %v6969_v17, %v15316_v25  ;;  %v12198_v9 = vpop.f32.mrf.mxu0  ;;  %12397 = vmatmul.mubr.msk.bf16.gmra.mxu0 %vm319_vm1, %v8746_v20  ;;  %v15636_v20 = vld [vmem:[%s12653_s23 + $0x180] sm:$0xff] }
 0x426   : > { %v12148_v11 = vpop.f32.mrf.mxu1  ;;  %12347 = vmatmul.mubr.msk.bf16.gmra.mxu1 %vm319_vm1, %v8356_v14  ;;  %12400 = vmatprep.mubr.msk.bf16.mxu0 %vm319_vm1, %v8747_v24  ;;  %v8324_v14 = vld [vmem:[%s12653_s23 + $0x177] sm:$0xff] }
 0x427   : > { %16473 = vst [vmem:[#allocation8_spill] sm:$0xff] %v15617_v58  ;;  %v15630_v56 = vadd.f32 %v7359_v31, %v7106_v39  ;;  %v7109_v27 = vadd.f32 %v12148_v11, %v15324_v8  ;;  %v7371_v25 = vpop.f32.mrf.mxu0  ;;  %12350 = vmatprep.mubr.msk.bf16.mxu1 %vm319_vm1, %v8357_v43  ;;  %v8748_v8 = vpack.c.bf16 %v15628_v5, %v15625_v48 }
 0x428   : > { %v6981_v49 = vpop.f32.mrf.mxu1  ;;  %v8358_v43 = vpack.c.bf16 %v8322_v23, %v8321_v13  ;;  %v8749_v39 = vpack.c.bf16 %v15639_v38, %v15636_v20  ;;  %v15663_v23 = vld [vmem:[%s12653_s23 + $0x198] sm:$0xff] }
 0x429   : > { %16475 = vst [vmem:[#allocation11_spill] sm:$0xff] %v15630_v56  ;;  %v15643_v24 = vadd.f32 %v12198_v9, %v7109_v27  ;;  %v7108_v17 = vadd.f32 %v6981_v49, %v15331_v54  ;;  %v12199_v58 = vpop.f32.mrf.mxu0  ;;  %v8359_v54 = vpack.c.bf16 %v8324_v14, %v8323_v63  ;;  %16478 = vst [vmem:[#allocation15_spill] sm:$0xff] %v15663_v23 }
 0x42a   : > { %v12149_v31 = vpop.f32.mrf.mxu1 }
 0x42b   : > { %v15650_v11 = vadd.f32 %v7371_v25, %v7108_v17  ;;  %v7110_v56 = vadd.f32 %v12149_v31, %v15334_v44  ;;  %v7374_v9 = vpop.f32.mrf.mxu0  ;;  %v8325_v25 = vld [vmem:[%s12653_s23 + $0x17f] sm:$0xff]  ;;  %v15660_v44 = vld [vmem:[%s12653_s23 + $0x190] sm:$0xff]  ;;  %v15672_v17 = vld [vmem:[%s12653_s23 + $0x1a8] sm:$0xff] }
 0x42c   : > { %v6984_v27 = vpop.f32.mrf.mxu1  ;;  %16477 = vst [vmem:[#allocation14_spill] sm:$0xff] %v15660_v44  ;;  %16480 = vst [vmem:[#allocation17_spill] sm:$0xff] %v15672_v17  ;;  %v8327_v31 = vld [vmem:[%s12653_s23 + $0x18f] sm:$0xff] }
 0x42d   : > { %v15653_v49 = vadd.f32 %v12199_v58, %v7110_v56  ;;  %v12202_v5 = vpop.f32.mrf.mxu0  ;;  %12401 = vmatmul.mubr.msk.bf16.gmra.mxu0 %vm319_vm1, %v8748_v8  ;;  %v8326_v58 = vld [vmem:[%s12653_s23 + $0x187] sm:$0xff] }
 0x42e   : > { %v12152_v13 = vpop.f32.mrf.mxu1  ;;  %12351 = vmatmul.mubr.msk.bf16.gmra.mxu1 %vm319_vm1, %v8358_v43  ;;  %12404 = vmatprep.mubr.msk.bf16.mxu0 %vm319_vm1, %v8749_v39  ;;  %v15669_v56 = vld [vmem:[%s12653_s23 + $0x1a0] sm:$0xff]  ;;  %v8328_v43 = vld [vmem:[%s12653_s23 + $0x197] sm:$0xff] }
 0x42f   : > { %16476 = vst [vmem:[#allocation13_spill] sm:$0xff] %v15653_v49  ;;  %v7112_v63 = vadd.f32 %v12152_v13, %v15345_v61  ;;  %v7386_v14 = vpop.f32.mrf.mxu0  ;;  %12354 = vmatprep.mubr.msk.bf16.mxu1 %vm319_vm1, %v8359_v54  ;;  %16479 = vst [vmem:[#allocation12_spill] sm:$0xff] %v15669_v56  ;;  %v8750_v61 = vpack.c.bf16 %v15663_v23, %v15660_v44  ;;  %v8360_v13 = vpack.c.bf16 %v8326_v58, %v8325_v25  ;;  %v8329_v25 = vld [vmem:[%s12653_s23 + $0x19f] sm:$0xff]  ;;  %v15688_v58 = vld [vmem:[%s12653_s23 + $0x1b0] sm:$0xff] }
 0x430   : > { %v6996_v8 = vpop.f32.mrf.mxu1  ;;  %v8751_v54 = vpack.c.bf16 %v15672_v17, %v15669_v56  ;;  %16482 = vst [vmem:[#allocation19_spill] sm:$0xff] %v15688_v58 }
 0x431   : > { %v15676_v39 = vadd.f32 %v12202_v5, %v7112_v63  ;;  %v12203_v9 = vpop.f32.mrf.mxu0  ;;  %v8361_v8 = vpack.c.bf16 %v8328_v43, %v8327_v31 }
 0x432   : > { %v12153_v27 = vpop.f32.mrf.mxu1 }
 0x433   : > { %16481 = vst [vmem:[#allocation16_spill] sm:$0xff] %v15676_v39  ;;  %v7388_v14 = vpop.f32.mrf.mxu0  ;;  %v15691_v27 = vld [vmem:[%s12653_s23 + $0x1b8] sm:$0xff] }
 0x434   : > { %v6998_v49 = vpop.f32.mrf.mxu1  ;;  %16483 = vst [vmem:[#allocation18_spill] sm:$0xff] %v15691_v27  ;;  %v8752_v56 = vpack.c.bf16 %v15691_v27, %v15688_v58 }
 0x435   : > { %v7111_v5 = vadd.f32 %v6998_v49, %v15355_v3  ;;  %v12206_v63 = vpop.f32.mrf.mxu0  ;;  %12405 = vmatmul.mubr.msk.bf16.gmra.mxu0 %vm319_vm1, %v8750_v61  ;;  %v8330_v3 = vld [vmem:[%s12653_s23 + $0x1a7] sm:$0xff] }
 0x436   : > { %v12156_v9 = vpop.f32.mrf.mxu1  ;;  %12355 = vmatmul.mubr.msk.bf16.gmra.mxu1 %vm319_vm1, %v8360_v13  ;;  %12408 = vmatprep.mubr.msk.bf16.mxu0 %vm319_vm1, %v8751_v54  ;;  %v15698_v49 = vld [vmem:[%s12653_s23 + $0x1c0] sm:$0xff]  ;;  %v15701_v63 = vld [vmem:[%s12653_s23 + $0x1c8] sm:$0xff]  ;;  %v8332_v13 = vld [vmem:[%s12653_s23 + $0x1b7] sm:$0xff] }
 0x437   : > { %v15693_v31 = vadd.f32 %v7388_v14, %v7111_v5  ;;  %v7400_v43 = vpop.f32.mrf.mxu0  ;;  %12358 = vmatprep.mubr.msk.bf16.mxu1 %vm319_vm1, %v8361_v8  ;;  %v8331_v9 = vld [vmem:[%s12653_s23 + $0x1af] sm:$0xff]  ;;  %v8362_v5 = vpack.c.bf16 %v8330_v3, %v8329_v25  ;;  %v8753_v8 = vpack.c.bf16 %v15701_v63, %v15698_v49  ;;  %v15724_v3 = vld [vmem:[%s12653_s23 + $0x1d8] sm:$0xff] }
 0x438   : > { %v7010_v61 = vpop.f32.mrf.mxu1  ;;  %v8363_v44 = vpack.c.bf16 %v8332_v13, %v8331_v9  ;;  %16486 = vst [vmem:[#allocation22_spill] sm:$0xff] %v15724_v3  ;;  %v8334_v9 = vld [vmem:[%s12653_s23 + $0x1c7] sm:$0xff] }
 0x439   : > { %16484 = vst [vmem:[#allocation21_spill] sm:$0xff] %v15693_v31  ;;  %v7113_v54 = vadd.f32 %v7010_v61, %v15367_v29  ;;  %v12207_v17 = vpop.f32.mrf.mxu0  ;;  %v15735_v13 = vld [vmem:[%s12653_s23 + $0x1e8] sm:$0xff] }
 0x43a   : > { %v12157_v14 = vpop.f32.mrf.mxu1 }
 0x43b   : > { %v15710_v31 = vadd.f32 %v7400_v43, %v7113_v54  ;;  %v7115_v23 = vadd.f32 %v12157_v14, %v15370_v41  ;;  %v7403_v39 = vpop.f32.mrf.mxu0  ;;  %v8333_v41 = vld [vmem:[%s12653_s23 + $0x1bf] sm:$0xff]  ;;  %v15721_v43 = vld [vmem:[%s12653_s23 + $0x1d0] sm:$0xff] }
 0x43c   : > { %v7013_v29 = vpop.f32.mrf.mxu1  ;;  %v8335_v14 = vld [vmem:[%s12653_s23 + $0x1cf] sm:$0xff] }
 0x43d   : > { %v15713_v61 = vadd.f32 %v12207_v17, %v7115_v23  ;;  %v7114_v27 = vadd.f32 %v7013_v29, %v15376_v12  ;;  %v12210_v58 = vpop.f32.mrf.mxu0  ;;  %12409 = vmatmul.mubr.msk.bf16.gmra.mxu0 %vm319_vm1, %v8752_v56  ;;  %v15732_v56 = vld [vmem:[%s12653_s23 + $0x1e0] sm:$0xff] }
 0x43e   : > { %v12160_v25 = vpop.f32.mrf.mxu1  ;;  %12359 = vmatmul.mubr.msk.bf16.gmra.mxu1 %vm319_vm1, %v8362_v5  ;;  %12412 = vmatprep.mubr.msk.bf16.mxu0 %vm319_vm1, %v8753_v8  ;;  %v8336_v5 = vld [vmem:[%s12653_s23 + $0x1d7] sm:$0xff] }
 0x43f   : > { %16485 = vst [vmem:[#allocation20_spill] sm:$0xff] %v15713_v61  ;;  %v15726_v23 = vadd.f32 %v7403_v39, %v7114_v27  ;;  %v7117_v17 = vadd.f32 %v12160_v25, %v15384_v55  ;;  %v7415_v12 = vpop.f32.mrf.mxu0  ;;  %12362 = vmatprep.mubr.msk.bf16.mxu1 %vm319_vm1, %v8363_v44  ;;  %v8754_v55 = vpack.c.bf16 %v15724_v3, %v15721_v43 }
 0x440   : > { %v7025_v54 = vpop.f32.mrf.mxu1  ;;  %v8364_v44 = vpack.c.bf16 %v8334_v9, %v8333_v41  ;;  %v8755_v27 = vpack.c.bf16 %v15735_v13, %v15732_v56  ;;  %v15759_v9 = vld [vmem:[%s12653_s23 + $0x1f8] sm:$0xff] }
 0x441   : > { %16487 = vst [vmem:[#allocation23_spill] sm:$0xff] %v15726_v23  ;;  %v15739_v8 = vadd.f32 %v12210_v58, %v7117_v17  ;;  %v7116_v29 = vadd.f32 %v7025_v54, %v15391_v2  ;;  %v12211_v61 = vpop.f32.mrf.mxu0  ;;  %v8365_v2 = vpack.c.bf16 %v8336_v5, %v8335_v14  ;;  %16490 = vst [vmem:[#allocation27_spill] sm:$0xff] %v15759_v9 }
 0x442   : > { %v12161_v39 = vpop.f32.mrf.mxu1 }
 0x443   : > { %v15746_v25 = vadd.f32 %v7415_v12, %v7116_v29  ;;  %v7118_v23 = vadd.f32 %v12161_v39, %v15394_v45  ;;  %v7418_v58 = vpop.f32.mrf.mxu0  ;;  %v8337_v12 = vld [vmem:[%s12653_s23 + $0x1df] sm:$0xff]  ;;  %v15756_v45 = vld [vmem:[%s12653_s23 + $0x1f0] sm:$0xff]  ;;  %v15768_v29 = vld [vmem:[%s12653_s23 + $0x208] sm:$0xff] }
 0x444   : > { %v7028_v17 = vpop.f32.mrf.mxu1  ;;  %16489 = vst [vmem:[#allocation26_spill] sm:$0xff] %v15756_v45  ;;  %16492 = vst [vmem:[#allocation29_spill] sm:$0xff] %v15768_v29  ;;  %v8339_v39 = vld [vmem:[%s12653_s23 + $0x1ef] sm:$0xff] }
 0x445   : > { %v15749_v54 = vadd.f32 %v12211_v61, %v7118_v23  ;;  %v12214_v3 = vpop.f32.mrf.mxu0  ;;  %12413 = vmatmul.mubr.msk.bf16.gmra.mxu0 %vm319_vm1, %v8754_v55  ;;  %v8338_v61 = vld [vmem:[%s12653_s23 + $0x1e7] sm:$0xff] }
 0x446   : > { %v12164_v41 = vpop.f32.mrf.mxu1  ;;  %12363 = vmatmul.mubr.msk.bf16.gmra.mxu1 %vm319_vm1, %v8364_v44  ;;  %12416 = vmatprep.mubr.msk.bf16.mxu0 %vm319_vm1, %v8755_v27  ;;  %v15765_v23 = vld [vmem:[%s12653_s23 + $0x200] sm:$0xff]  ;;  %v8340_v44 = vld [vmem:[%s12653_s23 + $0x1f7] sm:$0xff] }
 0x447   : > { %16488 = vst [vmem:[#allocation25_spill] sm:$0xff] %v15749_v54  ;;  %v7120_v14 = vadd.f32 %v12164_v41, %v15405_v26  ;;  %v7430_v5 = vpop.f32.mrf.mxu0  ;;  %12366 = vmatprep.mubr.msk.bf16.mxu1 %vm319_vm1, %v8365_v2  ;;  %16491 = vst [vmem:[#allocation24_spill] sm:$0xff] %v15765_v23  ;;  %v8756_v26 = vpack.c.bf16 %v15759_v9, %v15756_v45  ;;  %v8366_v41 = vpack.c.bf16 %v8338_v61, %v8337_v12  ;;  %v8341_v12 = vld [vmem:[%s12653_s23 + $0x1ff] sm:$0xff]  ;;  %v15784_v61 = vld [vmem:[%s12653_s23 + $0x210] sm:$0xff] }
 0x448   : > { %v7040_v55 = vpop.f32.mrf.mxu1  ;;  %v8757_v2 = vpack.c.bf16 %v15768_v29, %v15765_v23  ;;  %16494 = vst [vmem:[#allocation30_spill] sm:$0xff] %v15784_v61 }
 0x449   : > { %v15772_v27 = vadd.f32 %v12214_v3, %v7120_v14  ;;  %v12215_v58 = vpop.f32.mrf.mxu0  ;;  %v8367_v55 = vpack.c.bf16 %v8340_v44, %v8339_v39 }
 0x44a   : > { %v12165_v17 = vpop.f32.mrf.mxu1 }
 0x44b   : > { %16493 = vst [vmem:[#allocation28_spill] sm:$0xff] %v15772_v27  ;;  %v7432_v5 = vpop.f32.mrf.mxu0  ;;  %v15787_v17 = vld [vmem:[%s12653_s23 + $0x218] sm:$0xff] }
 0x44c   : > { %v7042_v54 = vpop.f32.mrf.mxu1  ;;  %16495 = vst [vmem:[#allocation31_spill] sm:$0xff] %v15787_v17  ;;  %v8758_v23 = vpack.c.bf16 %v15787_v17, %v15784_v61 }
 0x44d   : > { %v7119_v3 = vadd.f32 %v7042_v54, %v15415_v52  ;;  %v12218_v14 = vpop.f32.mrf.mxu0  ;;  %12417 = vmatmul.mubr.msk.bf16.gmra.mxu0 %vm319_vm1, %v8756_v26  ;;  %v8342_v52 = vld [vmem:[%s12653_s23 + $0x207] sm:$0xff] }
 0x44e   : > { %v12168_v58 = vpop.f32.mrf.mxu1  ;;  %12367 = vmatmul.mubr.msk.bf16.gmra.mxu1 %vm319_vm1, %v8366_v41  ;;  %12420 = vmatprep.mubr.msk.bf16.mxu0 %vm319_vm1, %v8757_v2  ;;  %v15794_v54 = vld [vmem:[%s12653_s23 + $0x220] sm:$0xff]  ;;  %v15797_v14 = vld [vmem:[%s12653_s23 + $0x228] sm:$0xff]  ;;  %v8344_v41 = vld [vmem:[%s12653_s23 + $0x217] sm:$0xff] }
 0x44f   : > { %v15789_v39 = vadd.f32 %v7432_v5, %v7119_v3  ;;  %v7444_v44 = vpop.f32.mrf.mxu0  ;;  %12370 = vmatprep.mubr.msk.bf16.mxu1 %vm319_vm1, %v8367_v55  ;;  %v8343_v58 = vld [vmem:[%s12653_s23 + $0x20f] sm:$0xff]  ;;  %v8368_v3 = vpack.c.bf16 %v8342_v52, %v8341_v12  ;;  %v8759_v55 = vpack.c.bf16 %v15797_v14, %v15794_v54 }
 0x450   : > { %v7054_v26 = vpop.f32.mrf.mxu1  ;;  %v8369_v45 = vpack.c.bf16 %v8344_v41, %v8343_v58  ;;  %v8346_v58 = vld [vmem:[%s12653_s23 + $0x227] sm:$0xff] }
 0x451   : > { %16496 = vst [vmem:[#allocation32_spill] sm:$0xff] %v15789_v39  ;;  %v7121_v2 = vadd.f32 %v7054_v26, %v15427_v46  ;;  %v12219_v29 = vpop.f32.mrf.mxu0 }
 0x452   : > { %v12169_v5 = vpop.f32.mrf.mxu1 }
 0x453   : > { %v15806_v39 = vadd.f32 %v7444_v44, %v7121_v2  ;;  %v7123_v9 = vadd.f32 %v12169_v5, %v15430_v7  ;;  %v7447_v27 = vpop.f32.mrf.mxu0  ;;  %v15816_v7 = vld [vmem:[%s12653_s23 + $0x230] sm:$0xff]  ;;  %v15819_v44 = vld [vmem:[%s12653_s23 + $0x238] sm:$0xff] }
 0x454   : > { %v7057_v46 = vpop.f32.mrf.mxu1  ;;  %v9080_v2 = vld [vmem:[%s12653_s23 + $0xcc] sm:$0xff] }
 0x455   : > { %v15809_v26 = vadd.f32 %v12219_v29, %v7123_v9  ;;  %v7122_v17 = vadd.f32 %v7057_v46, %v15439_v47  ;;  %v12222_v61 = vpop.f32.mrf.mxu0  ;;  %12421 = vmatmul.mubr.msk.bf16.gmra.mxu0 %vm319_vm1, %v8758_v23  ;;  %v8345_v47 = vld [vmem:[%s12653_s23 + $0x21f] sm:$0xff]  ;;  %v8760_v46 = vpack.c.bf16 %v15819_v44, %v15816_v7 }
 0x456   : > { %v12172_v12 = vpop.f32.mrf.mxu1  ;;  %12371 = vmatmul.mubr.msk.bf16.gmra.mxu1 %vm319_vm1, %v8368_v3  ;;  %12424 = vmatprep.mubr.msk.bf16.mxu0 %vm319_vm1, %v8759_v55  ;;  %v9079_v23 = vld [vmem:[%s12653_s23 + $0xc4] sm:$0xff] }
 0x457   : > { %v15821_v52 = vadd.f32 %v7447_v27, %v7122_v17  ;;  %v7125_v9 = vadd.f32 %v12172_v12, %v15450_v33  ;;  %v7459_v29 = vpop.f32.mrf.mxu0  ;;  %12374 = vmatprep.mubr.msk.bf16.mxu1 %vm319_vm1, %v8369_v45  ;;  %v8370_v17 = vpack.c.bf16 %v8346_v58, %v8345_v47  ;;  %v9517_v33 = vpack.c.bf16 %v15463_v28, %v15446_v30 }
 0x458   : > { %v7069_v41 = vpop.f32.mrf.mxu1 }
 0x459   : > { %v15829_v5 = vadd.f32 %v12222_v61, %v7125_v9  ;;  %v7124_v3 = vadd.f32 %v7069_v41, %v15454_v51  ;;  %v12223_v55 = vpop.f32.mrf.mxu0  ;;  %v9127_v9 = vpack.c.bf16 %v9080_v2, %v9079_v23  ;;  %v9083_v23 = vld [vmem:[%s12653_s23 + $0xe4] sm:$0xff]  ;;  %v9084_v2 = vld [vmem:[%s12653_s23 + $0xec] sm:$0xff] }
 0x45a   : > { %v12173_v27 = vpop.f32.mrf.mxu1 }
 0x45b   : > { %16497 = vst [vmem:[#allocation33_spill] sm:$0xff] %v15829_v5  ;;  %v15836_v45 = vadd.f32 %v7459_v29, %v7124_v3  ;;  %v7126_v12 = vadd.f32 %v12173_v27, %v15457_v34  ;;  %v7462_v61 = vpop.f32.mrf.mxu0  ;;  %v9081_v34 = vld [vmem:[%s12653_s23 + $0xd4] sm:$0xff]  ;;  %v9082_v29 = vld [vmem:[%s12653_s23 + $0xdc] sm:$0xff] }
 0x45c   : > { %v7072_v51 = vpop.f32.mrf.mxu1 }
 0x45d   : > { %v15839_v41 = vadd.f32 %v12223_v55, %v7126_v12  ;;  %v12226_v5 = vpop.f32.mrf.mxu0  ;;  %12425 = vmatmul.mubr.msk.bf16.gmra.mxu0 %vm319_vm1, %v8760_v46  ;;  %v9518_v46 = vpack.c.bf16 %v15479_v40, %v15466_v0  ;;  %v9129_v12 = vpack.c.bf16 %v9084_v2, %v9083_v23  ;;  %v9521_v2 = vpack.c.bf16 %v15529_v35, %v15508_v10 }
 0x45e   : > { %v12176_v47 = vpop.f32.mrf.mxu1  ;;  %12375 = vmatmul.mubr.msk.bf16.gmra.mxu1 %vm319_vm1, %v8370_v17  ;;  %12480 = vmatprep.mubr.msk.bf16.mxu0 %vm319_vm1, %v9517_v33  ;;  %v9128_v17 = vpack.c.bf16 %v9082_v29, %v9081_v34  ;;  %v9520_v29 = vpack.c.bf16 %v15505_v37, %v15498_v53 }
 0x45f   : > { %v7128_v30 = vadd.f32 %v12176_v47, %v15474_v32  ;;  %v7474_v28 = vpop.f32.mrf.mxu0  ;;  %12430 = vmatprep.mubr.msk.bf16.mxu1 %vm319_vm1, %v9127_v9  ;;  %v9519_v32 = vpack.c.bf16 %v15495_v42, %v15482_v22  ;;  %v9085_v22 = vld [vmem:[%s12653_s23 + $0xf4] sm:$0xff]  ;;  %v9086_v42 = vld [vmem:[%s12653_s23 + $0xfc] sm:$0xff] }
 0x460   : > { %v7084_v58 = vpop.f32.mrf.mxu1  ;;  %v9088_v28 = vld [vmem:[%s12653_s23 + $0x10c] sm:$0xff]  ;;  %v9130_v23 = vpack.c.bf16 %v9086_v42, %v9085_v22  ;;  %v9522_v42 = vpack.c.bf16 %v15540_v59, %v15532_v1 }
 0x461   : > { %v15850_v3 = vadd.f32 %v12226_v5, %v7128_v30  ;;  %v12227_v55 = vpop.f32.mrf.mxu0  ;;  %v9087_v30 = vld [vmem:[%s12653_s23 + $0x104] sm:$0xff]  ;;  %v16498_v59 = vld [vmem:[#allocation4_spill] sm:$0xff] }
 0x462   : > { %v12177_v27 = vpop.f32.mrf.mxu1 }
 0x463   : > { %v7476_v33 = vpop.f32.mrf.mxu0 }
 0x464   : > { %v7086_v61 = vpop.f32.mrf.mxu1 }
 0x465   : > { %v7127_v9 = vadd.f32 %v7086_v61, %v15500_v50  ;;  %v12282_v5 = vpop.f32.mrf.mxu0  ;;  %12481 = vmatmul.mubr.msk.bf16.vlgmr.msra.gmra.mxu0 %vm319_vm1, %v9518_v46  ;;  %v9090_v61 = vld [vmem:[%s12653_s23 + $0x11c] sm:$0xff] }
 0x466   : > { %v12232_v51 = vpop.f32.mrf.mxu1  ;;  %12431 = vmatmul.mubr.msk.bf16.vlgmr.msra.gmra.mxu1 %vm319_vm1, %v9128_v17  ;;  %12484 = vmatprep.mubr.msk.bf16.mxu0 %vm319_vm1, %v9519_v32  ;;  %v9131_v17 = vpack.c.bf16 %v9088_v28, %v9087_v30  ;;  %v9091_v5 = vld [vmem:[%s12653_s23 + $0x124] sm:$0xff] }
 0x467   : > { %v15860_v0 = vadd.f32 %v7476_v33, %v7127_v9  ;;  %v8092_v40 = vpop.f32.mrf.mxu0  ;;  %12434 = vmatprep.mubr.msk.bf16.mxu1 %vm319_vm1, %v9129_v12  ;;  %v9089_v12 = vld [vmem:[%s12653_s23 + $0x114] sm:$0xff] }
 0x468   : > { %v7702_v47 = vpop.f32.mrf.mxu1  ;;  %v9132_v30 = vpack.c.bf16 %v9090_v61, %v9089_v12  ;;  %v16501_v61 = vld [vmem:[#allocation5_spill] sm:$0xff] }
 0x469   : > { %v7877_v50 = vadd.f32 %v7702_v47, %v15518_v4  ;;  %v12283_v34 = vpop.f32.mrf.mxu0 }
 0x46a   : > { %v12233_v58 = vpop.f32.mrf.mxu1 }
 0x46b   : > { %v15872_v55 = vadd.f32 %v8092_v40, %v7877_v50  ;;  %v7879_v46 = vadd.f32 %v12233_v58, %v15521_v6  ;;  %v8095_v27 = vpop.f32.mrf.mxu0 }
 0x46c   : > { %v7705_v32 = vpop.f32.mrf.mxu1 }
 0x46d   : > { %v15875_v4 = vadd.f32 %v12283_v34, %v7879_v46  ;;  %v7878_v53 = vadd.f32 %v7705_v32, %v15534_v19  ;;  %v12286_v37 = vpop.f32.mrf.mxu0  ;;  %12485 = vmatmul.mubr.msk.bf16.gmra.mxu0 %vm319_vm1, %v9520_v29  ;;  %v9092_v19 = vld [vmem:[%s12653_s23 + $0x12c] sm:$0xff] }
 0x46e   : > { %v12236_v33 = vpop.f32.mrf.mxu1  ;;  %12435 = vmatmul.mubr.msk.bf16.gmra.mxu1 %vm319_vm1, %v9130_v23  ;;  %12488 = vmatprep.mubr.msk.bf16.mxu0 %vm319_vm1, %v9521_v2  ;;  %v9133_v29 = vpack.c.bf16 %v9092_v19, %v9091_v5  ;;  %v9094_v2 = vld [vmem:[%s12653_s23 + $0x13c] sm:$0xff] }
 0x46f   : > { %v15881_v10 = vadd.f32 %v8095_v27, %v7878_v53  ;;  %v7881_v6 = vadd.f32 %v12236_v33, %v15547_v15  ;;  %v8107_v35 = vpop.f32.mrf.mxu0  ;;  %12438 = vmatprep.mubr.msk.bf16.mxu1 %vm319_vm1, %v9131_v17  ;;  %v9523_v15 = vpack.c.bf16 %v15564_v62, %v15543_v16  ;;  %v9095_v27 = vld [vmem:[%s12653_s23 + $0x144] sm:$0xff]  ;;  %v9096_v17 = vld [vmem:[%s12653_s23 + $0x14c] sm:$0xff] }
 0x470   : > { %v7717_v9 = vpop.f32.mrf.mxu1  ;;  %v16500_v33 = vld [vmem:[#allocation2_spill] sm:$0xff] }
 0x471   : > { %v15889_v51 = vadd.f32 %v12286_v37, %v7881_v6  ;;  %v7880_v40 = vadd.f32 %v7717_v9, %v15554_v36  ;;  %v12287_v22 = vpop.f32.mrf.mxu0  ;;  %v16499_v37 = vld [vmem:[#allocation3_spill] sm:$0xff] }
 0x472   : > { %v12237_v47 = vpop.f32.mrf.mxu1  ;;  %v9524_v6 = vpack.c.bf16 %v16500_v33, %v16499_v37  ;;  %v16502_v9 = vld [vmem:[#allocation7_spill] sm:$0xff]  ;;  %v16505_v37 = vld [vmem:[#allocation8_spill] sm:$0xff] }
 0x473   : > { %v15896_v28 = vadd.f32 %v8107_v35, %v7880_v40  ;;  %v7882_v50 = vadd.f32 %v12237_v47, %v15557_v57  ;;  %v8110_v34 = vpop.f32.mrf.mxu0  ;;  %v9093_v57 = vld [vmem:[%s12653_s23 + $0x134] sm:$0xff]  ;;  %v9525_v5 = vpack.c.bf16 %v16502_v9, %v16501_v61  ;;  %v9135_v40 = vpack.c.bf16 %v9096_v17, %v9095_v27  ;;  %v16506_v61 = vld [vmem:[#allocation11_spill] sm:$0xff] }
 0x474   : > { %v7720_v36 = vpop.f32.mrf.mxu1  ;;  %v9134_v12 = vpack.c.bf16 %v9094_v2, %v9093_v57  ;;  %v16504_v57 = vld [vmem:[#allocation6_spill] sm:$0xff]  ;;  %v9527_v17 = vpack.c.bf16 %v15625_v48, %v15605_v18 }
 0x475   : > { %v15899_v58 = vadd.f32 %v12287_v22, %v7882_v50  ;;  %v12290_v23 = vpop.f32.mrf.mxu0  ;;  %12489 = vmatmul.mubr.msk.bf16.gmra.mxu0 %vm319_vm1, %v9522_v42  ;;  %v16503_v42 = vld [vmem:[#allocation9_spill] sm:$0xff]  ;;  %v9526_v2 = vpack.c.bf16 %v15602_v60, %v16504_v57 }
 0x476   : > { %v12240_v1 = vpop.f32.mrf.mxu1  ;;  %12439 = vmatmul.mubr.msk.bf16.gmra.mxu1 %vm319_vm1, %v9132_v30  ;;  %12492 = vmatprep.mubr.msk.bf16.mxu0 %vm319_vm1, %v9523_v15  ;;  %v9098_v36 = vld [vmem:[%s12653_s23 + $0x15c] sm:$0xff] }
 0x477   : > { %v7884_v16 = vadd.f32 %v12240_v1, %v16498_v59  ;;  %v8122_v62 = vpop.f32.mrf.mxu0  ;;  %12442 = vmatprep.mubr.msk.bf16.mxu1 %vm319_vm1, %v9133_v29  ;;  %v9097_v29 = vld [vmem:[%s12653_s23 + $0x154] sm:$0xff]  ;;  %v9099_v1 = vld [vmem:[%s12653_s23 + $0x164] sm:$0xff]  ;;  %v9100_v59 = vld [vmem:[%s12653_s23 + $0x16c] sm:$0xff] }
 0x478   : > { %v7732_v46 = vpop.f32.mrf.mxu1  ;;  %v9136_v27 = vpack.c.bf16 %v9098_v36, %v9097_v29  ;;  %v16507_v36 = vld [vmem:[#allocation10_spill] sm:$0xff]  ;;  %v16509_v57 = vld [vmem:[#allocation13_spill] sm:$0xff] }
 0x479   : > { %v15910_v32 = vadd.f32 %v12290_v23, %v7884_v16  ;;  %v12291_v53 = vpop.f32.mrf.mxu0 }
 0x47a   : > { %v12241_v35 = vpop.f32.mrf.mxu1 }
 0x47b   : > { %v8124_v19 = vpop.f32.mrf.mxu0  ;;  %v9137_v35 = vpack.c.bf16 %v9100_v59, %v9099_v1 }
 0x47c   : > { %v7734_v22 = vpop.f32.mrf.mxu1 }
 0x47d   : > { %v7883_v47 = vadd.f32 %v7734_v22, %v16503_v42  ;;  %v12294_v30 = vpop.f32.mrf.mxu0  ;;  %12493 = vmatmul.mubr.msk.bf16.gmra.mxu0 %vm319_vm1, %v9524_v6  ;;  %v9102_v22 = vld [vmem:[%s12653_s23 + $0x17c] sm:$0xff] }
 0x47e   : > { %v12244_v15 = vpop.f32.mrf.mxu1  ;;  %12443 = vmatmul.mubr.msk.bf16.gmra.mxu1 %vm319_vm1, %v9134_v12  ;;  %12496 = vmatprep.mubr.msk.bf16.mxu0 %vm319_vm1, %v9525_v5  ;;  %v9104_v30 = vld [vmem:[%s12653_s23 + $0x18c] sm:$0xff] }
 0x47f   : > { %v15920_v50 = vadd.f32 %v8124_v19, %v7883_v47  ;;  %v8136_v34 = vpop.f32.mrf.mxu0  ;;  %12446 = vmatprep.mubr.msk.bf16.mxu1 %vm319_vm1, %v9135_v40  ;;  %v9101_v40 = vld [vmem:[%s12653_s23 + $0x174] sm:$0xff]  ;;  %v9103_v47 = vld [vmem:[%s12653_s23 + $0x184] sm:$0xff] }
 0x480   : > { %v7746_v23 = vpop.f32.mrf.mxu1  ;;  %v9138_v59 = vpack.c.bf16 %v9102_v22, %v9101_v40  ;;  %v16512_v40 = vld [vmem:[#allocation12_spill] sm:$0xff] }
 0x481   : > { %v7885_v16 = vadd.f32 %v7746_v23, %v15614_v21  ;;  %v12295_v62 = vpop.f32.mrf.mxu0  ;;  %v9528_v23 = vpack.c.bf16 %v15636_v20, %v16507_v36 }
 0x482   : > { %v12245_v46 = vpop.f32.mrf.mxu1 }
 0x483   : > { %v15932_v53 = vadd.f32 %v8136_v34, %v7885_v16  ;;  %v7887_v33 = vadd.f32 %v12245_v46, %v16505_v37  ;;  %v8139_v6 = vpop.f32.mrf.mxu0 }
 0x484   : > { %v7749_v12 = vpop.f32.mrf.mxu1 }
 0x485   : > { %v15935_v21 = vadd.f32 %v12295_v62, %v7887_v33  ;;  %v7886_v60 = vadd.f32 %v7749_v12, %v16506_v61  ;;  %v12298_v9 = vpop.f32.mrf.mxu0  ;;  %12497 = vmatmul.mubr.msk.bf16.gmra.mxu0 %vm319_vm1, %v9526_v2  ;;  %v9106_v12 = vld [vmem:[%s12653_s23 + $0x19c] sm:$0xff] }
 0x486   : > { %v12248_v5 = vpop.f32.mrf.mxu1  ;;  %12447 = vmatmul.mubr.msk.bf16.gmra.mxu1 %vm319_vm1, %v9136_v27  ;;  %12500 = vmatprep.mubr.msk.bf16.mxu0 %vm319_vm1, %v9527_v17  ;;  %v9139_v27 = vpack.c.bf16 %v9104_v30, %v9103_v47  ;;  %v16513_v30 = vld [vmem:[#allocation17_spill] sm:$0xff] }
 0x487   : > { %v15941_v18 = vadd.f32 %v8139_v6, %v7886_v60  ;;  %v7889_v48 = vadd.f32 %v12248_v5, %v15643_v24  ;;  %v8151_v19 = vpop.f32.mrf.mxu0  ;;  %12450 = vmatprep.mubr.msk.bf16.mxu1 %vm319_vm1, %v9137_v35  ;;  %v16508_v24 = vld [vmem:[#allocation14_spill] sm:$0xff]  ;;  %v9105_v35 = vld [vmem:[%s12653_s23 + $0x194] sm:$0xff] }
 0x488   : > { %v7761_v42 = vpop.f32.mrf.mxu1  ;;  %v9529_v16 = vpack.c.bf16 %v16508_v24, %v15639_v38  ;;  %v16510_v38 = vld [vmem:[#allocation16_spill] sm:$0xff]  ;;  %v9107_v60 = vld [vmem:[%s12653_s23 + $0x1a4] sm:$0xff]  ;;  %v9140_v47 = vpack.c.bf16 %v9106_v12, %v9105_v35 }
 0x489   : > { %v15949_v15 = vadd.f32 %v12298_v9, %v7889_v48  ;;  %v7888_v34 = vadd.f32 %v7761_v42, %v15650_v11  ;;  %v12299_v29 = vpop.f32.mrf.mxu0  ;;  %v9108_v9 = vld [vmem:[%s12653_s23 + $0x1ac] sm:$0xff]  ;;  %v16516_v35 = vld [vmem:[#allocation18_spill] sm:$0xff] }
 0x48a   : > { %v12249_v1 = vpop.f32.mrf.mxu1  ;;  %v9532_v12 = vpack.c.bf16 %v15698_v49, %v16516_v35  ;;  %v16521_v35 = vld [vmem:[#allocation25_spill] sm:$0xff] }
 0x48b   : > { %v15956_v62 = vadd.f32 %v8151_v19, %v7888_v34  ;;  %v7890_v2 = vadd.f32 %v12249_v1, %v16509_v57  ;;  %v8154_v46 = vpop.f32.mrf.mxu0  ;;  %v16511_v19 = vld [vmem:[#allocation15_spill] sm:$0xff] }
 0x48c   : > { %v7764_v11 = vpop.f32.mrf.mxu1  ;;  %v9530_v22 = vpack.c.bf16 %v16512_v40, %v16511_v19  ;;  %v16514_v34 = vld [vmem:[#allocation19_spill] sm:$0xff]  ;;  %v16517_v19 = vld [vmem:[#allocation20_spill] sm:$0xff] }
 0x48d   : > { %v15959_v17 = vadd.f32 %v12299_v29, %v7890_v2  ;;  %v12302_v37 = vpop.f32.mrf.mxu0  ;;  %12501 = vmatmul.mubr.msk.bf16.gmra.mxu0 %vm319_vm1, %v9528_v23  ;;  %v9531_v29 = vpack.c.bf16 %v16514_v34, %v16513_v30  ;;  %v9141_v23 = vpack.c.bf16 %v9108_v9, %v9107_v60  ;;  %v9110_v11 = vld [vmem:[%s12653_s23 + $0x1bc] sm:$0xff]  ;;  %v9533_v9 = vpack.c.bf16 %v15721_v43, %v15701_v63  ;;  %v16518_v30 = vld [vmem:[#allocation23_spill] sm:$0xff] }
 0x48e   : > { %v12252_v20 = vpop.f32.mrf.mxu1  ;;  %12451 = vmatmul.mubr.msk.bf16.gmra.mxu1 %vm319_vm1, %v9138_v59  ;;  %12504 = vmatprep.mubr.msk.bf16.mxu0 %vm319_vm1, %v9529_v16  ;;  %v16515_v59 = vld [vmem:[#allocation21_spill] sm:$0xff] }
 0x48f   : > { %v7892_v33 = vadd.f32 %v12252_v20, %v16510_v38  ;;  %v8166_v6 = vpop.f32.mrf.mxu0  ;;  %12454 = vmatprep.mubr.msk.bf16.mxu1 %vm319_vm1, %v9139_v27  ;;  %v9109_v27 = vld [vmem:[%s12653_s23 + $0x1b4] sm:$0xff]  ;;  %v9111_v20 = vld [vmem:[%s12653_s23 + $0x1c4] sm:$0xff]  ;;  %v9112_v38 = vld [vmem:[%s12653_s23 + $0x1cc] sm:$0xff] }
 0x490   : > { %v7776_v61 = vpop.f32.mrf.mxu1  ;;  %v9142_v60 = vpack.c.bf16 %v9110_v11, %v9109_v27  ;;  %v16519_v11 = vld [vmem:[#allocation22_spill] sm:$0xff] }
 0x491   : > { %v15970_v5 = vadd.f32 %v12302_v37, %v7892_v33  ;;  %v12303_v48 = vpop.f32.mrf.mxu0 }
 0x492   : > { %v12253_v42 = vpop.f32.mrf.mxu1 }
 0x493   : > { %v8168_v36 = vpop.f32.mrf.mxu0  ;;  %v9143_v42 = vpack.c.bf16 %v9112_v38, %v9111_v20 }
 0x494   : > { %v7778_v1 = vpop.f32.mrf.mxu1 }
 0x495   : > { %v7891_v24 = vadd.f32 %v7778_v1, %v16515_v59  ;;  %v12306_v16 = vpop.f32.mrf.mxu0  ;;  %12505 = vmatmul.mubr.msk.bf16.gmra.mxu0 %vm319_vm1, %v9530_v22  ;;  %v9114_v1 = vld [vmem:[%s12653_s23 + $0x1dc] sm:$0xff] }
 0x496   : > { %v12256_v57 = vpop.f32.mrf.mxu1  ;;  %12455 = vmatmul.mubr.msk.bf16.gmra.mxu1 %vm319_vm1, %v9140_v47  ;;  %12508 = vmatprep.mubr.msk.bf16.mxu0 %vm319_vm1, %v9531_v29  ;;  %v9116_v16 = vld [vmem:[%s12653_s23 + $0x1ec] sm:$0xff] }
 0x497   : > { %v15980_v2 = vadd.f32 %v8168_v36, %v7891_v24  ;;  %v8180_v46 = vpop.f32.mrf.mxu0  ;;  %12458 = vmatprep.mubr.msk.bf16.mxu1 %vm319_vm1, %v9141_v23  ;;  %v9113_v23 = vld [vmem:[%s12653_s23 + $0x1d4] sm:$0xff]  ;;  %v9115_v24 = vld [vmem:[%s12653_s23 + $0x1e4] sm:$0xff] }
 0x498   : > { %v7790_v37 = vpop.f32.mrf.mxu1  ;;  %v9144_v38 = vpack.c.bf16 %v9114_v1, %v9113_v23  ;;  %v16524_v23 = vld [vmem:[#allocation24_spill] sm:$0xff] }
 0x499   : > { %v7893_v33 = vadd.f32 %v7790_v37, %v15710_v31  ;;  %v12307_v6 = vpop.f32.mrf.mxu0  ;;  %v9534_v37 = vpack.c.bf16 %v15732_v56, %v16519_v11 }
 0x49a   : > { %v12257_v61 = vpop.f32.mrf.mxu1 }
 0x49b   : > { %v15992_v48 = vadd.f32 %v8180_v46, %v7893_v33  ;;  %v7895_v40 = vadd.f32 %v12257_v61, %v16517_v19  ;;  %v8183_v22 = vpop.f32.mrf.mxu0 }
 0x49c   : > { %v7793_v47 = vpop.f32.mrf.mxu1 }
 0x49d   : > { %v15995_v31 = vadd.f32 %v12307_v6, %v7895_v40  ;;  %v7894_v49 = vadd.f32 %v7793_v47, %v16518_v30  ;;  %v12310_v34 = vpop.f32.mrf.mxu0  ;;  %12509 = vmatmul.mubr.msk.bf16.gmra.mxu0 %vm319_vm1, %v9532_v12  ;;  %v9118_v47 = vld [vmem:[%s12653_s23 + $0x1fc] sm:$0xff] }
 0x49e   : > { %v12260_v29 = vpop.f32.mrf.mxu1  ;;  %12459 = vmatmul.mubr.msk.bf16.gmra.mxu1 %vm319_vm1, %v9142_v60  ;;  %12512 = vmatprep.mubr.msk.bf16.mxu0 %vm319_vm1, %v9533_v9  ;;  %v9145_v60 = vpack.c.bf16 %v9116_v16, %v9115_v24  ;;  %v16525_v16 = vld [vmem:[#allocation29_spill] sm:$0xff] }
 0x49f   : > { %v16001_v63 = vadd.f32 %v8183_v22, %v7894_v49  ;;  %v7897_v43 = vadd.f32 %v12260_v29, %v15739_v8  ;;  %v8195_v36 = vpop.f32.mrf.mxu0  ;;  %12462 = vmatprep.mubr.msk.bf16.mxu1 %vm319_vm1, %v9143_v42  ;;  %v16520_v8 = vld [vmem:[#allocation26_spill] sm:$0xff]  ;;  %v9117_v42 = vld [vmem:[%s12653_s23 + $0x1f4] sm:$0xff] }
 0x4a0   : > { %v7805_v59 = vpop.f32.mrf.mxu1  ;;  %v9535_v33 = vpack.c.bf16 %v16520_v8, %v15735_v13  ;;  %v16522_v13 = vld [vmem:[#allocation28_spill] sm:$0xff]  ;;  %v9119_v49 = vld [vmem:[%s12653_s23 + $0x204] sm:$0xff]  ;;  %v9146_v24 = vpack.c.bf16 %v9118_v47, %v9117_v42 }
 0x4a1   : > { %v16009_v57 = vadd.f32 %v12310_v34, %v7897_v43  ;;  %v7896_v46 = vadd.f32 %v7805_v59, %v15746_v25  ;;  %v12311_v27 = vpop.f32.mrf.mxu0  ;;  %v9120_v34 = vld [vmem:[%s12653_s23 + $0x20c] sm:$0xff] }
 0x4a2   : > { %v12261_v20 = vpop.f32.mrf.mxu1  ;;  %v16528_v42 = vld [vmem:[#allocation31_spill] sm:$0xff] }
 0x4a3   : > { %v16016_v6 = vadd.f32 %v8195_v36, %v7896_v46  ;;  %v7898_v12 = vadd.f32 %v12261_v20, %v16521_v35  ;;  %v8198_v61 = vpop.f32.mrf.mxu0  ;;  %v16523_v36 = vld [vmem:[#allocation27_spill] sm:$0xff]  ;;  %v16526_v46 = vld [vmem:[#allocation30_spill] sm:$0xff]  ;;  %v9538_v47 = vpack.c.bf16 %v15794_v54, %v16528_v42 }
 0x4a4   : > { %v7808_v25 = vpop.f32.mrf.mxu1  ;;  %v9536_v1 = vpack.c.bf16 %v16524_v23, %v16523_v36 }
 0x4a5   : > { %v16019_v9 = vadd.f32 %v12311_v27, %v7898_v12  ;;  %v12314_v19 = vpop.f32.mrf.mxu0  ;;  %12513 = vmatmul.mubr.msk.bf16.gmra.mxu0 %vm319_vm1, %v9534_v37  ;;  %v9537_v27 = vpack.c.bf16 %v16526_v46, %v16525_v16  ;;  %v9147_v37 = vpack.c.bf16 %v9120_v34, %v9119_v49  ;;  %v9122_v25 = vld [vmem:[%s12653_s23 + $0x21c] sm:$0xff]  ;;  %v9539_v34 = vpack.c.bf16 %v15816_v7, %v15797_v14 }
 0x4a6   : > { %v12264_v56 = vpop.f32.mrf.mxu1  ;;  %12463 = vmatmul.mubr.msk.bf16.gmra.mxu1 %vm319_vm1, %v9144_v38  ;;  %12516 = vmatprep.mubr.msk.bf16.mxu0 %vm319_vm1, %v9535_v33  ;;  %v16527_v38 = vld [vmem:[#allocation32_spill] sm:$0xff]  ;;  %v9516_v14 = vld [vmem:[%s12653_s23 + $0x240] sm:$0xff] }
 0x4a7   : > { %v7900_v40 = vadd.f32 %v12264_v56, %v16522_v13  ;;  %v8210_v22 = vpop.f32.mrf.mxu0  ;;  %12466 = vmatprep.mubr.msk.bf16.mxu1 %vm319_vm1, %v9145_v60  ;;  %v9121_v60 = vld [vmem:[%s12653_s23 + $0x214] sm:$0xff]  ;;  %v9123_v56 = vld [vmem:[%s12653_s23 + $0x224] sm:$0xff]  ;;  %v9124_v13 = vld [vmem:[%s12653_s23 + $0x22c] sm:$0xff] }
 0x4a8   : > { %v7820_v30 = vpop.f32.mrf.mxu1  ;;  %v9148_v49 = vpack.c.bf16 %v9122_v25, %v9121_v60 }
 0x4a9   : > { %v16030_v29 = vadd.f32 %v12314_v19, %v7900_v40  ;;  %v12315_v43 = vpop.f32.mrf.mxu0 }
 0x4aa   : > { %v12265_v59 = vpop.f32.mrf.mxu1 }
 0x4ab   : > { %v8212_v11 = vpop.f32.mrf.mxu0 }
 0x4ac   : > { %v7822_v20 = vpop.f32.mrf.mxu1 }
 0x4ad   : > { %v7899_v8 = vadd.f32 %v7822_v20, %v16527_v38  ;;  %v12318_v33 = vpop.f32.mrf.mxu0  ;;  %12517 = vmatmul.mubr.msk.bf16.gmra.mxu0 %vm319_vm1, %v9536_v1  ;;  %v9149_v1 = vpack.c.bf16 %v9124_v13, %v9123_v56 }
 0x4ae   : > { %v12268_v35 = vpop.f32.mrf.mxu1  ;;  %12467 = vmatmul.mubr.msk.bf16.gmra.mxu1 %vm319_vm1, %v9146_v24  ;;  %12520 = vmatprep.mubr.msk.bf16.mxu0 %vm319_vm1, %v9537_v27  ;;  %v9540_v33 = vpack.c.bf16 %v9516_v14, %v15819_v44 }
 0x4af   : > { %v16040_v12 = vadd.f32 %v8212_v11, %v7899_v8  ;;  %v8224_v61 = vpop.f32.mrf.mxu0  ;;  %12470 = vmatprep.mubr.msk.bf16.mxu1 %vm319_vm1, %v9147_v37  ;;  %v9125_v11 = vld [vmem:[%s12653_s23 + $0x234] sm:$0xff]  ;;  %v9126_v37 = vld [vmem:[%s12653_s23 + $0x23c] sm:$0xff] }
 0x4b0   : > { %v7834_v19 = vpop.f32.mrf.mxu1 }
 0x4b1   : > { %v7901_v40 = vadd.f32 %v7834_v19, %v15806_v39  ;;  %v12319_v22 = vpop.f32.mrf.mxu0 }
 0x4b2   : > { %v12269_v30 = vpop.f32.mrf.mxu1 }
 0x4b3   : > { %v16052_v43 = vadd.f32 %v8224_v61, %v7901_v40  ;;  %v7903_v36 = vadd.f32 %v12269_v30, %v15809_v26  ;;  %v8227_v23 = vpop.f32.mrf.mxu0  ;;  %v16529_v26 = vld [vmem:[#allocation33_spill] sm:$0xff]  ;;  %v9150_v61 = vpack.c.bf16 %v9126_v37, %v9125_v11 }
 0x4b4   : > { %v7837_v59 = vpop.f32.mrf.mxu1 }
 0x4b5   : > { %v16055_v39 = vadd.f32 %v12319_v22, %v7903_v36  ;;  %v7902_v24 = vadd.f32 %v7837_v59, %v15821_v52  ;;  %v12322_v54 = vpop.f32.mrf.mxu0  ;;  %12521 = vmatmul.mubr.msk.bf16.gmra.mxu0 %vm319_vm1, %v9538_v47 }
 0x4b6   : > { %v12272_v16 = vpop.f32.mrf.mxu1  ;;  %12471 = vmatmul.mubr.msk.bf16.gmra.mxu1 %vm319_vm1, %v9148_v49  ;;  %12524 = vmatprep.mubr.msk.bf16.mxu0 %vm319_vm1, %v9539_v34 }
 0x4b7   : > { %v16062_v7 = vadd.f32 %v8227_v23, %v7902_v24  ;;  %v7905_v46 = vadd.f32 %v12272_v16, %v16529_v26  ;;  %v8239_v27 = vpop.f32.mrf.mxu0  ;;  %12474 = vmatprep.mubr.msk.bf16.mxu1 %vm319_vm1, %v9149_v1 }
 0x4b8   : > { %v7849_v20 = vpop.f32.mrf.mxu1 }
 0x4b9   : > { %v16068_v52 = vadd.f32 %v12322_v54, %v7905_v46  ;;  %v7904_v38 = vadd.f32 %v7849_v20, %v15836_v45  ;;  %v12323_v8 = vpop.f32.mrf.mxu0 }
 0x4ba   : > { %v12273_v35 = vpop.f32.mrf.mxu1 }
 0x4bb   : > { %v16072_v60 = vadd.f32 %v8239_v27, %v7904_v38  ;;  %v7906_v25 = vadd.f32 %v12273_v35, %v15839_v41  ;;  %v8242_v19 = vpop.f32.mrf.mxu0 }
 0x4bc   : > { %v7852_v56 = vpop.f32.mrf.mxu1 }
 0x4bd   : > { %v16075_v13 = vadd.f32 %v12323_v8, %v7906_v25  ;;  %v12326_v40 = vpop.f32.mrf.mxu0  ;;  %12525 = vmatmul.mubr.msk.bf16.gmra.mxu0 %vm319_vm1, %v9540_v33 }
 0x4be   : > { %v12276_v22 = vpop.f32.mrf.mxu1  ;;  %12475 = vmatmul.mubr.msk.bf16.gmra.mxu1 %vm319_vm1, %v9150_v61 }
 0x4bf   : > { %v7908_v45 = vadd.f32 %v12276_v22, %v15850_v3  ;;  %v8254_v42 = vpop.f32.mrf.mxu0 }
 0x4c0   : > { %v7864_v44 = vpop.f32.mrf.mxu1 }
 0x4c1   : > { %v16080_v47 = vadd.f32 %v12326_v40, %v7908_v45  ;;  %v12327_v30 = vpop.f32.mrf.mxu0 }
 0x4c2   : > { %v12277_v49 = vpop.f32.mrf.mxu1 }
 0x4c3   : > { %v8256_v34 = vpop.f32.mrf.mxu0 }
 0x4c4   : > { %v7866_v41 = vpop.f32.mrf.mxu1 }
 0x4c5   : > { %v7907_v36 = vadd.f32 %v7866_v41, %v15860_v0  ;;  %v12382_v23 = vpop.f32.mrf.mxu0 }
 0x4c6   : > { %v12332_v1 = vpop.f32.mrf.mxu1 }
 0x4c7   : > { %v16083_v59 = vadd.f32 %v8256_v34, %v7907_v36  ;;  %v8872_v24 = vpop.f32.mrf.mxu0 }
 0x4c8   : > { %v8482_v54 = vpop.f32.mrf.mxu1 }
 0x4c9   : > { %v8657_v16 = vadd.f32 %v8482_v54, %v15872_v55  ;;  %v12383_v14 = vpop.f32.mrf.mxu0 }
 0x4ca   : > { %v12333_v3 = vpop.f32.mrf.mxu1 }
 0x4cb   : > { %v16086_v26 = vadd.f32 %v8872_v24, %v8657_v16  ;;  %v8659_v46 = vadd.f32 %v12333_v3, %v15875_v4  ;;  %v8875_v27 = vpop.f32.mrf.mxu0 }
 0x4cc   : > { %v8485_v11 = vpop.f32.mrf.mxu1 }
 0x4cd   : > { %v16089_v37 = vadd.f32 %v12383_v14, %v8659_v46  ;;  %v8658_v0 = vadd.f32 %v8485_v11, %v15881_v10  ;;  %v12386_v20 = vpop.f32.mrf.mxu0 }
 0x4ce   : > { %v12336_v38 = vpop.f32.mrf.mxu1 }
 0x4cf   : > { %v16092_v8 = vadd.f32 %v8875_v27, %v8658_v0  ;;  %v8661_v33 = vadd.f32 %v12336_v38, %v15889_v51  ;;  %v8887_v35 = vpop.f32.mrf.mxu0 }
 0x4d0   : > { %v8497_v55 = vpop.f32.mrf.mxu1 }
 0x4d1   : > { %v16095_v61 = vadd.f32 %v12386_v20, %v8661_v33  ;;  %v8660_v25 = vadd.f32 %v8497_v55, %v15896_v28  ;;  %v12387_v19 = vpop.f32.mrf.mxu0 }
 0x4d2   : > { %v12337_v4 = vpop.f32.mrf.mxu1 }
 0x4d3   : > { %v16098_v56 = vadd.f32 %v8887_v35, %v8660_v25  ;;  %v8662_v40 = vadd.f32 %v12337_v4, %v15899_v58  ;;  %v8890_v22 = vpop.f32.mrf.mxu0 }
 0x4d4   : > { %v8500_v10 = vpop.f32.mrf.mxu1 }
 0x4d5   : > { %v16101_v45 = vadd.f32 %v12387_v19, %v8662_v40  ;;  %v12390_v42 = vpop.f32.mrf.mxu0 }
 0x4d6   : > { %v12340_v44 = vpop.f32.mrf.mxu1 }
 0x4d7   : > { %v8664_v51 = vadd.f32 %v12340_v44, %v15910_v32  ;;  %v8902_v30 = vpop.f32.mrf.mxu0 }
 0x4d8   : > { %v8512_v49 = vpop.f32.mrf.mxu1 }
 0x4d9   : > { %v16104_v34 = vadd.f32 %v12390_v42, %v8664_v51  ;;  %v12391_v41 = vpop.f32.mrf.mxu0 }
 0x4da   : > { %v12341_v28 = vpop.f32.mrf.mxu1 }
 0x4db   : > { %v8904_v36 = vpop.f32.mrf.mxu0 }
 0x4dc   : > { %v8514_v23 = vpop.f32.mrf.mxu1 }
 0x4dd   : > { %v8663_v1 = vadd.f32 %v8514_v23, %v15920_v50  ;;  %v12394_v24 = vpop.f32.mrf.mxu0 }
 0x4de   : > { %v12344_v58 = vpop.f32.mrf.mxu1 }
 0x4df   : > { %v16107_v54 = vadd.f32 %v8904_v36, %v8663_v1  ;;  %v8916_v16 = vpop.f32.mrf.mxu0 }
 0x4e0   : > { %v8526_v14 = vpop.f32.mrf.mxu1 }
 0x4e1   : > { %v8665_v3 = vadd.f32 %v8526_v14, %v15932_v53  ;;  %v12395_v46 = vpop.f32.mrf.mxu0 }
 0x4e2   : > { %v12345_v32 = vpop.f32.mrf.mxu1 }
 0x4e3   : > { %v16110_v27 = vadd.f32 %v8916_v16, %v8665_v3  ;;  %v8667_v11 = vadd.f32 %v12345_v32, %v15935_v21  ;;  %v8919_v0 = vpop.f32.mrf.mxu0 }
 0x4e4   : > { %v8529_v20 = vpop.f32.mrf.mxu1 }
 0x4e5   : > { %v16113_v38 = vadd.f32 %v12395_v46, %v8667_v11  ;;  %v8666_v50 = vadd.f32 %v8529_v20, %v15941_v18  ;;  %v12398_v33 = vpop.f32.mrf.mxu0 }
 0x4e6   : > { %v12348_v35 = vpop.f32.mrf.mxu1 }
 0x4e7   : > { %v16116_v55 = vadd.f32 %v8919_v0, %v8666_v50  ;;  %v8669_v25 = vadd.f32 %v12348_v35, %v15949_v15  ;;  %v8931_v19 = vpop.f32.mrf.mxu0 }
 0x4e8   : > { %v8541_v53 = vpop.f32.mrf.mxu1 }
 0x4e9   : > { %v16119_v4 = vadd.f32 %v12398_v33, %v8669_v25  ;;  %v8668_v40 = vadd.f32 %v8541_v53, %v15956_v62  ;;  %v12399_v22 = vpop.f32.mrf.mxu0 }
 0x4ea   : > { %v12349_v21 = vpop.f32.mrf.mxu1 }
 0x4eb   : > { %v16122_v10 = vadd.f32 %v8931_v19, %v8668_v40  ;;  %v8670_v42 = vadd.f32 %v12349_v21, %v15959_v17  ;;  %v8934_v44 = vpop.f32.mrf.mxu0 }
 0x4ec   : > { %v8544_v18 = vpop.f32.mrf.mxu1 }
 0x4ed   : > { %v16125_v51 = vadd.f32 %v12399_v22, %v8670_v42  ;;  %v12402_v30 = vpop.f32.mrf.mxu0 }
 0x4ee   : > { %v12352_v49 = vpop.f32.mrf.mxu1 }
 0x4ef   : > { %v8672_v15 = vadd.f32 %v12352_v49, %v15970_v5  ;;  %v8946_v41 = vpop.f32.mrf.mxu0 }
 0x4f0   : > { %v8556_v28 = vpop.f32.mrf.mxu1 }
 0x4f1   : > { %v16128_v36 = vadd.f32 %v12402_v30, %v8672_v15  ;;  %v12403_v23 = vpop.f32.mrf.mxu0 }
 0x4f2   : > { %v12353_v62 = vpop.f32.mrf.mxu1 }
 0x4f3   : > { %v8948_v1 = vpop.f32.mrf.mxu0 }
 0x4f4   : > { %v8558_v24 = vpop.f32.mrf.mxu1 }
 0x4f5   : > { %v8671_v58 = vadd.f32 %v8558_v24, %v15980_v2  ;;  %v12406_v16 = vpop.f32.mrf.mxu0 }
 0x4f6   : > { %v12356_v17 = vpop.f32.mrf.mxu1 }
 0x4f7   : > { %v16131_v14 = vadd.f32 %v8948_v1, %v8671_v58  ;;  %v8960_v3 = vpop.f32.mrf.mxu0 }
 0x4f8   : > { %v8570_v46 = vpop.f32.mrf.mxu1 }
 0x4f9   : > { %v8673_v32 = vadd.f32 %v8570_v46, %v15992_v48  ;;  %v12407_v11 = vpop.f32.mrf.mxu0 }
 0x4fa   : > { %v12357_v5 = vpop.f32.mrf.mxu1 }
 0x4fb   : > { %v16134_v0 = vadd.f32 %v8960_v3, %v8673_v32  ;;  %v8675_v20 = vadd.f32 %v12357_v5, %v15995_v31  ;;  %v8963_v50 = vpop.f32.mrf.mxu0 }
 0x4fc   : > { %v8573_v33 = vpop.f32.mrf.mxu1 }
 0x4fd   : > { %v16137_v35 = vadd.f32 %v12407_v11, %v8675_v20  ;;  %v8674_v2 = vadd.f32 %v8573_v33, %v16001_v63  ;;  %v12410_v25 = vpop.f32.mrf.mxu0 }
 0x4fe   : > { %v12360_v19 = vpop.f32.mrf.mxu1 }
 0x4ff   : > { %v16140_v53 = vadd.f32 %v8963_v50, %v8674_v2  ;;  %v8677_v40 = vadd.f32 %v12360_v19, %v16009_v57  ;;  %v8975_v22 = vpop.f32.mrf.mxu0 }
 0x500   : > { %v8585_v48 = vpop.f32.mrf.mxu1 }
 0x501   : > { %v16143_v21 = vadd.f32 %v12410_v25, %v8677_v40  ;;  %v8676_v42 = vadd.f32 %v8585_v48, %v16016_v6  ;;  %v12411_v44 = vpop.f32.mrf.mxu0 }
 0x502   : > { %v12361_v31 = vpop.f32.mrf.mxu1 }
 0x503   : > { %v16146_v18 = vadd.f32 %v8975_v22, %v8676_v42  ;;  %v8678_v30 = vadd.f32 %v12361_v31, %v16019_v9  ;;  %v8978_v49 = vpop.f32.mrf.mxu0 }
 0x504   : > { %v8588_v63 = vpop.f32.mrf.mxu1 }
 0x505   : > { %v16149_v15 = vadd.f32 %v12411_v44, %v8678_v30  ;;  %v12414_v41 = vpop.f32.mrf.mxu0 }
 0x506   : > { %v12364_v28 = vpop.f32.mrf.mxu1 }
 0x507   : > { %v8680_v57 = vadd.f32 %v12364_v28, %v16030_v29  ;;  %v8990_v23 = vpop.f32.mrf.mxu0 }
 0x508   : > { %v8600_v62 = vpop.f32.mrf.mxu1 }
 0x509   : > { %v16152_v1 = vadd.f32 %v12414_v41, %v8680_v57  ;;  %v12415_v24 = vpop.f32.mrf.mxu0 }
 0x50a   : > { %v12365_v6 = vpop.f32.mrf.mxu1 }
 0x50b   : > { %v8992_v58 = vpop.f32.mrf.mxu0 }
 0x50c   : > { %v8602_v16 = vpop.f32.mrf.mxu1 }
 0x50d   : > { %v8679_v17 = vadd.f32 %v8602_v16, %v16040_v12  ;;  %v12418_v3 = vpop.f32.mrf.mxu0 }
 0x50e   : > { %v12368_v9 = vpop.f32.mrf.mxu1 }
 0x50f   : > { %v16155_v46 = vadd.f32 %v8992_v58, %v8679_v17  ;;  %v9004_v32 = vpop.f32.mrf.mxu0 }
 0x510   : > { %v8614_v11 = vpop.f32.mrf.mxu1 }
 0x511   : > { %v8681_v5 = vadd.f32 %v8614_v11, %v16052_v43  ;;  %v12419_v20 = vpop.f32.mrf.mxu0 }
 0x512   : > { %v12369_v29 = vpop.f32.mrf.mxu1 }
 0x513   : > { %v16158_v50 = vadd.f32 %v9004_v32, %v8681_v5  ;;  %v8683_v33 = vadd.f32 %v12369_v29, %v16055_v39  ;;  %v9007_v2 = vpop.f32.mrf.mxu0 }
 0x514   : > { %v8617_v25 = vpop.f32.mrf.mxu1 }
 0x515   : > { %v16161_v19 = vadd.f32 %v12419_v20, %v8683_v33  ;;  %v8682_v12 = vadd.f32 %v8617_v25, %v16062_v7  ;;  %v12422_v40 = vpop.f32.mrf.mxu0  ;;  %v16185_v33 = vld [vmem:[%s16357_s2] ss:$0 sm:$0xff] }
 0x516   : > { %v12372_v22 = vpop.f32.mrf.mxu1 }
 0x517   : > { %v16164_v48 = vadd.f32 %v9007_v2, %v8682_v12  ;;  %v8685_v42 = vadd.f32 %v12372_v22, %v16068_v52  ;;  %v9019_v44 = vpop.f32.mrf.mxu0 }
 0x518   : > { %v8629_v43 = vpop.f32.mrf.mxu1 }
 0x519   : > { %v16167_v31 = vadd.f32 %v12422_v40, %v8685_v42  ;;  %v8684_v30 = vadd.f32 %v8629_v43, %v16072_v60  ;;  %v12423_v49 = vpop.f32.mrf.mxu0 }
 0x51a   : > { %v12373_v39 = vpop.f32.mrf.mxu1 }
 0x51b   : > { %v16170_v63 = vadd.f32 %v9019_v44, %v8684_v30  ;;  %v8686_v41 = vadd.f32 %v12373_v39, %v16075_v13  ;;  %v9022_v28 = vpop.f32.mrf.mxu0  ;;  %v12565_v30 = vld [vmem:[%s12653_s23 + $0x64] sm:$0xff] }
 0x51c   : > { %v8632_v7 = vpop.f32.mrf.mxu1 }
 0x51d   : > { %v16173_v57 = vadd.f32 %v12423_v49, %v8686_v41  ;;  %v12426_v23 = vpop.f32.mrf.mxu0 }
 0x51e   : > { %v12376_v62 = vpop.f32.mrf.mxu1 }
 0x51f   : > { %v8688_v52 = vadd.f32 %v12376_v62, %v16080_v47  ;;  %v9034_v24 = vpop.f32.mrf.mxu0 }
 0x520   : > { %v8644_v6 = vpop.f32.mrf.mxu1 }
 0x521   : > { %v16176_v58 = vadd.f32 %v12426_v23, %v8688_v52  ;;  %v12427_v60 = vpop.f32.mrf.mxu0 }
 0x522   : > { %v12377_v16 = vpop.f32.mrf.mxu1 }
 0x523   : > { %v9036_v17 = vpop.f32.mrf.mxu0 }
 0x524   : > { %v8646_v3 = vpop.f32.mrf.mxu1 }
 0x525   : > { %v8687_v9 = vadd.f32 %v8646_v3, %v16083_v59  ;;  %v12482_v13 = vpop.f32.mrf.mxu0 }
 0x526   : > { %v12432_v32 = vpop.f32.mrf.mxu1 }
 0x527   : > { %v16179_v11 = vadd.f32 %v9036_v17, %v8687_v9  ;;  %v9652_v5 = vpop.f32.mrf.mxu0 }
 0x528   : > { %v9262_v20 = vpop.f32.mrf.mxu1 }
 0x529   : > { %v9437_v47 = vadd.f32 %v9262_v20, %v16086_v26  ;;  %v12483_v29 = vpop.f32.mrf.mxu0 }
 0x52a   : > { %v12433_v2 = vpop.f32.mrf.mxu1 }
 0x52b   : > { %v9827_v25 = vadd.f32 %v9652_v5, %v9437_v47  ;;  %v9439_v59 = vadd.f32 %v12433_v2, %v16089_v37  ;;  %v9655_v12 = vpop.f32.mrf.mxu0 }
 0x52c   : > { %v9265_v40 = vpop.f32.mrf.mxu1 }
 0x52d   : > { %v9866_v22 = vadd.f32 %v16185_v33, %v9827_v25  ;;  %v9829_v42 = vadd.f32 %v12483_v29, %v9439_v59  ;;  %v9438_v44 = vadd.f32 %v9265_v40, %v16092_v8  ;;  %v12486_v26 = vpop.f32.mrf.mxu0  ;;  %v12566_v8 = vld [vmem:[%s12653_s23 + $0x7c] sm:$0xff]  ;;  %v12569_v25 = vld [vmem:[%s12653_s23 + $0x84] sm:$0xff] }
 0x52e   : > { %v12436_v43 = vpop.f32.mrf.mxu1 }
 0x52f   : > { %v9898_v37 = vadd.f32 %v12565_v30, %v9866_v22  ;;  %v9868_v49 = vadd.f32 %v16185_v33, %v9829_v42  ;;  %v9828_v39 = vadd.f32 %v9655_v12, %v9438_v44  ;;  %v9441_v41 = vadd.f32 %v12436_v43, %v16095_v61  ;;  %v9667_v28 = vpop.f32.mrf.mxu0  ;;  %v12567_v61 = vld [vmem:[%s12653_s23 + $0x6c] sm:$0xff]  ;;  %v12570_v42 = vld [vmem:[%s12653_s23 + $0x9c] sm:$0xff] }
 0x530   : > { %v9277_v7 = vpop.f32.mrf.mxu1 }
 0x531   : > { %9930 = vst.msk [vmem:[%s16194_s25] sm:$0xff] %vm319_vm1, %v9898_v37  ;;  %v9900_v23 = vadd.f32 %v12566_v8, %v9868_v49  ;;  %v9867_v62 = vadd.f32 %v16185_v33, %v9828_v39  ;;  %v9831_v52 = vadd.f32 %v12486_v26, %v9441_v41  ;;  %v9440_v24 = vadd.f32 %v9277_v7, %v16098_v56  ;;  %v12487_v6 = vpop.f32.mrf.mxu0  ;;  %v12568_v56 = vld [vmem:[%s12653_s23 + $0x94] sm:$0xff] }
 0x532   : > { %v12437_v60 = vpop.f32.mrf.mxu1  ;;  %v12571_v41 = vld [vmem:[%s12653_s23 + $0xb4] sm:$0xff] }
 0x533   : > { %9932 = vst.msk [vmem:[%s16194_s25 + $0x10] sm:$0xff] %vm319_vm1, %v9900_v23  ;;  %v9899_v16 = vadd.f32 %v12567_v61, %v9867_v62  ;;  %v9870_v17 = vadd.f32 %v16185_v33, %v9831_v52  ;;  %v9830_v3 = vadd.f32 %v9667_v28, %v9440_v24  ;;  %v9442_v9 = vadd.f32 %v12437_v60, %v16101_v45  ;;  %v9670_v13 = vpop.f32.mrf.mxu0 }
 0x534   : > { %v9280_v32 = vpop.f32.mrf.mxu1 }
 0x535   : > { %9931 = vst.msk [vmem:[%s16194_s25 + $0x8] sm:$0xff] %vm319_vm1, %v9899_v16  ;;  %v9902_v5 = vadd.f32 %v12568_v56, %v9870_v17  ;;  %v9869_v20 = vadd.f32 %v16185_v33, %v9830_v3  ;;  %v9832_v47 = vadd.f32 %v12487_v6, %v9442_v9  ;;  %v12490_v29 = vpop.f32.mrf.mxu0  ;;  %v12572_v16 = vld [vmem:[%s12653_s23 + $0xac] sm:$0xff] }
 0x536   : > { %v12440_v2 = vpop.f32.mrf.mxu1 }
 0x537   : > { %9934 = vst.msk [vmem:[%s16194_s25 + $0x20] sm:$0xff] %vm319_vm1, %v9902_v5  ;;  %v9901_v59 = vadd.f32 %v12569_v25, %v9869_v20  ;;  %v9871_v45 = vadd.f32 %v16185_v33, %v9832_v47  ;;  %v9444_v12 = vadd.f32 %v12440_v2, %v16104_v34  ;;  %v9682_v40 = vpop.f32.mrf.mxu0  ;;  %v12573_v47 = vld [vmem:[%s12653_s23 + $0xc4] sm:$0xff] }
 0x538   : > { %v9292_v22 = vpop.f32.mrf.mxu1 }
 0x539   : > { %9933 = vst.msk [vmem:[%s16194_s25 + $0x18] sm:$0xff] %vm319_vm1, %v9901_v59  ;;  %v9903_v44 = vadd.f32 %v12570_v42, %v9871_v45  ;;  %v9834_v26 = vadd.f32 %v12490_v29, %v9444_v12  ;;  %v12491_v43 = vpop.f32.mrf.mxu0  ;;  %v12574_v12 = vld [vmem:[%s12653_s23 + $0xdc] sm:$0xff] }
 0x53a   : > { %v12441_v30 = vpop.f32.mrf.mxu1 }
 0x53b   : > { %9935 = vst.msk [vmem:[%s16194_s25 + $0x28] sm:$0xff] %vm319_vm1, %v9903_v44  ;;  %v9873_v37 = vadd.f32 %v16185_v33, %v9834_v26  ;;  %v9684_v49 = vpop.f32.mrf.mxu0 }
 0x53c   : > { %v9294_v39 = vpop.f32.mrf.mxu1 }
 0x53d   : > { %v9905_v28 = vadd.f32 %v12571_v41, %v9873_v37  ;;  %v9443_v34 = vadd.f32 %v9294_v39, %v16107_v54  ;;  %v12494_v7 = vpop.f32.mrf.mxu0 }
 0x53e   : > { %v12444_v8 = vpop.f32.mrf.mxu1 }
 0x53f   : > { %9937 = vst.msk [vmem:[%s16194_s25 + $0x38] sm:$0xff] %vm319_vm1, %v9905_v28  ;;  %v9833_v23 = vadd.f32 %v9684_v49, %v9443_v34  ;;  %v9696_v62 = vpop.f32.mrf.mxu0 }
 0x540   : > { %v9306_v52 = vpop.f32.mrf.mxu1 }
 0x541   : > { %v9872_v24 = vadd.f32 %v16185_v33, %v9833_v23  ;;  %v9445_v6 = vadd.f32 %v9306_v52, %v16110_v27  ;;  %v12495_v60 = vpop.f32.mrf.mxu0 }
 0x542   : > { %v12445_v61 = vpop.f32.mrf.mxu1 }
 0x543   : > { %v9904_v17 = vadd.f32 %v12572_v16, %v9872_v24  ;;  %v9835_v3 = vadd.f32 %v9696_v62, %v9445_v6  ;;  %v9447_v54 = vadd.f32 %v12445_v61, %v16113_v38  ;;  %v9699_v9 = vpop.f32.mrf.mxu0  ;;  %v12577_v62 = vld [vmem:[%s12653_s23 + $0xe4] sm:$0xff]  ;;  %v12578_v61 = vld [vmem:[%s12653_s23 + $0xfc] sm:$0xff] }
 0x544   : > { %v9309_v13 = vpop.f32.mrf.mxu1 }
 0x545   : > { %9936 = vst.msk [vmem:[%s16194_s25 + $0x30] sm:$0xff] %vm319_vm1, %v9904_v17  ;;  %v9874_v32 = vadd.f32 %v16185_v33, %v9835_v3  ;;  %v9837_v56 = vadd.f32 %v12495_v60, %v9447_v54  ;;  %v9446_v5 = vadd.f32 %v9309_v13, %v16116_v55  ;;  %v12498_v20 = vpop.f32.mrf.mxu0 }
 0x546   : > { %v12448_v27 = vpop.f32.mrf.mxu1 }
 0x547   : > { %v9906_v29 = vadd.f32 %v12573_v47, %v9874_v32  ;;  %v9876_v2 = vadd.f32 %v16185_v33, %v9837_v56  ;;  %v9836_v38 = vadd.f32 %v9699_v9, %v9446_v5  ;;  %v9449_v25 = vadd.f32 %v12448_v27, %v16119_v4  ;;  %v9711_v59 = vpop.f32.mrf.mxu0  ;;  %v12575_v4 = vld [vmem:[%s12653_s23 + $0xcc] sm:$0xff]  ;;  %v12579_v56 = vld [vmem:[%s12653_s23 + $0x114] sm:$0xff] }
 0x548   : > { %v9321_v45 = vpop.f32.mrf.mxu1 }
 0x549   : > { %9938 = vst.msk [vmem:[%s16194_s25 + $0x40] sm:$0xff] %vm319_vm1, %v9906_v29  ;;  %v9908_v40 = vadd.f32 %v12574_v12, %v9876_v2  ;;  %v9875_v55 = vadd.f32 %v16185_v33, %v9836_v38  ;;  %v9839_v22 = vadd.f32 %v12498_v20, %v9449_v25  ;;  %v9448_v42 = vadd.f32 %v9321_v45, %v16122_v10  ;;  %v12499_v44 = vpop.f32.mrf.mxu0  ;;  %v12576_v10 = vld [vmem:[%s12653_s23 + $0xf4] sm:$0xff]  ;;  %v12580_v12 = vld [vmem:[%s12653_s23 + $0x10c] sm:$0xff] }
 0x54a   : > { %v12449_v26 = vpop.f32.mrf.mxu1 }
 0x54b   : > { %9940 = vst.msk [vmem:[%s16194_s25 + $0x50] sm:$0xff] %vm319_vm1, %v9908_v40  ;;  %v9907_v43 = vadd.f32 %v12575_v4, %v9875_v55  ;;  %v9878_v30 = vadd.f32 %v16185_v33, %v9839_v22  ;;  %v9838_v37 = vadd.f32 %v9711_v59, %v9448_v42  ;;  %v9450_v49 = vadd.f32 %v12449_v26, %v16125_v51  ;;  %v9714_v39 = vpop.f32.mrf.mxu0 }
 0x54c   : > { %v9324_v41 = vpop.f32.mrf.mxu1 }
 0x54d   : > { %9939 = vst.msk [vmem:[%s16194_s25 + $0x48] sm:$0xff] %vm319_vm1, %v9907_v43  ;;  %v9910_v28 = vadd.f32 %v12576_v10, %v9878_v30  ;;  %v9877_v34 = vadd.f32 %v16185_v33, %v9838_v37  ;;  %v9840_v7 = vadd.f32 %v12499_v44, %v9450_v49  ;;  %v12502_v8 = vpop.f32.mrf.mxu0  ;;  %v12581_v30 = vld [vmem:[%s12653_s23 + $0x124] sm:$0xff] }
 0x54e   : > { %v12452_v23 = vpop.f32.mrf.mxu1 }
 0x54f   : > { %9942 = vst.msk [vmem:[%s16194_s25 + $0x60] sm:$0xff] %vm319_vm1, %v9910_v28  ;;  %v9909_v52 = vadd.f32 %v12577_v62, %v9877_v34  ;;  %v9879_v51 = vadd.f32 %v16185_v33, %v9840_v7  ;;  %v9452_v24 = vadd.f32 %v12452_v23, %v16128_v36  ;;  %v9726_v6 = vpop.f32.mrf.mxu0  ;;  %v12582_v28 = vld [vmem:[%s12653_s23 + $0x13c] sm:$0xff] }
 0x550   : > { %v9336_v60 = vpop.f32.mrf.mxu1 }
 0x551   : > { %9941 = vst.msk [vmem:[%s16194_s25 + $0x58] sm:$0xff] %vm319_vm1, %v9909_v52  ;;  %v9911_v16 = vadd.f32 %v12578_v61, %v9879_v51  ;;  %v9842_v17 = vadd.f32 %v12502_v8, %v9452_v24  ;;  %v12503_v3 = vpop.f32.mrf.mxu0 }
 0x552   : > { %v12453_v54 = vpop.f32.mrf.mxu1 }
 0x553   : > { %9943 = vst.msk [vmem:[%s16194_s25 + $0x68] sm:$0xff] %vm319_vm1, %v9911_v16  ;;  %v9881_v9 = vadd.f32 %v16185_v33, %v9842_v17  ;;  %v9728_v13 = vpop.f32.mrf.mxu0 }
 0x554   : > { %v9338_v32 = vpop.f32.mrf.mxu1 }
 0x555   : > { %v9913_v5 = vadd.f32 %v12579_v56, %v9881_v9  ;;  %v9451_v36 = vadd.f32 %v9338_v32, %v16131_v14  ;;  %v12506_v20 = vpop.f32.mrf.mxu0 }
 0x556   : > { %v12456_v27 = vpop.f32.mrf.mxu1  ;;  %v12586_v20 = vld [vmem:[%s12653_s23 + $0x15c] sm:$0xff] }
 0x557   : > { %9945 = vst.msk [vmem:[%s16194_s25 + $0x78] sm:$0xff] %vm319_vm1, %v9913_v5  ;;  %v9841_v47 = vadd.f32 %v9728_v13, %v9451_v36  ;;  %v9740_v29 = vpop.f32.mrf.mxu0  ;;  %v12585_v13 = vld [vmem:[%s12653_s23 + $0x144] sm:$0xff] }
 0x558   : > { %v9350_v2 = vpop.f32.mrf.mxu1 }
 0x559   : > { %v9880_v38 = vadd.f32 %v16185_v33, %v9841_v47  ;;  %v9453_v25 = vadd.f32 %v9350_v2, %v16134_v0  ;;  %v12507_v59 = vpop.f32.mrf.mxu0 }
 0x55a   : > { %v12457_v45 = vpop.f32.mrf.mxu1 }
 0x55b   : > { %v9912_v40 = vadd.f32 %v12580_v12, %v9880_v38  ;;  %v9843_v55 = vadd.f32 %v9740_v29, %v9453_v25  ;;  %v9455_v14 = vadd.f32 %v12457_v45, %v16137_v35  ;;  %v9743_v22 = vpop.f32.mrf.mxu0  ;;  %v12587_v45 = vld [vmem:[%s12653_s23 + $0x174] sm:$0xff] }
 0x55c   : > { %v9353_v42 = vpop.f32.mrf.mxu1 }
 0x55d   : > { %9944 = vst.msk [vmem:[%s16194_s25 + $0x70] sm:$0xff] %vm319_vm1, %v9912_v40  ;;  %v9882_v44 = vadd.f32 %v16185_v33, %v9843_v55  ;;  %v9845_v26 = vadd.f32 %v12507_v59, %v9455_v14  ;;  %v9454_v4 = vadd.f32 %v9353_v42, %v16140_v53  ;;  %v12510_v43 = vpop.f32.mrf.mxu0 }
 0x55e   : > { %v12460_v0 = vpop.f32.mrf.mxu1 }
 0x55f   : > { %v9914_v37 = vadd.f32 %v12581_v30, %v9882_v44  ;;  %v9884_v49 = vadd.f32 %v16185_v33, %v9845_v26  ;;  %v9844_v35 = vadd.f32 %v9743_v22, %v9454_v4  ;;  %v9457_v39 = vadd.f32 %v12460_v0, %v16143_v21  ;;  %v9755_v41 = vpop.f32.mrf.mxu0  ;;  %v12583_v21 = vld [vmem:[%s12653_s23 + $0x12c] sm:$0xff] }
 0x560   : > { %v9365_v10 = vpop.f32.mrf.mxu1  ;;  %v12588_v0 = vld [vmem:[%s12653_s23 + $0x16c] sm:$0xff] }
 0x561   : > { %9946 = vst.msk [vmem:[%s16194_s25 + $0x80] sm:$0xff] %vm319_vm1, %v9914_v37  ;;  %v9916_v34 = vadd.f32 %v12582_v28, %v9884_v49  ;;  %v9883_v53 = vadd.f32 %v16185_v33, %v9844_v35  ;;  %v9847_v7 = vadd.f32 %v12510_v43, %v9457_v39  ;;  %v9456_v8 = vadd.f32 %v9365_v10, %v16146_v18  ;;  %v12511_v23 = vpop.f32.mrf.mxu0  ;;  %v12584_v18 = vld [vmem:[%s12653_s23 + $0x154] sm:$0xff] }
 0x562   : > { %v12461_v62 = vpop.f32.mrf.mxu1 }
 0x563   : > { %9948 = vst.msk [vmem:[%s16194_s25 + $0x90] sm:$0xff] %vm319_vm1, %v9916_v34  ;;  %v9915_v52 = vadd.f32 %v12583_v21, %v9883_v53  ;;  %v9886_v51 = vadd.f32 %v16185_v33, %v9847_v7  ;;  %v9846_v24 = vadd.f32 %v9755_v41, %v9456_v8  ;;  %v9458_v6 = vadd.f32 %v12461_v62, %v16149_v15  ;;  %v9758_v60 = vpop.f32.mrf.mxu0  ;;  %v12589_v34 = vld [vmem:[%s12653_s23 + $0x184] sm:$0xff]  ;;  %v12590_v21 = vld [vmem:[%s12653_s23 + $0x19c] sm:$0xff] }
 0x564   : > { %v9368_v61 = vpop.f32.mrf.mxu1 }
 0x565   : > { %9947 = vst.msk [vmem:[%s16194_s25 + $0x88] sm:$0xff] %vm319_vm1, %v9915_v52  ;;  %v9918_v16 = vadd.f32 %v12584_v18, %v9886_v51  ;;  %v9885_v17 = vadd.f32 %v16185_v33, %v9846_v24  ;;  %v9848_v3 = vadd.f32 %v12511_v23, %v9458_v6  ;;  %v12514_v54 = vpop.f32.mrf.mxu0 }
 0x566   : > { %v12464_v9 = vpop.f32.mrf.mxu1 }
 0x567   : > { %9950 = vst.msk [vmem:[%s16194_s25 + $0xa0] sm:$0xff] %vm319_vm1, %v9918_v16  ;;  %v9917_v32 = vadd.f32 %v12585_v13, %v9885_v17  ;;  %v9887_v15 = vadd.f32 %v16185_v33, %v9848_v3  ;;  %v9460_v56 = vadd.f32 %v12464_v9, %v16152_v1  ;;  %v9770_v5 = vpop.f32.mrf.mxu0 }
 0x568   : > { %v9380_v36 = vpop.f32.mrf.mxu1  ;;  %v12593_v5 = vld [vmem:[%s12653_s23 + $0x1a4] sm:$0xff] }
 0x569   : > { %9949 = vst.msk [vmem:[%s16194_s25 + $0x98] sm:$0xff] %vm319_vm1, %v9917_v32  ;;  %v9919_v27 = vadd.f32 %v12586_v20, %v9887_v15  ;;  %v9850_v47 = vadd.f32 %v12514_v54, %v9460_v56  ;;  %v12515_v29 = vpop.f32.mrf.mxu0 }
 0x56a   : > { %v12465_v2 = vpop.f32.mrf.mxu1  ;;  %v12594_v29 = vld [vmem:[%s12653_s23 + $0x1bc] sm:$0xff] }
 0x56b   : > { %9951 = vst.msk [vmem:[%s16194_s25 + $0xa8] sm:$0xff] %vm319_vm1, %v9919_v27  ;;  %v9889_v38 = vadd.f32 %v16185_v33, %v9850_v47  ;;  %v9772_v25 = vpop.f32.mrf.mxu0 }
 0x56c   : > { %v9382_v59 = vpop.f32.mrf.mxu1 }
 0x56d   : > { %v9921_v12 = vadd.f32 %v12587_v45, %v9889_v38  ;;  %v9459_v1 = vadd.f32 %v9382_v59, %v16155_v46  ;;  %v12518_v40 = vpop.f32.mrf.mxu0 }
 0x56e   : > { %v12468_v55 = vpop.f32.mrf.mxu1 }
 0x56f   : > { %9953 = vst.msk [vmem:[%s16194_s25 + $0xb8] sm:$0xff] %vm319_vm1, %v9921_v12  ;;  %v9849_v14 = vadd.f32 %v9772_v25, %v9459_v1  ;;  %v9784_v22 = vpop.f32.mrf.mxu0  ;;  %v12595_v1 = vld [vmem:[%s12653_s23 + $0x1d4] sm:$0xff] }
 0x570   : > { %v9394_v42 = vpop.f32.mrf.mxu1 }
 0x571   : > { %v9888_v44 = vadd.f32 %v16185_v33, %v9849_v14  ;;  %v9461_v26 = vadd.f32 %v9394_v42, %v16158_v50  ;;  %v12519_v4 = vpop.f32.mrf.mxu0  ;;  %v12596_v42 = vld [vmem:[%s12653_s23 + $0x1cc] sm:$0xff] }
 0x572   : > { %v12469_v43 = vpop.f32.mrf.mxu1 }
 0x573   : > { %v9920_v30 = vadd.f32 %v12588_v0, %v9888_v44  ;;  %v9851_v37 = vadd.f32 %v9784_v22, %v9461_v26  ;;  %v9463_v46 = vadd.f32 %v12469_v43, %v16161_v19  ;;  %v9787_v49 = vpop.f32.mrf.mxu0 }
 0x574   : > { %v9397_v35 = vpop.f32.mrf.mxu1 }
 0x575   : > { %9952 = vst.msk [vmem:[%s16194_s25 + $0xb0] sm:$0xff] %vm319_vm1, %v9920_v30  ;;  %v9890_v39 = vadd.f32 %v16185_v33, %v9851_v37  ;;  %v9853_v41 = vadd.f32 %v12519_v4, %v9463_v46  ;;  %v9462_v10 = vadd.f32 %v9397_v35, %v16164_v48  ;;  %v12522_v28 = vpop.f32.mrf.mxu0 }
 0x576   : > { %v12472_v50 = vpop.f32.mrf.mxu1 }
 0x577   : > { %v9922_v53 = vadd.f32 %v12589_v34, %v9890_v39  ;;  %v9892_v7 = vadd.f32 %v16185_v33, %v9853_v41  ;;  %v9852_v19 = vadd.f32 %v9787_v49, %v9462_v10  ;;  %v9465_v8 = vadd.f32 %v12472_v50, %v16167_v31  ;;  %v9799_v23 = vpop.f32.mrf.mxu0  ;;  %v12591_v31 = vld [vmem:[%s12653_s23 + $0x18c] sm:$0xff] }
 0x578   : > { %v9409_v62 = vpop.f32.mrf.mxu1 }
 0x579   : > { %9954 = vst.msk [vmem:[%s16194_s25 + $0xc0] sm:$0xff] %vm319_vm1, %v9922_v53  ;;  %v9924_v52 = vadd.f32 %v12590_v21, %v9892_v7  ;;  %v9891_v48 = vadd.f32 %v16185_v33, %v9852_v19  ;;  %v9855_v51 = vadd.f32 %v12522_v28, %v9465_v8  ;;  %v9464_v24 = vadd.f32 %v9409_v62, %v16170_v63  ;;  %v12523_v6 = vpop.f32.mrf.mxu0  ;;  %v12592_v63 = vld [vmem:[%s12653_s23 + $0x1b4] sm:$0xff] }
 0x57a   : > { %v12473_v60 = vpop.f32.mrf.mxu1 }
 0x57b   : > { %9956 = vst.msk [vmem:[%s16194_s25 + $0xd0] sm:$0xff] %vm319_vm1, %v9924_v52  ;;  %v9923_v61 = vadd.f32 %v12591_v31, %v9891_v48  ;;  %v9894_v18 = vadd.f32 %v16185_v33, %v9855_v51  ;;  %v9854_v16 = vadd.f32 %v9799_v23, %v9464_v24  ;;  %v9466_v17 = vadd.f32 %v12473_v60, %v16173_v57  ;;  %v9802_v3 = vpop.f32.mrf.mxu0 }
 0x57c   : > { %v9412_v54 = vpop.f32.mrf.mxu1 }
 0x57d   : > { %9955 = vst.msk [vmem:[%s16194_s25 + $0xc8] sm:$0xff] %vm319_vm1, %v9923_v61  ;;  %v9926_v9 = vadd.f32 %v12592_v63, %v9894_v18  ;;  %v9893_v13 = vadd.f32 %v16185_v33, %v9854_v16  ;;  %v9856_v32 = vadd.f32 %v12523_v6, %v9466_v17  ;;  %v12526_v15 = vpop.f32.mrf.mxu0 }
 0x57e   : > { %v12476_v56 = vpop.f32.mrf.mxu1 }
 0x57f   : > { %9958 = vst.msk [vmem:[%s16194_s25 + $0xe0] sm:$0xff] %vm319_vm1, %v9926_v9  ;;  %v9925_v36 = vadd.f32 %v12593_v5, %v9893_v13  ;;  %v9895_v57 = vadd.f32 %v16185_v33, %v9856_v32  ;;  %v9468_v20 = vadd.f32 %v12476_v56, %v16176_v58  ;;  %v9814_v27 = vpop.f32.mrf.mxu0 }
 0x580   : > { %v9424_v47 = vpop.f32.mrf.mxu1 }
 0x581   : > { %9957 = vst.msk [vmem:[%s16194_s25 + $0xd8] sm:$0xff] %vm319_vm1, %v9925_v36  ;;  %v9927_v2 = vadd.f32 %v12594_v29, %v9895_v57  ;;  %v9858_v38 = vadd.f32 %v12526_v15, %v9468_v20  ;;  %v12527_v25 = vpop.f32.mrf.mxu0 }
 0x582   : > { %v12477_v59 = vpop.f32.mrf.mxu1 }
 0x583   : > { %9959 = vst.msk [vmem:[%s16194_s25 + $0xe8] sm:$0xff] %vm319_vm1, %v9927_v2  ;;  %v9897_v45 = vadd.f32 %v16185_v33, %v9858_v38  ;;  %v9816_v55 = vpop.f32.mrf.mxu0 }
 0x584   : > { %v9426_v12 = vpop.f32.mrf.mxu1 }
 0x585   : > { %v9929_v40 = vadd.f32 %v12595_v1, %v9897_v45  ;;  %v9467_v58 = vadd.f32 %v9426_v12, %v16179_v11 }
 0x587   : > { %9961 = vst.msk [vmem:[%s16194_s25 + $0xf8] sm:$0xff] %vm319_vm1, %v9929_v40  ;;  %v9857_v14 = vadd.f32 %v9816_v55, %v9467_v58 }
 0x589   : > { %v9896_v22 = vadd.f32 %v16185_v33, %v9857_v14 }
 0x58b   : > { %v9928_v44 = vadd.f32 %v12596_v42, %v9896_v22 }
 0x58d   : > { %9960 = vst.msk [vmem:[%s16194_s25 + $0xf0] sm:$0xff] %vm319_vm1, %v9928_v44 }
 0x58e PF: > { %s13_s12 = sadd.s32 1, %s12603_s12  }
 0x58f   : > { %p10_p4 = scmp.ge.s32.totalorder %s13_s12, 4  }
 0x591   :  { %12 = sbr.rel (!%p10_p4) target bundleno = 1 (0x1), region = 86 }

</bundles_post_ra>
